<compile_context>
chip_gen: v7x
topology: tpu7x:2x2x1
jax: 0.10.0
libtpu: 0.0.40
codegen_flags: <defaults>
</compile_context>

<pallas_src>
import functools

import jax
import jax.numpy as jnp
from jax.experimental import pallas as pl
from jax.experimental.pallas import tpu as pltpu


def _round_up(x, m):
    return ((x + m - 1) // m) * m


# ----------------------------- Pallas kernel --------------------------------
def _matmul_act_kernel(x_ref, w_ref, b_ref, o_ref, *, activation, cout_is_one):
    # x_ref: (tm, Kc)   w_ref: (Kc, Cout)  [or (1, Kc) when Cout == 1]
    # b_ref: (1, Cout)  o_ref: (tm, Cout)
    x = x_ref[...]
    if cout_is_one:
        # Cout == 1: a 1-lane MXU matmul wastes 255/256 output lanes; do a VPU
        # broadcast-multiply + lane reduction instead.
        acc = jnp.sum(x * w_ref[...], axis=1, keepdims=True)
    else:
        acc = jnp.dot(x, w_ref[...], preferred_element_type=jnp.float32)
    acc = acc + b_ref[...]
    if activation == "relu":
        acc = jnp.maximum(acc, 0.0)
    elif activation == "sigmoid":
        acc = jax.nn.sigmoid(acc)
    o_ref[...] = acc.astype(o_ref.dtype)


def _matmul_act_pallas(xs, w_mat, b_row, *, activation, cout, tm=256):
    """act(xs @ W + b) with xs:(M, Kc), W:(Kc, Cout) (or (1, Kc) if Cout==1)."""
    m, kc = xs.shape
    block_m = min(tm, _round_up(m, 8))
    mp = _round_up(m, block_m)
    if mp != m:
        xs = jnp.pad(xs, ((0, mp - m), (0, 0)))

    kernel = functools.partial(
        _matmul_act_kernel, activation=activation, cout_is_one=(cout == 1)
    )
    out = pl.pallas_call(
        kernel,
        out_shape=jax.ShapeDtypeStruct((mp, cout), xs.dtype),
        grid_spec=pltpu.PrefetchScalarGridSpec(
            num_scalar_prefetch=0,
            grid=(mp // block_m,),
            in_specs=[
                pl.BlockSpec((block_m, kc), lambda i: (i, 0)),
                pl.BlockSpec(w_mat.shape, lambda i: (0, 0)),   # resident across grid
                pl.BlockSpec(b_row.shape, lambda i: (0, 0)),
            ],
            out_specs=pl.BlockSpec((block_m, cout), lambda i: (i, 0)),
        ),
        compiler_params=pltpu.CompilerParams(
            dimension_semantics=("parallel",),          # megacore-shard M on v7x
            vmem_limit_bytes=32 * 1024 * 1024,          # few MiB needed; legal on v7x
        ),
    )(xs, w_mat, b_row)
    return out[:m]


# --------------------------- ConvTranspose2d wrapper -------------------------
def conv_transpose2d_pallas(x_nhwc, w_mat, b_row, *, k, stride, padding, cout,
                            activation):
    """PyTorch-semantics ConvTranspose2d on an NHWC input.

    w_mat is the pre-folded (K*K*Cin, Cout) matrix (flipped kernel), or (1, K*K*Cin)
    for Cout == 1; b_row has shape (1, Cout).  Glue (dilate / pad / im2col) is plain
    JAX and fuses under jit; the matmul + bias + activation runs in the Pallas kernel.
    """
    B, H, W, Cin = x_nhwc.shape
    Ho = (H - 1) * stride - 2 * padding + k
    Wo = (W - 1) * stride - 2 * padding + k

    # zero-dilate by stride, then pad with K-1-padding (transposed conv == conv
    # of the dilated/padded input with the flipped kernel)
    if stride == 1:
        xd = x_nhwc
    else:
        Hd, Wd = (H - 1) * stride + 1, (W - 1) * stride + 1
        xd = jnp.zeros((B, Hd, Wd, Cin), x_nhwc.dtype)
        xd = xd.at[:, ::stride, ::stride, :].set(x_nhwc)
    pad = k - 1 - padding
    xp = jnp.pad(xd, ((0, 0), (pad, pad), (pad, pad), (0, 0)))

    # im2col with the K*K taps folded into the channel axis -> (M, K*K*Cin)
    views = [xp[:, ky:ky + Ho, kx:kx + Wo, :] for ky in range(k) for kx in range(k)]
    xs = jnp.concatenate(views, axis=-1).reshape(B * Ho * Wo, k * k * Cin)

    out = _matmul_act_pallas(xs, w_mat, b_row, activation=activation, cout=cout)
    return out.reshape(B, Ho, Wo, cout)


# ------------------------------ model / params -------------------------------
_LAYER_CFG = [
    # (Cin,  Cout, K, stride, padding, activation)
    (None, 256, 3, 1, 0, "relu"),     # Cin filled with z_dim
    (256, 128, 3, 2, 0, "relu"),
    (128, 64, 4, 2, 1, "relu"),
    (64, 1, 4, 2, 1, "sigmoid"),
]


def _fold_weight(w_pt):
    """(Cin, Cout, K, K) PyTorch ConvTranspose2d weight -> folded (K*K*Cin, Cout)."""
    cin, cout, k, _ = w_pt.shape
    wf = jnp.flip(w_pt, axis=(2, 3))                       # flipped kernel
    wf = jnp.transpose(wf, (2, 3, 0, 1)).reshape(k * k * cin, cout)
    if cout == 1:
        wf = wf.reshape(1, k * k * cin)                    # row vector for VPU path
    return wf


def init_params(key, z_dim):
    params = []
    for i, (cin, cout, k, s, p, act) in enumerate(_LAYER_CFG):
        cin = z_dim if cin is None else cin
        kw, kb = jax.random.split(jax.random.fold_in(key, i))
        bound = 1.0 / (cin * k * k) ** 0.5  # PyTorch default ConvTranspose2d init
        w_pt = jax.random.uniform(kw, (cin, cout, k, k), jnp.float32, -bound, bound)
        b = jax.random.uniform(kb, (cout,), jnp.float32, -bound, bound)
        params.append({
            # hoisted constant preprocessing (flip / transpose / reshape done once):
            "w_mat": _fold_weight(w_pt),
            "b_row": b.reshape(1, cout),
            # original tensors kept only for the pure-JAX reference:
            "w_pt": w_pt, "b": b,
            "k": k, "stride": s, "padding": p, "cout": cout, "act": act,
        })
    return params


def decoder_mnist_conv_forward(z, params):
    # z: (B, z_dim).  PyTorch reshapes to (B, z_dim, 1, 1) NCHW; NHWC equivalent here.
    B, z_dim = z.shape
    x = z.reshape(B, 1, 1, z_dim)
    for lp in params:
        x = conv_transpose2d_pallas(
            x, lp["w_mat"], lp["b_row"],
            k=lp["k"], stride=lp["stride"], padding=lp["padding"],
            cout=lp["cout"], activation=lp["act"],
        )
    x_mean = jnp.transpose(x, (0, 3, 1, 2))   # back to NCHW: (B, 1, 28, 28)
    x_logvar = jnp.zeros_like(x_mean)
    return x_mean, x_logvar


# ------------------------------ pure-JAX reference ---------------------------
def _reference_forward(z, params):
    x = z.reshape(z.shape[0], 1, 1, z.shape[1])
    for lp in params:
        w, b = lp["w_pt"], lp["b"]
        k, s, p = lp["k"], lp["stride"], lp["padding"]
        wf = jnp.transpose(jnp.flip(w, axis=(2, 3)), (2, 3, 0, 1))  # HWIO
        x = jax.lax.conv_general_dilated(
            x, wf, window_strides=(1, 1),
            padding=[(k - 1 - p, k - 1 - p)] * 2,
            lhs_dilation=(s, s),
            dimension_numbers=("NHWC", "HWIO", "NHWC"),
        ) + b
        x = jnp.maximum(x, 0.0) if lp["act"] == "relu" else jax.nn.sigmoid(x)
    return jnp.transpose(x, (0, 3, 1, 2))


# ----------------------------------- main -------------------------------------
if __name__ == "__main__":
    key = jax.random.PRNGKey(0)
    B, z_dim = 2, 32

    params = init_params(jax.random.fold_in(key, 100), z_dim)
    z = jax.random.normal(jax.random.fold_in(key, 200), (B, z_dim), jnp.float32)

    fwd = jax.jit(lambda zz: decoder_mnist_conv_forward(zz, params))
    x_mean, x_logvar = fwd(z)
    jax.block_until_ready((x_mean, x_logvar))

    assert x_mean.shape == (B, 1, 28, 28), x_mean.shape
    assert x_logvar.shape == (B, 1, 28, 28), x_logvar.shape
    assert bool(jnp.all(x_logvar == 0.0))

    ref = _reference_forward(z, params)
    max_err = float(jnp.max(jnp.abs(x_mean - ref)))
    assert bool(jnp.allclose(x_mean, ref, atol=1e-3, rtol=1e-3)), max_err

    print("KERNEL_OK")
</pallas_src>

<mosaic_0001>
module attributes {stable_mosaic.version = 11 : i64} {
  func.func @_matmul_act_kernel(%arg0: i32, %arg1: memref<24x288xf32, #tpu.memory_space<vmem>>, %arg2: memref<288x256xf32, #tpu.memory_space<vmem>>, %arg3: memref<1x256xf32, #tpu.memory_space<vmem>>, %arg4: memref<24x256xf32, #tpu.memory_space<vmem>>) attributes {dimension_semantics = [#tpu.dimension_semantics<parallel>], iteration_bounds = array<i64: 1>, scalar_prefetch = 0 : i64, scratch_operands = 0 : i64, tpu.core_type = #tpu.core_type<tc>, window_params = [{transform_indices = @transform_0, window_bounds = array<i64: 24, 288>}, {pipeline_mode = #tpu.pipeline_mode<synchronous>, transform_indices = @transform_1, window_bounds = array<i64: 288, 256>}, {pipeline_mode = #tpu.pipeline_mode<synchronous>, transform_indices = @transform_2, window_bounds = array<i64: 1, 256>}, {transform_indices = @transform_3, window_bounds = array<i64: 24, 256>}]} {
    %c0 = arith.constant 0 : index
    %c0_0 = arith.constant 0 : index
    %0 = vector.load %arg1[%c0, %c0_0] : memref<24x288xf32, #tpu.memory_space<vmem>>, vector<24x288xf32>
    %c0_1 = arith.constant 0 : index
    %c0_2 = arith.constant 0 : index
    %1 = vector.load %arg2[%c0_1, %c0_2] : memref<288x256xf32, #tpu.memory_space<vmem>>, vector<288x256xf32>
    %cst = arith.constant dense<0.000000e+00> : vector<24x256xf32>
    %2 = tpu.matmul %0, %1, %cst {dimension_numbers = #tpu.dot_dimension_numbers<[1], [0], [0], [1], [0, 0, 1, 1], [], []>} : vector<24x288xf32>, vector<288x256xf32>, vector<24x256xf32> -> vector<24x256xf32>
    %c0_3 = arith.constant 0 : index
    %c0_4 = arith.constant 0 : index
    %3 = vector.load %arg3[%c0_3, %c0_4] : memref<1x256xf32, #tpu.memory_space<vmem>>, vector<1x256xf32>
    %4 = vector.broadcast %3 : vector<1x256xf32> to vector<24x256xf32>
    %5 = arith.addf %2, %4 : vector<24x256xf32>
    %cst_5 = arith.constant 0.000000e+00 : f32
    %6 = vector.broadcast %cst_5 : f32 to vector<24x256xf32>
    %7 = arith.maximumf %5, %6 : vector<24x256xf32>
    %c0_6 = arith.constant 0 : index
    %c0_7 = arith.constant 0 : index
    %8 = vector.load %arg4[%c0_6, %c0_7] : memref<24x256xf32, #tpu.memory_space<vmem>>, vector<24x256xf32>
    tpu.vector_store %arg4[%c0_6, %c0_7], %7 {strides = array<i32>} : memref<24x256xf32, #tpu.memory_space<vmem>>, vector<24x256xf32>,
    return
  }
  func.func @transform_0(%arg0: i32) -> (i32, i32) {
    %c0_i32 = arith.constant 0 : i32
    %c0_i32_0 = arith.constant 0 : i32
    return %arg0, %c0_i32 : i32, i32
  }
  func.func @transform_1(%arg0: i32) -> (i32, i32) {
    %c0_i32 = arith.constant 0 : i32
    %c0_i32_0 = arith.constant 0 : i32
    %c0_i32_1 = arith.constant 0 : i32
    return %c0_i32, %c0_i32_0 : i32, i32
  }
  func.func @transform_2(%arg0: i32) -> (i32, i32) {
    %c0_i32 = arith.constant 0 : i32
    %c0_i32_0 = arith.constant 0 : i32
    %c0_i32_1 = arith.constant 0 : i32
    return %c0_i32, %c0_i32_0 : i32, i32
  }
  func.func @transform_3(%arg0: i32) -> (i32, i32) {
    %c0_i32 = arith.constant 0 : i32
    %c0_i32_0 = arith.constant 0 : i32
    return %arg0, %c0_i32 : i32, i32
  }
}

module attributes {stable_mosaic.version = 11 : i64} {
  func.func @_matmul_act_kernel(%arg0: i32, %arg1: memref<104x2304xf32, #tpu.memory_space<vmem>>, %arg2: memref<2304x128xf32, #tpu.memory_space<vmem>>, %arg3: memref<1x128xf32, #tpu.memory_space<vmem>>, %arg4: memref<104x128xf32, #tpu.memory_space<vmem>>) attributes {dimension_semantics = [#tpu.dimension_semantics<parallel>], iteration_bounds = array<i64: 1>, scalar_prefetch = 0 : i64, scratch_operands = 0 : i64, tpu.core_type = #tpu.core_type<tc>, window_params = [{transform_indices = @transform_0, window_bounds = array<i64: 104, 2304>}, {pipeline_mode = #tpu.pipeline_mode<synchronous>, transform_indices = @transform_1, window_bounds = array<i64: 2304, 128>}, {pipeline_mode = #tpu.pipeline_mode<synchronous>, transform_indices = @transform_2, window_bounds = array<i64: 1, 128>}, {transform_indices = @transform_3, window_bounds = array<i64: 104, 128>}]} {
    %c0 = arith.constant 0 : index
    %c0_0 = arith.constant 0 : index
    %0 = vector.load %arg1[%c0, %c0_0] : memref<104x2304xf32, #tpu.memory_space<vmem>>, vector<104x2304xf32>
    %c0_1 = arith.constant 0 : index
    %c0_2 = arith.constant 0 : index
    %1 = vector.load %arg2[%c0_1, %c0_2] : memref<2304x128xf32, #tpu.memory_space<vmem>>, vector<2304x128xf32>
    %cst = arith.constant dense<0.000000e+00> : vector<104x128xf32>
    %2 = tpu.matmul %0, %1, %cst {dimension_numbers = #tpu.dot_dimension_numbers<[1], [0], [0], [1], [0, 0, 1, 1], [], []>} : vector<104x2304xf32>, vector<2304x128xf32>, vector<104x128xf32> -> vector<104x128xf32>
    %c0_3 = arith.constant 0 : index
    %c0_4 = arith.constant 0 : index
    %3 = vector.load %arg3[%c0_3, %c0_4] : memref<1x128xf32, #tpu.memory_space<vmem>>, vector<1x128xf32>
    %4 = vector.broadcast %3 : vector<1x128xf32> to vector<104x128xf32>
    %5 = arith.addf %2, %4 : vector<104x128xf32>
    %cst_5 = arith.constant 0.000000e+00 : f32
    %6 = vector.broadcast %cst_5 : f32 to vector<104x128xf32>
    %7 = arith.maximumf %5, %6 : vector<104x128xf32>
    %c0_6 = arith.constant 0 : index
    %c0_7 = arith.constant 0 : index
    %8 = vector.load %arg4[%c0_6, %c0_7] : memref<104x128xf32, #tpu.memory_space<vmem>>, vector<104x128xf32>
    tpu.vector_store %arg4[%c0_6, %c0_7], %7 {strides = array<i32>} : memref<104x128xf32, #tpu.memory_space<vmem>>, vector<104x128xf32>,
    return
  }
  func.func @transform_0(%arg0: i32) -> (i32, i32) {
    %c0_i32 = arith.constant 0 : i32
    %c0_i32_0 = arith.constant 0 : i32
    return %arg0, %c0_i32 : i32, i32
  }
  func.func @transform_1(%arg0: i32) -> (i32, i32) {
    %c0_i32 = arith.constant 0 : i32
    %c0_i32_0 = arith.constant 0 : i32
    %c0_i32_1 = arith.constant 0 : i32
    return %c0_i32, %c0_i32_0 : i32, i32
  }
  func.func @transform_2(%arg0: i32) -> (i32, i32) {
    %c0_i32 = arith.constant 0 : i32
    %c0_i32_0 = arith.constant 0 : i32
    %c0_i32_1 = arith.constant 0 : i32
    return %c0_i32, %c0_i32_0 : i32, i32
  }
  func.func @transform_3(%arg0: i32) -> (i32, i32) {
    %c0_i32 = arith.constant 0 : i32
    %c0_i32_0 = arith.constant 0 : i32
    return %arg0, %c0_i32 : i32, i32
  }
}

module attributes {stable_mosaic.version = 11 : i64} {
  func.func @_matmul_act_kernel(%arg0: i32, %arg1: memref<256x2048xf32, #tpu.memory_space<vmem>>, %arg2: memref<2048x64xf32, #tpu.memory_space<vmem>>, %arg3: memref<1x64xf32, #tpu.memory_space<vmem>>, %arg4: memref<256x64xf32, #tpu.memory_space<vmem>>) attributes {dimension_semantics = [#tpu.dimension_semantics<parallel>], iteration_bounds = array<i64: 2>, scalar_prefetch = 0 : i64, scratch_operands = 0 : i64, tpu.core_type = #tpu.core_type<tc>, window_params = [{transform_indices = @transform_0, window_bounds = array<i64: 256, 2048>}, {pipeline_mode = #tpu.pipeline_mode<synchronous>, transform_indices = @transform_1, window_bounds = array<i64: 2048, 64>}, {pipeline_mode = #tpu.pipeline_mode<synchronous>, transform_indices = @transform_2, window_bounds = array<i64: 1, 64>}, {transform_indices = @transform_3, window_bounds = array<i64: 256, 64>}]} {
    %c0 = arith.constant 0 : index
    %c0_0 = arith.constant 0 : index
    %0 = vector.load %arg1[%c0, %c0_0] : memref<256x2048xf32, #tpu.memory_space<vmem>>, vector<256x2048xf32>
    %c0_1 = arith.constant 0 : index
    %c0_2 = arith.constant 0 : index
    %1 = vector.load %arg2[%c0_1, %c0_2] : memref<2048x64xf32, #tpu.memory_space<vmem>>, vector<2048x64xf32>
    %cst = arith.constant dense<0.000000e+00> : vector<256x64xf32>
    %2 = tpu.matmul %0, %1, %cst {dimension_numbers = #tpu.dot_dimension_numbers<[1], [0], [0], [1], [0, 0, 1, 1], [], []>} : vector<256x2048xf32>, vector<2048x64xf32>, vector<256x64xf32> -> vector<256x64xf32>
    %c0_3 = arith.constant 0 : index
    %c0_4 = arith.constant 0 : index
    %3 = vector.load %arg3[%c0_3, %c0_4] : memref<1x64xf32, #tpu.memory_space<vmem>>, vector<1x64xf32>
    %4 = vector.broadcast %3 : vector<1x64xf32> to vector<256x64xf32>
    %5 = arith.addf %2, %4 : vector<256x64xf32>
    %cst_5 = arith.constant 0.000000e+00 : f32
    %6 = vector.broadcast %cst_5 : f32 to vector<256x64xf32>
    %7 = arith.maximumf %5, %6 : vector<256x64xf32>
    %c0_6 = arith.constant 0 : index
    %c0_7 = arith.constant 0 : index
    %8 = vector.load %arg4[%c0_6, %c0_7] : memref<256x64xf32, #tpu.memory_space<vmem>>, vector<256x64xf32>
    tpu.vector_store %arg4[%c0_6, %c0_7], %7 {strides = array<i32>} : memref<256x64xf32, #tpu.memory_space<vmem>>, vector<256x64xf32>,
    return
  }
  func.func @transform_0(%arg0: i32) -> (i32, i32) {
    %c0_i32 = arith.constant 0 : i32
    %c0_i32_0 = arith.constant 0 : i32
    return %arg0, %c0_i32 : i32, i32
  }
  func.func @transform_1(%arg0: i32) -> (i32, i32) {
    %c0_i32 = arith.constant 0 : i32
    %c0_i32_0 = arith.constant 0 : i32
    %c0_i32_1 = arith.constant 0 : i32
    return %c0_i32, %c0_i32_0 : i32, i32
  }
  func.func @transform_2(%arg0: i32) -> (i32, i32) {
    %c0_i32 = arith.constant 0 : i32
    %c0_i32_0 = arith.constant 0 : i32
    %c0_i32_1 = arith.constant 0 : i32
    return %c0_i32, %c0_i32_0 : i32, i32
  }
  func.func @transform_3(%arg0: i32) -> (i32, i32) {
    %c0_i32 = arith.constant 0 : i32
    %c0_i32_0 = arith.constant 0 : i32
    return %arg0, %c0_i32 : i32, i32
  }
}

module attributes {stable_mosaic.version = 11 : i64} {
  func.func @_matmul_act_kernel(%arg0: i32, %arg1: memref<256x1024xf32, #tpu.memory_space<vmem>>, %arg2: memref<1x1024xf32, #tpu.memory_space<vmem>>, %arg3: memref<1x1xf32, #tpu.memory_space<vmem>>, %arg4: memref<256x1xf32, #tpu.memory_space<vmem>>) attributes {dimension_semantics = [#tpu.dimension_semantics<parallel>], iteration_bounds = array<i64: 7>, scalar_prefetch = 0 : i64, scratch_operands = 0 : i64, tpu.core_type = #tpu.core_type<tc>, window_params = [{transform_indices = @transform_0, window_bounds = array<i64: 256, 1024>}, {pipeline_mode = #tpu.pipeline_mode<synchronous>, transform_indices = @transform_1, window_bounds = array<i64: 1, 1024>}, {pipeline_mode = #tpu.pipeline_mode<synchronous>, transform_indices = @transform_2, window_bounds = array<i64: 1, 1>}, {transform_indices = @transform_3, window_bounds = array<i64: 256, 1>}]} {
    %c0 = arith.constant 0 : index
    %c0_0 = arith.constant 0 : index
    %0 = vector.load %arg1[%c0, %c0_0] : memref<256x1024xf32, #tpu.memory_space<vmem>>, vector<256x1024xf32>
    %c0_1 = arith.constant 0 : index
    %c0_2 = arith.constant 0 : index
    %1 = vector.load %arg2[%c0_1, %c0_2] : memref<1x1024xf32, #tpu.memory_space<vmem>>, vector<1x1024xf32>
    %2 = vector.broadcast %1 : vector<1x1024xf32> to vector<256x1024xf32>
    %3 = arith.mulf %0, %2 : vector<256x1024xf32>
    %cst = arith.constant dense<0.000000e+00> : vector<256xf32>
    %4 = vector.multi_reduction <add>, %3, %cst [1] : vector<256x1024xf32> to vector<256xf32>
    %5 = vector.shape_cast %4 : vector<256xf32> to vector<256x1xf32>
    %c0_3 = arith.constant 0 : index
    %c0_4 = arith.constant 0 : index
    %6 = vector.load %arg3[%c0_3, %c0_4] : memref<1x1xf32, #tpu.memory_space<vmem>>, vector<1x1xf32>
    %7 = vector.broadcast %6 : vector<1x1xf32> to vector<256x1xf32>
    %8 = arith.addf %5, %7 : vector<256x1xf32>
    %9 = arith.negf %8 : vector<256x1xf32>
    %10 = math.exp %9 : vector<256x1xf32>
    %cst_5 = arith.constant 1.000000e+00 : f32
    %11 = vector.broadcast %cst_5 : f32 to vector<256x1xf32>
    %12 = arith.addf %11, %10 : vector<256x1xf32>
    %13 = arith.divf %11, %12 : vector<256x1xf32>
    %c0_6 = arith.constant 0 : index
    %c0_7 = arith.constant 0 : index
    %14 = vector.load %arg4[%c0_6, %c0_7] : memref<256x1xf32, #tpu.memory_space<vmem>>, vector<256x1xf32>
    tpu.vector_store %arg4[%c0_6, %c0_7], %13 {strides = array<i32>} : memref<256x1xf32, #tpu.memory_space<vmem>>, vector<256x1xf32>,
    return
  }
  func.func @transform_0(%arg0: i32) -> (i32, i32) {
    %c0_i32 = arith.constant 0 : i32
    %c0_i32_0 = arith.constant 0 : i32
    return %arg0, %c0_i32 : i32, i32
  }
  func.func @transform_1(%arg0: i32) -> (i32, i32) {
    %c0_i32 = arith.constant 0 : i32
    %c0_i32_0 = arith.constant 0 : i32
    %c0_i32_1 = arith.constant 0 : i32
    return %c0_i32, %c0_i32_0 : i32, i32
  }
  func.func @transform_2(%arg0: i32) -> (i32, i32) {
    %c0_i32 = arith.constant 0 : i32
    %c0_i32_0 = arith.constant 0 : i32
    %c0_i32_1 = arith.constant 0 : i32
    return %c0_i32, %c0_i32_0 : i32, i32
  }
  func.func @transform_3(%arg0: i32) -> (i32, i32) {
    %c0_i32 = arith.constant 0 : i32
    %c0_i32_0 = arith.constant 0 : i32
    return %arg0, %c0_i32 : i32, i32
  }
}

</mosaic_0001>

<bundles_post_ra>
// kernel: _lambda_.4
= control target key start
LH: loop header
LB: loop body
LE: loop exit
PB: predicated region body
PF: predicated region fallthrough
CT: control target
= control target key end

     0   :  { %8 = vsyncpa [#allocation3], 0  ;;  %s567_s0 = inlined_call_operand.vmem [shape: f32[24,288], index: 0, kind: input, shape index: {}]   ;;  %s568_s1 = inlined_call_operand.hbm [shape: f32[288,256], index: 1, kind: input, shape index: {}]   ;;  %s569_s2 = inlined_call_operand.hbm [shape: f32[1,256], index: 2, kind: input, shape index: {}]   ;;  %s570_s3 = inlined_call_operand.vmem [shape: f32[24,256], index: 3, kind: output, shape index: {}]  }
   0x1   :  { %9 = vsyncpa [#allocation5], 0  ;;  %s467_s12 = smov [#allocation2]   ;;  %s419_s16 = scalar_lea.hbm %s568_s1, 9216 }
   0x2   :  { %s17_s13 = sshll.u32 %s467_s12, 4  ;;  %p420_p0 = scmp.ne.s32.totalorder %s568_s1, %s419_s16  ;;  %s18_s13 = int_to_ptr.vmem [resolvable:$true] %s17_s13 }
   0x3   :  { %p423_p1 = scmp.lt.u32.totalorder %s419_s16, %s568_s1 }
   0x5   :  { %p425_p2 = pnand %p423_p1, %p420_p0 }
   0x7   :  { %428 = shalt.err (!%p425_p2)
}
   0x8   :  { %s429_s21 = scalar_lea.vmem %s18_s13, 9216  ;;  %p434_p4 = scmp.lt.s32.totalorder %s18_s13, %s18_s13 }
   0x9   :  { %p430_p3 = scmp.ne.s32.totalorder %s18_s13, %s429_s21  ;;  %p435_p5 = scmp.lt.s32.totalorder %s429_s21, %s429_s21 }
   0xb   :  { %p436_p6 = por %p435_p5, %p434_p4 }
   0xd   :  { %p437_p7 = pnand %p436_p6, %p430_p3 }
   0xf   :  { %440 = shalt.err (!%p437_p7)
}
  0x10   :  { %s468_s22 = smov 256   ;;  %s469_s23 = smov 16  }
  0x11   :  { %23 = dma.hbm_to_vmem [thread:$0]  %s568_s1, 9216, %s18_s13, [#allocation3], %s468_s22, %s468_s22, %s469_s23  }
  0x12   :  { %s470_s26 = smov [#allocation4]   ;;  %s441_s30 = scalar_lea.hbm %s569_s2, 32 }
  0x13   :  { %s30_s27 = sshll.u32 %s470_s26, 4  ;;  %p442_p8 = scmp.ne.s32.totalorder %s569_s2, %s441_s30  ;;  %s31_s27 = int_to_ptr.vmem [resolvable:$true] %s30_s27 }
  0x14   :  { %p445_p9 = scmp.lt.u32.totalorder %s441_s30, %s569_s2 }
  0x16   :  { %p447_p10 = pnand %p445_p9, %p442_p8 }
  0x18   :  { %450 = shalt.err (!%p447_p10)
}
  0x19   :  { %s451_s8 = scalar_lea.vmem %s31_s27, 32  ;;  %p456_p12 = scmp.lt.s32.totalorder %s31_s27, %s31_s27 }
  0x1a   :  { %p452_p11 = scmp.ne.s32.totalorder %s31_s27, %s451_s8  ;;  %p457_p13 = scmp.lt.s32.totalorder %s451_s8, %s451_s8 }
  0x1c   :  { %p458_p0 = por %p457_p13, %p456_p12 }
  0x1e   :  { %p459_p1 = pnand %p458_p0, %p452_p11 }
  0x20   :  { %462 = shalt.err (!%p459_p1)
}
  0x21   :  { %33 = dma.hbm_to_vmem [thread:$0]  %s569_s2, 32, %s31_s27, [#allocation5]  }
  0x22   :  { %463 = dma.done.wait [#allocation3], 9216  }
  0x23   :  { %464 = vsyncadd [#allocation3], 4294958080 }
  0x24   :  { %465 = dma.done.wait [#allocation5], 32  }
  0x25   :  { %466 = vsyncadd [#allocation5], 4294967264  ;;  %v471_v0 = vmov 0.0   ;;  %v50_v1 = vld [vmem:[#allocation2 + $0x8] sm:$0xff]  ;;  %v52_v2 = vld [vmem:[#allocation2 + $0x18] sm:$0xff]  ;;  %vm133_vm0 = vcmask 261120  }
  0x26   :  { %290 = vmatprep.mubr.f32.mxu0 %v471_v0  ;;  %v49_v3 = vld [vmem:[#allocation2] sm:$0xff]  ;;  %v330_v4 = vpack.c.bf16 %v52_v2, %v50_v1  ;;  %v51_v5 = vld [vmem:[#allocation2 + $0x10] sm:$0xff]  ;;  %v54_v6 = vld [vmem:[#allocation2 + $0x28] sm:$0xff] }
  0x27   :  { %v56_v7 = vld [vmem:[#allocation2 + $0x38] sm:$0xff]  ;;  %v332_v8 = vpack.c.bf16 %v51_v5, %v49_v3  ;;  %v53_v10 = vld [vmem:[#allocation2 + $0x20] sm:$0xff]  ;;  %v55_v11 = vld [vmem:[#allocation2 + $0x30] sm:$0xff] }
  0x28   :  { %v334_v9 = vpack.c.bf16 %v56_v7, %v54_v6  ;;  %v58_v12 = vld [vmem:[#allocation2 + $0x48] sm:$0xff]  ;;  %331 = vmatprep.subr.bf16.mxu1 %v330_v4  ;;  %v60_v13 = vld [vmem:[#allocation2 + $0x58] sm:$0xff]  ;;  %v336_v14 = vpack.c.bf16 %v55_v11, %v53_v10  ;;  %v57_v16 = vld [vmem:[#allocation2 + $0x40] sm:$0xff] }
  0x29   :  { %333 = vmatpush1.bf16.msra.mxu1 %v332_v8  ;;  %v338_v15 = vpack.c.bf16 %v60_v13, %v58_v12  ;;  %v59_v17 = vld [vmem:[#allocation2 + $0x50] sm:$0xff]  ;;  %v62_v18 = vld [vmem:[#allocation2 + $0x68] sm:$0xff]  ;;  %v64_v19 = vld [vmem:[#allocation2 + $0x78] sm:$0xff] }
  0x2a   :  { %335 = vmatprep.subr.bf16.mxu1 %v334_v9  ;;  %v340_v20 = vpack.c.bf16 %v59_v17, %v57_v16  ;;  %v342_v21 = vpack.c.bf16 %v64_v19, %v62_v18  ;;  %v61_v22 = vld [vmem:[#allocation2 + $0x60] sm:$0xff]  ;;  %v63_v23 = vld [vmem:[#allocation2 + $0x70] sm:$0xff]  ;;  %v66_v24 = vld [vmem:[#allocation2 + $0x88] sm:$0xff] }
  0x2b   :  { %v68_v25 = vld [vmem:[#allocation2 + $0x98] sm:$0xff]  ;;  %v344_v26 = vpack.c.bf16 %v63_v23, %v61_v22  ;;  %v65_v28 = vld [vmem:[#allocation2 + $0x80] sm:$0xff]  ;;  %v67_v29 = vld [vmem:[#allocation2 + $0x90] sm:$0xff] }
  0x2c   :  { %v346_v27 = vpack.c.bf16 %v68_v25, %v66_v24  ;;  %v70_v30 = vld [vmem:[#allocation2 + $0xa8] sm:$0xff]  ;;  %v72_v31 = vld [vmem:[#allocation2 + $0xb8] sm:$0xff]  ;;  %v348_v32 = vpack.c.bf16 %v67_v29, %v65_v28  ;;  %v69_v34 = vld [vmem:[#allocation2 + $0xa0] sm:$0xff] }
  0x2d   :  { %337 = vmatpush1.bf16.msra.mxu1 %v336_v14  ;;  %v350_v33 = vpack.c.bf16 %v72_v31, %v70_v30  ;;  %v71_v35 = vld [vmem:[#allocation2 + $0xb0] sm:$0xff]  ;;  %v74_v36 = vld [vmem:[#allocation2 + $0xc8] sm:$0xff]  ;;  %v76_v37 = vld [vmem:[#allocation2 + $0xd8] sm:$0xff] }
  0x2e   :  { %339 = vmatprep.subr.bf16.mxu1 %v338_v15  ;;  %v352_v38 = vpack.c.bf16 %v71_v35, %v69_v34  ;;  %v114_v39 = vld [vmem:[#allocation2 + $0x208] sm:$0xff]  ;;  %v116_v40 = vld [vmem:[#allocation2 + $0x218] sm:$0xff]  ;;  %v113_v41 = vld [vmem:[#allocation2 + $0x200] sm:$0xff]  ;;  %v354_v42 = vpack.c.bf16 %v76_v37, %v74_v36 }
  0x2f   :  { %v73_v43 = vld [vmem:[#allocation2 + $0xc0] sm:$0xff]  ;;  %v75_v44 = vld [vmem:[#allocation2 + $0xd0] sm:$0xff]  ;;  %v394_v45 = vpack.c.bf16 %v116_v40, %v114_v39  ;;  %v78_v47 = vld [vmem:[#allocation2 + $0xe8] sm:$0xff] }
  0x30   :  { %v115_v46 = vld [vmem:[#allocation2 + $0x210] sm:$0xff]  ;;  %v80_v48 = vld [vmem:[#allocation2 + $0xf8] sm:$0xff]  ;;  %v118_v50 = vld [vmem:[#allocation2 + $0x228] sm:$0xff]  ;;  %v356_v54 = vpack.c.bf16 %v75_v44, %v73_v43 }
  0x31   :  { %341 = vmatpush1.bf16.msra.mxu1 %v340_v20  ;;  %v396_v49 = vpack.c.bf16 %v115_v46, %v113_v41  ;;  %395 = vmatprep.subr.bf16.mxu0 %v394_v45  ;;  %v120_v51 = vld [vmem:[#allocation2 + $0x238] sm:$0xff]  ;;  %v117_v52 = vld [vmem:[#allocation2 + $0x220] sm:$0xff]  ;;  %v119_v53 = vld [vmem:[#allocation2 + $0x230] sm:$0xff]  ;;  %v358_v58 = vpack.c.bf16 %v80_v48, %v78_v47 }
  0x32   :  { %343 = vmatprep.subr.bf16.mxu1 %v342_v21  ;;  %v398_v55 = vpack.c.bf16 %v120_v51, %v118_v50  ;;  %v400_v56 = vpack.c.bf16 %v119_v53, %v117_v52  ;;  %v41_v57 = vld [vmem:[%s567_s0 + $0x8] sm:$0xff]  ;;  %v77_v59 = vld [vmem:[#allocation2 + $0xe0] sm:$0xff]  ;;  %v79_v60 = vld [vmem:[#allocation2 + $0xf0] sm:$0xff] }
  0x33   :  { %397 = vmatpush1.bf16.msra.mxu0 %v396_v49  ;;  %207 = vmatprep.mubr.f32.mxu1 %v41_v57  ;;  %v82_v61 = vld [vmem:[#allocation2 + $0x108] sm:$0xff]  ;;  %v84_v62 = vld [vmem:[#allocation2 + $0x118] sm:$0xff]  ;;  %v360_v63 = vpack.c.bf16 %v79_v60, %v77_v59  ;;  %v42_v1 = vld [vmem:[%s567_s0 + $0x10] sm:$0xff]  ;;  %v123_v60 = vlaneseq }
  0x34   :  { %399 = vmatprep.subr.bf16.mxu0 %v398_v55  ;;  %v362_v2 = vpack.c.bf16 %v84_v62, %v82_v61  ;;  %v81_v3 = vld [vmem:[#allocation2 + $0x100] sm:$0xff]  ;;  %v83_v4 = vld [vmem:[#allocation2 + $0x110] sm:$0xff]  ;;  %v86_v5 = vld [vmem:[#allocation2 + $0x128] sm:$0xff] }
  0x35   :  { %345 = vmatpush1.bf16.msra.mxu1 %v344_v26  ;;  %v88_v6 = vld [vmem:[#allocation2 + $0x138] sm:$0xff]  ;;  %v364_v7 = vpack.c.bf16 %v83_v4, %v81_v3  ;;  %v45_v8 = vld [vmem:[%s567_s0 + $0x28] sm:$0xff]  ;;  %v85_v10 = vld [vmem:[#allocation2 + $0x120] sm:$0xff]  ;;  %v124_v61 = vshrl.u32 %v123_v60, 7 }
  0x36   :  { %347 = vmatprep.subr.bf16.mxu1 %v346_v27  ;;  %v366_v9 = vpack.c.bf16 %v88_v6, %v86_v5  ;;  %v87_v11 = vld [vmem:[#allocation2 + $0x130] sm:$0xff]  ;;  %v90_v12 = vld [vmem:[#allocation2 + $0x148] sm:$0xff]  ;;  %v92_v13 = vld [vmem:[#allocation2 + $0x158] sm:$0xff] }
  0x37   :  { %401 = vmatpush1.bf16.msra.mxu0 %v400_v56  ;;  %v368_v14 = vpack.c.bf16 %v87_v11, %v85_v10  ;;  %v48_v15 = vld [vmem:[%s567_s0 + $0x40] sm:$0xff]  ;;  %v370_v16 = vpack.c.bf16 %v92_v13, %v90_v12  ;;  %v91_v18 = vld [vmem:[#allocation2 + $0x150] sm:$0xff]  ;;  %v94_v19 = vld [vmem:[#allocation2 + $0x168] sm:$0xff]  ;;  %v125_v62 = vsub.s32 0, %v124_v61 }
  0x38   :  { %v89_v17 = vld [vmem:[#allocation2 + $0x140] sm:$0xff]  ;;  %v96_v20 = vld [vmem:[#allocation2 + $0x178] sm:$0xff]  ;;  %v95_v24 = vld [vmem:[#allocation2 + $0x170] sm:$0xff] }
  0x39   :  { %349 = vmatpush1.bf16.msra.mxu1 %v348_v32  ;;  %v372_v21 = vpack.c.bf16 %v91_v18, %v89_v17  ;;  %v374_v22 = vpack.c.bf16 %v96_v20, %v94_v19  ;;  %v93_v23 = vld [vmem:[#allocation2 + $0x160] sm:$0xff]  ;;  %v98_v25 = vld [vmem:[#allocation2 + $0x188] sm:$0xff]  ;;  %v99_v29 = vld [vmem:[#allocation2 + $0x190] sm:$0xff] }
  0x3a   :  { %351 = vmatprep.subr.bf16.mxu1 %v350_v33  ;;  %327 = vmatmul.mubr.msk.f32.vlgmr.msra.gmra.mrb[0].mxu0 %vm133_vm0, %v42_v1  ;;  %v376_v26 = vpack.c.bf16 %v95_v24, %v93_v23  ;;  %v97_v28 = vld [vmem:[#allocation2 + $0x180] sm:$0xff]  ;;  %v102_v30 = vld [vmem:[#allocation2 + $0x1a8] sm:$0xff]  ;;  %v104_v31 = vld [vmem:[#allocation2 + $0x1b8] sm:$0xff]  ;;  %v129_v1 = vsub.s32 1, %v124_v61 }
  0x3b   :  { %296 = vmatprep.mubr.f32.mxu0 %v471_v0  ;;  %v380_v32 = vpack.c.bf16 %v99_v29, %v97_v28  ;;  %v382_v33 = vpack.c.bf16 %v104_v31, %v102_v30  ;;  %v101_v34 = vld [vmem:[#allocation2 + $0x1a0] sm:$0xff]  ;;  %v103_v35 = vld [vmem:[#allocation2 + $0x1b0] sm:$0xff]  ;;  %v106_v36 = vld [vmem:[#allocation2 + $0x1c8] sm:$0xff] }
  0x3c   :  { %v108_v37 = vld [vmem:[#allocation2 + $0x1d8] sm:$0xff]  ;;  %v105_v40 = vld [vmem:[#allocation2 + $0x1c0] sm:$0xff]  ;;  %v107_v41 = vld [vmem:[#allocation2 + $0x1d0] sm:$0xff] }
  0x3d   :  { %353 = vmatpush1.bf16.msra.mxu1 %v352_v38  ;;  %v384_v38 = vpack.c.bf16 %v103_v35, %v101_v34  ;;  %v386_v39 = vpack.c.bf16 %v108_v37, %v106_v36  ;;  %v112_v43 = vld [vmem:[#allocation2 + $0x1f8] sm:$0xff]  ;;  %v388_v44 = vpack.c.bf16 %v107_v41, %v105_v40  ;;  %v109_v46 = vld [vmem:[#allocation2 + $0x1e0] sm:$0xff]  ;;  %v111_v47 = vld [vmem:[#allocation2 + $0x1f0] sm:$0xff] }
  0x3e   :  { %355 = vmatprep.subr.bf16.mxu1 %v354_v42  ;;  %328 = vmatmul.mubr.msk.f32.gmra.mrb[2].mxu0 %vm133_vm0, %v45_v8  ;;  %v110_v42 = vld [vmem:[#allocation2 + $0x1e8] sm:$0xff]  ;;  %v392_v48 = vpack.c.bf16 %v111_v47, %v109_v46  ;;  %v40_v49 = vld [vmem:[%s567_s0] sm:$0xff]  ;;  %v43_v51 = vld [vmem:[%s567_s0 + $0x18] sm:$0xff] }
  0x3f   :  { %302 = vmatprep.mubr.f32.mxu0 %v471_v0  ;;  %v100_v0 = vld [vmem:[#allocation2 + $0x198] sm:$0xff]  ;;  %v390_v45 = vpack.c.bf16 %v112_v43, %v110_v42  ;;  %v44_v50 = vld [vmem:[%s567_s0 + $0x20] sm:$0xff]  ;;  %v46_v53 = vld [vmem:[%s567_s0 + $0x30] sm:$0xff] }
  0x40   :  { %v378_v27 = vpack.c.bf16 %v100_v0, %v98_v25  ;;  %v47_v52 = vld [vmem:[%s567_s0 + $0x38] sm:$0xff] }
  0x41   :  { %357 = vmatpush1.bf16.msra.mxu1 %v356_v54 }
  0x42   :  { %359 = vmatprep.subr.bf16.mxu1 %v358_v58  ;;  %329 = vmatmul.mubr.msk.f32.gmra.mrb[4].mxu0 %vm133_vm0, %v48_v15 }
  0x45   :  { %361 = vmatpush1.bf16.msra.mxu1 %v360_v63  ;;  %v121_v63 = vld [vmem:[#allocation4] sm:$0x3] }
  0x46   :  { %363 = vmatprep.subr.bf16.mxu1 %v362_v2  ;;  %v126_v2 = vrot.slane %v121_v63, %v125_v62  ;;  %v130_v3 = vrot.slane %v121_v63, %v129_v1 }
  0x49   :  { %365 = vmatpush1.bf16.msra.mxu1 %v364_v7 }
  0x4a   :  { %367 = vmatprep.subr.bf16.mxu1 %v366_v9 }
  0x4d   :  { %369 = vmatpush1.bf16.msra.mxu1 %v368_v14 }
  0x4e   :  { %371 = vmatprep.subr.bf16.mxu1 %v370_v16 }
  0x51   :  { %373 = vmatpush1.bf16.msra.mxu1 %v372_v21 }
  0x52   :  { %375 = vmatprep.subr.bf16.mxu1 %v374_v22 }
  0x55   :  { %377 = vmatpush1.bf16.msra.mxu1 %v376_v26 }
  0x56   :  { %379 = vmatprep.subr.bf16.mxu1 %v378_v27 }
  0x59   :  { %381 = vmatpush1.bf16.msra.mxu1 %v380_v32 }
  0x5a   :  { %383 = vmatprep.subr.bf16.mxu1 %v382_v33 }
  0x5d   :  { %385 = vmatpush1.bf16.msra.mxu1 %v384_v38 }
  0x5e   :  { %387 = vmatprep.subr.bf16.mxu1 %v386_v39 }
  0x61   :  { %389 = vmatpush1.bf16.msra.mxu1 %v388_v44 }
  0x62   :  { %391 = vmatprep.subr.bf16.mxu1 %v390_v45 }
  0x65   :  { %393 = vmatpush1.bf16.msra.mxu1 %v392_v48 }
  0x68   :  { %208 = vmatmul.mubr.f32.vlgmr.msra.gmra.mrb[0].mxu1 %v40_v49 }
  0x69   :  { %213 = vmatprep.mubr.f32.mxu1 %v44_v50 }
  0x6c   :  { %214 = vmatmul.mubr.f32.gmra.mrb[2].mxu1 %v43_v51 }
  0x6d   :  { %219 = vmatprep.mubr.f32.mxu1 %v47_v52 }
  0x70   :  { %220 = vmatmul.mubr.f32.gmra.mrb[4].mxu1 %v46_v53 }
 0x10d   :  { %v292_v54 = vpop.f32.mrb[0].mxu0 }
 0x10e   :  { %v294_v55 = vpop.f32.mrb[1].mxu0 }
 0x111   :  { %v298_v56 = vpop.f32.mrb[2].mxu0 }
 0x112   :  { %v300_v57 = vpop.f32.mrb[3].mxu0 }
 0x115   :  { %v304_v58 = vpop.f32.mrb[4].mxu0 }
 0x116   :  { %v306_v59 = vpop.f32.mrb[5].mxu0 }
 0x13b   :  { %v209_v4 = vpop.f32.mrb[0].mxu1 }
 0x13c   :  { %v210_v5 = vadd.f32 %v209_v4, %v126_v2  ;;  %v211_v6 = vpop.f32.mrb[1].mxu1 }
 0x13d   :  { %v212_v7 = vadd.f32 %v211_v6, %v130_v3 }
 0x13e   :  { %v293_v8 = vadd.f32 %v292_v54, %v210_v5 }
 0x13f   :  { %v295_v9 = vadd.f32 %v294_v55, %v212_v7  ;;  %v215_v10 = vpop.f32.mrb[2].mxu1 }
 0x140   :  { %v309_v11 = vmax.f32 %v293_v8, 0.0  ;;  %v216_v12 = vadd.f32 %v215_v10, %v126_v2  ;;  %v217_v13 = vpop.f32.mrb[3].mxu1 }
 0x141   :  { %v310_v14 = vmax.f32 %v295_v9, 0.0  ;;  %v218_v15 = vadd.f32 %v217_v13, %v130_v3 }
 0x142   :  { %315 = vst [vmem:[%s570_s3] sm:$0xff] %v309_v11  ;;  %v299_v16 = vadd.f32 %v298_v56, %v216_v12 }
 0x143   :  { %316 = vst [vmem:[%s570_s3 + $0x8] sm:$0xff] %v310_v14  ;;  %v301_v17 = vadd.f32 %v300_v57, %v218_v15  ;;  %v221_v18 = vpop.f32.mrb[4].mxu1 }
 0x144   :  { %v311_v19 = vmax.f32 %v299_v16, 0.0  ;;  %v222_v20 = vadd.f32 %v221_v18, %v126_v2  ;;  %v223_v21 = vpop.f32.mrb[5].mxu1 }
 0x145   :  { %v312_v22 = vmax.f32 %v301_v17, 0.0  ;;  %v224_v23 = vadd.f32 %v223_v21, %v130_v3 }
 0x146   :  { %317 = vst [vmem:[%s570_s3 + $0x10] sm:$0xff] %v311_v19  ;;  %v305_v24 = vadd.f32 %v304_v58, %v222_v20 }
 0x147   :  { %318 = vst [vmem:[%s570_s3 + $0x18] sm:$0xff] %v312_v22  ;;  %v307_v25 = vadd.f32 %v306_v59, %v224_v23 }
 0x148   :  { %v313_v0 = vmax.f32 %v305_v24, 0.0 }
 0x149   :  { %v314_v26 = vmax.f32 %v307_v25, 0.0 }
 0x14a   :  { %319 = vst [vmem:[%s570_s3 + $0x20] sm:$0xff] %v313_v0 }
 0x14b   :  { %320 = vst [vmem:[%s570_s3 + $0x28] sm:$0xff] %v314_v26 }
 0x14c   :  { %325 = vsyncpa [#allocation3], 1 }
 0x14d   :  { %326 = vsyncpa [#allocation5], 1 }

// kernel: _lambda_.5
= control target key start
LH: loop header
LB: loop body
LE: loop exit
PB: predicated region body
PF: predicated region fallthrough
CT: control target
= control target key end

     0   :  { %s4474_s1 = inlined_call_operand.vmem [shape: f32[2304,128], index: 1, kind: input, shape index: {}]   ;;  %s4475_s0 = inlined_call_operand.vmem [shape: f32[104,2304], index: 0, kind: input, shape index: {}]   ;;  %s4476_s2 = inlined_call_operand.vmem [shape: f32[1,128], index: 2, kind: input, shape index: {}]   ;;  %s4477_s3 = inlined_call_operand.vmem [shape: f32[104,128], index: 3, kind: output, shape index: {}]  }
   0x1   :  { %v264_v0 = vld [vmem:[%s4474_s1 + $0x80] sm:$0xff]  ;;  %v265_v1 = vld [vmem:[%s4474_s1 + $0x88] sm:$0xff]  ;;  %v266_v11 = vld [vmem:[%s4474_s1 + $0x90] sm:$0xff] }
   0x2   :  { %v296_v2 = vld [vmem:[%s4474_s1 + $0x180] sm:$0xff]  ;;  %v2383_v3 = vpack.c.bf16 %v265_v1, %v264_v0  ;;  %v297_v4 = vld [vmem:[%s4474_s1 + $0x188] sm:$0xff]  ;;  %v267_v13 = vld [vmem:[%s4474_s1 + $0x98] sm:$0xff] }
   0x3   :  { %v248_v5 = vld [vmem:[%s4474_s1] sm:$0xff]  ;;  %v249_v6 = vld [vmem:[%s4474_s1 + $0x8] sm:$0xff]  ;;  %v2415_v7 = vpack.c.bf16 %v297_v4, %v296_v2  ;;  %v298_v14 = vld [vmem:[%s4474_s1 + $0x190] sm:$0xff]  ;;  %v2387_v16 = vpack.c.bf16 %v267_v13, %v266_v11 }
   0x4   :  { %v2385_v8 = vpack.c.bf16 %v249_v6, %v248_v5  ;;  %v280_v9 = vld [vmem:[%s4474_s1 + $0x100] sm:$0xff]  ;;  %v281_v10 = vld [vmem:[%s4474_s1 + $0x108] sm:$0xff]  ;;  %2384 = vmatprep.subr.bf16.mxu0 %v2383_v3  ;;  %v299_v15 = vld [vmem:[%s4474_s1 + $0x198] sm:$0xff] }
   0x5   :  { %v2417_v12 = vpack.c.bf16 %v281_v10, %v280_v9  ;;  %2416 = vmatprep.subr.bf16.mxu1 %v2415_v7  ;;  %v2419_v17 = vpack.c.bf16 %v299_v15, %v298_v14  ;;  %v250_v18 = vld [vmem:[%s4474_s1 + $0x10] sm:$0xff]  ;;  %v251_v19 = vld [vmem:[%s4474_s1 + $0x18] sm:$0xff]  ;;  %v268_v23 = vld [vmem:[%s4474_s1 + $0xa0] sm:$0xff] }
   0x6   :  { %2386 = vmatpush3.bf16.msra.mxu0 %v2385_v8  ;;  %v282_v20 = vld [vmem:[%s4474_s1 + $0x110] sm:$0xff]  ;;  %v2389_v21 = vpack.c.bf16 %v251_v19, %v250_v18  ;;  %v283_v22 = vld [vmem:[%s4474_s1 + $0x118] sm:$0xff]  ;;  %v269_v24 = vld [vmem:[%s4474_s1 + $0xa8] sm:$0xff] }
   0x7   :  { %2418 = vmatpush3.bf16.msra.mxu1 %v2417_v12  ;;  %2388 = vmatprep.subr.bf16.mxu0 %v2387_v16  ;;  %v2421_v25 = vpack.c.bf16 %v283_v22, %v282_v20  ;;  %v2391_v26 = vpack.c.bf16 %v269_v24, %v268_v23  ;;  %v300_v27 = vld [vmem:[%s4474_s1 + $0x1a0] sm:$0xff]  ;;  %v301_v28 = vld [vmem:[%s4474_s1 + $0x1a8] sm:$0xff]  ;;  %v270_v35 = vld [vmem:[%s4474_s1 + $0xb0] sm:$0xff] }
   0x8   :  { %2420 = vmatprep.subr.bf16.mxu1 %v2419_v17  ;;  %v252_v29 = vld [vmem:[%s4474_s1 + $0x20] sm:$0xff]  ;;  %v2423_v30 = vpack.c.bf16 %v301_v28, %v300_v27  ;;  %v253_v31 = vld [vmem:[%s4474_s1 + $0x28] sm:$0xff]  ;;  %v271_v36 = vld [vmem:[%s4474_s1 + $0xb8] sm:$0xff] }
   0x9   :  { %v284_v32 = vld [vmem:[%s4474_s1 + $0x120] sm:$0xff]  ;;  %v285_v33 = vld [vmem:[%s4474_s1 + $0x128] sm:$0xff]  ;;  %v2393_v34 = vpack.c.bf16 %v253_v31, %v252_v29  ;;  %v302_v37 = vld [vmem:[%s4474_s1 + $0x1b0] sm:$0xff]  ;;  %v2395_v39 = vpack.c.bf16 %v271_v36, %v270_v35 }
   0xa   :  { %2390 = vmatpush3.bf16.msra.mxu0 %v2389_v21  ;;  %v2425_v38 = vpack.c.bf16 %v285_v33, %v284_v32  ;;  %v303_v40 = vld [vmem:[%s4474_s1 + $0x1b8] sm:$0xff]  ;;  %v254_v41 = vld [vmem:[%s4474_s1 + $0x30] sm:$0xff]  ;;  %v272_v46 = vld [vmem:[%s4474_s1 + $0xc0] sm:$0xff] }
   0xb   :  { %2422 = vmatpush3.bf16.msra.mxu1 %v2421_v25  ;;  %2392 = vmatprep.subr.bf16.mxu0 %v2391_v26  ;;  %v255_v42 = vld [vmem:[%s4474_s1 + $0x38] sm:$0xff]  ;;  %v2427_v43 = vpack.c.bf16 %v303_v40, %v302_v37  ;;  %v286_v44 = vld [vmem:[%s4474_s1 + $0x130] sm:$0xff]  ;;  %v273_v47 = vld [vmem:[%s4474_s1 + $0xc8] sm:$0xff] }
   0xc   :  { %2424 = vmatprep.subr.bf16.mxu1 %v2423_v30  ;;  %v287_v45 = vld [vmem:[%s4474_s1 + $0x138] sm:$0xff]  ;;  %v304_v48 = vld [vmem:[%s4474_s1 + $0x1c0] sm:$0xff]  ;;  %v305_v49 = vld [vmem:[%s4474_s1 + $0x1c8] sm:$0xff]  ;;  %v2397_v50 = vpack.c.bf16 %v255_v42, %v254_v41  ;;  %v2399_v52 = vpack.c.bf16 %v273_v47, %v272_v46 }
   0xd   :  { %v2429_v51 = vpack.c.bf16 %v287_v45, %v286_v44  ;;  %v256_v53 = vld [vmem:[%s4474_s1 + $0x40] sm:$0xff]  ;;  %v257_v54 = vld [vmem:[%s4474_s1 + $0x48] sm:$0xff]  ;;  %v2431_v56 = vpack.c.bf16 %v305_v49, %v304_v48  ;;  %v274_v58 = vld [vmem:[%s4474_s1 + $0xd0] sm:$0xff] }
   0xe   :  { %2394 = vmatpush3.bf16.msra.mxu0 %v2393_v34  ;;  %v288_v55 = vld [vmem:[%s4474_s1 + $0x140] sm:$0xff]  ;;  %v289_v57 = vld [vmem:[%s4474_s1 + $0x148] sm:$0xff]  ;;  %v275_v59 = vld [vmem:[%s4474_s1 + $0xd8] sm:$0xff]  ;;  %v2401_v62 = vpack.c.bf16 %v257_v54, %v256_v53 }
   0xf   :  { %2426 = vmatpush3.bf16.msra.mxu1 %v2425_v38  ;;  %2396 = vmatprep.subr.bf16.mxu0 %v2395_v39  ;;  %v306_v60 = vld [vmem:[%s4474_s1 + $0x1d0] sm:$0xff]  ;;  %v307_v61 = vld [vmem:[%s4474_s1 + $0x1d8] sm:$0xff]  ;;  %v2433_v63 = vpack.c.bf16 %v289_v57, %v288_v55  ;;  %v2403_v0 = vpack.c.bf16 %v275_v59, %v274_v58  ;;  %v276_v6 = vld [vmem:[%s4474_s1 + $0xe0] sm:$0xff] }
  0x10   :  { %2428 = vmatprep.subr.bf16.mxu1 %v2427_v43  ;;  %v258_v1 = vld [vmem:[%s4474_s1 + $0x50] sm:$0xff]  ;;  %v259_v2 = vld [vmem:[%s4474_s1 + $0x58] sm:$0xff]  ;;  %v2435_v4 = vpack.c.bf16 %v307_v61, %v306_v60  ;;  %v277_v7 = vld [vmem:[%s4474_s1 + $0xe8] sm:$0xff] }
  0x11   :  { %v290_v3 = vld [vmem:[%s4474_s1 + $0x150] sm:$0xff]  ;;  %v291_v5 = vld [vmem:[%s4474_s1 + $0x158] sm:$0xff]  ;;  %v308_v8 = vld [vmem:[%s4474_s1 + $0x1e0] sm:$0xff]  ;;  %v2405_v10 = vpack.c.bf16 %v259_v2, %v258_v1  ;;  %v2407_v14 = vpack.c.bf16 %v277_v7, %v276_v6 }
  0x12   :  { %2398 = vmatpush3.bf16.msra.mxu0 %v2397_v50  ;;  %v309_v9 = vld [vmem:[%s4474_s1 + $0x1e8] sm:$0xff]  ;;  %v260_v11 = vld [vmem:[%s4474_s1 + $0x60] sm:$0xff]  ;;  %v2437_v13 = vpack.c.bf16 %v291_v5, %v290_v3  ;;  %v17_v17 = vld [vmem:[%s4475_s0 + $0x18] sm:$0xff] }
  0x13   :  { %2430 = vmatpush3.bf16.msra.mxu1 %v2429_v51  ;;  %2400 = vmatprep.subr.bf16.mxu0 %v2399_v52  ;;  %v261_v12 = vld [vmem:[%s4474_s1 + $0x68] sm:$0xff]  ;;  %v292_v15 = vld [vmem:[%s4474_s1 + $0x160] sm:$0xff]  ;;  %v2439_v18 = vpack.c.bf16 %v309_v9, %v308_v8  ;;  %v278_v20 = vld [vmem:[%s4474_s1 + $0xf0] sm:$0xff] }
  0x14   :  { %2432 = vmatprep.subr.bf16.mxu1 %v2431_v56  ;;  %v15_v16 = vld [vmem:[%s4475_s0 + $0x8] sm:$0xff]  ;;  %v279_v21 = vld [vmem:[%s4474_s1 + $0xf8] sm:$0xff]  ;;  %v310_v22 = vld [vmem:[%s4474_s1 + $0x1f0] sm:$0xff]  ;;  %737 = vmatprep.mubr.f32.mxu1 %v17_v17  ;;  %v2409_v24 = vpack.c.bf16 %v261_v12, %v260_v11 }
  0x15   :  { %v293_v19 = vld [vmem:[%s4474_s1 + $0x168] sm:$0xff]  ;;  %607 = vmatprep.mubr.f32.mxu0 %v15_v16  ;;  %v311_v23 = vld [vmem:[%s4474_s1 + $0x1f8] sm:$0xff]  ;;  %v2411_v26 = vpack.c.bf16 %v279_v21, %v278_v20  ;;  %v262_v27 = vld [vmem:[%s4474_s1 + $0x70] sm:$0xff] }
  0x16   :  { %2402 = vmatpush3.bf16.msra.mxu0 %v2401_v62  ;;  %v2441_v25 = vpack.c.bf16 %v293_v19, %v292_v15  ;;  %v263_v28 = vld [vmem:[%s4474_s1 + $0x78] sm:$0xff]  ;;  %v294_v29 = vld [vmem:[%s4474_s1 + $0x170] sm:$0xff]  ;;  %v2443_v30 = vpack.c.bf16 %v311_v23, %v310_v22  ;;  %v328_v32 = vld [vmem:[%s4474_s1 + $0x280] sm:$0xff] }
  0x17   :  { %2434 = vmatpush3.bf16.msra.mxu1 %v2433_v63  ;;  %2404 = vmatprep.subr.bf16.mxu0 %v2403_v0  ;;  %v295_v31 = vld [vmem:[%s4474_s1 + $0x178] sm:$0xff]  ;;  %v329_v33 = vld [vmem:[%s4474_s1 + $0x288] sm:$0xff]  ;;  %v360_v34 = vld [vmem:[%s4474_s1 + $0x380] sm:$0xff]  ;;  %v2413_v36 = vpack.c.bf16 %v263_v28, %v262_v27 }
  0x18   :  { %2436 = vmatprep.subr.bf16.mxu1 %v2435_v4  ;;  %v361_v35 = vld [vmem:[%s4474_s1 + $0x388] sm:$0xff]  ;;  %v2445_v37 = vpack.c.bf16 %v295_v31, %v294_v29  ;;  %v2447_v38 = vpack.c.bf16 %v329_v33, %v328_v32  ;;  %v312_v39 = vld [vmem:[%s4474_s1 + $0x200] sm:$0xff]  ;;  %v330_v44 = vld [vmem:[%s4474_s1 + $0x290] sm:$0xff] }
  0x19   :  { %v313_v40 = vld [vmem:[%s4474_s1 + $0x208] sm:$0xff]  ;;  %v2479_v41 = vpack.c.bf16 %v361_v35, %v360_v34  ;;  %v344_v42 = vld [vmem:[%s4474_s1 + $0x300] sm:$0xff]  ;;  %v331_v45 = vld [vmem:[%s4474_s1 + $0x298] sm:$0xff] }
  0x1a   :  { %2406 = vmatpush3.bf16.msra.mxu0 %v2405_v10  ;;  %v345_v43 = vld [vmem:[%s4474_s1 + $0x308] sm:$0xff]  ;;  %v14_v46 = vld [vmem:[%s4475_s0] sm:$0xff]  ;;  %v2449_v47 = vpack.c.bf16 %v313_v40, %v312_v39  ;;  %v362_v48 = vld [vmem:[%s4474_s1 + $0x390] sm:$0xff]  ;;  %v2451_v54 = vpack.c.bf16 %v331_v45, %v330_v44 }
  0x1b   :  { %2438 = vmatpush3.bf16.msra.mxu1 %v2437_v13  ;;  %2408 = vmatprep.subr.bf16.mxu0 %v2407_v14  ;;  %v363_v49 = vld [vmem:[%s4474_s1 + $0x398] sm:$0xff]  ;;  %v16_v50 = vld [vmem:[%s4475_s0 + $0x10] sm:$0xff]  ;;  %v35_v52 = vld [vmem:[%s4475_s0 + $0xa8] sm:$0xff]  ;;  %v2481_v53 = vpack.c.bf16 %v345_v43, %v344_v42 }
  0x1c   :  { %2440 = vmatprep.subr.bf16.mxu1 %v2439_v18  ;;  %v33_v51 = vld [vmem:[%s4475_s0 + $0x98] sm:$0xff]  ;;  %v314_v55 = vld [vmem:[%s4474_s1 + $0x210] sm:$0xff]  ;;  %v2483_v58 = vpack.c.bf16 %v363_v49, %v362_v48  ;;  %v332_v60 = vld [vmem:[%s4474_s1 + $0x2a0] sm:$0xff] }
  0x1d   :  { %v315_v56 = vld [vmem:[%s4474_s1 + $0x218] sm:$0xff]  ;;  %v346_v57 = vld [vmem:[%s4474_s1 + $0x310] sm:$0xff]  ;;  %v333_v61 = vld [vmem:[%s4474_s1 + $0x2a8] sm:$0xff] }
  0x1e   :  { %2410 = vmatpush3.bf16.msra.mxu0 %v2409_v24  ;;  %v347_v59 = vld [vmem:[%s4474_s1 + $0x318] sm:$0xff]  ;;  %v32_v62 = vld [vmem:[%s4475_s0 + $0x90] sm:$0xff]  ;;  %v364_v63 = vld [vmem:[%s4474_s1 + $0x3a0] sm:$0xff]  ;;  %v2453_v4 = vpack.c.bf16 %v315_v56, %v314_v55  ;;  %v2455_v6 = vpack.c.bf16 %v333_v61, %v332_v60 }
  0x1f   :  { %2442 = vmatpush3.bf16.msra.mxu1 %v2441_v25  ;;  %2412 = vmatprep.subr.bf16.mxu0 %v2411_v26  ;;  %v365_v0 = vld [vmem:[%s4474_s1 + $0x3a8] sm:$0xff]  ;;  %v34_v1 = vld [vmem:[%s4475_s0 + $0xa0] sm:$0xff]  ;;  %v53_v3 = vld [vmem:[%s4475_s0 + $0x138] sm:$0xff]  ;;  %v2485_v5 = vpack.c.bf16 %v347_v59, %v346_v57 }
  0x20   :  { %2444 = vmatprep.subr.bf16.mxu1 %v2443_v30  ;;  %v51_v2 = vld [vmem:[%s4475_s0 + $0x128] sm:$0xff]  ;;  %v316_v7 = vld [vmem:[%s4474_s1 + $0x220] sm:$0xff]  ;;  %v2487_v10 = vpack.c.bf16 %v365_v0, %v364_v63  ;;  %v334_v12 = vld [vmem:[%s4474_s1 + $0x2b0] sm:$0xff] }
  0x21   :  { %v317_v8 = vld [vmem:[%s4474_s1 + $0x228] sm:$0xff]  ;;  %v348_v9 = vld [vmem:[%s4474_s1 + $0x320] sm:$0xff]  ;;  %v335_v13 = vld [vmem:[%s4474_s1 + $0x2b8] sm:$0xff] }
  0x22   :  { %2414 = vmatpush3.bf16.msra.mxu0 %v2413_v36  ;;  %v349_v11 = vld [vmem:[%s4474_s1 + $0x328] sm:$0xff]  ;;  %v50_v14 = vld [vmem:[%s4475_s0 + $0x120] sm:$0xff]  ;;  %v366_v15 = vld [vmem:[%s4474_s1 + $0x3b0] sm:$0xff]  ;;  %v2457_v20 = vpack.c.bf16 %v317_v8, %v316_v7  ;;  %v2459_v22 = vpack.c.bf16 %v335_v13, %v334_v12 }
  0x23   :  { %2446 = vmatpush3.bf16.msra.mxu1 %v2445_v37  ;;  %2448 = vmatprep.subr.bf16.mxu0 %v2447_v38  ;;  %v367_v16 = vld [vmem:[%s4474_s1 + $0x3b8] sm:$0xff]  ;;  %v52_v17 = vld [vmem:[%s4475_s0 + $0x130] sm:$0xff]  ;;  %v71_v19 = vld [vmem:[%s4475_s0 + $0x1c8] sm:$0xff]  ;;  %v2489_v21 = vpack.c.bf16 %v349_v11, %v348_v9 }
  0x24   :  { %2480 = vmatprep.subr.bf16.mxu1 %v2479_v41  ;;  %v69_v18 = vld [vmem:[%s4475_s0 + $0x1b8] sm:$0xff]  ;;  %v318_v23 = vld [vmem:[%s4474_s1 + $0x230] sm:$0xff]  ;;  %v2491_v26 = vpack.c.bf16 %v367_v16, %v366_v15  ;;  %v336_v28 = vld [vmem:[%s4474_s1 + $0x2c0] sm:$0xff] }
  0x25   :  { %608 = vmatmul.mubr.f32.vlgmr.msra.gmra.mrb[0].mxu0 %v14_v46  ;;  %v319_v24 = vld [vmem:[%s4474_s1 + $0x238] sm:$0xff]  ;;  %v350_v25 = vld [vmem:[%s4474_s1 + $0x330] sm:$0xff]  ;;  %v337_v29 = vld [vmem:[%s4474_s1 + $0x2c8] sm:$0xff] }
  0x26   :  { %738 = vmatmul.mubr.f32.vlgmr.msra.gmra.mrb[0].mxu1 %v16_v50  ;;  %2450 = vmatpush3.bf16.msra.mxu0 %v2449_v47  ;;  %v351_v27 = vld [vmem:[%s4474_s1 + $0x338] sm:$0xff]  ;;  %v68_v30 = vld [vmem:[%s4475_s0 + $0x1b0] sm:$0xff]  ;;  %v368_v31 = vld [vmem:[%s4474_s1 + $0x3c0] sm:$0xff]  ;;  %v2461_v36 = vpack.c.bf16 %v319_v24, %v318_v23  ;;  %v2463_v38 = vpack.c.bf16 %v337_v29, %v336_v28 }
  0x27   :  { %612 = vmatprep.mubr.f32.mxu0 %v33_v51  ;;  %742 = vmatprep.mubr.f32.mxu1 %v35_v52  ;;  %v369_v32 = vld [vmem:[%s4474_s1 + $0x3c8] sm:$0xff]  ;;  %v70_v33 = vld [vmem:[%s4475_s0 + $0x1c0] sm:$0xff]  ;;  %v89_v35 = vld [vmem:[%s4475_s0 + $0x258] sm:$0xff]  ;;  %v2493_v37 = vpack.c.bf16 %v351_v27, %v350_v25 }
  0x28   :  { %2482 = vmatpush3.bf16.msra.mxu1 %v2481_v53  ;;  %2452 = vmatprep.subr.bf16.mxu0 %v2451_v54  ;;  %v87_v34 = vld [vmem:[%s4475_s0 + $0x248] sm:$0xff]  ;;  %v320_v39 = vld [vmem:[%s4474_s1 + $0x240] sm:$0xff]  ;;  %v2495_v42 = vpack.c.bf16 %v369_v32, %v368_v31  ;;  %v338_v44 = vld [vmem:[%s4474_s1 + $0x2d0] sm:$0xff] }
  0x29   :  { %613 = vmatmul.mubr.f32.gmra.mrb[2].mxu0 %v32_v62  ;;  %2484 = vmatprep.subr.bf16.mxu1 %v2483_v58  ;;  %v321_v40 = vld [vmem:[%s4474_s1 + $0x248] sm:$0xff]  ;;  %v352_v41 = vld [vmem:[%s4474_s1 + $0x340] sm:$0xff]  ;;  %v339_v45 = vld [vmem:[%s4474_s1 + $0x2d8] sm:$0xff] }
  0x2a   :  { %743 = vmatmul.mubr.f32.gmra.mrb[2].mxu1 %v34_v1  ;;  %617 = vmatprep.mubr.f32.mxu0 %v51_v2  ;;  %v353_v43 = vld [vmem:[%s4474_s1 + $0x348] sm:$0xff]  ;;  %v86_v46 = vld [vmem:[%s4475_s0 + $0x240] sm:$0xff]  ;;  %v88_v47 = vld [vmem:[%s4475_s0 + $0x250] sm:$0xff]  ;;  %v2465_v50 = vpack.c.bf16 %v321_v40, %v320_v39  ;;  %v2467_v54 = vpack.c.bf16 %v339_v45, %v338_v44 }
  0x2b   :  { %747 = vmatprep.mubr.f32.mxu1 %v53_v3  ;;  %2454 = vmatpush3.bf16.msra.mxu0 %v2453_v4  ;;  %v105_v48 = vld [vmem:[%s4475_s0 + $0x2d8] sm:$0xff]  ;;  %v107_v49 = vld [vmem:[%s4475_s0 + $0x2e8] sm:$0xff]  ;;  %v370_v51 = vld [vmem:[%s4474_s1 + $0x3d0] sm:$0xff]  ;;  %v2497_v53 = vpack.c.bf16 %v353_v43, %v352_v41 }
  0x2c   :  { %2486 = vmatpush3.bf16.msra.mxu1 %v2485_v5  ;;  %2456 = vmatprep.subr.bf16.mxu0 %v2455_v6  ;;  %v371_v52 = vld [vmem:[%s4474_s1 + $0x3d8] sm:$0xff]  ;;  %v322_v55 = vld [vmem:[%s4474_s1 + $0x250] sm:$0xff]  ;;  %v340_v60 = vld [vmem:[%s4474_s1 + $0x2e0] sm:$0xff] }
  0x2d   :  { %618 = vmatmul.mubr.f32.gmra.mrb[4].mxu0 %v50_v14  ;;  %2488 = vmatprep.subr.bf16.mxu1 %v2487_v10  ;;  %v323_v56 = vld [vmem:[%s4474_s1 + $0x258] sm:$0xff]  ;;  %v354_v57 = vld [vmem:[%s4474_s1 + $0x350] sm:$0xff]  ;;  %v2499_v58 = vpack.c.bf16 %v371_v52, %v370_v51  ;;  %v341_v61 = vld [vmem:[%s4474_s1 + $0x2e8] sm:$0xff] }
  0x2e   :  { %748 = vmatmul.mubr.f32.gmra.mrb[4].mxu1 %v52_v17  ;;  %622 = vmatprep.mubr.f32.mxu0 %v69_v18  ;;  %v355_v59 = vld [vmem:[%s4474_s1 + $0x358] sm:$0xff]  ;;  %v104_v62 = vld [vmem:[%s4475_s0 + $0x2d0] sm:$0xff]  ;;  %v106_v63 = vld [vmem:[%s4475_s0 + $0x2e0] sm:$0xff]  ;;  %v2469_v2 = vpack.c.bf16 %v323_v56, %v322_v55  ;;  %v2471_v5 = vpack.c.bf16 %v341_v61, %v340_v60 }
  0x2f   :  { %752 = vmatprep.mubr.f32.mxu1 %v71_v19  ;;  %2458 = vmatpush3.bf16.msra.mxu0 %v2457_v20  ;;  %v123_v0 = vld [vmem:[%s4475_s0 + $0x368] sm:$0xff]  ;;  %v125_v1 = vld [vmem:[%s4475_s0 + $0x378] sm:$0xff]  ;;  %v324_v3 = vld [vmem:[%s4474_s1 + $0x260] sm:$0xff]  ;;  %v2501_v4 = vpack.c.bf16 %v355_v59, %v354_v57 }
  0x30   :  { %2490 = vmatpush3.bf16.msra.mxu1 %v2489_v21  ;;  %2460 = vmatprep.subr.bf16.mxu0 %v2459_v22  ;;  %v325_v6 = vld [vmem:[%s4474_s1 + $0x268] sm:$0xff]  ;;  %v372_v7 = vld [vmem:[%s4474_s1 + $0x3e0] sm:$0xff]  ;;  %v342_v13 = vld [vmem:[%s4474_s1 + $0x2f0] sm:$0xff] }
  0x31   :  { %623 = vmatmul.mubr.f32.gmra.mrb[6].mxu0 %v68_v30  ;;  %2492 = vmatprep.subr.bf16.mxu1 %v2491_v26  ;;  %v373_v8 = vld [vmem:[%s4474_s1 + $0x3e8] sm:$0xff]  ;;  %v356_v10 = vld [vmem:[%s4474_s1 + $0x360] sm:$0xff]  ;;  %v343_v14 = vld [vmem:[%s4474_s1 + $0x2f8] sm:$0xff]  ;;  %v2473_v18 = vpack.c.bf16 %v325_v6, %v324_v3 }
  0x32   :  { %753 = vmatmul.mubr.f32.gmra.mrb[6].mxu1 %v70_v33  ;;  %627 = vmatprep.mubr.f32.mxu0 %v87_v34  ;;  %v2503_v9 = vpack.c.bf16 %v373_v8, %v372_v7  ;;  %v357_v11 = vld [vmem:[%s4474_s1 + $0x368] sm:$0xff]  ;;  %v122_v12 = vld [vmem:[%s4475_s0 + $0x360] sm:$0xff]  ;;  %v124_v15 = vld [vmem:[%s4475_s0 + $0x370] sm:$0xff]  ;;  %v2475_v20 = vpack.c.bf16 %v343_v14, %v342_v13 }
  0x33   :  { %757 = vmatprep.mubr.f32.mxu1 %v89_v35  ;;  %2462 = vmatpush3.bf16.msra.mxu0 %v2461_v36  ;;  %v141_v16 = vld [vmem:[%s4475_s0 + $0x3f8] sm:$0xff]  ;;  %v143_v17 = vld [vmem:[%s4475_s0 + $0x408] sm:$0xff]  ;;  %v2505_v19 = vpack.c.bf16 %v357_v11, %v356_v10  ;;  %v326_v21 = vld [vmem:[%s4474_s1 + $0x270] sm:$0xff] }
  0x34   :  { %2494 = vmatpush3.bf16.msra.mxu1 %v2493_v37  ;;  %2464 = vmatprep.subr.bf16.mxu0 %v2463_v38  ;;  %v327_v22 = vld [vmem:[%s4474_s1 + $0x278] sm:$0xff]  ;;  %v374_v23 = vld [vmem:[%s4474_s1 + $0x3f0] sm:$0xff]  ;;  %v142_v28 = vld [vmem:[%s4475_s0 + $0x400] sm:$0xff] }
  0x35   :  { %628 = vmatmul.mubr.f32.gmra.mrb[8].mxu0 %v86_v46  ;;  %2496 = vmatprep.subr.bf16.mxu1 %v2495_v42  ;;  %v375_v24 = vld [vmem:[%s4474_s1 + $0x3f8] sm:$0xff]  ;;  %v358_v25 = vld [vmem:[%s4474_s1 + $0x370] sm:$0xff]  ;;  %v159_v30 = vld [vmem:[%s4475_s0 + $0x488] sm:$0xff]  ;;  %v2477_v31 = vpack.c.bf16 %v327_v22, %v326_v21 }
  0x36   :  { %758 = vmatmul.mubr.f32.gmra.mrb[8].mxu1 %v88_v47  ;;  %632 = vmatprep.mubr.f32.mxu0 %v105_v48  ;;  %v359_v26 = vld [vmem:[%s4474_s1 + $0x378] sm:$0xff]  ;;  %v140_v27 = vld [vmem:[%s4475_s0 + $0x3f0] sm:$0xff]  ;;  %v2507_v29 = vpack.c.bf16 %v375_v24, %v374_v23  ;;  %v392_v32 = vld [vmem:[%s4474_s1 + $0x480] sm:$0xff] }
  0x37   :  { %762 = vmatprep.mubr.f32.mxu1 %v107_v49  ;;  %2466 = vmatpush3.bf16.msra.mxu0 %v2465_v50  ;;  %v393_v33 = vld [vmem:[%s4474_s1 + $0x488] sm:$0xff]  ;;  %v161_v34 = vld [vmem:[%s4475_s0 + $0x498] sm:$0xff]  ;;  %v2509_v35 = vpack.c.bf16 %v359_v26, %v358_v25  ;;  %v158_v37 = vld [vmem:[%s4475_s0 + $0x480] sm:$0xff] }
  0x38   :  { %2498 = vmatpush3.bf16.msra.mxu1 %v2497_v53  ;;  %2468 = vmatprep.subr.bf16.mxu0 %v2467_v54  ;;  %v2511_v36 = vpack.c.bf16 %v393_v33, %v392_v32  ;;  %v424_v38 = vld [vmem:[%s4474_s1 + $0x580] sm:$0xff]  ;;  %v425_v39 = vld [vmem:[%s4474_s1 + $0x588] sm:$0xff]  ;;  %v160_v40 = vld [vmem:[%s4475_s0 + $0x490] sm:$0xff] }
  0x39   :  { %633 = vmatmul.mubr.f32.gmra.mrb[10].mxu0 %v104_v62  ;;  %2500 = vmatprep.subr.bf16.mxu1 %v2499_v58  ;;  %v177_v41 = vld [vmem:[%s4475_s0 + $0x518] sm:$0xff]  ;;  %v2543_v42 = vpack.c.bf16 %v425_v39, %v424_v38  ;;  %v179_v43 = vld [vmem:[%s4475_s0 + $0x528] sm:$0xff]  ;;  %v176_v44 = vld [vmem:[%s4475_s0 + $0x510] sm:$0xff] }
  0x3a   :  { %763 = vmatmul.mubr.f32.gmra.mrb[10].mxu1 %v106_v63  ;;  %637 = vmatprep.mubr.f32.mxu0 %v123_v0  ;;  %v178_v45 = vld [vmem:[%s4475_s0 + $0x520] sm:$0xff]  ;;  %v195_v46 = vld [vmem:[%s4475_s0 + $0x5a8] sm:$0xff]  ;;  %v197_v47 = vld [vmem:[%s4475_s0 + $0x5b8] sm:$0xff] }
  0x3b   :  { %767 = vmatprep.mubr.f32.mxu1 %v125_v1  ;;  %2470 = vmatpush3.bf16.msra.mxu0 %v2469_v2  ;;  %v194_v48 = vld [vmem:[%s4475_s0 + $0x5a0] sm:$0xff]  ;;  %v196_v49 = vld [vmem:[%s4475_s0 + $0x5b0] sm:$0xff]  ;;  %v213_v50 = vld [vmem:[%s4475_s0 + $0x638] sm:$0xff] }
  0x3c   :  { %2502 = vmatpush3.bf16.msra.mxu1 %v2501_v4  ;;  %2472 = vmatprep.subr.bf16.mxu0 %v2471_v5  ;;  %v215_v51 = vld [vmem:[%s4475_s0 + $0x648] sm:$0xff]  ;;  %v212_v52 = vld [vmem:[%s4475_s0 + $0x630] sm:$0xff]  ;;  %v214_v53 = vld [vmem:[%s4475_s0 + $0x640] sm:$0xff] }
  0x3d   :  { %638 = vmatmul.mubr.f32.gmra.mrb[12].mxu0 %v122_v12  ;;  %2504 = vmatprep.subr.bf16.mxu1 %v2503_v9  ;;  %v231_v54 = vld [vmem:[%s4475_s0 + $0x6c8] sm:$0xff]  ;;  %v233_v55 = vld [vmem:[%s4475_s0 + $0x6d8] sm:$0xff]  ;;  %v230_v56 = vld [vmem:[%s4475_s0 + $0x6c0] sm:$0xff] }
  0x3e   :  { %768 = vmatmul.mubr.f32.gmra.mrb[12].mxu1 %v124_v15  ;;  %642 = vmatprep.mubr.f32.mxu0 %v141_v16  ;;  %v232_v57 = vld [vmem:[%s4475_s0 + $0x6d0] sm:$0xff]  ;;  %v19_v58 = vld [vmem:[%s4475_s0 + $0x28] sm:$0xff]  ;;  %v376_v59 = vld [vmem:[%s4474_s1 + $0x400] sm:$0xff] }
  0x3f   :  { %772 = vmatprep.mubr.f32.mxu1 %v143_v17  ;;  %2474 = vmatpush3.bf16.msra.mxu0 %v2473_v18  ;;  %v377_v60 = vld [vmem:[%s4474_s1 + $0x408] sm:$0xff]  ;;  %v21_v61 = vld [vmem:[%s4475_s0 + $0x38] sm:$0xff]  ;;  %v408_v62 = vld [vmem:[%s4474_s1 + $0x500] sm:$0xff] }
  0x40   :  { %2506 = vmatpush3.bf16.msra.mxu1 %v2505_v19  ;;  %2476 = vmatprep.subr.bf16.mxu0 %v2475_v20  ;;  %v409_v63 = vld [vmem:[%s4474_s1 + $0x508] sm:$0xff]  ;;  %v394_v0 = vld [vmem:[%s4474_s1 + $0x490] sm:$0xff]  ;;  %v395_v1 = vld [vmem:[%s4474_s1 + $0x498] sm:$0xff]  ;;  %v2513_v3 = vpack.c.bf16 %v377_v60, %v376_v59 }
  0x41   :  { %643 = vmatmul.mubr.f32.gmra.mrb[14].mxu0 %v140_v27  ;;  %2508 = vmatprep.subr.bf16.mxu1 %v2507_v29  ;;  %v18_v2 = vld [vmem:[%s4475_s0 + $0x20] sm:$0xff]  ;;  %v426_v4 = vld [vmem:[%s4474_s1 + $0x590] sm:$0xff]  ;;  %v427_v5 = vld [vmem:[%s4474_s1 + $0x598] sm:$0xff]  ;;  %v2545_v9 = vpack.c.bf16 %v409_v63, %v408_v62  ;;  %v2515_v10 = vpack.c.bf16 %v395_v1, %v394_v0 }
  0x42   :  { %773 = vmatmul.mubr.f32.gmra.mrb[14].mxu1 %v142_v28  ;;  %647 = vmatprep.mubr.f32.mxu0 %v159_v30  ;;  %v20_v6 = vld [vmem:[%s4475_s0 + $0x30] sm:$0xff]  ;;  %v37_v7 = vld [vmem:[%s4475_s0 + $0xb8] sm:$0xff]  ;;  %v39_v8 = vld [vmem:[%s4475_s0 + $0xc8] sm:$0xff]  ;;  %v2547_v14 = vpack.c.bf16 %v427_v5, %v426_v4 }
  0x43   :  { %777 = vmatprep.mubr.f32.mxu1 %v161_v34  ;;  %2478 = vmatpush3.bf16.msra.mxu0 %v2477_v31  ;;  %v378_v11 = vld [vmem:[%s4474_s1 + $0x410] sm:$0xff]  ;;  %v379_v12 = vld [vmem:[%s4474_s1 + $0x418] sm:$0xff]  ;;  %v396_v16 = vld [vmem:[%s4474_s1 + $0x4a0] sm:$0xff] }
  0x44   :  { %2510 = vmatpush3.bf16.msra.mxu1 %v2509_v35  ;;  %2512 = vmatprep.subr.bf16.mxu0 %v2511_v36  ;;  %v410_v13 = vld [vmem:[%s4474_s1 + $0x510] sm:$0xff]  ;;  %v411_v15 = vld [vmem:[%s4474_s1 + $0x518] sm:$0xff]  ;;  %v397_v17 = vld [vmem:[%s4474_s1 + $0x4a8] sm:$0xff]  ;;  %v2517_v24 = vpack.c.bf16 %v379_v12, %v378_v11 }
  0x45   :  { %648 = vmatmul.mubr.f32.gmra.mrb[16].mxu0 %v158_v37  ;;  %2544 = vmatprep.subr.bf16.mxu1 %v2543_v42  ;;  %v36_v18 = vld [vmem:[%s4475_s0 + $0xb0] sm:$0xff]  ;;  %v428_v19 = vld [vmem:[%s4474_s1 + $0x5a0] sm:$0xff]  ;;  %v429_v20 = vld [vmem:[%s4474_s1 + $0x5a8] sm:$0xff]  ;;  %v2549_v25 = vpack.c.bf16 %v411_v15, %v410_v13  ;;  %v2519_v26 = vpack.c.bf16 %v397_v17, %v396_v16 }
  0x46   :  { %778 = vmatmul.mubr.f32.gmra.mrb[16].mxu1 %v160_v40  ;;  %652 = vmatprep.mubr.f32.mxu0 %v177_v41  ;;  %v38_v21 = vld [vmem:[%s4475_s0 + $0xc0] sm:$0xff]  ;;  %v55_v22 = vld [vmem:[%s4475_s0 + $0x148] sm:$0xff]  ;;  %v57_v23 = vld [vmem:[%s4475_s0 + $0x158] sm:$0xff]  ;;  %v2551_v30 = vpack.c.bf16 %v429_v20, %v428_v19 }
  0x47   :  { %782 = vmatprep.mubr.f32.mxu1 %v179_v43  ;;  %v380_v27 = vld [vmem:[%s4474_s1 + $0x420] sm:$0xff]  ;;  %v381_v28 = vld [vmem:[%s4474_s1 + $0x428] sm:$0xff]  ;;  %v398_v32 = vld [vmem:[%s4474_s1 + $0x4b0] sm:$0xff] }
  0x48   :  { %v412_v29 = vld [vmem:[%s4474_s1 + $0x520] sm:$0xff]  ;;  %v413_v31 = vld [vmem:[%s4474_s1 + $0x528] sm:$0xff]  ;;  %v399_v33 = vld [vmem:[%s4474_s1 + $0x4b8] sm:$0xff]  ;;  %v2521_v40 = vpack.c.bf16 %v381_v28, %v380_v27 }
  0x49   :  { %653 = vmatmul.mubr.f32.gmra.mrb[18].mxu0 %v176_v44  ;;  %v54_v34 = vld [vmem:[%s4475_s0 + $0x140] sm:$0xff]  ;;  %v430_v35 = vld [vmem:[%s4474_s1 + $0x5b0] sm:$0xff]  ;;  %v431_v36 = vld [vmem:[%s4474_s1 + $0x5b8] sm:$0xff]  ;;  %v2553_v41 = vpack.c.bf16 %v413_v31, %v412_v29  ;;  %v2523_v42 = vpack.c.bf16 %v399_v33, %v398_v32 }
  0x4a   :  { %783 = vmatmul.mubr.f32.gmra.mrb[18].mxu1 %v178_v45  ;;  %657 = vmatprep.mubr.f32.mxu0 %v195_v46  ;;  %v56_v37 = vld [vmem:[%s4475_s0 + $0x150] sm:$0xff]  ;;  %v73_v38 = vld [vmem:[%s4475_s0 + $0x1d8] sm:$0xff]  ;;  %v75_v39 = vld [vmem:[%s4475_s0 + $0x1e8] sm:$0xff]  ;;  %v2555_v46 = vpack.c.bf16 %v431_v36, %v430_v35 }
  0x4b   :  { %787 = vmatprep.mubr.f32.mxu1 %v197_v47  ;;  %v382_v43 = vld [vmem:[%s4474_s1 + $0x430] sm:$0xff]  ;;  %v383_v44 = vld [vmem:[%s4474_s1 + $0x438] sm:$0xff]  ;;  %v384_v59 = vld [vmem:[%s4474_s1 + $0x440] sm:$0xff] }
  0x4c   :  { %v414_v45 = vld [vmem:[%s4474_s1 + $0x530] sm:$0xff]  ;;  %v415_v47 = vld [vmem:[%s4474_s1 + $0x538] sm:$0xff]  ;;  %v385_v60 = vld [vmem:[%s4474_s1 + $0x448] sm:$0xff] }
  0x4d   :  { %658 = vmatmul.mubr.f32.gmra.mrb[20].mxu0 %v194_v48  ;;  %v400_v48 = vld [vmem:[%s4474_s1 + $0x4c0] sm:$0xff]  ;;  %v417_v63 = vld [vmem:[%s4474_s1 + $0x548] sm:$0xff]  ;;  %v402_v0 = vld [vmem:[%s4474_s1 + $0x4d0] sm:$0xff] }
  0x4e   :  { %788 = vmatmul.mubr.f32.gmra.mrb[20].mxu1 %v196_v49  ;;  %662 = vmatprep.mubr.f32.mxu0 %v213_v50  ;;  %v401_v49 = vld [vmem:[%s4474_s1 + $0x4c8] sm:$0xff]  ;;  %v72_v50 = vld [vmem:[%s4475_s0 + $0x1d0] sm:$0xff]  ;;  %v403_v1 = vld [vmem:[%s4474_s1 + $0x4d8] sm:$0xff] }
  0x4f   :  { %792 = vmatprep.mubr.f32.mxu1 %v215_v51  ;;  %v432_v51 = vld [vmem:[%s4474_s1 + $0x5c0] sm:$0xff]  ;;  %v435_v4 = vld [vmem:[%s4474_s1 + $0x5d8] sm:$0xff]  ;;  %v92_v5 = vld [vmem:[%s4475_s0 + $0x270] sm:$0xff] }
  0x50   :  { %v386_v11 = vld [vmem:[%s4474_s1 + $0x450] sm:$0xff]  ;;  %v387_v12 = vld [vmem:[%s4474_s1 + $0x458] sm:$0xff]  ;;  %v404_v16 = vld [vmem:[%s4474_s1 + $0x4e0] sm:$0xff] }
  0x51   :  { %663 = vmatmul.mubr.f32.gmra.mrb[22].mxu0 %v212_v52  ;;  %v433_v52 = vld [vmem:[%s4474_s1 + $0x5c8] sm:$0xff]  ;;  %v418_v13 = vld [vmem:[%s4474_s1 + $0x550] sm:$0xff]  ;;  %v419_v15 = vld [vmem:[%s4474_s1 + $0x558] sm:$0xff] }
  0x52   :  { %793 = vmatmul.mubr.f32.gmra.mrb[22].mxu1 %v214_v53  ;;  %667 = vmatprep.mubr.f32.mxu0 %v231_v54  ;;  %v74_v53 = vld [vmem:[%s4475_s0 + $0x1e0] sm:$0xff]  ;;  %v91_v54 = vld [vmem:[%s4475_s0 + $0x268] sm:$0xff]  ;;  %v2559_v62 = vpack.c.bf16 %v433_v52, %v432_v51  ;;  %v406_v32 = vld [vmem:[%s4474_s1 + $0x4f0] sm:$0xff] }
  0x53   :  { %797 = vmatprep.mubr.f32.mxu1 %v233_v55  ;;  %v93_v55 = vld [vmem:[%s4475_s0 + $0x278] sm:$0xff]  ;;  %v405_v17 = vld [vmem:[%s4474_s1 + $0x4e8] sm:$0xff]  ;;  %v436_v19 = vld [vmem:[%s4474_s1 + $0x5e0] sm:$0xff] }
  0x54   :  { %v437_v20 = vld [vmem:[%s4474_s1 + $0x5e8] sm:$0xff]  ;;  %v388_v27 = vld [vmem:[%s4474_s1 + $0x460] sm:$0xff]  ;;  %v407_v33 = vld [vmem:[%s4474_s1 + $0x4f8] sm:$0xff] }
  0x55   :  { %668 = vmatmul.mubr.f32.gmra.mrb[24].mxu0 %v230_v56  ;;  %v2525_v56 = vpack.c.bf16 %v383_v44, %v382_v43  ;;  %v389_v28 = vld [vmem:[%s4474_s1 + $0x468] sm:$0xff]  ;;  %v420_v29 = vld [vmem:[%s4474_s1 + $0x560] sm:$0xff]  ;;  %v438_v35 = vld [vmem:[%s4474_s1 + $0x5f0] sm:$0xff] }
  0x56   :  { %798 = vmatmul.mubr.f32.gmra.mrb[24].mxu1 %v232_v57  ;;  %867 = vmatprep.mubr.f32.mxu0 %v19_v58  ;;  %v2557_v57 = vpack.c.bf16 %v415_v47, %v414_v45  ;;  %v2527_v58 = vpack.c.bf16 %v401_v49, %v400_v48  ;;  %v421_v31 = vld [vmem:[%s4474_s1 + $0x568] sm:$0xff]  ;;  %v439_v36 = vld [vmem:[%s4474_s1 + $0x5f8] sm:$0xff]  ;;  %v390_v43 = vld [vmem:[%s4474_s1 + $0x470] sm:$0xff] }
  0x57   :  { %997 = vmatprep.mubr.f32.mxu1 %v21_v61  ;;  %v416_v61 = vld [vmem:[%s4474_s1 + $0x540] sm:$0xff]  ;;  %v391_v44 = vld [vmem:[%s4474_s1 + $0x478] sm:$0xff]  ;;  %v422_v45 = vld [vmem:[%s4474_s1 + $0x570] sm:$0xff] }
  0x58   :  { %v423_v47 = vld [vmem:[%s4474_s1 + $0x578] sm:$0xff]  ;;  %v456_v48 = vld [vmem:[%s4474_s1 + $0x680] sm:$0xff]  ;;  %v457_v49 = vld [vmem:[%s4474_s1 + $0x688] sm:$0xff] }
  0x59   :  { %868 = vmatmul.mubr.f32.vlgmr.msra.gmra.mrb[26].mxu0 %v18_v2  ;;  %v90_v2 = vld [vmem:[%s4475_s0 + $0x260] sm:$0xff]  ;;  %v489_v52 = vld [vmem:[%s4474_s1 + $0x788] sm:$0xff] }
  0x5a   :  { %998 = vmatmul.mubr.f32.vlgmr.msra.gmra.mrb[26].mxu1 %v20_v6  ;;  %2514 = vmatpush3.bf16.msra.mxu0 %v2513_v3  ;;  %v434_v3 = vld [vmem:[%s4474_s1 + $0x5d0] sm:$0xff]  ;;  %v109_v6 = vld [vmem:[%s4475_s0 + $0x2f8] sm:$0xff]  ;;  %v488_v51 = vld [vmem:[%s4474_s1 + $0x780] sm:$0xff] }
  0x5b   :  { %872 = vmatprep.mubr.f32.mxu0 %v37_v7  ;;  %1002 = vmatprep.mubr.f32.mxu1 %v39_v8  ;;  %v111_v7 = vld [vmem:[%s4475_s0 + $0x308] sm:$0xff]  ;;  %v2529_v8 = vpack.c.bf16 %v385_v60, %v384_v59  ;;  %v2607_v59 = vpack.c.bf16 %v489_v52, %v488_v51  ;;  %v162_v60 = vld [vmem:[%s4475_s0 + $0x4a0] sm:$0xff]  ;;  %v462_v52 = vld [vmem:[%s4474_s1 + $0x6b0] sm:$0xff] }
  0x5c   :  { %2546 = vmatpush3.bf16.msra.mxu1 %v2545_v9  ;;  %2516 = vmatprep.subr.bf16.mxu0 %v2515_v10  ;;  %v2561_v9 = vpack.c.bf16 %v417_v63, %v416_v61  ;;  %v2531_v10 = vpack.c.bf16 %v403_v1, %v402_v0  ;;  %v164_v61 = vld [vmem:[%s4475_s0 + $0x4b0] sm:$0xff]  ;;  %v183_v63 = vld [vmem:[%s4475_s0 + $0x548] sm:$0xff]  ;;  %v182_v1 = vld [vmem:[%s4475_s0 + $0x540] sm:$0xff] }
  0x5d   :  { %873 = vmatmul.mubr.f32.gmra.mrb[28].mxu0 %v36_v18  ;;  %2548 = vmatprep.subr.bf16.mxu1 %v2547_v14  ;;  %v2563_v14 = vpack.c.bf16 %v435_v4, %v434_v3  ;;  %v108_v18 = vld [vmem:[%s4475_s0 + $0x2f0] sm:$0xff]  ;;  %v201_v3 = vld [vmem:[%s4475_s0 + $0x5d8] sm:$0xff]  ;;  %v198_v4 = vld [vmem:[%s4475_s0 + $0x5c0] sm:$0xff] }
  0x5e   :  { %1003 = vmatmul.mubr.f32.gmra.mrb[28].mxu1 %v38_v21  ;;  %877 = vmatprep.mubr.f32.mxu0 %v55_v22  ;;  %v110_v21 = vld [vmem:[%s4475_s0 + $0x300] sm:$0xff]  ;;  %v127_v22 = vld [vmem:[%s4475_s0 + $0x388] sm:$0xff]  ;;  %v180_v0 = vld [vmem:[%s4475_s0 + $0x530] sm:$0xff] }
  0x5f   :  { %1007 = vmatprep.mubr.f32.mxu1 %v57_v23  ;;  %2518 = vmatpush3.bf16.msra.mxu0 %v2517_v24  ;;  %v129_v23 = vld [vmem:[%s4475_s0 + $0x398] sm:$0xff]  ;;  %v2533_v24 = vpack.c.bf16 %v387_v12, %v386_v11  ;;  %v234_v12 = vld [vmem:[%s4475_s0 + $0x6e0] sm:$0xff]  ;;  %v477_v51 = vld [vmem:[%s4474_s1 + $0x728] sm:$0xff] }
  0x60   :  { %2550 = vmatpush3.bf16.msra.mxu1 %v2549_v25  ;;  %2520 = vmatprep.subr.bf16.mxu0 %v2519_v26  ;;  %v2565_v25 = vpack.c.bf16 %v419_v15, %v418_v13  ;;  %v2535_v26 = vpack.c.bf16 %v405_v17, %v404_v16  ;;  %v237_v11 = vld [vmem:[%s4475_s0 + $0x6f8] sm:$0xff]  ;;  %v236_v13 = vld [vmem:[%s4475_s0 + $0x6f0] sm:$0xff]  ;;  %v440_v15 = vld [vmem:[%s4474_s1 + $0x600] sm:$0xff] }
  0x61   :  { %878 = vmatmul.mubr.f32.gmra.mrb[30].mxu0 %v54_v34  ;;  %2552 = vmatprep.subr.bf16.mxu1 %v2551_v30  ;;  %v2567_v30 = vpack.c.bf16 %v437_v20, %v436_v19  ;;  %v126_v34 = vld [vmem:[%s4475_s0 + $0x380] sm:$0xff]  ;;  %v441_v16 = vld [vmem:[%s4474_s1 + $0x608] sm:$0xff]  ;;  %v25_v17 = vld [vmem:[%s4475_s0 + $0x58] sm:$0xff] }
  0x62   :  { %1008 = vmatmul.mubr.f32.gmra.mrb[30].mxu1 %v56_v37  ;;  %882 = vmatprep.mubr.f32.mxu0 %v73_v38  ;;  %v128_v37 = vld [vmem:[%s4475_s0 + $0x390] sm:$0xff]  ;;  %v145_v38 = vld [vmem:[%s4475_s0 + $0x418] sm:$0xff]  ;;  %v473_v19 = vld [vmem:[%s4474_s1 + $0x708] sm:$0xff] }
  0x63   :  { %1012 = vmatprep.mubr.f32.mxu1 %v75_v39  ;;  %2522 = vmatpush3.bf16.msra.mxu0 %v2521_v40  ;;  %v147_v39 = vld [vmem:[%s4475_s0 + $0x428] sm:$0xff]  ;;  %v2537_v40 = vpack.c.bf16 %v389_v28, %v388_v27  ;;  %v458_v20 = vld [vmem:[%s4474_s1 + $0x690] sm:$0xff]  ;;  %v41_v27 = vld [vmem:[%s4475_s0 + $0xd8] sm:$0xff] }
  0x64   :  { %2554 = vmatpush3.bf16.msra.mxu1 %v2553_v41  ;;  %2524 = vmatprep.subr.bf16.mxu0 %v2523_v42  ;;  %v2569_v41 = vpack.c.bf16 %v421_v31, %v420_v29  ;;  %v2539_v42 = vpack.c.bf16 %v407_v33, %v406_v32  ;;  %v43_v28 = vld [vmem:[%s4475_s0 + $0xe8] sm:$0xff]  ;;  %v442_v31 = vld [vmem:[%s4474_s1 + $0x610] sm:$0xff]  ;;  %v443_v32 = vld [vmem:[%s4474_s1 + $0x618] sm:$0xff] }
  0x65   :  { %883 = vmatmul.mubr.f32.gmra.mrb[32].mxu0 %v72_v50  ;;  %2556 = vmatprep.subr.bf16.mxu1 %v2555_v46  ;;  %v2571_v46 = vpack.c.bf16 %v439_v36, %v438_v35  ;;  %v144_v50 = vld [vmem:[%s4475_s0 + $0x410] sm:$0xff]  ;;  %v475_v35 = vld [vmem:[%s4474_s1 + $0x718] sm:$0xff]  ;;  %v460_v36 = vld [vmem:[%s4474_s1 + $0x6a0] sm:$0xff] }
  0x66   :  { %1013 = vmatmul.mubr.f32.gmra.mrb[32].mxu1 %v74_v53  ;;  %887 = vmatprep.mubr.f32.mxu0 %v91_v54  ;;  %v146_v53 = vld [vmem:[%s4475_s0 + $0x420] sm:$0xff]  ;;  %v163_v54 = vld [vmem:[%s4475_s0 + $0x4a8] sm:$0xff]  ;;  %v474_v33 = vld [vmem:[%s4474_s1 + $0x710] sm:$0xff] }
  0x67   :  { %1017 = vmatprep.mubr.f32.mxu1 %v93_v55  ;;  %2526 = vmatpush3.bf16.msra.mxu0 %v2525_v56  ;;  %v2541_v55 = vpack.c.bf16 %v391_v44, %v390_v43  ;;  %v165_v56 = vld [vmem:[%s4475_s0 + $0x4b8] sm:$0xff]  ;;  %v2581_v44 = vpack.c.bf16 %v443_v32, %v442_v31  ;;  %v450_v31 = vld [vmem:[%s4474_s1 + $0x650] sm:$0xff] }
  0x68   :  { %2558 = vmatpush3.bf16.msra.mxu1 %v2557_v57  ;;  %2528 = vmatprep.subr.bf16.mxu0 %v2527_v58  ;;  %v2573_v57 = vpack.c.bf16 %v423_v47, %v422_v45  ;;  %v2575_v58 = vpack.c.bf16 %v457_v49, %v456_v48  ;;  %v61_v43 = vld [vmem:[%s4475_s0 + $0x178] sm:$0xff]  ;;  %v2613_v45 = vpack.c.bf16 %v475_v35, %v474_v33  ;;  %v444_v47 = vld [vmem:[%s4474_s1 + $0x620] sm:$0xff]  ;;  %v445_v48 = vld [vmem:[%s4474_s1 + $0x628] sm:$0xff] }
  0x69   :  { %888 = vmatmul.mubr.f32.gmra.mrb[34].mxu0 %v90_v2  ;;  %2560 = vmatprep.subr.bf16.mxu1 %v2559_v62  ;;  %v181_v62 = vld [vmem:[%s4475_s0 + $0x538] sm:$0xff]  ;;  %v199_v2 = vld [vmem:[%s4475_s0 + $0x5c8] sm:$0xff]  ;;  %v476_v49 = vld [vmem:[%s4474_s1 + $0x720] sm:$0xff] }
  0x6a   :  { %1018 = vmatmul.mubr.f32.gmra.mrb[34].mxu1 %v92_v5  ;;  %892 = vmatprep.mubr.f32.mxu0 %v109_v6  ;;  %v200_v5 = vld [vmem:[%s4475_s0 + $0x5d0] sm:$0xff]  ;;  %v217_v6 = vld [vmem:[%s4475_s0 + $0x658] sm:$0xff] }
  0x6b   :  { %1022 = vmatprep.mubr.f32.mxu1 %v111_v7  ;;  %2530 = vmatpush3.bf16.msra.mxu0 %v2529_v8  ;;  %v219_v7 = vld [vmem:[%s4475_s0 + $0x668] sm:$0xff]  ;;  %v216_v8 = vld [vmem:[%s4475_s0 + $0x650] sm:$0xff]  ;;  %v451_v32 = vld [vmem:[%s4474_s1 + $0x658] sm:$0xff] }
  0x6c   :  { %2562 = vmatpush3.bf16.msra.mxu1 %v2561_v9  ;;  %2532 = vmatprep.subr.bf16.mxu0 %v2531_v10  ;;  %v218_v9 = vld [vmem:[%s4475_s0 + $0x660] sm:$0xff]  ;;  %v235_v10 = vld [vmem:[%s4475_s0 + $0x6e8] sm:$0xff]  ;;  %v482_v33 = vld [vmem:[%s4474_s1 + $0x750] sm:$0xff] }
  0x6d   :  { %893 = vmatmul.mubr.f32.gmra.mrb[36].mxu0 %v108_v18  ;;  %2564 = vmatprep.subr.bf16.mxu1 %v2563_v14  ;;  %v23_v14 = vld [vmem:[%s4475_s0 + $0x48] sm:$0xff]  ;;  %v472_v18 = vld [vmem:[%s4474_s1 + $0x700] sm:$0xff]  ;;  %v483_v35 = vld [vmem:[%s4474_s1 + $0x758] sm:$0xff] }
  0x6e   :  { %1023 = vmatmul.mubr.f32.gmra.mrb[36].mxu1 %v110_v21  ;;  %897 = vmatprep.mubr.f32.mxu0 %v127_v22  ;;  %v459_v21 = vld [vmem:[%s4474_s1 + $0x698] sm:$0xff]  ;;  %v22_v22 = vld [vmem:[%s4475_s0 + $0x40] sm:$0xff]  ;;  %v2609_v29 = vpack.c.bf16 %v473_v19, %v472_v18  ;;  %v481_v19 = vld [vmem:[%s4474_s1 + $0x748] sm:$0xff] }
  0x6f   :  { %1027 = vmatprep.mubr.f32.mxu1 %v129_v23  ;;  %2534 = vmatpush3.bf16.msra.mxu0 %v2533_v24  ;;  %v2577_v23 = vpack.c.bf16 %v441_v16, %v440_v15  ;;  %v490_v24 = vld [vmem:[%s4474_s1 + $0x790] sm:$0xff]  ;;  %v448_v15 = vld [vmem:[%s4474_s1 + $0x640] sm:$0xff]  ;;  %v449_v16 = vld [vmem:[%s4474_s1 + $0x648] sm:$0xff] }
  0x70   :  { %2566 = vmatpush3.bf16.msra.mxu1 %v2565_v25  ;;  %2536 = vmatprep.subr.bf16.mxu0 %v2535_v26  ;;  %v491_v25 = vld [vmem:[%s4474_s1 + $0x798] sm:$0xff]  ;;  %v24_v26 = vld [vmem:[%s4475_s0 + $0x50] sm:$0xff] }
  0x71   :  { %898 = vmatmul.mubr.f32.gmra.mrb[38].mxu0 %v126_v34  ;;  %2568 = vmatprep.subr.bf16.mxu1 %v2567_v30  ;;  %v2579_v30 = vpack.c.bf16 %v459_v21, %v458_v20  ;;  %v2611_v34 = vpack.c.bf16 %v491_v25, %v490_v24  ;;  %v466_v20 = vld [vmem:[%s4474_s1 + $0x6d0] sm:$0xff]  ;;  %v467_v21 = vld [vmem:[%s4474_s1 + $0x6d8] sm:$0xff] }
  0x72   :  { %1028 = vmatmul.mubr.f32.gmra.mrb[38].mxu1 %v128_v37  ;;  %902 = vmatprep.mubr.f32.mxu0 %v145_v38  ;;  %v461_v37 = vld [vmem:[%s4474_s1 + $0x6a8] sm:$0xff]  ;;  %v40_v38 = vld [vmem:[%s4475_s0 + $0xd0] sm:$0xff]  ;;  %v499_v24 = vld [vmem:[%s4474_s1 + $0x7d8] sm:$0xff] }
  0x73   :  { %1032 = vmatprep.mubr.f32.mxu1 %v147_v39  ;;  %2538 = vmatpush3.bf16.msra.mxu0 %v2537_v40  ;;  %v492_v39 = vld [vmem:[%s4474_s1 + $0x7a0] sm:$0xff]  ;;  %v493_v40 = vld [vmem:[%s4474_s1 + $0x7a8] sm:$0xff]  ;;  %v96_v25 = vld [vmem:[%s4475_s0 + $0x290] sm:$0xff] }
  0x74   :  { %2570 = vmatpush3.bf16.msra.mxu1 %v2569_v41  ;;  %2540 = vmatprep.subr.bf16.mxu0 %v2539_v42  ;;  %v42_v41 = vld [vmem:[%s4475_s0 + $0xe0] sm:$0xff]  ;;  %v59_v42 = vld [vmem:[%s4475_s0 + $0x168] sm:$0xff] }
  0x75   :  { %903 = vmatmul.mubr.f32.gmra.mrb[40].mxu0 %v144_v50  ;;  %2572 = vmatprep.subr.bf16.mxu1 %v2571_v46  ;;  %v2583_v46 = vpack.c.bf16 %v461_v37, %v460_v36  ;;  %v2615_v50 = vpack.c.bf16 %v493_v40, %v492_v39  ;;  %v468_v36 = vld [vmem:[%s4474_s1 + $0x6e0] sm:$0xff]  ;;  %v469_v37 = vld [vmem:[%s4474_s1 + $0x6e8] sm:$0xff] }
  0x76   :  { %1033 = vmatmul.mubr.f32.gmra.mrb[40].mxu1 %v146_v53  ;;  %907 = vmatprep.mubr.f32.mxu0 %v163_v54  ;;  %v463_v53 = vld [vmem:[%s4474_s1 + $0x6b8] sm:$0xff]  ;;  %v58_v54 = vld [vmem:[%s4475_s0 + $0x160] sm:$0xff]  ;;  %v501_v40 = vld [vmem:[%s4474_s1 + $0x7e8] sm:$0xff] }
  0x77   :  { %1037 = vmatprep.mubr.f32.mxu1 %v165_v56  ;;  %2542 = vmatpush3.bf16.msra.mxu0 %v2541_v55  ;;  %v494_v55 = vld [vmem:[%s4474_s1 + $0x7b0] sm:$0xff]  ;;  %v495_v56 = vld [vmem:[%s4474_s1 + $0x7b8] sm:$0xff]  ;;  %v500_v39 = vld [vmem:[%s4474_s1 + $0x7e0] sm:$0xff] }
  0x78   :  { %2574 = vmatpush3.bf16.msra.mxu1 %v2573_v57  ;;  %2576 = vmatprep.subr.bf16.mxu0 %v2575_v58  ;;  %v60_v57 = vld [vmem:[%s4475_s0 + $0x170] sm:$0xff]  ;;  %v77_v58 = vld [vmem:[%s4475_s0 + $0x1f8] sm:$0xff] }
  0x79   :  { %908 = vmatmul.mubr.f32.gmra.mrb[42].mxu0 %v162_v60  ;;  %2608 = vmatprep.subr.bf16.mxu1 %v2607_v59  ;;  %v79_v59 = vld [vmem:[%s4475_s0 + $0x208] sm:$0xff]  ;;  %v2585_v60 = vpack.c.bf16 %v445_v48, %v444_v47  ;;  %v452_v47 = vld [vmem:[%s4474_s1 + $0x660] sm:$0xff] }
  0x7a   :  { %1038 = vmatmul.mubr.f32.gmra.mrb[42].mxu1 %v164_v61  ;;  %912 = vmatprep.mubr.f32.mxu0 %v181_v62  ;;  %v2617_v61 = vpack.c.bf16 %v477_v51, %v476_v49  ;;  %v2587_v62 = vpack.c.bf16 %v463_v53, %v462_v52  ;;  %v453_v48 = vld [vmem:[%s4474_s1 + $0x668] sm:$0xff]  ;;  %v484_v49 = vld [vmem:[%s4474_s1 + $0x760] sm:$0xff]  ;;  %v470_v52 = vld [vmem:[%s4474_s1 + $0x6f0] sm:$0xff] }
  0x7b   :  { %1042 = vmatprep.mubr.f32.mxu1 %v183_v63  ;;  %v446_v63 = vld [vmem:[%s4474_s1 + $0x630] sm:$0xff]  ;;  %v485_v51 = vld [vmem:[%s4474_s1 + $0x768] sm:$0xff]  ;;  %v471_v53 = vld [vmem:[%s4474_s1 + $0x6f8] sm:$0xff] }
  0x7d   :  { %913 = vmatmul.mubr.f32.gmra.mrb[44].mxu0 %v180_v0  ;;  %v447_v0 = vld [vmem:[%s4474_s1 + $0x638] sm:$0xff] }
  0x7e   :  { %1043 = vmatmul.mubr.f32.gmra.mrb[44].mxu1 %v182_v1  ;;  %917 = vmatprep.mubr.f32.mxu0 %v199_v2  ;;  %v478_v1 = vld [vmem:[%s4474_s1 + $0x730] sm:$0xff]  ;;  %v2619_v2 = vpack.c.bf16 %v495_v56, %v494_v55  ;;  %v503_v56 = vld [vmem:[%s4474_s1 + $0x7f8] sm:$0xff] }
  0x7f   :  { %1047 = vmatprep.mubr.f32.mxu1 %v201_v3  ;;  %v479_v3 = vld [vmem:[%s4474_s1 + $0x738] sm:$0xff]  ;;  %v502_v55 = vld [vmem:[%s4474_s1 + $0x7f0] sm:$0xff] }
  0x81   :  { %918 = vmatmul.mubr.f32.gmra.mrb[46].mxu0 %v198_v4  ;;  %v464_v4 = vld [vmem:[%s4474_s1 + $0x6c0] sm:$0xff] }
  0x82   :  { %1048 = vmatmul.mubr.f32.gmra.mrb[46].mxu1 %v200_v5  ;;  %922 = vmatprep.mubr.f32.mxu0 %v217_v6  ;;  %v465_v5 = vld [vmem:[%s4474_s1 + $0x6c8] sm:$0xff]  ;;  %v76_v6 = vld [vmem:[%s4475_s0 + $0x1f0] sm:$0xff] }
  0x83   :  { %1052 = vmatprep.mubr.f32.mxu1 %v219_v7  ;;  %v496_v7 = vld [vmem:[%s4474_s1 + $0x7c0] sm:$0xff] }
  0x85   :  { %923 = vmatmul.mubr.f32.gmra.mrb[48].mxu0 %v216_v8  ;;  %v497_v8 = vld [vmem:[%s4474_s1 + $0x7c8] sm:$0xff] }
  0x86   :  { %1053 = vmatmul.mubr.f32.gmra.mrb[48].mxu1 %v218_v9  ;;  %927 = vmatprep.mubr.f32.mxu0 %v235_v10  ;;  %v78_v9 = vld [vmem:[%s4475_s0 + $0x200] sm:$0xff]  ;;  %v95_v10 = vld [vmem:[%s4475_s0 + $0x288] sm:$0xff]  ;;  %v2623_v18 = vpack.c.bf16 %v497_v8, %v496_v7 }
  0x87   :  { %1057 = vmatprep.mubr.f32.mxu1 %v237_v11  ;;  %v97_v11 = vld [vmem:[%s4475_s0 + $0x298] sm:$0xff]  ;;  %v150_v7 = vld [vmem:[%s4475_s0 + $0x440] sm:$0xff]  ;;  %v167_v8 = vld [vmem:[%s4475_s0 + $0x4c8] sm:$0xff] }
  0x89   :  { %928 = vmatmul.mubr.f32.gmra.mrb[50].mxu0 %v234_v12  ;;  %v2589_v12 = vpack.c.bf16 %v447_v0, %v446_v63  ;;  %v454_v63 = vld [vmem:[%s4474_s1 + $0x670] sm:$0xff]  ;;  %v455_v0 = vld [vmem:[%s4474_s1 + $0x678] sm:$0xff] }
  0x8a   :  { %1058 = vmatmul.mubr.f32.gmra.mrb[50].mxu1 %v236_v13  ;;  %1127 = vmatprep.mubr.f32.mxu0 %v23_v14  ;;  %v2621_v13 = vpack.c.bf16 %v479_v3, %v478_v1  ;;  %v2591_v14 = vpack.c.bf16 %v465_v5, %v464_v4  ;;  %v486_v1 = vld [vmem:[%s4474_s1 + $0x770] sm:$0xff]  ;;  %v487_v3 = vld [vmem:[%s4474_s1 + $0x778] sm:$0xff]  ;;  %v520_v4 = vld [vmem:[%s4474_s1 + $0x880] sm:$0xff] }
  0x8b   :  { %1257 = vmatprep.mubr.f32.mxu1 %v25_v17  ;;  %v480_v17 = vld [vmem:[%s4474_s1 + $0x740] sm:$0xff]  ;;  %v521_v5 = vld [vmem:[%s4474_s1 + $0x888] sm:$0xff] }
  0x8d   :  { %1128 = vmatmul.mubr.f32.vlgmr.msra.gmra.mrb[52].mxu0 %v22_v22  ;;  %v94_v22 = vld [vmem:[%s4475_s0 + $0x280] sm:$0xff] }
  0x8e   :  { %1258 = vmatmul.mubr.f32.vlgmr.msra.gmra.mrb[52].mxu1 %v24_v26  ;;  %2578 = vmatpush3.bf16.msra.mxu0 %v2577_v23  ;;  %v498_v23 = vld [vmem:[%s4474_s1 + $0x7d0] sm:$0xff]  ;;  %v113_v26 = vld [vmem:[%s4475_s0 + $0x318] sm:$0xff] }
  0x8f   :  { %1132 = vmatprep.mubr.f32.mxu0 %v41_v27  ;;  %1262 = vmatprep.mubr.f32.mxu1 %v43_v28  ;;  %v115_v27 = vld [vmem:[%s4475_s0 + $0x328] sm:$0xff]  ;;  %v2593_v28 = vpack.c.bf16 %v449_v16, %v448_v15  ;;  %v185_v15 = vld [vmem:[%s4475_s0 + $0x558] sm:$0xff] }
  0x90   :  { %2610 = vmatpush3.bf16.msra.mxu1 %v2609_v29  ;;  %2580 = vmatprep.subr.bf16.mxu0 %v2579_v30  ;;  %v2625_v29 = vpack.c.bf16 %v481_v19, %v480_v17  ;;  %v2595_v30 = vpack.c.bf16 %v467_v21, %v466_v20  ;;  %v187_v16 = vld [vmem:[%s4475_s0 + $0x568] sm:$0xff]  ;;  %v184_v17 = vld [vmem:[%s4475_s0 + $0x550] sm:$0xff]  ;;  %v205_v20 = vld [vmem:[%s4475_s0 + $0x5f8] sm:$0xff] }
  0x91   :  { %1133 = vmatmul.mubr.f32.gmra.mrb[54].mxu0 %v40_v38  ;;  %2612 = vmatprep.subr.bf16.mxu1 %v2611_v34  ;;  %v2627_v34 = vpack.c.bf16 %v499_v24, %v498_v23  ;;  %v112_v38 = vld [vmem:[%s4475_s0 + $0x310] sm:$0xff]  ;;  %v203_v19 = vld [vmem:[%s4475_s0 + $0x5e8] sm:$0xff]  ;;  %v202_v21 = vld [vmem:[%s4475_s0 + $0x5e0] sm:$0xff] }
  0x92   :  { %1263 = vmatmul.mubr.f32.gmra.mrb[54].mxu1 %v42_v41  ;;  %1137 = vmatprep.mubr.f32.mxu0 %v59_v42  ;;  %v114_v41 = vld [vmem:[%s4475_s0 + $0x320] sm:$0xff]  ;;  %v131_v42 = vld [vmem:[%s4475_s0 + $0x3a8] sm:$0xff]  ;;  %v221_v23 = vld [vmem:[%s4475_s0 + $0x678] sm:$0xff] }
  0x93   :  { %1267 = vmatprep.mubr.f32.mxu1 %v61_v43  ;;  %2582 = vmatpush3.bf16.msra.mxu0 %v2581_v44  ;;  %v133_v43 = vld [vmem:[%s4475_s0 + $0x3b8] sm:$0xff]  ;;  %v2597_v44 = vpack.c.bf16 %v451_v32, %v450_v31  ;;  %v223_v24 = vld [vmem:[%s4475_s0 + $0x688] sm:$0xff]  ;;  %v504_v32 = vld [vmem:[%s4474_s1 + $0x800] sm:$0xff] }
  0x94   :  { %2614 = vmatpush3.bf16.msra.mxu1 %v2613_v45  ;;  %2584 = vmatprep.subr.bf16.mxu0 %v2583_v46  ;;  %v2629_v45 = vpack.c.bf16 %v483_v35, %v482_v33  ;;  %v2599_v46 = vpack.c.bf16 %v469_v37, %v468_v36  ;;  %v27_v31 = vld [vmem:[%s4475_s0 + $0x68] sm:$0xff]  ;;  %v522_v35 = vld [vmem:[%s4474_s1 + $0x890] sm:$0xff]  ;;  %v523_v36 = vld [vmem:[%s4474_s1 + $0x898] sm:$0xff] }
  0x95   :  { %1138 = vmatmul.mubr.f32.gmra.mrb[56].mxu0 %v58_v54  ;;  %2616 = vmatprep.subr.bf16.mxu1 %v2615_v50  ;;  %v2631_v50 = vpack.c.bf16 %v501_v40, %v500_v39  ;;  %v130_v54 = vld [vmem:[%s4475_s0 + $0x3a0] sm:$0xff]  ;;  %v505_v33 = vld [vmem:[%s4474_s1 + $0x808] sm:$0xff]  ;;  %v28_v39 = vld [vmem:[%s4475_s0 + $0x70] sm:$0xff] }
  0x96   :  { %1268 = vmatmul.mubr.f32.gmra.mrb[56].mxu1 %v60_v57  ;;  %1142 = vmatprep.mubr.f32.mxu0 %v77_v58  ;;  %v132_v57 = vld [vmem:[%s4475_s0 + $0x3b0] sm:$0xff]  ;;  %v149_v58 = vld [vmem:[%s4475_s0 + $0x438] sm:$0xff]  ;;  %v26_v37 = vld [vmem:[%s4475_s0 + $0x60] sm:$0xff] }
  0x97   :  { %1272 = vmatprep.mubr.f32.mxu1 %v79_v59  ;;  %2586 = vmatpush3.bf16.msra.mxu0 %v2585_v60  ;;  %v151_v59 = vld [vmem:[%s4475_s0 + $0x448] sm:$0xff]  ;;  %v2601_v60 = vpack.c.bf16 %v453_v48, %v452_v47  ;;  %v45_v40 = vld [vmem:[%s4475_s0 + $0xf8] sm:$0xff]  ;;  %v44_v47 = vld [vmem:[%s4475_s0 + $0xf0] sm:$0xff] }
  0x98   :  { %2618 = vmatpush3.bf16.msra.mxu1 %v2617_v61  ;;  %2588 = vmatprep.subr.bf16.mxu0 %v2587_v62  ;;  %v2633_v61 = vpack.c.bf16 %v485_v51, %v484_v49  ;;  %v2603_v62 = vpack.c.bf16 %v471_v53, %v470_v52  ;;  %v46_v48 = vld [vmem:[%s4475_s0 + $0x100] sm:$0xff]  ;;  %v63_v49 = vld [vmem:[%s4475_s0 + $0x188] sm:$0xff]  ;;  %v65_v51 = vld [vmem:[%s4475_s0 + $0x198] sm:$0xff] }
  0x99   :  { %1143 = vmatmul.mubr.f32.gmra.mrb[58].mxu0 %v76_v6  ;;  %2620 = vmatprep.subr.bf16.mxu1 %v2619_v2  ;;  %v2635_v2 = vpack.c.bf16 %v503_v56, %v502_v55  ;;  %v148_v6 = vld [vmem:[%s4475_s0 + $0x430] sm:$0xff]  ;;  %v508_v53 = vld [vmem:[%s4474_s1 + $0x820] sm:$0xff]  ;;  %v527_v56 = vld [vmem:[%s4474_s1 + $0x8b8] sm:$0xff] }
  0x9a   :  { %1273 = vmatmul.mubr.f32.gmra.mrb[58].mxu1 %v78_v9  ;;  %1147 = vmatprep.mubr.f32.mxu0 %v95_v10  ;;  %v2605_v9 = vpack.c.bf16 %v455_v0, %v454_v63  ;;  %v169_v10 = vld [vmem:[%s4475_s0 + $0x4d8] sm:$0xff]  ;;  %v526_v55 = vld [vmem:[%s4474_s1 + $0x8b0] sm:$0xff] }
  0x9b   :  { %1277 = vmatprep.mubr.f32.mxu1 %v97_v11  ;;  %2590 = vmatpush3.bf16.msra.mxu0 %v2589_v12  ;;  %v2637_v11 = vpack.c.bf16 %v487_v3, %v486_v1  ;;  %v2639_v12 = vpack.c.bf16 %v521_v5, %v520_v4  ;;  %v510_v63 = vld [vmem:[%s4474_s1 + $0x830] sm:$0xff]  ;;  %v511_v0 = vld [vmem:[%s4474_s1 + $0x838] sm:$0xff]  ;;  %v528_v1 = vld [vmem:[%s4474_s1 + $0x8c0] sm:$0xff] }
  0x9c   :  { %2622 = vmatpush3.bf16.msra.mxu1 %v2621_v13  ;;  %2592 = vmatprep.subr.bf16.mxu0 %v2591_v14  ;;  %v166_v13 = vld [vmem:[%s4475_s0 + $0x4c0] sm:$0xff]  ;;  %v168_v14 = vld [vmem:[%s4475_s0 + $0x4d0] sm:$0xff]  ;;  %v99_v5 = vld [vmem:[%s4475_s0 + $0x2a8] sm:$0xff] }
  0x9d   :  { %1148 = vmatmul.mubr.f32.gmra.mrb[60].mxu0 %v94_v22  ;;  %2624 = vmatprep.subr.bf16.mxu1 %v2623_v18  ;;  %v186_v18 = vld [vmem:[%s4475_s0 + $0x560] sm:$0xff]  ;;  %v204_v22 = vld [vmem:[%s4475_s0 + $0x5f0] sm:$0xff] }
  0x9e   :  { %1278 = vmatmul.mubr.f32.gmra.mrb[60].mxu1 %v96_v25  ;;  %1152 = vmatprep.mubr.f32.mxu0 %v113_v26  ;;  %v220_v25 = vld [vmem:[%s4475_s0 + $0x670] sm:$0xff]  ;;  %v222_v26 = vld [vmem:[%s4475_s0 + $0x680] sm:$0xff] }
  0x9f   :  { %1282 = vmatprep.mubr.f32.mxu1 %v115_v27  ;;  %2594 = vmatpush3.bf16.msra.mxu0 %v2593_v28  ;;  %v239_v27 = vld [vmem:[%s4475_s0 + $0x708] sm:$0xff]  ;;  %v241_v28 = vld [vmem:[%s4475_s0 + $0x718] sm:$0xff]  ;;  %v80_v3 = vld [vmem:[%s4475_s0 + $0x210] sm:$0xff] }
  0xa0   :  { %2626 = vmatpush3.bf16.msra.mxu1 %v2625_v29  ;;  %2596 = vmatprep.subr.bf16.mxu0 %v2595_v30  ;;  %v238_v29 = vld [vmem:[%s4475_s0 + $0x700] sm:$0xff]  ;;  %v240_v30 = vld [vmem:[%s4475_s0 + $0x710] sm:$0xff] }
  0xa1   :  { %1153 = vmatmul.mubr.f32.gmra.mrb[62].mxu0 %v112_v38  ;;  %2628 = vmatprep.subr.bf16.mxu1 %v2627_v34  ;;  %v29_v34 = vld [vmem:[%s4475_s0 + $0x78] sm:$0xff]  ;;  %v2641_v38 = vpack.c.bf16 %v505_v33, %v504_v32  ;;  %v82_v4 = vld [vmem:[%s4475_s0 + $0x220] sm:$0xff] }
  0xa2   :  { %1283 = vmatmul.mubr.f32.gmra.mrb[62].mxu1 %v114_v41  ;;  %1157 = vmatprep.mubr.f32.mxu0 %v131_v42  ;;  %v47_v41 = vld [vmem:[%s4475_s0 + $0x108] sm:$0xff]  ;;  %v2643_v42 = vpack.c.bf16 %v523_v36, %v522_v35  ;;  %v535_v32 = vld [vmem:[%s4474_s1 + $0x8f8] sm:$0xff]  ;;  %v134_v33 = vld [vmem:[%s4475_s0 + $0x3c0] sm:$0xff] }
  0xa3   :  { %1287 = vmatprep.mubr.f32.mxu1 %v133_v43  ;;  %2598 = vmatpush3.bf16.msra.mxu0 %v2597_v44  ;;  %v506_v43 = vld [vmem:[%s4474_s1 + $0x810] sm:$0xff]  ;;  %v507_v44 = vld [vmem:[%s4474_s1 + $0x818] sm:$0xff] }
  0xa4   :  { %2630 = vmatpush3.bf16.msra.mxu1 %v2629_v45  ;;  %2600 = vmatprep.subr.bf16.mxu0 %v2599_v46  ;;  %v524_v45 = vld [vmem:[%s4474_s1 + $0x8a0] sm:$0xff]  ;;  %v525_v46 = vld [vmem:[%s4474_s1 + $0x8a8] sm:$0xff]  ;;  %v153_v35 = vld [vmem:[%s4475_s0 + $0x458] sm:$0xff] }
  0xa5   :  { %1158 = vmatmul.mubr.f32.gmra.mrb[64].mxu0 %v130_v54  ;;  %2632 = vmatprep.subr.bf16.mxu1 %v2631_v50  ;;  %v2645_v50 = vpack.c.bf16 %v507_v44, %v506_v43  ;;  %v2647_v52 = vpack.c.bf16 %v525_v46, %v524_v45  ;;  %v509_v54 = vld [vmem:[%s4474_s1 + $0x828] sm:$0xff]  ;;  %v173_v45 = vld [vmem:[%s4475_s0 + $0x4f8] sm:$0xff]  ;;  %v170_v46 = vld [vmem:[%s4475_s0 + $0x4e0] sm:$0xff] }
  0xa6   :  { %1288 = vmatmul.mubr.f32.gmra.mrb[64].mxu1 %v132_v57  ;;  %1162 = vmatprep.mubr.f32.mxu0 %v149_v58  ;;  %v62_v57 = vld [vmem:[%s4475_s0 + $0x180] sm:$0xff]  ;;  %v64_v58 = vld [vmem:[%s4475_s0 + $0x190] sm:$0xff]  ;;  %v171_v43 = vld [vmem:[%s4475_s0 + $0x4e8] sm:$0xff] }
  0xa7   :  { %1292 = vmatprep.mubr.f32.mxu1 %v151_v59  ;;  %2602 = vmatpush3.bf16.msra.mxu0 %v2601_v60  ;;  %v81_v59 = vld [vmem:[%s4475_s0 + $0x218] sm:$0xff]  ;;  %v2649_v60 = vpack.c.bf16 %v509_v54, %v508_v53  ;;  %v206_v54 = vld [vmem:[%s4475_s0 + $0x600] sm:$0xff] }
  0xa8   :  { %2634 = vmatpush3.bf16.msra.mxu1 %v2633_v61  ;;  %2604 = vmatprep.subr.bf16.mxu0 %v2603_v62  ;;  %v83_v61 = vld [vmem:[%s4475_s0 + $0x228] sm:$0xff]  ;;  %v2651_v62 = vpack.c.bf16 %v527_v56, %v526_v55  ;;  %v209_v53 = vld [vmem:[%s4475_s0 + $0x618] sm:$0xff]  ;;  %v208_v55 = vld [vmem:[%s4475_s0 + $0x610] sm:$0xff] }
  0xa9   :  { %1163 = vmatmul.mubr.f32.gmra.mrb[66].mxu0 %v148_v6  ;;  %2636 = vmatprep.subr.bf16.mxu1 %v2635_v2  ;;  %v529_v2 = vld [vmem:[%s4474_s1 + $0x8c8] sm:$0xff]  ;;  %v2653_v6 = vpack.c.bf16 %v511_v0, %v510_v63  ;;  %v225_v56 = vld [vmem:[%s4475_s0 + $0x698] sm:$0xff]  ;;  %v244_v63 = vld [vmem:[%s4475_s0 + $0x730] sm:$0xff] }
  0xaa   :  { %1293 = vmatmul.mubr.f32.gmra.mrb[66].mxu1 %v150_v7  ;;  %1167 = vmatprep.mubr.f32.mxu0 %v167_v8  ;;  %v101_v7 = vld [vmem:[%s4475_s0 + $0x2b8] sm:$0xff]  ;;  %v2655_v8 = vpack.c.bf16 %v529_v2, %v528_v1  ;;  %v31_v0 = vld [vmem:[%s4475_s0 + $0x88] sm:$0xff]  ;;  %v30_v2 = vld [vmem:[%s4475_s0 + $0x80] sm:$0xff] }
  0xab   :  { %1297 = vmatprep.mubr.f32.mxu1 %v169_v10  ;;  %2606 = vmatpush3.bf16.msra.mxu0 %v2605_v9  ;;  %v512_v9 = vld [vmem:[%s4474_s1 + $0x840] sm:$0xff]  ;;  %v513_v10 = vld [vmem:[%s4474_s1 + $0x848] sm:$0xff]  ;;  %v157_v1 = vld [vmem:[%s4475_s0 + $0x478] sm:$0xff] }
  0xac   :  { %2638 = vmatpush3.bf16.msra.mxu1 %v2637_v11  ;;  %2640 = vmatprep.subr.bf16.mxu0 %v2639_v12  ;;  %v530_v11 = vld [vmem:[%s4474_s1 + $0x8d0] sm:$0xff] }
  0xad   :  { %1168 = vmatmul.mubr.f32.gmra.mrb[68].mxu0 %v166_v13  ;;  %2671 = vmatprep.subr.bf16.mxu1 %v2639_v12  ;;  %v531_v12 = vld [vmem:[%s4474_s1 + $0x8d8] sm:$0xff]  ;;  %v98_v13 = vld [vmem:[%s4475_s0 + $0x2a0] sm:$0xff] }
  0xae   :  { %1298 = vmatmul.mubr.f32.gmra.mrb[68].mxu1 %v168_v14  ;;  %1172 = vmatprep.mubr.f32.mxu0 %v185_v15  ;;  %v100_v14 = vld [vmem:[%s4475_s0 + $0x2b0] sm:$0xff]  ;;  %v117_v15 = vld [vmem:[%s4475_s0 + $0x338] sm:$0xff] }
  0xaf   :  { %1302 = vmatprep.mubr.f32.mxu1 %v187_v16  ;;  %v2657_v16 = vpack.c.bf16 %v513_v10, %v512_v9  ;;  %v193_v10 = vld [vmem:[%s4475_s0 + $0x598] sm:$0xff] }
  0xb1   :  { %1173 = vmatmul.mubr.f32.gmra.mrb[70].mxu0 %v184_v17  ;;  %v119_v17 = vld [vmem:[%s4475_s0 + $0x348] sm:$0xff] }
  0xb2   :  { %1303 = vmatmul.mubr.f32.gmra.mrb[70].mxu1 %v186_v18  ;;  %1177 = vmatprep.mubr.f32.mxu0 %v203_v19  ;;  %v2659_v18 = vpack.c.bf16 %v531_v12, %v530_v11  ;;  %v514_v19 = vld [vmem:[%s4474_s1 + $0x850] sm:$0xff]  ;;  %v4228_v11 = vld [vmem:[%s4476_s2] ss:$0 sm:$0xff] }
  0xb3   :  { %1307 = vmatprep.mubr.f32.mxu1 %v205_v20  ;;  %v515_v20 = vld [vmem:[%s4474_s1 + $0x858] sm:$0xff] }
  0xb5   :  { %1178 = vmatmul.mubr.f32.gmra.mrb[72].mxu0 %v202_v21  ;;  %v532_v21 = vld [vmem:[%s4474_s1 + $0x8e0] sm:$0xff] }
  0xb6   :  { %1308 = vmatmul.mubr.f32.gmra.mrb[72].mxu1 %v204_v22  ;;  %1182 = vmatprep.mubr.f32.mxu0 %v221_v23  ;;  %v533_v22 = vld [vmem:[%s4474_s1 + $0x8e8] sm:$0xff]  ;;  %v116_v23 = vld [vmem:[%s4475_s0 + $0x330] sm:$0xff] }
  0xb7   :  { %1312 = vmatprep.mubr.f32.mxu1 %v223_v24  ;;  %v118_v24 = vld [vmem:[%s4475_s0 + $0x340] sm:$0xff] }
  0xb9   :  { %1183 = vmatmul.mubr.f32.gmra.mrb[74].mxu0 %v220_v25  ;;  %v135_v25 = vld [vmem:[%s4475_s0 + $0x3c8] sm:$0xff] }
  0xba   :  { %1313 = vmatmul.mubr.f32.gmra.mrb[74].mxu1 %v222_v26  ;;  %1187 = vmatprep.mubr.f32.mxu0 %v239_v27  ;;  %v2661_v26 = vpack.c.bf16 %v515_v20, %v514_v19  ;;  %v137_v27 = vld [vmem:[%s4475_s0 + $0x3d8] sm:$0xff] }
  0xbb   :  { %1317 = vmatprep.mubr.f32.mxu1 %v241_v28  ;;  %v2663_v28 = vpack.c.bf16 %v533_v22, %v532_v21  ;;  %v85_v19 = vld [vmem:[%s4475_s0 + $0x238] sm:$0xff]  ;;  %v211_v22 = vld [vmem:[%s4475_s0 + $0x628] sm:$0xff] }
  0xbd   :  { %1188 = vmatmul.mubr.f32.gmra.mrb[76].mxu0 %v238_v29  ;;  %v516_v29 = vld [vmem:[%s4474_s1 + $0x860] sm:$0xff] }
  0xbe   :  { %1318 = vmatmul.mubr.f32.gmra.mrb[76].mxu1 %v240_v30  ;;  %1387 = vmatprep.mubr.f32.mxu0 %v27_v31  ;;  %v517_v30 = vld [vmem:[%s4474_s1 + $0x868] sm:$0xff]  ;;  %v534_v31 = vld [vmem:[%s4474_s1 + $0x8f0] sm:$0xff] }
  0xbf   :  { %1517 = vmatprep.mubr.f32.mxu1 %v29_v34  ;;  %v136_v34 = vld [vmem:[%s4475_s0 + $0x3d0] sm:$0xff]  ;;  %v2665_v36 = vpack.c.bf16 %v517_v30, %v516_v29  ;;  %v210_v30 = vld [vmem:[%s4475_s0 + $0x620] sm:$0xff] }
  0xc1   :  { %1388 = vmatmul.mubr.f32.vlgmr.msra.gmra.mrb[78].mxu0 %v26_v37  ;;  %v155_v37 = vld [vmem:[%s4475_s0 + $0x468] sm:$0xff] }
  0xc2   :  { %1518 = vmatmul.mubr.f32.vlgmr.msra.gmra.mrb[78].mxu1 %v28_v39  ;;  %2642 = vmatpush3.bf16.msra.mxu0 %v2641_v38  ;;  %v518_v39 = vld [vmem:[%s4474_s1 + $0x870] sm:$0xff] }
  0xc3   :  { %1392 = vmatprep.mubr.f32.mxu0 %v45_v40  ;;  %1522 = vmatprep.mubr.f32.mxu1 %v47_v41  ;;  %v519_v40 = vld [vmem:[%s4474_s1 + $0x878] sm:$0xff]  ;;  %v152_v41 = vld [vmem:[%s4475_s0 + $0x450] sm:$0xff] }
  0xc4   :  { %2679 = vmatpush3.bf16.msra.mxu1 %v2641_v38  ;;  %2644 = vmatprep.subr.bf16.mxu0 %v2643_v42  ;;  %v2667_v38 = vpack.c.bf16 %v535_v32, %v534_v31  ;;  %v2669_v44 = vpack.c.bf16 %v519_v40, %v518_v39  ;;  %v103_v31 = vld [vmem:[%s4475_s0 + $0x2c8] sm:$0xff]  ;;  %v102_v40 = vld [vmem:[%s4475_s0 + $0x2c0] sm:$0xff] }
  0xc5   :  { %1393 = vmatmul.mubr.f32.gmra.mrb[80].mxu0 %v44_v47  ;;  %2672 = vmatprep.subr.bf16.mxu1 %v2643_v42  ;;  %v154_v42 = vld [vmem:[%s4475_s0 + $0x460] sm:$0xff]  ;;  %v172_v47 = vld [vmem:[%s4475_s0 + $0x4f0] sm:$0xff] }
  0xc6   :  { %1523 = vmatmul.mubr.f32.gmra.mrb[80].mxu1 %v46_v48  ;;  %1397 = vmatprep.mubr.f32.mxu0 %v63_v49  ;;  %v189_v48 = vld [vmem:[%s4475_s0 + $0x578] sm:$0xff]  ;;  %v191_v49 = vld [vmem:[%s4475_s0 + $0x588] sm:$0xff] }
  0xc7   :  { %1527 = vmatprep.mubr.f32.mxu1 %v65_v51  ;;  %2646 = vmatpush3.bf16.msra.mxu0 %v2645_v50  ;;  %v190_v51 = vld [vmem:[%s4475_s0 + $0x580] sm:$0xff] }
  0xc8   :  { %2680 = vmatpush3.bf16.msra.mxu1 %v2645_v50  ;;  %2648 = vmatprep.subr.bf16.mxu0 %v2647_v52  ;;  %v188_v50 = vld [vmem:[%s4475_s0 + $0x570] sm:$0xff] }
  0xc9   :  { %1398 = vmatmul.mubr.f32.gmra.mrb[82].mxu0 %v62_v57  ;;  %2673 = vmatprep.subr.bf16.mxu1 %v2647_v52  ;;  %v207_v52 = vld [vmem:[%s4475_s0 + $0x608] sm:$0xff] }
  0xca   :  { %1528 = vmatmul.mubr.f32.gmra.mrb[82].mxu1 %v64_v58  ;;  %1402 = vmatprep.mubr.f32.mxu0 %v81_v59  ;;  %v227_v57 = vld [vmem:[%s4475_s0 + $0x6a8] sm:$0xff]  ;;  %v224_v58 = vld [vmem:[%s4475_s0 + $0x690] sm:$0xff]  ;;  %v226_v59 = vld [vmem:[%s4475_s0 + $0x6a0] sm:$0xff] }
  0xcb   :  { %1532 = vmatprep.mubr.f32.mxu1 %v83_v61  ;;  %2650 = vmatpush3.bf16.msra.mxu0 %v2649_v60  ;;  %v245_v61 = vld [vmem:[%s4475_s0 + $0x738] sm:$0xff] }
  0xcc   :  { %2681 = vmatpush3.bf16.msra.mxu1 %v2649_v60  ;;  %2652 = vmatprep.subr.bf16.mxu0 %v2651_v62  ;;  %v243_v60 = vld [vmem:[%s4475_s0 + $0x728] sm:$0xff] }
  0xcd   :  { %1403 = vmatmul.mubr.f32.gmra.mrb[84].mxu0 %v80_v3  ;;  %2674 = vmatprep.subr.bf16.mxu1 %v2651_v62  ;;  %v242_v62 = vld [vmem:[%s4475_s0 + $0x720] sm:$0xff]  ;;  %v156_v3 = vld [vmem:[%s4475_s0 + $0x470] sm:$0xff] }
  0xce   :  { %1533 = vmatmul.mubr.f32.gmra.mrb[84].mxu1 %v82_v4  ;;  %1407 = vmatprep.mubr.f32.mxu0 %v99_v5  ;;  %v49_v4 = vld [vmem:[%s4475_s0 + $0x118] sm:$0xff]  ;;  %v175_v5 = vld [vmem:[%s4475_s0 + $0x508] sm:$0xff] }
  0xcf   :  { %1537 = vmatprep.mubr.f32.mxu1 %v101_v7  ;;  %2654 = vmatpush3.bf16.msra.mxu0 %v2653_v6  ;;  %v174_v7 = vld [vmem:[%s4475_s0 + $0x500] sm:$0xff] }
  0xd0   :  { %2682 = vmatpush3.bf16.msra.mxu1 %v2653_v6  ;;  %2656 = vmatprep.subr.bf16.mxu0 %v2655_v8  ;;  %v48_v6 = vld [vmem:[%s4475_s0 + $0x110] sm:$0xff] }
  0xd1   :  { %1408 = vmatmul.mubr.f32.gmra.mrb[86].mxu0 %v98_v13  ;;  %2675 = vmatprep.subr.bf16.mxu1 %v2655_v8  ;;  %v67_v8 = vld [vmem:[%s4475_s0 + $0x1a8] sm:$0xff] }
  0xd2   :  { %1538 = vmatmul.mubr.f32.gmra.mrb[86].mxu1 %v100_v14  ;;  %1412 = vmatprep.mubr.f32.mxu0 %v117_v15 }
  0xd3   :  { %1542 = vmatprep.mubr.f32.mxu1 %v119_v17  ;;  %2658 = vmatpush3.bf16.msra.mxu0 %v2657_v16 }
  0xd4   :  { %2683 = vmatpush3.bf16.msra.mxu1 %v2657_v16  ;;  %2660 = vmatprep.subr.bf16.mxu0 %v2659_v18  ;;  %v66_v16 = vld [vmem:[%s4475_s0 + $0x1a0] sm:$0xff] }
  0xd5   :  { %1413 = vmatmul.mubr.f32.gmra.mrb[88].mxu0 %v116_v23  ;;  %2676 = vmatprep.subr.bf16.mxu1 %v2659_v18  ;;  %v192_v18 = vld [vmem:[%s4475_s0 + $0x590] sm:$0xff] }
  0xd6   :  { %1543 = vmatmul.mubr.f32.gmra.mrb[88].mxu1 %v118_v24  ;;  %1417 = vmatprep.mubr.f32.mxu0 %v135_v25 }
  0xd7   :  { %1547 = vmatprep.mubr.f32.mxu1 %v137_v27  ;;  %2662 = vmatpush3.bf16.msra.mxu0 %v2661_v26 }
  0xd8   :  { %2684 = vmatpush3.bf16.msra.mxu1 %v2661_v26  ;;  %2664 = vmatprep.subr.bf16.mxu0 %v2663_v28 }
  0xd9   :  { %1418 = vmatmul.mubr.f32.gmra.mrb[90].mxu0 %v134_v33  ;;  %2677 = vmatprep.subr.bf16.mxu1 %v2663_v28  ;;  %v84_v28 = vld [vmem:[%s4475_s0 + $0x230] sm:$0xff] }
  0xda   :  { %1548 = vmatmul.mubr.f32.gmra.mrb[90].mxu1 %v136_v34  ;;  %1422 = vmatprep.mubr.f32.mxu0 %v153_v35  ;;  %v229_v34 = vld [vmem:[%s4475_s0 + $0x6b8] sm:$0xff] }
  0xdb   :  { %1552 = vmatprep.mubr.f32.mxu1 %v155_v37  ;;  %2666 = vmatpush3.bf16.msra.mxu0 %v2665_v36 }
  0xdc   :  { %2685 = vmatpush3.bf16.msra.mxu1 %v2665_v36  ;;  %2668 = vmatprep.subr.bf16.mxu0 %v2667_v38 }
  0xdd   :  { %1423 = vmatmul.mubr.f32.gmra.mrb[92].mxu0 %v152_v41  ;;  %2678 = vmatprep.subr.bf16.mxu1 %v2667_v38 }
  0xde   :  { %1553 = vmatmul.mubr.f32.gmra.mrb[92].mxu1 %v154_v42  ;;  %1427 = vmatprep.mubr.f32.mxu0 %v171_v43  ;;  %v228_v42 = vld [vmem:[%s4475_s0 + $0x6b0] sm:$0xff]  ;;  %v121_v43 = vld [vmem:[%s4475_s0 + $0x358] sm:$0xff] }
  0xdf   :  { %1557 = vmatprep.mubr.f32.mxu1 %v173_v45  ;;  %2670 = vmatpush3.bf16.msra.mxu0 %v2669_v44 }
  0xe0   :  { %2686 = vmatpush3.bf16.msra.mxu1 %v2669_v44 }
  0xe1   :  { %1428 = vmatmul.mubr.f32.gmra.mrb[94].mxu0 %v170_v46  ;;  %v247_v46 = vld [vmem:[%s4475_s0 + $0x748] sm:$0xff] }
  0xe2   :  { %1558 = vmatmul.mubr.f32.gmra.mrb[94].mxu1 %v172_v47  ;;  %1432 = vmatprep.mubr.f32.mxu0 %v189_v48 }
  0xe3   :  { %1562 = vmatprep.mubr.f32.mxu1 %v191_v49 }
  0xe5   :  { %1433 = vmatmul.mubr.f32.gmra.mrb[96].mxu0 %v188_v50 }
  0xe6   :  { %1563 = vmatmul.mubr.f32.gmra.mrb[96].mxu1 %v190_v51  ;;  %1437 = vmatprep.mubr.f32.mxu0 %v207_v52  ;;  %v120_v52 = vld [vmem:[%s4475_s0 + $0x350] sm:$0xff] }
  0xe7   :  { %1567 = vmatprep.mubr.f32.mxu1 %v209_v53 }
  0xe9   :  { %1438 = vmatmul.mubr.f32.gmra.mrb[98].mxu0 %v206_v54  ;;  %v246_v54 = vld [vmem:[%s4475_s0 + $0x740] sm:$0xff] }
  0xea   :  { %1568 = vmatmul.mubr.f32.gmra.mrb[98].mxu1 %v208_v55  ;;  %1442 = vmatprep.mubr.f32.mxu0 %v225_v56  ;;  %v139_v55 = vld [vmem:[%s4475_s0 + $0x3e8] sm:$0xff] }
  0xeb   :  { %1572 = vmatprep.mubr.f32.mxu1 %v227_v57 }
  0xed   :  { %1443 = vmatmul.mubr.f32.gmra.mrb[100].mxu0 %v224_v58 }
  0xee   :  { %1573 = vmatmul.mubr.f32.gmra.mrb[100].mxu1 %v226_v59  ;;  %1447 = vmatprep.mubr.f32.mxu0 %v243_v60 }
  0xef   :  { %1577 = vmatprep.mubr.f32.mxu1 %v245_v61 }
  0xf1   :  { %1448 = vmatmul.mubr.f32.gmra.mrb[102].mxu0 %v242_v62 }
  0xf2   :  { %1578 = vmatmul.mubr.f32.gmra.mrb[102].mxu1 %v244_v63  ;;  %1647 = vmatprep.mubr.f32.mxu0 %v31_v0  ;;  %v138_v63 = vld [vmem:[%s4475_s0 + $0x3e0] sm:$0xff] }
  0xf3   :  { %1682 = vmatprep.mubr.f32.mxu1 %v157_v1 }
  0xf5   :  { %1648 = vmatmul.mubr.f32.vlgmr.msra.gmra.mrb[104].mxu0 %v30_v2 }
  0xf6   :  { %1683 = vmatmul.mubr.f32.vlgmr.msra.gmra.mrb[104].mxu1 %v156_v3  ;;  %1652 = vmatprep.mubr.f32.mxu0 %v49_v4 }
  0xf7   :  { %1687 = vmatprep.mubr.f32.mxu1 %v175_v5 }
  0xf8   :  { %v1776_v9 = vpop.f32.mrb[0].mxu0 }
  0xf9   :  { %v1777_v12 = vpop.f32.mrb[1].mxu0  ;;  %1653 = vmatmul.mubr.f32.gmra.mrb[106].mxu0 %v48_v6  ;;  %v1847_v13 = vpop.f32.mrb[0].mxu1 }
  0xfa   :  { %v1778_v14 = vadd.f32 %v1777_v12, %v1776_v9  ;;  %1688 = vmatmul.mubr.f32.gmra.mrb[106].mxu1 %v174_v7  ;;  %v1848_v15 = vpop.f32.mrb[1].mxu1  ;;  %1657 = vmatprep.mubr.f32.mxu0 %v67_v8 }
  0xfb   :  { %v1849_v17 = vadd.f32 %v1848_v15, %v1847_v13  ;;  %1692 = vmatprep.mubr.f32.mxu1 %v193_v10 }
  0xfc   :  { %v610_v20 = vadd.f32 %v1778_v14, %v4228_v11  ;;  %v1779_v21 = vpop.f32.mrb[2].mxu0 }
  0xfd   :  { %v1780_v23 = vpop.f32.mrb[3].mxu0  ;;  %1658 = vmatmul.mubr.f32.gmra.mrb[108].mxu0 %v66_v16  ;;  %v1850_v24 = vpop.f32.mrb[2].mxu1 }
  0xfe   :  { %v4243_v25 = vadd.f32 %v1849_v17, %v610_v20  ;;  %v1781_v26 = vadd.f32 %v1780_v23, %v1779_v21  ;;  %1693 = vmatmul.mubr.f32.gmra.mrb[108].mxu1 %v192_v18  ;;  %v1851_v27 = vpop.f32.mrb[3].mxu1  ;;  %1662 = vmatprep.mubr.f32.mxu0 %v85_v19 }
  0xff   :  { %v1852_v29 = vadd.f32 %v1851_v27, %v1850_v24  ;;  %1697 = vmatprep.mubr.f32.mxu1 %v211_v22 }
 0x100   :  { %v615_v32 = vadd.f32 %v1781_v26, %v4228_v11  ;;  %v1782_v33 = vpop.f32.mrb[4].mxu0 }
 0x101   :  { %v1783_v35 = vpop.f32.mrb[5].mxu0  ;;  %1663 = vmatmul.mubr.f32.gmra.mrb[110].mxu0 %v84_v28  ;;  %v1853_v36 = vpop.f32.mrb[4].mxu1 }
 0x102   :  { %v4258_v37 = vadd.f32 %v1852_v29, %v615_v32  ;;  %v1784_v38 = vadd.f32 %v1783_v35, %v1782_v33  ;;  %1698 = vmatmul.mubr.f32.gmra.mrb[110].mxu1 %v210_v30  ;;  %v1854_v39 = vpop.f32.mrb[5].mxu1  ;;  %1667 = vmatprep.mubr.f32.mxu0 %v103_v31 }
 0x103   :  { %v1855_v41 = vadd.f32 %v1854_v39, %v1853_v36  ;;  %1702 = vmatprep.mubr.f32.mxu1 %v229_v34 }
 0x104   :  { %v620_v44 = vadd.f32 %v1784_v38, %v4228_v11  ;;  %v1785_v45 = vpop.f32.mrb[6].mxu0 }
 0x105   :  { %v1786_v47 = vpop.f32.mrb[7].mxu0  ;;  %1668 = vmatmul.mubr.f32.gmra.mrb[112].mxu0 %v102_v40  ;;  %v1856_v48 = vpop.f32.mrb[6].mxu1 }
 0x106   :  { %v4273_v49 = vadd.f32 %v1855_v41, %v620_v44  ;;  %v1787_v50 = vadd.f32 %v1786_v47, %v1785_v45  ;;  %1703 = vmatmul.mubr.f32.gmra.mrb[112].mxu1 %v228_v42  ;;  %v1857_v51 = vpop.f32.mrb[7].mxu1  ;;  %1672 = vmatprep.mubr.f32.mxu0 %v121_v43 }
 0x107   :  { %v1858_v53 = vadd.f32 %v1857_v51, %v1856_v48  ;;  %1707 = vmatprep.mubr.f32.mxu1 %v247_v46 }
 0x108   :  { %v625_v56 = vadd.f32 %v1787_v50, %v4228_v11  ;;  %v1788_v57 = vpop.f32.mrb[8].mxu0 }
 0x109   :  { %v1789_v58 = vpop.f32.mrb[9].mxu0  ;;  %1673 = vmatmul.mubr.f32.gmra.mrb[114].mxu0 %v120_v52  ;;  %v1859_v59 = vpop.f32.mrb[8].mxu1 }
 0x10a   :  { %v4285_v60 = vadd.f32 %v1858_v53, %v625_v56  ;;  %v1790_v61 = vadd.f32 %v1789_v58, %v1788_v57  ;;  %1708 = vmatmul.mubr.f32.gmra.mrb[114].mxu1 %v246_v54  ;;  %v1860_v62 = vpop.f32.mrb[9].mxu1  ;;  %1677 = vmatprep.mubr.f32.mxu0 %v139_v55 }
 0x10b   :  { %v1861_v0 = vadd.f32 %v1860_v62, %v1859_v59 }
 0x10c   :  { %v630_v1 = vadd.f32 %v1790_v61, %v4228_v11  ;;  %v1791_v2 = vpop.f32.mrb[10].mxu0 }
 0x10d   :  { %v1792_v3 = vpop.f32.mrb[11].mxu0  ;;  %1678 = vmatmul.mubr.f32.gmra.mrb[116].mxu0 %v138_v63  ;;  %v1862_v4 = vpop.f32.mrb[10].mxu1 }
 0x10e   :  { %v4291_v5 = vadd.f32 %v1861_v0, %v630_v1  ;;  %v1793_v6 = vadd.f32 %v1792_v3, %v1791_v2  ;;  %v1863_v7 = vpop.f32.mrb[11].mxu1 }
 0x10f   :  { %v1864_v8 = vadd.f32 %v1863_v7, %v1862_v4 }
 0x110   :  { %v635_v9 = vadd.f32 %v1793_v6, %v4228_v11  ;;  %v1794_v10 = vpop.f32.mrb[12].mxu0 }
 0x111   :  { %v1795_v12 = vpop.f32.mrb[13].mxu0  ;;  %v1865_v13 = vpop.f32.mrb[12].mxu1 }
 0x112   :  { %v4294_v14 = vadd.f32 %v1864_v8, %v635_v9  ;;  %v1796_v15 = vadd.f32 %v1795_v12, %v1794_v10  ;;  %v1866_v16 = vpop.f32.mrb[13].mxu1 }
 0x113   :  { %v1867_v17 = vadd.f32 %v1866_v16, %v1865_v13 }
 0x114   :  { %v640_v18 = vadd.f32 %v1796_v15, %v4228_v11  ;;  %v1797_v19 = vpop.f32.mrb[14].mxu0 }
 0x115   :  { %v1798_v20 = vpop.f32.mrb[15].mxu0  ;;  %v1868_v21 = vpop.f32.mrb[14].mxu1 }
 0x116   :  { %v4297_v22 = vadd.f32 %v1867_v17, %v640_v18  ;;  %v1799_v23 = vadd.f32 %v1798_v20, %v1797_v19  ;;  %v1869_v24 = vpop.f32.mrb[15].mxu1 }
 0x117   :  { %v1870_v26 = vadd.f32 %v1869_v24, %v1868_v21 }
 0x118   :  { %v645_v27 = vadd.f32 %v1799_v23, %v4228_v11  ;;  %v1800_v28 = vpop.f32.mrb[16].mxu0 }
 0x119   :  { %v1801_v29 = vpop.f32.mrb[17].mxu0  ;;  %v1871_v30 = vpop.f32.mrb[16].mxu1 }
 0x11a   :  { %v4300_v31 = vadd.f32 %v1870_v26, %v645_v27  ;;  %v1802_v32 = vadd.f32 %v1801_v29, %v1800_v28  ;;  %v1872_v33 = vpop.f32.mrb[17].mxu1 }
 0x11b   :  { %v1873_v34 = vadd.f32 %v1872_v33, %v1871_v30 }
 0x11c   :  { %v650_v35 = vadd.f32 %v1802_v32, %v4228_v11  ;;  %v1803_v36 = vpop.f32.mrb[18].mxu0 }
 0x11d   :  { %v1804_v38 = vpop.f32.mrb[19].mxu0  ;;  %v1874_v39 = vpop.f32.mrb[18].mxu1 }
 0x11e   :  { %v4303_v40 = vadd.f32 %v1873_v34, %v650_v35  ;;  %v1805_v41 = vadd.f32 %v1804_v38, %v1803_v36  ;;  %v1875_v42 = vpop.f32.mrb[19].mxu1 }
 0x11f   :  { %v1876_v43 = vadd.f32 %v1875_v42, %v1874_v39 }
 0x120   :  { %v655_v44 = vadd.f32 %v1805_v41, %v4228_v11  ;;  %v1806_v45 = vpop.f32.mrb[20].mxu0 }
 0x121   :  { %v1807_v46 = vpop.f32.mrb[21].mxu0  ;;  %v1877_v47 = vpop.f32.mrb[20].mxu1 }
 0x122   :  { %v4306_v48 = vadd.f32 %v1876_v43, %v655_v44  ;;  %v1808_v50 = vadd.f32 %v1807_v46, %v1806_v45  ;;  %v1878_v51 = vpop.f32.mrb[21].mxu1 }
 0x123   :  { %v1879_v52 = vadd.f32 %v1878_v51, %v1877_v47 }
 0x124   :  { %v660_v53 = vadd.f32 %v1808_v50, %v4228_v11  ;;  %v1809_v54 = vpop.f32.mrb[22].mxu0 }
 0x125   :  { %v1810_v55 = vpop.f32.mrb[23].mxu0  ;;  %v1880_v56 = vpop.f32.mrb[22].mxu1 }
 0x126   :  { %v4309_v57 = vadd.f32 %v1879_v52, %v660_v53  ;;  %v1811_v58 = vadd.f32 %v1810_v55, %v1809_v54  ;;  %v1881_v59 = vpop.f32.mrb[23].mxu1 }
 0x127   :  { %v1882_v61 = vadd.f32 %v1881_v59, %v1880_v56 }
 0x128   :  { %v665_v62 = vadd.f32 %v1811_v58, %v4228_v11  ;;  %v1812_v63 = vpop.f32.mrb[24].mxu0 }
 0x129   :  { %v1813_v0 = vpop.f32.mrb[25].mxu0  ;;  %v1883_v1 = vpop.f32.mrb[24].mxu1 }
 0x12a   :  { %v4312_v2 = vadd.f32 %v1882_v61, %v665_v62  ;;  %v1814_v3 = vadd.f32 %v1813_v0, %v1812_v63  ;;  %v1884_v4 = vpop.f32.mrb[25].mxu1 }
 0x12b   :  { %v1885_v6 = vadd.f32 %v1884_v4, %v1883_v1 }
 0x12c   :  { %v670_v7 = vadd.f32 %v1814_v3, %v4228_v11  ;;  %v1918_v8 = vpop.f32.mrb[26].mxu0 }
 0x12d   :  { %v1919_v9 = vpop.f32.mrb[27].mxu0  ;;  %v1989_v10 = vpop.f32.mrb[26].mxu1 }
 0x12e   :  { %v4315_v12 = vadd.f32 %v1885_v6, %v670_v7  ;;  %v1920_v13 = vadd.f32 %v1919_v9, %v1918_v8  ;;  %v1990_v15 = vpop.f32.mrb[27].mxu1 }
 0x12f   :  { %v1991_v16 = vadd.f32 %v1990_v15, %v1989_v10 }
 0x130   :  { %v870_v17 = vadd.f32 %v1920_v13, %v4243_v25  ;;  %v1921_v18 = vpop.f32.mrb[28].mxu0 }
 0x131   :  { %v1922_v19 = vpop.f32.mrb[29].mxu0  ;;  %v1992_v20 = vpop.f32.mrb[28].mxu1 }
 0x132   :  { %v4318_v21 = vadd.f32 %v1991_v16, %v870_v17  ;;  %v1923_v23 = vadd.f32 %v1922_v19, %v1921_v18  ;;  %v1993_v24 = vpop.f32.mrb[29].mxu1 }
 0x133   :  { %v1994_v26 = vadd.f32 %v1993_v24, %v1992_v20 }
 0x134   :  { %v875_v11 = vadd.f32 %v1923_v23, %v4258_v37  ;;  %v1924_v27 = vpop.f32.mrb[30].mxu0 }
 0x135   :  { %v1925_v28 = vpop.f32.mrb[31].mxu0  ;;  %v1995_v29 = vpop.f32.mrb[30].mxu1 }
 0x136   :  { %v4321_v30 = vadd.f32 %v1994_v26, %v875_v11  ;;  %v1926_v32 = vadd.f32 %v1925_v28, %v1924_v27  ;;  %v1996_v33 = vpop.f32.mrb[31].mxu1 }
 0x137   :  { %v1997_v34 = vadd.f32 %v1996_v33, %v1995_v29 }
 0x138   :  { %v880_v25 = vadd.f32 %v1926_v32, %v4273_v49  ;;  %v1927_v35 = vpop.f32.mrb[32].mxu0 }
 0x139   :  { %v1928_v36 = vpop.f32.mrb[33].mxu0  ;;  %v1998_v38 = vpop.f32.mrb[32].mxu1 }
 0x13a   :  { %v4324_v39 = vadd.f32 %v1997_v34, %v880_v25  ;;  %v1929_v41 = vadd.f32 %v1928_v36, %v1927_v35  ;;  %v1999_v42 = vpop.f32.mrb[33].mxu1 }
 0x13b   :  { %v2000_v43 = vadd.f32 %v1999_v42, %v1998_v38 }
 0x13c   :  { %v885_v37 = vadd.f32 %v1929_v41, %v4285_v60  ;;  %v1930_v44 = vpop.f32.mrb[34].mxu0 }
 0x13d   :  { %v1931_v45 = vpop.f32.mrb[35].mxu0  ;;  %v2001_v46 = vpop.f32.mrb[34].mxu1 }
 0x13e   :  { %v4327_v47 = vadd.f32 %v2000_v43, %v885_v37  ;;  %v1932_v50 = vadd.f32 %v1931_v45, %v1930_v44  ;;  %v2002_v51 = vpop.f32.mrb[35].mxu1 }
 0x13f   :  { %v2003_v52 = vadd.f32 %v2002_v51, %v2001_v46 }
 0x140   :  { %v890_v49 = vadd.f32 %v1932_v50, %v4291_v5  ;;  %v1933_v53 = vpop.f32.mrb[36].mxu0 }
 0x141   :  { %v1934_v54 = vpop.f32.mrb[37].mxu0  ;;  %v2004_v55 = vpop.f32.mrb[36].mxu1 }
 0x142   :  { %v4330_v56 = vadd.f32 %v2003_v52, %v890_v49  ;;  %v1935_v58 = vadd.f32 %v1934_v54, %v1933_v53  ;;  %v2005_v59 = vpop.f32.mrb[37].mxu1 }
 0x143   :  { %v2006_v61 = vadd.f32 %v2005_v59, %v2004_v55 }
 0x144   :  { %v895_v60 = vadd.f32 %v1935_v58, %v4294_v14  ;;  %v1936_v62 = vpop.f32.mrb[38].mxu0 }
 0x145   :  { %v1937_v63 = vpop.f32.mrb[39].mxu0  ;;  %v2007_v0 = vpop.f32.mrb[38].mxu1 }
 0x146   :  { %v4333_v1 = vadd.f32 %v2006_v61, %v895_v60  ;;  %v1938_v3 = vadd.f32 %v1937_v63, %v1936_v62  ;;  %v2008_v4 = vpop.f32.mrb[39].mxu1 }
 0x147   :  { %v2009_v6 = vadd.f32 %v2008_v4, %v2007_v0 }
 0x148   :  { %v900_v5 = vadd.f32 %v1938_v3, %v4297_v22  ;;  %v1939_v7 = vpop.f32.mrb[40].mxu0 }
 0x149   :  { %v1940_v8 = vpop.f32.mrb[41].mxu0  ;;  %v2010_v9 = vpop.f32.mrb[40].mxu1 }
 0x14a   :  { %v4336_v10 = vadd.f32 %v2009_v6, %v900_v5  ;;  %v1941_v13 = vadd.f32 %v1940_v8, %v1939_v7  ;;  %v2011_v15 = vpop.f32.mrb[41].mxu1 }
 0x14b   :  { %v2012_v16 = vadd.f32 %v2011_v15, %v2010_v9 }
 0x14c   :  { %v905_v14 = vadd.f32 %v1941_v13, %v4300_v31  ;;  %v1942_v17 = vpop.f32.mrb[42].mxu0 }
 0x14d   :  { %v1943_v18 = vpop.f32.mrb[43].mxu0  ;;  %v2013_v19 = vpop.f32.mrb[42].mxu1 }
 0x14e   :  { %v4339_v20 = vadd.f32 %v2012_v16, %v905_v14  ;;  %v1944_v23 = vadd.f32 %v1943_v18, %v1942_v17  ;;  %v2014_v24 = vpop.f32.mrb[43].mxu1 }
 0x14f   :  { %v2015_v26 = vadd.f32 %v2014_v24, %v2013_v19 }
 0x150   :  { %v910_v22 = vadd.f32 %v1944_v23, %v4303_v40  ;;  %v1945_v11 = vpop.f32.mrb[44].mxu0 }
 0x151   :  { %v1946_v27 = vpop.f32.mrb[45].mxu0  ;;  %v2016_v28 = vpop.f32.mrb[44].mxu1 }
 0x152   :  { %v4342_v29 = vadd.f32 %v2015_v26, %v910_v22  ;;  %v1947_v32 = vadd.f32 %v1946_v27, %v1945_v11  ;;  %v2017_v33 = vpop.f32.mrb[45].mxu1 }
 0x153   :  { %v2018_v34 = vadd.f32 %v2017_v33, %v2016_v28 }
 0x154   :  { %v915_v31 = vadd.f32 %v1947_v32, %v4306_v48  ;;  %v1948_v25 = vpop.f32.mrb[46].mxu0 }
 0x155   :  { %v1949_v35 = vpop.f32.mrb[47].mxu0  ;;  %v2019_v36 = vpop.f32.mrb[46].mxu1 }
 0x156   :  { %v4345_v38 = vadd.f32 %v2018_v34, %v915_v31  ;;  %v1950_v41 = vadd.f32 %v1949_v35, %v1948_v25  ;;  %v2020_v42 = vpop.f32.mrb[47].mxu1 }
 0x157   :  { %v2021_v43 = vadd.f32 %v2020_v42, %v2019_v36 }
 0x158   :  { %v920_v40 = vadd.f32 %v1950_v41, %v4309_v57  ;;  %v1951_v37 = vpop.f32.mrb[48].mxu0 }
 0x159   :  { %v1952_v44 = vpop.f32.mrb[49].mxu0  ;;  %v2022_v45 = vpop.f32.mrb[48].mxu1 }
 0x15a   :  { %v4348_v46 = vadd.f32 %v2021_v43, %v920_v40  ;;  %v1953_v50 = vadd.f32 %v1952_v44, %v1951_v37  ;;  %v2023_v51 = vpop.f32.mrb[49].mxu1 }
 0x15b   :  { %v2024_v52 = vadd.f32 %v2023_v51, %v2022_v45 }
 0x15c   :  { %v925_v48 = vadd.f32 %v1953_v50, %v4312_v2  ;;  %v1954_v49 = vpop.f32.mrb[50].mxu0 }
 0x15d   :  { %v1955_v53 = vpop.f32.mrb[51].mxu0  ;;  %v2025_v54 = vpop.f32.mrb[50].mxu1 }
 0x15e   :  { %v4351_v55 = vadd.f32 %v2024_v52, %v925_v48  ;;  %v1956_v58 = vadd.f32 %v1955_v53, %v1954_v49  ;;  %v2026_v59 = vpop.f32.mrb[51].mxu1 }
 0x15f   :  { %v2027_v61 = vadd.f32 %v2026_v59, %v2025_v54 }
 0x160   :  { %v930_v57 = vadd.f32 %v1956_v58, %v4315_v12  ;;  %v2060_v60 = vpop.f32.mrb[52].mxu0 }
 0x161   :  { %v2061_v62 = vpop.f32.mrb[53].mxu0  ;;  %v2131_v63 = vpop.f32.mrb[52].mxu1 }
 0x162   :  { %v4354_v0 = vadd.f32 %v2027_v61, %v930_v57  ;;  %v2062_v3 = vadd.f32 %v2061_v62, %v2060_v60  ;;  %v2132_v4 = vpop.f32.mrb[53].mxu1 }
 0x163   :  { %v2133_v6 = vadd.f32 %v2132_v4, %v2131_v63 }
 0x164   :  { %v1130_v2 = vadd.f32 %v2062_v3, %v4318_v21  ;;  %v2063_v5 = vpop.f32.mrb[54].mxu0 }
 0x165   :  { %v2064_v7 = vpop.f32.mrb[55].mxu0  ;;  %v2134_v8 = vpop.f32.mrb[54].mxu1 }
 0x166   :  { %v4357_v9 = vadd.f32 %v2133_v6, %v1130_v2  ;;  %v2065_v13 = vadd.f32 %v2064_v7, %v2063_v5  ;;  %v2135_v15 = vpop.f32.mrb[55].mxu1 }
 0x167   :  { %v2136_v16 = vadd.f32 %v2135_v15, %v2134_v8 }
 0x168   :  { %v1135_v12 = vadd.f32 %v2065_v13, %v4321_v30  ;;  %v2066_v14 = vpop.f32.mrb[56].mxu0 }
 0x169   :  { %v2067_v17 = vpop.f32.mrb[57].mxu0  ;;  %v2137_v18 = vpop.f32.mrb[56].mxu1 }
 0x16a   :  { %v4360_v19 = vadd.f32 %v2136_v16, %v1135_v12  ;;  %v2068_v23 = vadd.f32 %v2067_v17, %v2066_v14  ;;  %v2138_v24 = vpop.f32.mrb[57].mxu1 }
 0x16b   :  { %v2139_v26 = vadd.f32 %v2138_v24, %v2137_v18 }
 0x16c   :  { %v1140_v21 = vadd.f32 %v2068_v23, %v4324_v39  ;;  %v2069_v22 = vpop.f32.mrb[58].mxu0 }
 0x16d   :  { %v2070_v11 = vpop.f32.mrb[59].mxu0  ;;  %v2140_v27 = vpop.f32.mrb[58].mxu1 }
 0x16e   :  { %v4363_v28 = vadd.f32 %v2139_v26, %v1140_v21  ;;  %v2071_v32 = vadd.f32 %v2070_v11, %v2069_v22  ;;  %v2141_v33 = vpop.f32.mrb[59].mxu1 }
 0x16f   :  { %v2142_v34 = vadd.f32 %v2141_v33, %v2140_v27 }
 0x170   :  { %v1145_v30 = vadd.f32 %v2071_v32, %v4327_v47  ;;  %v2072_v31 = vpop.f32.mrb[60].mxu0 }
 0x171   :  { %v2073_v25 = vpop.f32.mrb[61].mxu0  ;;  %v2143_v35 = vpop.f32.mrb[60].mxu1 }
 0x172   :  { %v4366_v36 = vadd.f32 %v2142_v34, %v1145_v30  ;;  %v2074_v41 = vadd.f32 %v2073_v25, %v2072_v31  ;;  %v2144_v42 = vpop.f32.mrb[61].mxu1 }
 0x173   :  { %v2145_v43 = vadd.f32 %v2144_v42, %v2143_v35 }
 0x174   :  { %v1150_v39 = vadd.f32 %v2074_v41, %v4330_v56  ;;  %v2075_v40 = vpop.f32.mrb[62].mxu0 }
 0x175   :  { %v2076_v37 = vpop.f32.mrb[63].mxu0  ;;  %v2146_v44 = vpop.f32.mrb[62].mxu1 }
 0x176   :  { %v4369_v45 = vadd.f32 %v2145_v43, %v1150_v39  ;;  %v2077_v50 = vadd.f32 %v2076_v37, %v2075_v40  ;;  %v2147_v51 = vpop.f32.mrb[63].mxu1 }
 0x177   :  { %v2148_v52 = vadd.f32 %v2147_v51, %v2146_v44 }
 0x178   :  { %v1155_v47 = vadd.f32 %v2077_v50, %v4333_v1  ;;  %v2078_v48 = vpop.f32.mrb[64].mxu0 }
 0x179   :  { %v2079_v49 = vpop.f32.mrb[65].mxu0  ;;  %v2149_v53 = vpop.f32.mrb[64].mxu1 }
 0x17a   :  { %v4372_v54 = vadd.f32 %v2148_v52, %v1155_v47  ;;  %v2080_v58 = vadd.f32 %v2079_v49, %v2078_v48  ;;  %v2150_v59 = vpop.f32.mrb[65].mxu1 }
 0x17b   :  { %v2151_v61 = vadd.f32 %v2150_v59, %v2149_v53 }
 0x17c   :  { %v1160_v56 = vadd.f32 %v2080_v58, %v4336_v10  ;;  %v2081_v57 = vpop.f32.mrb[66].mxu0 }
 0x17d   :  { %v2082_v60 = vpop.f32.mrb[67].mxu0  ;;  %v2152_v62 = vpop.f32.mrb[66].mxu1 }
 0x17e   :  { %v4375_v63 = vadd.f32 %v2151_v61, %v1160_v56  ;;  %v2083_v3 = vadd.f32 %v2082_v60, %v2081_v57  ;;  %v2153_v4 = vpop.f32.mrb[67].mxu1 }
 0x17f   :  { %v2154_v6 = vadd.f32 %v2153_v4, %v2152_v62 }
 0x180   :  { %v1165_v1 = vadd.f32 %v2083_v3, %v4339_v20  ;;  %v2084_v2 = vpop.f32.mrb[68].mxu0 }
 0x181   :  { %v2085_v5 = vpop.f32.mrb[69].mxu0  ;;  %v2155_v7 = vpop.f32.mrb[68].mxu1 }
 0x182   :  { %v4378_v8 = vadd.f32 %v2154_v6, %v1165_v1  ;;  %v2086_v13 = vadd.f32 %v2085_v5, %v2084_v2  ;;  %v2156_v15 = vpop.f32.mrb[69].mxu1 }
 0x183   :  { %v2157_v16 = vadd.f32 %v2156_v15, %v2155_v7 }
 0x184   :  { %v1170_v10 = vadd.f32 %v2086_v13, %v4342_v29  ;;  %v2087_v12 = vpop.f32.mrb[70].mxu0 }
 0x185   :  { %v2088_v14 = vpop.f32.mrb[71].mxu0  ;;  %v2158_v17 = vpop.f32.mrb[70].mxu1 }
 0x186   :  { %v4381_v18 = vadd.f32 %v2157_v16, %v1170_v10  ;;  %v2089_v23 = vadd.f32 %v2088_v14, %v2087_v12  ;;  %v2159_v24 = vpop.f32.mrb[71].mxu1 }
 0x187   :  { %v2160_v26 = vadd.f32 %v2159_v24, %v2158_v17 }
 0x188   :  { %v1175_v20 = vadd.f32 %v2089_v23, %v4345_v38  ;;  %v2090_v21 = vpop.f32.mrb[72].mxu0 }
 0x189   :  { %v2091_v22 = vpop.f32.mrb[73].mxu0  ;;  %v2161_v11 = vpop.f32.mrb[72].mxu1 }
 0x18a   :  { %v4384_v27 = vadd.f32 %v2160_v26, %v1175_v20  ;;  %v2092_v32 = vadd.f32 %v2091_v22, %v2090_v21  ;;  %v2162_v33 = vpop.f32.mrb[73].mxu1 }
 0x18b   :  { %v2163_v34 = vadd.f32 %v2162_v33, %v2161_v11 }
 0x18c   :  { %v1180_v29 = vadd.f32 %v2092_v32, %v4348_v46  ;;  %v2093_v30 = vpop.f32.mrb[74].mxu0 }
 0x18d   :  { %v2094_v31 = vpop.f32.mrb[75].mxu0  ;;  %v2164_v25 = vpop.f32.mrb[74].mxu1 }
 0x18e   :  { %v4387_v35 = vadd.f32 %v2163_v34, %v1180_v29  ;;  %v2095_v41 = vadd.f32 %v2094_v31, %v2093_v30  ;;  %v2165_v42 = vpop.f32.mrb[75].mxu1 }
 0x18f   :  { %v2166_v43 = vadd.f32 %v2165_v42, %v2164_v25 }
 0x190   :  { %v1185_v38 = vadd.f32 %v2095_v41, %v4351_v55  ;;  %v2096_v39 = vpop.f32.mrb[76].mxu0 }
 0x191   :  { %v2097_v40 = vpop.f32.mrb[77].mxu0  ;;  %v2167_v37 = vpop.f32.mrb[76].mxu1 }
 0x192   :  { %v4390_v44 = vadd.f32 %v2166_v43, %v1185_v38  ;;  %v2098_v50 = vadd.f32 %v2097_v40, %v2096_v39  ;;  %v2168_v51 = vpop.f32.mrb[77].mxu1 }
 0x193   :  { %v2169_v52 = vadd.f32 %v2168_v51, %v2167_v37 }
 0x194   :  { %v1190_v46 = vadd.f32 %v2098_v50, %v4354_v0  ;;  %v2202_v47 = vpop.f32.mrb[78].mxu0 }
 0x195   :  { %v2203_v48 = vpop.f32.mrb[79].mxu0  ;;  %v2273_v49 = vpop.f32.mrb[78].mxu1 }
 0x196   :  { %v4393_v53 = vadd.f32 %v2169_v52, %v1190_v46  ;;  %v2204_v58 = vadd.f32 %v2203_v48, %v2202_v47  ;;  %v2274_v59 = vpop.f32.mrb[79].mxu1 }
 0x197   :  { %v2275_v61 = vadd.f32 %v2274_v59, %v2273_v49 }
 0x198   :  { %v1390_v55 = vadd.f32 %v2204_v58, %v4357_v9  ;;  %v2205_v56 = vpop.f32.mrb[80].mxu0 }
 0x199   :  { %v2206_v57 = vpop.f32.mrb[81].mxu0  ;;  %v2276_v60 = vpop.f32.mrb[80].mxu1 }
 0x19a   :  { %v4396_v62 = vadd.f32 %v2275_v61, %v1390_v55  ;;  %v2207_v3 = vadd.f32 %v2206_v57, %v2205_v56  ;;  %v2277_v4 = vpop.f32.mrb[81].mxu1 }
 0x19b   :  { %v2278_v6 = vadd.f32 %v2277_v4, %v2276_v60 }
 0x19c   :  { %v1395_v0 = vadd.f32 %v2207_v3, %v4360_v19  ;;  %v2208_v1 = vpop.f32.mrb[82].mxu0 }
 0x19d   :  { %v2209_v2 = vpop.f32.mrb[83].mxu0  ;;  %v2279_v5 = vpop.f32.mrb[82].mxu1 }
 0x19e   :  { %v4399_v7 = vadd.f32 %v2278_v6, %v1395_v0  ;;  %v2210_v13 = vadd.f32 %v2209_v2, %v2208_v1  ;;  %v2280_v15 = vpop.f32.mrb[83].mxu1 }
 0x19f   :  { %v2281_v16 = vadd.f32 %v2280_v15, %v2279_v5 }
 0x1a0   :  { %v1400_v9 = vadd.f32 %v2210_v13, %v4363_v28  ;;  %v2211_v10 = vpop.f32.mrb[84].mxu0 }
 0x1a1   :  { %v2212_v12 = vpop.f32.mrb[85].mxu0  ;;  %v2282_v14 = vpop.f32.mrb[84].mxu1 }
 0x1a2   :  { %v4402_v17 = vadd.f32 %v2281_v16, %v1400_v9  ;;  %v2213_v23 = vadd.f32 %v2212_v12, %v2211_v10  ;;  %v2283_v24 = vpop.f32.mrb[85].mxu1 }
 0x1a3   :  { %v2284_v26 = vadd.f32 %v2283_v24, %v2282_v14 }
 0x1a4   :  { %v1405_v19 = vadd.f32 %v2213_v23, %v4366_v36  ;;  %v2214_v20 = vpop.f32.mrb[86].mxu0 }
 0x1a5   :  { %v2215_v21 = vpop.f32.mrb[87].mxu0  ;;  %v2285_v22 = vpop.f32.mrb[86].mxu1 }
 0x1a6   :  { %v4405_v11 = vadd.f32 %v2284_v26, %v1405_v19  ;;  %v2216_v32 = vadd.f32 %v2215_v21, %v2214_v20  ;;  %v2286_v33 = vpop.f32.mrb[87].mxu1 }
 0x1a7   :  { %v2287_v34 = vadd.f32 %v2286_v33, %v2285_v22 }
 0x1a8   :  { %v1410_v28 = vadd.f32 %v2216_v32, %v4369_v45  ;;  %v2217_v29 = vpop.f32.mrb[88].mxu0 }
 0x1a9   :  { %v2218_v30 = vpop.f32.mrb[89].mxu0  ;;  %v2288_v31 = vpop.f32.mrb[88].mxu1 }
 0x1aa   :  { %v4408_v25 = vadd.f32 %v2287_v34, %v1410_v28  ;;  %v2219_v41 = vadd.f32 %v2218_v30, %v2217_v29  ;;  %v2289_v42 = vpop.f32.mrb[89].mxu1 }
 0x1ab   :  { %v2290_v43 = vadd.f32 %v2289_v42, %v2288_v31 }
 0x1ac   :  { %v1415_v36 = vadd.f32 %v2219_v41, %v4372_v54  ;;  %v2220_v38 = vpop.f32.mrb[90].mxu0 }
 0x1ad   :  { %v2221_v39 = vpop.f32.mrb[91].mxu0  ;;  %v2291_v40 = vpop.f32.mrb[90].mxu1 }
 0x1ae   :  { %v4411_v37 = vadd.f32 %v2290_v43, %v1415_v36  ;;  %v2222_v50 = vadd.f32 %v2221_v39, %v2220_v38  ;;  %v2292_v51 = vpop.f32.mrb[91].mxu1 }
 0x1af   :  { %v2293_v52 = vadd.f32 %v2292_v51, %v2291_v40 }
 0x1b0   :  { %v1420_v45 = vadd.f32 %v2222_v50, %v4375_v63  ;;  %v2223_v46 = vpop.f32.mrb[92].mxu0 }
 0x1b1   :  { %v2224_v47 = vpop.f32.mrb[93].mxu0  ;;  %v2294_v48 = vpop.f32.mrb[92].mxu1 }
 0x1b2   :  { %v4414_v49 = vadd.f32 %v2293_v52, %v1420_v45  ;;  %v2225_v58 = vadd.f32 %v2224_v47, %v2223_v46  ;;  %v2295_v59 = vpop.f32.mrb[93].mxu1 }
 0x1b3   :  { %v2296_v61 = vadd.f32 %v2295_v59, %v2294_v48 }
 0x1b4   :  { %v1425_v54 = vadd.f32 %v2225_v58, %v4378_v8  ;;  %v2226_v55 = vpop.f32.mrb[94].mxu0 }
 0x1b5   :  { %v2227_v56 = vpop.f32.mrb[95].mxu0  ;;  %v2297_v57 = vpop.f32.mrb[94].mxu1 }
 0x1b6   :  { %v1555_v60 = vadd.f32 %v2296_v61, %v1425_v54  ;;  %v2228_v3 = vadd.f32 %v2227_v56, %v2226_v55  ;;  %v2298_v4 = vpop.f32.mrb[95].mxu1 }
 0x1b7   :  { %v2299_v6 = vadd.f32 %v2298_v4, %v2297_v57 }
 0x1b8   :  { %v1430_v0 = vadd.f32 %v2228_v3, %v4381_v18  ;;  %v2229_v63 = vpop.f32.mrb[96].mxu0 }
 0x1b9   :  { %v2230_v1 = vpop.f32.mrb[97].mxu0  ;;  %v2300_v2 = vpop.f32.mrb[96].mxu1 }
 0x1ba   :  { %v1560_v5 = vadd.f32 %v2299_v6, %v1430_v0  ;;  %v2231_v13 = vadd.f32 %v2230_v1, %v2229_v63  ;;  %v2301_v15 = vpop.f32.mrb[97].mxu1 }
 0x1bb   :  { %v2302_v16 = vadd.f32 %v2301_v15, %v2300_v2 }
 0x1bc   :  { %v1435_v9 = vadd.f32 %v2231_v13, %v4384_v27  ;;  %v2232_v10 = vpop.f32.mrb[98].mxu0 }
 0x1bd   :  { %v2233_v8 = vpop.f32.mrb[99].mxu0  ;;  %v2303_v12 = vpop.f32.mrb[98].mxu1 }
 0x1be   :  { %v1565_v14 = vadd.f32 %v2302_v16, %v1435_v9  ;;  %v2234_v23 = vadd.f32 %v2233_v8, %v2232_v10  ;;  %v2304_v24 = vpop.f32.mrb[99].mxu1 }
 0x1bf   :  { %v2305_v26 = vadd.f32 %v2304_v24, %v2303_v12 }
 0x1c0   :  { %v1440_v19 = vadd.f32 %v2234_v23, %v4387_v35  ;;  %v2235_v20 = vpop.f32.mrb[100].mxu0 }
 0x1c1   :  { %v2236_v18 = vpop.f32.mrb[101].mxu0  ;;  %v2306_v21 = vpop.f32.mrb[100].mxu1 }
 0x1c2   :  { %v1570_v22 = vadd.f32 %v2305_v26, %v1440_v19  ;;  %v2237_v32 = vadd.f32 %v2236_v18, %v2235_v20  ;;  %v2307_v33 = vpop.f32.mrb[101].mxu1 }
 0x1c3   :  { %v2308_v34 = vadd.f32 %v2307_v33, %v2306_v21 }
 0x1c4   :  { %v1445_v28 = vadd.f32 %v2237_v32, %v4390_v44  ;;  %v2238_v29 = vpop.f32.mrb[102].mxu0 }
 0x1c5   :  { %v2239_v27 = vpop.f32.mrb[103].mxu0  ;;  %v2309_v30 = vpop.f32.mrb[102].mxu1 }
 0x1c6   :  { %v4421_v31 = vadd.f32 %v2308_v34, %v1445_v28  ;;  %v2240_v41 = vadd.f32 %v2239_v27, %v2238_v29  ;;  %v2310_v42 = vpop.f32.mrb[103].mxu1 }
 0x1c7   :  { %v2311_v43 = vadd.f32 %v2310_v42, %v2309_v30 }
 0x1c8   :  { %v1450_v36 = vadd.f32 %v2240_v41, %v4393_v53  ;;  %v2344_v35 = vpop.f32.mrb[104].mxu0 }
 0x1c9   :  { %v2365_v38 = vpop.f32.mrb[104].mxu1  ;;  %v2345_v39 = vpop.f32.mrb[105].mxu0 }
 0x1ca   :  { %v4424_v40 = vadd.f32 %v2311_v43, %v1450_v36  ;;  %v2346_v50 = vadd.f32 %v2345_v39, %v2344_v35  ;;  %v2366_v51 = vpop.f32.mrb[105].mxu1 }
 0x1cb   :  { %v2367_v52 = vadd.f32 %v2366_v51, %v2365_v38 }
 0x1cc   :  { %v1650_v44 = vadd.f32 %v2346_v50, %v4396_v62  ;;  %v2347_v45 = vpop.f32.mrb[106].mxu0 }
 0x1cd   :  { %v1685_v46 = vadd.f32 %v2367_v52, %v1555_v60  ;;  %v2368_v47 = vpop.f32.mrb[106].mxu1  ;;  %v2348_v48 = vpop.f32.mrb[107].mxu0 }
 0x1ce   :  { %v1713_v58 = vmax.f32 %v1650_v44, 0.0  ;;  %v2349_v59 = vadd.f32 %v2348_v48, %v2347_v45  ;;  %v2369_v61 = vpop.f32.mrb[107].mxu1 }
 0x1cf   :  { %v1720_v54 = vmax.f32 %v1685_v46, 0.0  ;;  %v2370_v55 = vadd.f32 %v2369_v61, %v2368_v47 }
 0x1d0   :  { %1726 = vst [vmem:[%s4477_s3] sm:$0xff] %v1713_v58  ;;  %v1655_v53 = vadd.f32 %v2349_v59, %v4399_v7  ;;  %v2350_v56 = vpop.f32.mrb[108].mxu0 }
 0x1d1   :  { %1733 = vst [vmem:[%s4477_s3 + $0x38] sm:$0xff] %v1720_v54  ;;  %v1690_v62 = vadd.f32 %v2370_v55, %v1560_v5  ;;  %v2371_v57 = vpop.f32.mrb[108].mxu1  ;;  %v2351_v60 = vpop.f32.mrb[109].mxu0 }
 0x1d2   :  { %v1714_v3 = vmax.f32 %v1655_v53, 0.0  ;;  %v2352_v4 = vadd.f32 %v2351_v60, %v2350_v56  ;;  %v2372_v6 = vpop.f32.mrb[109].mxu1 }
 0x1d3   :  { %v1721_v0 = vmax.f32 %v1690_v62, 0.0  ;;  %v2373_v63 = vadd.f32 %v2372_v6, %v2371_v57 }
 0x1d4   :  { %1727 = vst [vmem:[%s4477_s3 + $0x8] sm:$0xff] %v1714_v3  ;;  %v1660_v1 = vadd.f32 %v2352_v4, %v4402_v17  ;;  %v2353_v7 = vpop.f32.mrb[110].mxu0 }
 0x1d5   :  { %1734 = vst [vmem:[%s4477_s3 + $0x40] sm:$0xff] %v1721_v0  ;;  %v1695_v2 = vadd.f32 %v2373_v63, %v1565_v14  ;;  %v2374_v5 = vpop.f32.mrb[110].mxu1  ;;  %v2354_v13 = vpop.f32.mrb[111].mxu0 }
 0x1d6   :  { %v1715_v15 = vmax.f32 %v1660_v1, 0.0  ;;  %v2355_v16 = vadd.f32 %v2354_v13, %v2353_v7  ;;  %v2375_v9 = vpop.f32.mrb[111].mxu1 }
 0x1d7   :  { %v1722_v10 = vmax.f32 %v1695_v2, 0.0  ;;  %v2376_v8 = vadd.f32 %v2375_v9, %v2374_v5 }
 0x1d8   :  { %1728 = vst [vmem:[%s4477_s3 + $0x10] sm:$0xff] %v1715_v15  ;;  %v1665_v12 = vadd.f32 %v2355_v16, %v4405_v11  ;;  %v2356_v17 = vpop.f32.mrb[112].mxu0 }
 0x1d9   :  { %1735 = vst [vmem:[%s4477_s3 + $0x48] sm:$0xff] %v1722_v10  ;;  %v1700_v23 = vadd.f32 %v2376_v8, %v1570_v22  ;;  %v2377_v14 = vpop.f32.mrb[112].mxu1  ;;  %v2357_v24 = vpop.f32.mrb[113].mxu0 }
 0x1da   :  { %v1716_v26 = vmax.f32 %v1665_v12, 0.0  ;;  %v2358_v19 = vadd.f32 %v2357_v24, %v2356_v17  ;;  %v2378_v20 = vpop.f32.mrb[113].mxu1 }
 0x1db   :  { %v1723_v18 = vmax.f32 %v1700_v23, 0.0  ;;  %v2379_v21 = vadd.f32 %v2378_v20, %v2377_v14 }
 0x1dc   :  { %1729 = vst [vmem:[%s4477_s3 + $0x18] sm:$0xff] %v1716_v26  ;;  %v1670_v32 = vadd.f32 %v2358_v19, %v4408_v25  ;;  %v2359_v11 = vpop.f32.mrb[114].mxu0 }
 0x1dd   :  { %1736 = vst [vmem:[%s4477_s3 + $0x50] sm:$0xff] %v1723_v18  ;;  %v1705_v22 = vadd.f32 %v2379_v21, %v4421_v31  ;;  %v2380_v33 = vpop.f32.mrb[114].mxu1  ;;  %v2360_v34 = vpop.f32.mrb[115].mxu0 }
 0x1de   :  { %v1717_v28 = vmax.f32 %v1670_v32, 0.0  ;;  %v2361_v29 = vadd.f32 %v2360_v34, %v2359_v11  ;;  %v2381_v27 = vpop.f32.mrb[115].mxu1 }
 0x1df   :  { %v1724_v30 = vmax.f32 %v1705_v22, 0.0  ;;  %v2382_v41 = vadd.f32 %v2381_v27, %v2380_v33 }
 0x1e0   :  { %1730 = vst [vmem:[%s4477_s3 + $0x20] sm:$0xff] %v1717_v28  ;;  %v1675_v25 = vadd.f32 %v2361_v29, %v4411_v37  ;;  %v2362_v42 = vpop.f32.mrb[116].mxu0 }
 0x1e1   :  { %1737 = vst [vmem:[%s4477_s3 + $0x58] sm:$0xff] %v1724_v30  ;;  %v1710_v31 = vadd.f32 %v2382_v41, %v4424_v40  ;;  %v2363_v43 = vpop.f32.mrb[117].mxu0 }
 0x1e2   :  { %v1718_v36 = vmax.f32 %v1675_v25, 0.0  ;;  %v2364_v35 = vadd.f32 %v2363_v43, %v2362_v42 }
 0x1e3   :  { %v1725_v38 = vmax.f32 %v1710_v31, 0.0 }
 0x1e4   :  { %1731 = vst [vmem:[%s4477_s3 + $0x28] sm:$0xff] %v1718_v36  ;;  %v1680_v39 = vadd.f32 %v2364_v35, %v4414_v49 }
 0x1e5   :  { %1738 = vst [vmem:[%s4477_s3 + $0x60] sm:$0xff] %v1725_v38 }
 0x1e6   :  { %v1719_v37 = vmax.f32 %v1680_v39, 0.0 }
 0x1e8   :  { %1732 = vst [vmem:[%s4477_s3 + $0x30] sm:$0xff] %v1719_v37 }

// kernel: _lambda_.6
= control target key start
LH: loop header
LB: loop body
LE: loop exit
PB: predicated region body
PF: predicated region fallthrough
CT: control target
= control target key end

     0   :  { %s3757_s12 = smov 0   ;;  %s5291_s0 = inlined_call_operand.vmem [shape: f32[512,2048], index: 0, kind: input, shape index: {}]   ;;  %s5292_s1 = inlined_call_operand.vmem [shape: f32[2048,64], index: 1, kind: input, shape index: {}]   ;;  %s5293_s2 = inlined_call_operand.vmem [shape: f32[1,64], index: 2, kind: input, shape index: {}]   ;;  %s5294_s3 = inlined_call_operand.vmem [shape: f32[512,64], index: 3, kind: output, shape index: {}]  }
   0x1 LB: > { %s2873_s13 = sadd.s32 4294967295, %s3734_s12   ;;  %p2877_p0 = scmp.ge.s32.totalorder %s3734_s12, 1  ;;  %s3734_s12 = sphi %s3757_s12, %s13_s12  }
   0x2   : > { %p139_p1 = scmp.lt.s32.totalorder %s3734_s12, 3 }
   0x4   : > { %p140_p2 = pnand %p2877_p0, %p139_p1 }
   0x5   : > { %v689_v0 = vld [vmem:[%s5292_s1] sm:$0xff] (!%p140_p2)  ;;  %v690_v1 = vld [vmem:[%s5292_s1 + $0x8] sm:$0xff] (!%p140_p2)  ;;  %v3736_v3 = vmov (!%p140_p2), 0.0|0.0   ;;  %v691_v6 = vld [vmem:[%s5292_s1 + $0x10] sm:$0xff] (!%p140_p2)  ;;  %s2878_s7 = sshll.u32 (!%p140_p2), %s2873_s13, 5  ;;  %vm2784_vm0 = vcmask (!%p140_p2), 523264  }
   0x6   : > { %143 = sbr.rel (%p140_p2) target bundleno = 798 (0x31e), region = 32  ;;  %v817_v2 = vld [vmem:[%s5292_s1 + $0x400] sm:$0xff] (!%p140_p2)  ;;  %2887 = vmatprep.subr.bf16.mxu1 (!%p140_p2), %v3736_v3  ;;  %3079 = vmatprep.subr.bf16.mxu0 (!%p140_p2), %v3736_v3  ;;  %v2888_v4 = vpack.c.bf16 (!%p140_p2), %v690_v1, %v689_v0  ;;  %v818_v5 = vld [vmem:[%s5292_s1 + $0x408] sm:$0xff] (!%p140_p2)  ;;  %v692_v7 = vld [vmem:[%s5292_s1 + $0x18] sm:$0xff] (!%p140_p2)  ;;  %p165_p3 = scmp.lt.s32.totalorder (!%p140_p2), %s2878_s7, 63 }
   0x7   : > { %v3080_v8 = vpack.c.bf16 (!%p140_p2), %v818_v5, %v817_v2  ;;  %v819_v9 = vld [vmem:[%s5292_s1 + $0x410] sm:$0xff] (!%p140_p2)  ;;  %v820_v10 = vld [vmem:[%s5292_s1 + $0x418] sm:$0xff] (!%p140_p2)  ;;  %v2891_v11 = vpack.c.bf16 (!%p140_p2), %v692_v7, %v691_v6  ;;  %v693_v13 = vld [vmem:[%s5292_s1 + $0x20] sm:$0xff] (!%p140_p2) }
   0x8   : > { %2889 = vmatpush1.bf16.msra.mxu1 (!%p140_p2), %v2888_v4  ;;  %v3083_v12 = vpack.c.bf16 (!%p140_p2), %v820_v10, %v819_v9  ;;  %v694_v14 = vld [vmem:[%s5292_s1 + $0x28] sm:$0xff] (!%p140_p2)  ;;  %v821_v15 = vld [vmem:[%s5292_s1 + $0x420] sm:$0xff] (!%p140_p2)  ;;  %v695_v19 = vld [vmem:[%s5292_s1 + $0x30] sm:$0xff] (!%p140_p2) }
   0x9   : > { %3081 = vmatpush1.bf16.msra.mxu0 (!%p140_p2), %v3080_v8  ;;  %2890 = vmatprep.subr.bf16.mxu1 (!%p140_p2), %v3736_v3  ;;  %v822_v16 = vld [vmem:[%s5292_s1 + $0x428] sm:$0xff] (!%p140_p2)  ;;  %v2894_v17 = vpack.c.bf16 (!%p140_p2), %v694_v14, %v693_v13  ;;  %v696_v20 = vld [vmem:[%s5292_s1 + $0x38] sm:$0xff] (!%p140_p2)  ;;  %v823_v21 = vld [vmem:[%s5292_s1 + $0x430] sm:$0xff] (!%p140_p2) }
   0xa   : > { %3082 = vmatprep.subr.bf16.mxu0 (!%p140_p2), %v3736_v3  ;;  %v3086_v18 = vpack.c.bf16 (!%p140_p2), %v822_v16, %v821_v15  ;;  %v824_v22 = vld [vmem:[%s5292_s1 + $0x438] sm:$0xff] (!%p140_p2)  ;;  %v2897_v23 = vpack.c.bf16 (!%p140_p2), %v696_v20, %v695_v19  ;;  %v697_v25 = vld [vmem:[%s5292_s1 + $0x40] sm:$0xff] (!%p140_p2)  ;;  %v698_v26 = vld [vmem:[%s5292_s1 + $0x48] sm:$0xff] (!%p140_p2) }
   0xb   : > { %v3089_v24 = vpack.c.bf16 (!%p140_p2), %v824_v22, %v823_v21  ;;  %v825_v27 = vld [vmem:[%s5292_s1 + $0x440] sm:$0xff] (!%p140_p2)  ;;  %v826_v28 = vld [vmem:[%s5292_s1 + $0x448] sm:$0xff] (!%p140_p2)  ;;  %v2900_v29 = vpack.c.bf16 (!%p140_p2), %v698_v26, %v697_v25  ;;  %v699_v31 = vld [vmem:[%s5292_s1 + $0x50] sm:$0xff] (!%p140_p2) }
   0xc   : > { %2892 = vmatpush1.bf16.msra.mxu1 (!%p140_p2), %v2891_v11  ;;  %v3092_v30 = vpack.c.bf16 (!%p140_p2), %v826_v28, %v825_v27  ;;  %v700_v32 = vld [vmem:[%s5292_s1 + $0x58] sm:$0xff] (!%p140_p2)  ;;  %v827_v33 = vld [vmem:[%s5292_s1 + $0x450] sm:$0xff] (!%p140_p2)  ;;  %v701_v37 = vld [vmem:[%s5292_s1 + $0x60] sm:$0xff] (!%p140_p2) }
   0xd   : > { %3084 = vmatpush1.bf16.msra.mxu0 %v3083_v12  ;;  %2893 = vmatprep.subr.bf16.mxu1 %v3736_v3  ;;  %s5296_s7 = smov (!%p165_p3, %s2878_s7), 63  ;;  %v828_v34 = vld [vmem:[%s5292_s1 + $0x458] sm:$0xff]  ;;  %v2903_v35 = vpack.c.bf16 %v700_v32, %v699_v31  ;;  %v702_v38 = vld [vmem:[%s5292_s1 + $0x68] sm:$0xff]  ;;  %v829_v39 = vld [vmem:[%s5292_s1 + $0x460] sm:$0xff] }
   0xe   : > { %3085 = vmatprep.subr.bf16.mxu0 %v3736_v3  ;;  %s2886_s29 = sshll.u32 %s5296_s7, 7  ;;  %v3095_v36 = vpack.c.bf16 %v828_v34, %v827_v33  ;;  %v830_v40 = vld [vmem:[%s5292_s1 + $0x468] sm:$0xff]  ;;  %v2906_v43 = vpack.c.bf16 %v702_v38, %v701_v37  ;;  %v703_v45 = vld [vmem:[%s5292_s1 + $0x70] sm:$0xff]  ;;  %v704_v46 = vld [vmem:[%s5292_s1 + $0x78] sm:$0xff]  ;;  %s2882_s26 = sshll.u32 %s5296_s7, 3 }
   0xf   : > { %s3853_s13 = scalar_lea.vmem %s5291_s0, %s2886_s29  ;;  %v3098_v44 = vpack.c.bf16 %v830_v40, %v829_v39  ;;  %v831_v47 = vld [vmem:[%s5292_s1 + $0x470] sm:$0xff]  ;;  %v832_v48 = vld [vmem:[%s5292_s1 + $0x478] sm:$0xff]  ;;  %v2909_v49 = vpack.c.bf16 %v704_v46, %v703_v45  ;;  %v705_v51 = vld [vmem:[%s5292_s1 + $0x80] sm:$0xff]  ;;  %s5191_s29 = scalar_lea.vmem %s5294_s3, %s2882_s26 }
  0x10   : > { %2895 = vmatpush1.bf16.msra.mxu1 %v2894_v17  ;;  %v178_v41 = vld [vmem:[%s3853_s13 + $0x8] sm:$0xff]  ;;  %v3101_v50 = vpack.c.bf16 %v832_v48, %v831_v47  ;;  %v833_v53 = vld [vmem:[%s5292_s1 + $0x480] sm:$0xff]  ;;  %v707_v57 = vld [vmem:[%s5292_s1 + $0x90] sm:$0xff] }
  0x11   : > { %3087 = vmatpush1.bf16.msra.mxu0 %v3086_v18  ;;  %2896 = vmatprep.subr.bf16.mxu1 %v3736_v3  ;;  %v186_v42 = vld [vmem:[%s3853_s13 + $0x48] sm:$0xff]  ;;  %v708_v58 = vld [vmem:[%s5292_s1 + $0x98] sm:$0xff]  ;;  %v835_v59 = vld [vmem:[%s5292_s1 + $0x490] sm:$0xff] }
  0x12   : > { %3088 = vmatprep.subr.bf16.mxu0 %v3736_v3  ;;  %1016 = vmatprep.mubr.f32.mxu1 %v178_v41  ;;  %v706_v52 = vld [vmem:[%s5292_s1 + $0x88] sm:$0xff]  ;;  %v836_v60 = vld [vmem:[%s5292_s1 + $0x498] sm:$0xff]  ;;  %v2915_v61 = vpack.c.bf16 %v708_v58, %v707_v57  ;;  %v709_v63 = vld [vmem:[%s5292_s1 + $0xa0] sm:$0xff] }
  0x13   : > { %1916 = vmatprep.mubr.f32.mxu0 %v186_v42  ;;  %v834_v54 = vld [vmem:[%s5292_s1 + $0x488] sm:$0xff]  ;;  %v2912_v55 = vpack.c.bf16 %v706_v52, %v705_v51  ;;  %v3107_v62 = vpack.c.bf16 %v836_v60, %v835_v59  ;;  %v837_v1 = vld [vmem:[%s5292_s1 + $0x4a0] sm:$0xff]  ;;  %v711_v6 = vld [vmem:[%s5292_s1 + $0xb0] sm:$0xff] }
  0x14   : > { %2898 = vmatpush1.bf16.msra.mxu1 %v2897_v23  ;;  %v3104_v56 = vpack.c.bf16 %v834_v54, %v833_v53  ;;  %v710_v0 = vld [vmem:[%s5292_s1 + $0xa8] sm:$0xff]  ;;  %v712_v7 = vld [vmem:[%s5292_s1 + $0xb8] sm:$0xff]  ;;  %v839_v8 = vld [vmem:[%s5292_s1 + $0x4b0] sm:$0xff] }
  0x15   : > { %3090 = vmatpush1.bf16.msra.mxu0 %v3089_v24  ;;  %2899 = vmatprep.subr.bf16.mxu1 %v3736_v3  ;;  %v838_v2 = vld [vmem:[%s5292_s1 + $0x4a8] sm:$0xff]  ;;  %v2918_v4 = vpack.c.bf16 %v710_v0, %v709_v63  ;;  %v840_v9 = vld [vmem:[%s5292_s1 + $0x4b8] sm:$0xff]  ;;  %v2921_v10 = vpack.c.bf16 %v712_v7, %v711_v6  ;;  %v713_v12 = vld [vmem:[%s5292_s1 + $0xc0] sm:$0xff] }
  0x16   : > { %3091 = vmatprep.subr.bf16.mxu0 %v3736_v3  ;;  %v3110_v5 = vpack.c.bf16 %v838_v2, %v837_v1  ;;  %v3113_v11 = vpack.c.bf16 %v840_v9, %v839_v8  ;;  %v714_v13 = vld [vmem:[%s5292_s1 + $0xc8] sm:$0xff]  ;;  %v841_v14 = vld [vmem:[%s5292_s1 + $0x4c0] sm:$0xff]  ;;  %v715_v18 = vld [vmem:[%s5292_s1 + $0xd0] sm:$0xff] }
  0x17   : > { %v842_v15 = vld [vmem:[%s5292_s1 + $0x4c8] sm:$0xff]  ;;  %v2924_v16 = vpack.c.bf16 %v714_v13, %v713_v12  ;;  %v716_v19 = vld [vmem:[%s5292_s1 + $0xd8] sm:$0xff]  ;;  %v843_v20 = vld [vmem:[%s5292_s1 + $0x4d0] sm:$0xff] }
  0x18   : > { %2901 = vmatpush1.bf16.msra.mxu1 %v2900_v29  ;;  %v3116_v17 = vpack.c.bf16 %v842_v15, %v841_v14  ;;  %v844_v21 = vld [vmem:[%s5292_s1 + $0x4d8] sm:$0xff]  ;;  %v2927_v22 = vpack.c.bf16 %v716_v19, %v715_v18  ;;  %v717_v24 = vld [vmem:[%s5292_s1 + $0xe0] sm:$0xff]  ;;  %v718_v25 = vld [vmem:[%s5292_s1 + $0xe8] sm:$0xff] }
  0x19   : > { %3093 = vmatpush1.bf16.msra.mxu0 %v3092_v30  ;;  %2902 = vmatprep.subr.bf16.mxu1 %v3736_v3  ;;  %v3119_v23 = vpack.c.bf16 %v844_v21, %v843_v20  ;;  %v845_v26 = vld [vmem:[%s5292_s1 + $0x4e0] sm:$0xff]  ;;  %v846_v27 = vld [vmem:[%s5292_s1 + $0x4e8] sm:$0xff]  ;;  %v2930_v28 = vpack.c.bf16 %v718_v25, %v717_v24  ;;  %v719_v30 = vld [vmem:[%s5292_s1 + $0xf0] sm:$0xff] }
  0x1a   : > { %3094 = vmatprep.subr.bf16.mxu0 %v3736_v3  ;;  %v3122_v29 = vpack.c.bf16 %v846_v27, %v845_v26  ;;  %v720_v31 = vld [vmem:[%s5292_s1 + $0xf8] sm:$0xff]  ;;  %v847_v32 = vld [vmem:[%s5292_s1 + $0x4f0] sm:$0xff]  ;;  %v722_v37 = vld [vmem:[%s5292_s1 + $0x108] sm:$0xff] }
  0x1b   : > { %v848_v33 = vld [vmem:[%s5292_s1 + $0x4f8] sm:$0xff]  ;;  %v2933_v34 = vpack.c.bf16 %v720_v31, %v719_v30  ;;  %v849_v38 = vld [vmem:[%s5292_s1 + $0x500] sm:$0xff]  ;;  %v850_v39 = vld [vmem:[%s5292_s1 + $0x508] sm:$0xff] }
  0x1c   : > { %2904 = vmatpush1.bf16.msra.mxu1 %v2903_v35  ;;  %v3125_v35 = vpack.c.bf16 %v848_v33, %v847_v32  ;;  %v177_v40 = vld [vmem:[%s3853_s13] sm:$0xff]  ;;  %v3128_v45 = vpack.c.bf16 %v850_v39, %v849_v38  ;;  %v723_v46 = vld [vmem:[%s5292_s1 + $0x110] sm:$0xff]  ;;  %v724_v47 = vld [vmem:[%s5292_s1 + $0x118] sm:$0xff] }
  0x1d   : > { %3096 = vmatpush1.bf16.msra.mxu0 %v3095_v36  ;;  %2905 = vmatprep.subr.bf16.mxu1 %v3736_v3  ;;  %v721_v36 = vld [vmem:[%s5292_s1 + $0x100] sm:$0xff]  ;;  %v851_v48 = vld [vmem:[%s5292_s1 + $0x510] sm:$0xff]  ;;  %v210_v52 = vld [vmem:[%s3853_s13 + $0x108] sm:$0xff]  ;;  %v2939_v53 = vpack.c.bf16 %v724_v47, %v723_v46 }
  0x1e   : > { %3097 = vmatprep.subr.bf16.mxu0 %v3736_v3  ;;  %v2936_v41 = vpack.c.bf16 %v722_v37, %v721_v36  ;;  %v185_v42 = vld [vmem:[%s3853_s13 + $0x40] sm:$0xff]  ;;  %v218_v54 = vld [vmem:[%s3853_s13 + $0x148] sm:$0xff]  ;;  %v727_v2 = vld [vmem:[%s5292_s1 + $0x130] sm:$0xff] }
  0x1f   : > { %v201_v51 = vld [vmem:[%s3853_s13 + $0xc0] sm:$0xff]  ;;  %v726_v57 = vld [vmem:[%s5292_s1 + $0x128] sm:$0xff]  ;;  %v856_v6 = vld [vmem:[%s5292_s1 + $0x538] sm:$0xff] }
  0x20   : > { %2907 = vmatpush1.bf16.msra.mxu1 %v2906_v43  ;;  %v194_v43 = vld [vmem:[%s3853_s13 + $0x88] sm:$0xff]  ;;  %v853_v58 = vld [vmem:[%s5292_s1 + $0x520] sm:$0xff]  ;;  %v732_v24 = vld [vmem:[%s5292_s1 + $0x158] sm:$0xff] }
  0x21   : > { %3099 = vmatpush1.bf16.msra.mxu0 %v3098_v44  ;;  %2908 = vmatprep.subr.bf16.mxu1 %v3736_v3  ;;  %v202_v44 = vld [vmem:[%s3853_s13 + $0xc8] sm:$0xff]  ;;  %v209_v60 = vld [vmem:[%s3853_s13 + $0x100] sm:$0xff]  ;;  %v859_v25 = vld [vmem:[%s5292_s1 + $0x550] sm:$0xff] }
  0x22   : > { %3100 = vmatprep.subr.bf16.mxu0 %v3736_v3  ;;  %v854_v59 = vld [vmem:[%s5292_s1 + $0x528] sm:$0xff]  ;;  %v225_v7 = vld [vmem:[%s3853_s13 + $0x180] sm:$0xff]  ;;  %v860_v26 = vld [vmem:[%s5292_s1 + $0x558] sm:$0xff] }
  0x23   : > { %v234_v0 = vld [vmem:[%s3853_s13 + $0x1c8] sm:$0xff]  ;;  %v3134_v1 = vpack.c.bf16 %v854_v59, %v853_v58  ;;  %v233_v8 = vld [vmem:[%s3853_s13 + $0x1c0] sm:$0xff]  ;;  %v3143_v32 = vpack.c.bf16 %v860_v26, %v859_v25  ;;  %v864_v46 = vld [vmem:[%s5292_s1 + $0x578] sm:$0xff] }
  0x24   : > { %2910 = vmatpush1.bf16.msra.mxu1 %v2909_v49  ;;  %v852_v49 = vld [vmem:[%s5292_s1 + $0x518] sm:$0xff]  ;;  %v242_v9 = vld [vmem:[%s3853_s13 + $0x208] sm:$0xff]  ;;  %v729_v13 = vld [vmem:[%s5292_s1 + $0x140] sm:$0xff] }
  0x25   : > { %3102 = vmatpush1.bf16.msra.mxu0 %v3101_v50  ;;  %2911 = vmatprep.subr.bf16.mxu1 %v3736_v3  ;;  %v193_v50 = vld [vmem:[%s3853_s13 + $0x80] sm:$0xff]  ;;  %v730_v14 = vld [vmem:[%s5292_s1 + $0x148] sm:$0xff] }
  0x26   : > { %3103 = vmatprep.subr.bf16.mxu0 %v3736_v3  ;;  %v857_v15 = vld [vmem:[%s5292_s1 + $0x540] sm:$0xff]  ;;  %v258_v19 = vld [vmem:[%s3853_s13 + $0x288] sm:$0xff]  ;;  %v2948_v20 = vpack.c.bf16 %v730_v14, %v729_v13 }
  0x27   : > { %v249_v18 = vld [vmem:[%s3853_s13 + $0x240] sm:$0xff]  ;;  %v266_v21 = vld [vmem:[%s3853_s13 + $0x2c8] sm:$0xff] }
  0x28   : > { %2913 = vmatpush1.bf16.msra.mxu1 %v2912_v55  ;;  %v3131_v55 = vpack.c.bf16 %v852_v49, %v851_v48  ;;  %v257_v27 = vld [vmem:[%s3853_s13 + $0x280] sm:$0xff]  ;;  %v282_v31 = vld [vmem:[%s3853_s13 + $0x348] sm:$0xff] }
  0x29   : > { %3105 = vmatpush1.bf16.msra.mxu0 %v3104_v56  ;;  %2914 = vmatprep.subr.bf16.mxu1 %v3736_v3  ;;  %v725_v56 = vld [vmem:[%s5292_s1 + $0x120] sm:$0xff]  ;;  %v862_v36 = vld [vmem:[%s5292_s1 + $0x568] sm:$0xff] }
  0x2a   : > { %3106 = vmatprep.subr.bf16.mxu0 %v3736_v3  ;;  %v2942_v63 = vpack.c.bf16 %v726_v57, %v725_v56  ;;  %v733_v33 = vld [vmem:[%s5292_s1 + $0x160] sm:$0xff]  ;;  %v290_v39 = vld [vmem:[%s3853_s13 + $0x388] sm:$0xff] }
  0x2b   : > { %v273_v37 = vld [vmem:[%s3853_s13 + $0x300] sm:$0xff]  ;;  %v306_v49 = vld [vmem:[%s3853_s13 + $0x408] sm:$0xff] }
  0x2c   : > { %2916 = vmatpush1.bf16.msra.mxu1 %v2915_v61  ;;  %v217_v61 = vld [vmem:[%s3853_s13 + $0x140] sm:$0xff]  ;;  %v866_v56 = vld [vmem:[%s5292_s1 + $0x588] sm:$0xff] }
  0x2d   : > { %3108 = vmatpush1.bf16.msra.mxu0 %v3107_v62  ;;  %2917 = vmatprep.subr.bf16.mxu1 %v3736_v3  ;;  %v226_v62 = vld [vmem:[%s3853_s13 + $0x188] sm:$0xff]  ;;  %v281_v38 = vld [vmem:[%s3853_s13 + $0x340] sm:$0xff] }
  0x2e   : > { %3109 = vmatprep.subr.bf16.mxu0 %v3736_v3  ;;  %v289_v47 = vld [vmem:[%s3853_s13 + $0x380] sm:$0xff]  ;;  %v322_v59 = vld [vmem:[%s3853_s13 + $0x488] sm:$0xff] }
  0x2f   : > { %v297_v48 = vld [vmem:[%s3853_s13 + $0x3c0] sm:$0xff]  ;;  %v870_v13 = vld [vmem:[%s5292_s1 + $0x5a8] sm:$0xff] }
  0x30   : > { %2919 = vmatpush1.bf16.msra.mxu1 %v2918_v4  ;;  %v728_v4 = vld [vmem:[%s5292_s1 + $0x138] sm:$0xff]  ;;  %v305_v57 = vld [vmem:[%s3853_s13 + $0x400] sm:$0xff]  ;;  %v370_v26 = vld [vmem:[%s3853_s13 + $0x608] sm:$0xff] }
  0x31   : > { %3111 = vmatpush1.bf16.msra.mxu0 %v3110_v5  ;;  %2920 = vmatprep.subr.bf16.mxu1 %v3736_v3  ;;  %v855_v5 = vld [vmem:[%s5292_s1 + $0x530] sm:$0xff]  ;;  %v313_v58 = vld [vmem:[%s3853_s13 + $0x440] sm:$0xff] }
  0x32   : > { %3112 = vmatprep.subr.bf16.mxu0 %v3736_v3  ;;  %v3137_v12 = vpack.c.bf16 %v856_v6, %v855_v5  ;;  %v329_v5 = vld [vmem:[%s3853_s13 + $0x4c0] sm:$0xff]  ;;  %v338_v6 = vld [vmem:[%s3853_s13 + $0x508] sm:$0xff] }
  0x33   : > { %v337_v14 = vld [vmem:[%s3853_s13 + $0x500] sm:$0xff] }
  0x34   : > { %2922 = vmatpush1.bf16.msra.mxu1 %v2921_v10  ;;  %v2945_v10 = vpack.c.bf16 %v728_v4, %v727_v2  ;;  %v868_v2 = vld [vmem:[%s5292_s1 + $0x598] sm:$0xff]  ;;  %v321_v4 = vld [vmem:[%s3853_s13 + $0x480] sm:$0xff] }
  0x35   : > { %3114 = vmatpush1.bf16.msra.mxu0 %v3113_v11  ;;  %2923 = vmatprep.subr.bf16.mxu1 %v3736_v3  ;;  %v250_v11 = vld [vmem:[%s3853_s13 + $0x248] sm:$0xff]  ;;  %v361_v25 = vld [vmem:[%s3853_s13 + $0x5c0] sm:$0xff] }
  0x36   : > { %3115 = vmatprep.subr.bf16.mxu0 %v3736_v3 }
  0x38   : > { %2925 = vmatpush1.bf16.msra.mxu1 %v2924_v16  ;;  %v858_v16 = vld [vmem:[%s5292_s1 + $0x548] sm:$0xff] }
  0x39   : > { %3117 = vmatpush1.bf16.msra.mxu0 %v3116_v17  ;;  %2926 = vmatprep.subr.bf16.mxu1 %v3736_v3  ;;  %v241_v17 = vld [vmem:[%s3853_s13 + $0x200] sm:$0xff] }
  0x3a   : > { %3118 = vmatprep.subr.bf16.mxu0 %v3736_v3 }
  0x3c   : > { %2928 = vmatpush1.bf16.msra.mxu1 %v2927_v22  ;;  %v3140_v22 = vpack.c.bf16 %v858_v16, %v857_v15  ;;  %v345_v15 = vld [vmem:[%s3853_s13 + $0x540] sm:$0xff]  ;;  %v354_v16 = vld [vmem:[%s3853_s13 + $0x588] sm:$0xff] }
  0x3d   : > { %3120 = vmatpush1.bf16.msra.mxu0 %v3119_v23  ;;  %2929 = vmatprep.subr.bf16.mxu1 %v3736_v3  ;;  %v731_v23 = vld [vmem:[%s5292_s1 + $0x150] sm:$0xff] }
  0x3e   : > { %3121 = vmatprep.subr.bf16.mxu0 %v3736_v3  ;;  %v2951_v30 = vpack.c.bf16 %v732_v24, %v731_v23  ;;  %v872_v23 = vld [vmem:[%s5292_s1 + $0x5b8] sm:$0xff]  ;;  %v353_v24 = vld [vmem:[%s3853_s13 + $0x580] sm:$0xff] }
  0x40   : > { %2931 = vmatpush1.bf16.msra.mxu1 %v2930_v28  ;;  %v265_v28 = vld [vmem:[%s3853_s13 + $0x2c0] sm:$0xff] }
  0x41   : > { %3123 = vmatpush1.bf16.msra.mxu0 %v3122_v29  ;;  %2932 = vmatprep.subr.bf16.mxu1 %v3736_v3  ;;  %v274_v29 = vld [vmem:[%s3853_s13 + $0x308] sm:$0xff] }
  0x42   : > { %3124 = vmatprep.subr.bf16.mxu0 %v3736_v3 }
  0x44   : > { %2934 = vmatpush1.bf16.msra.mxu1 %v2933_v34  ;;  %v734_v34 = vld [vmem:[%s5292_s1 + $0x168] sm:$0xff] }
  0x45   : > { %3126 = vmatpush1.bf16.msra.mxu0 %v3125_v35  ;;  %2935 = vmatprep.subr.bf16.mxu1 %v3736_v3  ;;  %v861_v35 = vld [vmem:[%s5292_s1 + $0x560] sm:$0xff] }
  0x46   : > { %3127 = vmatprep.subr.bf16.mxu0 %v3736_v3 }
  0x47   : > { %1017 = vmatmul.mubr.f32.vlgmr.msra.gmra.mrb[0].mxu1 %v177_v40  ;;  %v2954_v40 = vpack.c.bf16 %v734_v34, %v733_v33  ;;  %v874_v33 = vld [vmem:[%s5292_s1 + $0x5c8] sm:$0xff]  ;;  %v369_v34 = vld [vmem:[%s3853_s13 + $0x600] sm:$0xff] }
  0x48   : > { %1917 = vmatmul.mubr.f32.vlgmr.msra.gmra.mrb[0].mxu0 %v185_v42  ;;  %2937 = vmatpush1.bf16.msra.mxu1 %v2936_v41  ;;  %v298_v41 = vld [vmem:[%s3853_s13 + $0x3c8] sm:$0xff]  ;;  %v3146_v42 = vpack.c.bf16 %v862_v36, %v861_v35  ;;  %v377_v35 = vld [vmem:[%s3853_s13 + $0x640] sm:$0xff] }
  0x49   : > { %1021 = vmatprep.mubr.f32.mxu1 %v194_v43  ;;  %1921 = vmatprep.mubr.f32.mxu0 %v202_v44  ;;  %v735_v43 = vld [vmem:[%s5292_s1 + $0x170] sm:$0xff]  ;;  %v736_v44 = vld [vmem:[%s5292_s1 + $0x178] sm:$0xff]  ;;  %v386_v36 = vld [vmem:[%s3853_s13 + $0x688] sm:$0xff] }
  0x4a   : > { %3129 = vmatpush1.bf16.msra.mxu0 %v3128_v45  ;;  %2938 = vmatprep.subr.bf16.mxu1 %v3736_v3  ;;  %v863_v45 = vld [vmem:[%s5292_s1 + $0x570] sm:$0xff] }
  0x4b   : > { %1022 = vmatmul.mubr.f32.gmra.mrb[2].mxu1 %v193_v50  ;;  %3130 = vmatprep.subr.bf16.mxu0 %v3736_v3  ;;  %v2957_v50 = vpack.c.bf16 %v736_v44, %v735_v43  ;;  %v876_v43 = vld [vmem:[%s5292_s1 + $0x5d8] sm:$0xff]  ;;  %v385_v44 = vld [vmem:[%s3853_s13 + $0x680] sm:$0xff] }
  0x4c   : > { %1922 = vmatmul.mubr.f32.gmra.mrb[2].mxu0 %v201_v51  ;;  %1026 = vmatprep.mubr.f32.mxu1 %v210_v52  ;;  %v314_v51 = vld [vmem:[%s3853_s13 + $0x448] sm:$0xff]  ;;  %v3149_v52 = vpack.c.bf16 %v864_v46, %v863_v45  ;;  %v393_v45 = vld [vmem:[%s3853_s13 + $0x6c0] sm:$0xff] }
  0x4d   : > { %1926 = vmatprep.mubr.f32.mxu0 %v218_v54  ;;  %2940 = vmatpush1.bf16.msra.mxu1 %v2939_v53  ;;  %v737_v53 = vld [vmem:[%s5292_s1 + $0x180] sm:$0xff]  ;;  %v738_v54 = vld [vmem:[%s5292_s1 + $0x188] sm:$0xff] }
  0x4e   : > { %3132 = vmatpush1.bf16.msra.mxu0 %v3131_v55  ;;  %2941 = vmatprep.subr.bf16.mxu1 %v3736_v3  ;;  %v865_v55 = vld [vmem:[%s5292_s1 + $0x580] sm:$0xff]  ;;  %v402_v46 = vld [vmem:[%s3853_s13 + $0x708] sm:$0xff] }
  0x4f   : > { %1027 = vmatmul.mubr.f32.gmra.mrb[4].mxu1 %v209_v60  ;;  %3133 = vmatprep.subr.bf16.mxu0 %v3736_v3  ;;  %v2960_v60 = vpack.c.bf16 %v738_v54, %v737_v53  ;;  %v878_v53 = vld [vmem:[%s5292_s1 + $0x5e8] sm:$0xff]  ;;  %v401_v54 = vld [vmem:[%s3853_s13 + $0x700] sm:$0xff] }
  0x50   : > { %1927 = vmatmul.mubr.f32.gmra.mrb[4].mxu0 %v217_v61  ;;  %1031 = vmatprep.mubr.f32.mxu1 %v226_v62  ;;  %v330_v61 = vld [vmem:[%s3853_s13 + $0x4c8] sm:$0xff]  ;;  %v3152_v62 = vpack.c.bf16 %v866_v56, %v865_v55  ;;  %v409_v55 = vld [vmem:[%s3853_s13 + $0x740] sm:$0xff] }
  0x51   : > { %1931 = vmatprep.mubr.f32.mxu0 %v234_v0  ;;  %2943 = vmatpush1.bf16.msra.mxu1 %v2942_v63  ;;  %v739_v63 = vld [vmem:[%s5292_s1 + $0x190] sm:$0xff]  ;;  %v740_v0 = vld [vmem:[%s5292_s1 + $0x198] sm:$0xff]  ;;  %v418_v56 = vld [vmem:[%s3853_s13 + $0x788] sm:$0xff] }
  0x52   : > { %3135 = vmatpush1.bf16.msra.mxu0 %v3134_v1  ;;  %2944 = vmatprep.subr.bf16.mxu1 %v3736_v3  ;;  %v867_v1 = vld [vmem:[%s5292_s1 + $0x590] sm:$0xff] }
  0x53   : > { %1032 = vmatmul.mubr.f32.gmra.mrb[6].mxu1 %v225_v7  ;;  %3136 = vmatprep.subr.bf16.mxu0 %v3736_v3  ;;  %v2963_v7 = vpack.c.bf16 %v740_v0, %v739_v63  ;;  %v880_v63 = vld [vmem:[%s5292_s1 + $0x5f8] sm:$0xff]  ;;  %v417_v0 = vld [vmem:[%s3853_s13 + $0x780] sm:$0xff] }
  0x54   : > { %1932 = vmatmul.mubr.f32.gmra.mrb[6].mxu0 %v233_v8  ;;  %1036 = vmatprep.mubr.f32.mxu1 %v242_v9  ;;  %v346_v8 = vld [vmem:[%s3853_s13 + $0x548] sm:$0xff]  ;;  %v3155_v9 = vpack.c.bf16 %v868_v2, %v867_v1  ;;  %v425_v1 = vld [vmem:[%s3853_s13 + $0x7c0] sm:$0xff] }
  0x55   : > { %1936 = vmatprep.mubr.f32.mxu0 %v250_v11  ;;  %2946 = vmatpush1.bf16.msra.mxu1 %v2945_v10  ;;  %v741_v10 = vld [vmem:[%s5292_s1 + $0x1a0] sm:$0xff]  ;;  %v742_v11 = vld [vmem:[%s5292_s1 + $0x1a8] sm:$0xff] }
  0x56   : > { %3138 = vmatpush1.bf16.msra.mxu0 %v3137_v12  ;;  %2947 = vmatprep.subr.bf16.mxu1 %v3736_v3  ;;  %v869_v12 = vld [vmem:[%s5292_s1 + $0x5a0] sm:$0xff]  ;;  %v434_v2 = vld [vmem:[%s3853_s13 + $0x808] sm:$0xff] }
  0x57   : > { %1037 = vmatmul.mubr.f32.gmra.mrb[8].mxu1 %v241_v17  ;;  %3139 = vmatprep.subr.bf16.mxu0 %v3736_v3  ;;  %v2966_v17 = vpack.c.bf16 %v742_v11, %v741_v10  ;;  %v458_v10 = vld [vmem:[%s3853_s13 + $0x8c8] sm:$0xff]  ;;  %v449_v11 = vld [vmem:[%s3853_s13 + $0x880] sm:$0xff] }
  0x58   : > { %1937 = vmatmul.mubr.f32.gmra.mrb[8].mxu0 %v249_v18  ;;  %1041 = vmatprep.mubr.f32.mxu1 %v258_v19  ;;  %v362_v18 = vld [vmem:[%s3853_s13 + $0x5c8] sm:$0xff]  ;;  %v3158_v19 = vpack.c.bf16 %v870_v13, %v869_v12  ;;  %v457_v12 = vld [vmem:[%s3853_s13 + $0x8c0] sm:$0xff] }
  0x59   : > { %1941 = vmatprep.mubr.f32.mxu0 %v266_v21  ;;  %2949 = vmatpush1.bf16.msra.mxu1 %v2948_v20  ;;  %v743_v20 = vld [vmem:[%s5292_s1 + $0x1b0] sm:$0xff]  ;;  %v744_v21 = vld [vmem:[%s5292_s1 + $0x1b8] sm:$0xff]  ;;  %v466_v13 = vld [vmem:[%s3853_s13 + $0x908] sm:$0xff] }
  0x5a   : > { %3141 = vmatpush1.bf16.msra.mxu0 %v3140_v22  ;;  %2950 = vmatprep.subr.bf16.mxu1 %v3736_v3  ;;  %v871_v22 = vld [vmem:[%s5292_s1 + $0x5b0] sm:$0xff] }
  0x5b   : > { %1042 = vmatmul.mubr.f32.gmra.mrb[10].mxu1 %v257_v27  ;;  %3142 = vmatprep.subr.bf16.mxu0 %v3736_v3  ;;  %v2969_v27 = vpack.c.bf16 %v744_v21, %v743_v20  ;;  %v489_v20 = vld [vmem:[%s3853_s13 + $0x9c0] sm:$0xff]  ;;  %v498_v21 = vld [vmem:[%s3853_s13 + $0xa08] sm:$0xff] }
  0x5c   : > { %1942 = vmatmul.mubr.f32.gmra.mrb[10].mxu0 %v265_v28  ;;  %1046 = vmatprep.mubr.f32.mxu1 %v274_v29  ;;  %v378_v28 = vld [vmem:[%s3853_s13 + $0x648] sm:$0xff]  ;;  %v3161_v29 = vpack.c.bf16 %v872_v23, %v871_v22  ;;  %v497_v23 = vld [vmem:[%s3853_s13 + $0xa00] sm:$0xff] }
  0x5d   : > { %1946 = vmatprep.mubr.f32.mxu0 %v282_v31  ;;  %2952 = vmatpush1.bf16.msra.mxu1 %v2951_v30  ;;  %v745_v30 = vld [vmem:[%s5292_s1 + $0x1c0] sm:$0xff]  ;;  %v746_v31 = vld [vmem:[%s5292_s1 + $0x1c8] sm:$0xff] }
  0x5e   : > { %3144 = vmatpush1.bf16.msra.mxu0 %v3143_v32  ;;  %2953 = vmatprep.subr.bf16.mxu1 %v3736_v3  ;;  %v873_v32 = vld [vmem:[%s5292_s1 + $0x5c0] sm:$0xff]  ;;  %v506_v22 = vld [vmem:[%s3853_s13 + $0xa48] sm:$0xff] }
  0x5f   : > { %1047 = vmatmul.mubr.f32.gmra.mrb[12].mxu1 %v273_v37  ;;  %3145 = vmatprep.subr.bf16.mxu0 %v3736_v3  ;;  %v2972_v37 = vpack.c.bf16 %v746_v31, %v745_v30  ;;  %v538_v30 = vld [vmem:[%s3853_s13 + $0xb48] sm:$0xff]  ;;  %v529_v31 = vld [vmem:[%s3853_s13 + $0xb00] sm:$0xff] }
  0x60   : > { %1947 = vmatmul.mubr.f32.gmra.mrb[12].mxu0 %v281_v38  ;;  %1051 = vmatprep.mubr.f32.mxu1 %v290_v39  ;;  %v394_v38 = vld [vmem:[%s3853_s13 + $0x6c8] sm:$0xff]  ;;  %v3164_v39 = vpack.c.bf16 %v874_v33, %v873_v32  ;;  %v537_v32 = vld [vmem:[%s3853_s13 + $0xb40] sm:$0xff] }
  0x61   : > { %1951 = vmatprep.mubr.f32.mxu0 %v298_v41  ;;  %2955 = vmatpush1.bf16.msra.mxu1 %v2954_v40  ;;  %v747_v40 = vld [vmem:[%s5292_s1 + $0x1d0] sm:$0xff]  ;;  %v748_v41 = vld [vmem:[%s5292_s1 + $0x1d8] sm:$0xff]  ;;  %v546_v33 = vld [vmem:[%s3853_s13 + $0xb88] sm:$0xff] }
  0x62   : > { %3147 = vmatpush1.bf16.msra.mxu0 %v3146_v42  ;;  %2956 = vmatprep.subr.bf16.mxu1 %v3736_v3  ;;  %v875_v42 = vld [vmem:[%s5292_s1 + $0x5d0] sm:$0xff] }
  0x63   : > { %1052 = vmatmul.mubr.f32.gmra.mrb[14].mxu1 %v289_v47  ;;  %3148 = vmatprep.subr.bf16.mxu0 %v3736_v3  ;;  %v2975_v47 = vpack.c.bf16 %v748_v41, %v747_v40  ;;  %v569_v40 = vld [vmem:[%s3853_s13 + $0xc40] sm:$0xff]  ;;  %v578_v41 = vld [vmem:[%s3853_s13 + $0xc88] sm:$0xff] }
  0x64   : > { %1952 = vmatmul.mubr.f32.gmra.mrb[14].mxu0 %v297_v48  ;;  %1056 = vmatprep.mubr.f32.mxu1 %v306_v49  ;;  %v410_v48 = vld [vmem:[%s3853_s13 + $0x748] sm:$0xff]  ;;  %v3167_v49 = vpack.c.bf16 %v876_v43, %v875_v42  ;;  %v577_v43 = vld [vmem:[%s3853_s13 + $0xc80] sm:$0xff] }
  0x65   : > { %1956 = vmatprep.mubr.f32.mxu0 %v314_v51  ;;  %2958 = vmatpush1.bf16.msra.mxu1 %v2957_v50  ;;  %v749_v50 = vld [vmem:[%s5292_s1 + $0x1e0] sm:$0xff]  ;;  %v750_v51 = vld [vmem:[%s5292_s1 + $0x1e8] sm:$0xff] }
  0x66   : > { %3150 = vmatpush1.bf16.msra.mxu0 %v3149_v52  ;;  %2959 = vmatprep.subr.bf16.mxu1 %v3736_v3  ;;  %v877_v52 = vld [vmem:[%s5292_s1 + $0x5e0] sm:$0xff]  ;;  %v586_v42 = vld [vmem:[%s3853_s13 + $0xcc8] sm:$0xff] }
  0x67   : > { %1057 = vmatmul.mubr.f32.gmra.mrb[16].mxu1 %v305_v57  ;;  %3151 = vmatprep.subr.bf16.mxu0 %v3736_v3  ;;  %v2978_v57 = vpack.c.bf16 %v750_v51, %v749_v50  ;;  %v618_v50 = vld [vmem:[%s3853_s13 + $0xdc8] sm:$0xff]  ;;  %v609_v51 = vld [vmem:[%s3853_s13 + $0xd80] sm:$0xff] }
  0x68   : > { %1957 = vmatmul.mubr.f32.gmra.mrb[16].mxu0 %v313_v58  ;;  %1061 = vmatprep.mubr.f32.mxu1 %v322_v59  ;;  %v426_v58 = vld [vmem:[%s3853_s13 + $0x7c8] sm:$0xff]  ;;  %v3170_v59 = vpack.c.bf16 %v878_v53, %v877_v52  ;;  %v617_v52 = vld [vmem:[%s3853_s13 + $0xdc0] sm:$0xff] }
  0x69   : > { %1961 = vmatprep.mubr.f32.mxu0 %v330_v61  ;;  %2961 = vmatpush1.bf16.msra.mxu1 %v2960_v60  ;;  %v751_v60 = vld [vmem:[%s5292_s1 + $0x1f0] sm:$0xff]  ;;  %v752_v61 = vld [vmem:[%s5292_s1 + $0x1f8] sm:$0xff]  ;;  %v626_v53 = vld [vmem:[%s3853_s13 + $0xe08] sm:$0xff] }
  0x6a   : > { %3153 = vmatpush1.bf16.msra.mxu0 %v3152_v62  ;;  %2962 = vmatprep.subr.bf16.mxu1 %v3736_v3  ;;  %v879_v62 = vld [vmem:[%s5292_s1 + $0x5f0] sm:$0xff] }
  0x6b   : > { %1062 = vmatmul.mubr.f32.gmra.mrb[18].mxu1 %v321_v4  ;;  %3154 = vmatprep.subr.bf16.mxu0 %v3736_v3  ;;  %v2981_v4 = vpack.c.bf16 %v752_v61, %v751_v60  ;;  %v649_v60 = vld [vmem:[%s3853_s13 + $0xec0] sm:$0xff]  ;;  %v658_v61 = vld [vmem:[%s3853_s13 + $0xf08] sm:$0xff] }
  0x6c   : > { %1962 = vmatmul.mubr.f32.gmra.mrb[18].mxu0 %v329_v5  ;;  %1066 = vmatprep.mubr.f32.mxu1 %v338_v6  ;;  %v442_v5 = vld [vmem:[%s3853_s13 + $0x848] sm:$0xff]  ;;  %v3173_v6 = vpack.c.bf16 %v880_v63, %v879_v62  ;;  %v657_v63 = vld [vmem:[%s3853_s13 + $0xf00] sm:$0xff] }
  0x6d   : > { %1966 = vmatprep.mubr.f32.mxu0 %v346_v8  ;;  %2964 = vmatpush1.bf16.msra.mxu1 %v2963_v7  ;;  %v433_v7 = vld [vmem:[%s3853_s13 + $0x800] sm:$0xff]  ;;  %v666_v62 = vld [vmem:[%s3853_s13 + $0xf48] sm:$0xff] }
  0x6e   : > { %3156 = vmatpush1.bf16.msra.mxu0 %v3155_v9  ;;  %2965 = vmatprep.subr.bf16.mxu1 %v3736_v3  ;;  %v441_v8 = vld [vmem:[%s3853_s13 + $0x840] sm:$0xff]  ;;  %v450_v9 = vld [vmem:[%s3853_s13 + $0x888] sm:$0xff] }
  0x6f   : > { %1067 = vmatmul.mubr.f32.gmra.mrb[20].mxu1 %v337_v14  ;;  %3157 = vmatprep.subr.bf16.mxu0 %v3736_v3  ;;  %v474_v14 = vld [vmem:[%s3853_s13 + $0x948] sm:$0xff] }
  0x70   : > { %1967 = vmatmul.mubr.f32.gmra.mrb[20].mxu0 %v345_v15  ;;  %1071 = vmatprep.mubr.f32.mxu1 %v354_v16  ;;  %v465_v15 = vld [vmem:[%s3853_s13 + $0x900] sm:$0xff] }
  0x71   : > { %1971 = vmatprep.mubr.f32.mxu0 %v362_v18  ;;  %2967 = vmatpush1.bf16.msra.mxu1 %v2966_v17  ;;  %v473_v16 = vld [vmem:[%s3853_s13 + $0x940] sm:$0xff]  ;;  %v482_v17 = vld [vmem:[%s3853_s13 + $0x988] sm:$0xff] }
  0x72   : > { %3159 = vmatpush1.bf16.msra.mxu0 %v3158_v19  ;;  %2968 = vmatprep.subr.bf16.mxu1 %v3736_v3  ;;  %v490_v18 = vld [vmem:[%s3853_s13 + $0x9c8] sm:$0xff]  ;;  %v481_v19 = vld [vmem:[%s3853_s13 + $0x980] sm:$0xff] }
  0x73   : > { %1072 = vmatmul.mubr.f32.gmra.mrb[22].mxu1 %v353_v24  ;;  %3160 = vmatprep.subr.bf16.mxu0 %v3736_v3  ;;  %v505_v24 = vld [vmem:[%s3853_s13 + $0xa40] sm:$0xff] }
  0x74   : > { %1972 = vmatmul.mubr.f32.gmra.mrb[22].mxu0 %v361_v25  ;;  %1076 = vmatprep.mubr.f32.mxu1 %v370_v26  ;;  %v514_v25 = vld [vmem:[%s3853_s13 + $0xa88] sm:$0xff] }
  0x75   : > { %1976 = vmatprep.mubr.f32.mxu0 %v378_v28  ;;  %2970 = vmatpush1.bf16.msra.mxu1 %v2969_v27  ;;  %v522_v26 = vld [vmem:[%s3853_s13 + $0xac8] sm:$0xff]  ;;  %v513_v27 = vld [vmem:[%s3853_s13 + $0xa80] sm:$0xff] }
  0x76   : > { %3162 = vmatpush1.bf16.msra.mxu0 %v3161_v29  ;;  %2971 = vmatprep.subr.bf16.mxu1 %v3736_v3  ;;  %v521_v28 = vld [vmem:[%s3853_s13 + $0xac0] sm:$0xff]  ;;  %v530_v29 = vld [vmem:[%s3853_s13 + $0xb08] sm:$0xff] }
  0x77   : > { %1077 = vmatmul.mubr.f32.gmra.mrb[24].mxu1 %v369_v34  ;;  %3163 = vmatprep.subr.bf16.mxu0 %v3736_v3  ;;  %v554_v34 = vld [vmem:[%s3853_s13 + $0xbc8] sm:$0xff] }
  0x78   : > { %1977 = vmatmul.mubr.f32.gmra.mrb[24].mxu0 %v377_v35  ;;  %1081 = vmatprep.mubr.f32.mxu1 %v386_v36  ;;  %v545_v35 = vld [vmem:[%s3853_s13 + $0xb80] sm:$0xff] }
  0x79   : > { %1981 = vmatprep.mubr.f32.mxu0 %v394_v38  ;;  %2973 = vmatpush1.bf16.msra.mxu1 %v2972_v37  ;;  %v553_v36 = vld [vmem:[%s3853_s13 + $0xbc0] sm:$0xff]  ;;  %v562_v37 = vld [vmem:[%s3853_s13 + $0xc08] sm:$0xff] }
  0x7a   : > { %3165 = vmatpush1.bf16.msra.mxu0 %v3164_v39  ;;  %2974 = vmatprep.subr.bf16.mxu1 %v3736_v3  ;;  %v570_v38 = vld [vmem:[%s3853_s13 + $0xc48] sm:$0xff]  ;;  %v561_v39 = vld [vmem:[%s3853_s13 + $0xc00] sm:$0xff] }
  0x7b   : > { %1082 = vmatmul.mubr.f32.gmra.mrb[26].mxu1 %v385_v44  ;;  %3166 = vmatprep.subr.bf16.mxu0 %v3736_v3  ;;  %v585_v44 = vld [vmem:[%s3853_s13 + $0xcc0] sm:$0xff] }
  0x7c   : > { %1982 = vmatmul.mubr.f32.gmra.mrb[26].mxu0 %v393_v45  ;;  %1086 = vmatprep.mubr.f32.mxu1 %v402_v46  ;;  %v594_v45 = vld [vmem:[%s3853_s13 + $0xd08] sm:$0xff] }
  0x7d   : > { %1986 = vmatprep.mubr.f32.mxu0 %v410_v48  ;;  %2976 = vmatpush1.bf16.msra.mxu1 %v2975_v47  ;;  %v602_v46 = vld [vmem:[%s3853_s13 + $0xd48] sm:$0xff]  ;;  %v593_v47 = vld [vmem:[%s3853_s13 + $0xd00] sm:$0xff] }
  0x7e   : > { %3168 = vmatpush1.bf16.msra.mxu0 %v3167_v49  ;;  %2977 = vmatprep.subr.bf16.mxu1 %v3736_v3  ;;  %v601_v48 = vld [vmem:[%s3853_s13 + $0xd40] sm:$0xff]  ;;  %v610_v49 = vld [vmem:[%s3853_s13 + $0xd88] sm:$0xff] }
  0x7f   : > { %1087 = vmatmul.mubr.f32.gmra.mrb[28].mxu1 %v401_v54  ;;  %3169 = vmatprep.subr.bf16.mxu0 %v3736_v3  ;;  %v634_v54 = vld [vmem:[%s3853_s13 + $0xe48] sm:$0xff] }
  0x80   : > { %1987 = vmatmul.mubr.f32.gmra.mrb[28].mxu0 %v409_v55  ;;  %1091 = vmatprep.mubr.f32.mxu1 %v418_v56  ;;  %v625_v55 = vld [vmem:[%s3853_s13 + $0xe00] sm:$0xff] }
  0x81   : > { %1991 = vmatprep.mubr.f32.mxu0 %v426_v58  ;;  %2979 = vmatpush1.bf16.msra.mxu1 %v2978_v57  ;;  %v633_v56 = vld [vmem:[%s3853_s13 + $0xe40] sm:$0xff]  ;;  %v642_v57 = vld [vmem:[%s3853_s13 + $0xe88] sm:$0xff] }
  0x82   : > { %3171 = vmatpush1.bf16.msra.mxu0 %v3170_v59  ;;  %2980 = vmatprep.subr.bf16.mxu1 %v3736_v3  ;;  %v650_v58 = vld [vmem:[%s3853_s13 + $0xec8] sm:$0xff]  ;;  %v641_v59 = vld [vmem:[%s3853_s13 + $0xe80] sm:$0xff] }
  0x83   : > { %1092 = vmatmul.mubr.f32.gmra.mrb[30].mxu1 %v417_v0  ;;  %3172 = vmatprep.subr.bf16.mxu0 %v3736_v3  ;;  %v665_v0 = vld [vmem:[%s3853_s13 + $0xf40] sm:$0xff] }
  0x84   : > { %1992 = vmatmul.mubr.f32.gmra.mrb[30].mxu0 %v425_v1  ;;  %1096 = vmatprep.mubr.f32.mxu1 %v434_v2  ;;  %v674_v1 = vld [vmem:[%s3853_s13 + $0xf88] sm:$0xff] }
  0x85   : > { %1996 = vmatprep.mubr.f32.mxu0 %v442_v5  ;;  %2982 = vmatpush1.bf16.msra.mxu1 %v2981_v4  ;;  %v682_v2 = vld [vmem:[%s3853_s13 + $0xfc8] sm:$0xff]  ;;  %v673_v4 = vld [vmem:[%s3853_s13 + $0xf80] sm:$0xff] }
  0x86   : > { %3174 = vmatpush1.bf16.msra.mxu0 %v3173_v6  ;;  %2983 = vmatprep.subr.bf16.mxu1 %v3736_v3  ;;  %v681_v5 = vld [vmem:[%s3853_s13 + $0xfc0] sm:$0xff]  ;;  %v180_v6 = vld [vmem:[%s3853_s13 + $0x18] sm:$0xff] }
  0x87   : > { %1097 = vmatmul.mubr.f32.gmra.mrb[32].mxu1 %v433_v7  ;;  %3175 = vmatprep.subr.bf16.mxu0 %v3736_v3  ;;  %v753_v7 = vld [vmem:[%s5292_s1 + $0x200] sm:$0xff] }
  0x88   : > { %1997 = vmatmul.mubr.f32.gmra.mrb[32].mxu0 %v441_v8  ;;  %1101 = vmatprep.mubr.f32.mxu1 %v450_v9  ;;  %v754_v8 = vld [vmem:[%s5292_s1 + $0x208] sm:$0xff]  ;;  %v188_v9 = vld [vmem:[%s3853_s13 + $0x58] sm:$0xff] }
  0x89   : > { %2001 = vmatprep.mubr.f32.mxu0 %v458_v10  ;;  %v881_v10 = vld [vmem:[%s5292_s1 + $0x600] sm:$0xff] }
  0x8b   : > { %1102 = vmatmul.mubr.f32.gmra.mrb[34].mxu1 %v449_v11  ;;  %v882_v11 = vld [vmem:[%s5292_s1 + $0x608] sm:$0xff] }
  0x8c   : > { %2002 = vmatmul.mubr.f32.gmra.mrb[34].mxu0 %v457_v12  ;;  %1106 = vmatprep.mubr.f32.mxu1 %v466_v13  ;;  %v179_v12 = vld [vmem:[%s3853_s13 + $0x10] sm:$0xff]  ;;  %v2984_v13 = vpack.c.bf16 %v754_v8, %v753_v7  ;;  %v893_v7 = vld [vmem:[%s5292_s1 + $0x660] sm:$0xff]  ;;  %v894_v8 = vld [vmem:[%s5292_s1 + $0x668] sm:$0xff] }
  0x8d   : > { %2006 = vmatprep.mubr.f32.mxu0 %v474_v14  ;;  %v187_v14 = vld [vmem:[%s3853_s13 + $0x50] sm:$0xff] }
  0x8f   : > { %1107 = vmatmul.mubr.f32.gmra.mrb[36].mxu1 %v465_v15  ;;  %v196_v15 = vld [vmem:[%s3853_s13 + $0x98] sm:$0xff] }
  0x90   : > { %2007 = vmatmul.mubr.f32.gmra.mrb[36].mxu0 %v473_v16  ;;  %1111 = vmatprep.mubr.f32.mxu1 %v482_v17  ;;  %v204_v16 = vld [vmem:[%s3853_s13 + $0xd8] sm:$0xff]  ;;  %v3176_v17 = vpack.c.bf16 %v882_v11, %v881_v10  ;;  %v283_v10 = vld [vmem:[%s3853_s13 + $0x350] sm:$0xff] }
  0x91   : > { %2011 = vmatprep.mubr.f32.mxu0 %v490_v18  ;;  %v755_v18 = vld [vmem:[%s5292_s1 + $0x210] sm:$0xff]  ;;  %v292_v11 = vld [vmem:[%s3853_s13 + $0x398] sm:$0xff] }
  0x93   : > { %1112 = vmatmul.mubr.f32.gmra.mrb[38].mxu1 %v481_v19  ;;  %v756_v19 = vld [vmem:[%s5292_s1 + $0x218] sm:$0xff] }
  0x94   : > { %2012 = vmatmul.mubr.f32.gmra.mrb[38].mxu0 %v489_v20  ;;  %1116 = vmatprep.mubr.f32.mxu1 %v498_v21  ;;  %v883_v20 = vld [vmem:[%s5292_s1 + $0x610] sm:$0xff]  ;;  %v884_v21 = vld [vmem:[%s5292_s1 + $0x618] sm:$0xff] }
  0x95   : > { %2016 = vmatprep.mubr.f32.mxu0 %v506_v22  ;;  %v195_v22 = vld [vmem:[%s3853_s13 + $0x90] sm:$0xff] }
  0x97   : > { %1117 = vmatmul.mubr.f32.gmra.mrb[40].mxu1 %v497_v23  ;;  %v203_v23 = vld [vmem:[%s3853_s13 + $0xd0] sm:$0xff] }
  0x98   : > { %2017 = vmatmul.mubr.f32.gmra.mrb[40].mxu0 %v505_v24  ;;  %1121 = vmatprep.mubr.f32.mxu1 %v514_v25  ;;  %v212_v24 = vld [vmem:[%s3853_s13 + $0x118] sm:$0xff]  ;;  %v2987_v25 = vpack.c.bf16 %v756_v19, %v755_v18  ;;  %v291_v19 = vld [vmem:[%s3853_s13 + $0x390] sm:$0xff] }
  0x99   : > { %2021 = vmatprep.mubr.f32.mxu0 %v522_v26  ;;  %v220_v26 = vld [vmem:[%s3853_s13 + $0x158] sm:$0xff] }
  0x9a   : > { %v896_v18 = vld [vmem:[%s5292_s1 + $0x678] sm:$0xff] }
  0x9b   : > { %1122 = vmatmul.mubr.f32.gmra.mrb[42].mxu1 %v513_v27  ;;  %v3179_v27 = vpack.c.bf16 %v884_v21, %v883_v20  ;;  %v299_v20 = vld [vmem:[%s3853_s13 + $0x3d0] sm:$0xff]  ;;  %v308_v21 = vld [vmem:[%s3853_s13 + $0x418] sm:$0xff] }
  0x9c   : > { %2022 = vmatmul.mubr.f32.gmra.mrb[42].mxu0 %v521_v28  ;;  %1126 = vmatprep.mubr.f32.mxu1 %v530_v29  ;;  %v757_v28 = vld [vmem:[%s5292_s1 + $0x220] sm:$0xff]  ;;  %v758_v29 = vld [vmem:[%s5292_s1 + $0x228] sm:$0xff] }
  0x9d   : > { %2026 = vmatprep.mubr.f32.mxu0 %v538_v30  ;;  %v885_v30 = vld [vmem:[%s5292_s1 + $0x620] sm:$0xff] }
  0x9f   : > { %1127 = vmatmul.mubr.f32.gmra.mrb[44].mxu1 %v529_v31  ;;  %v886_v31 = vld [vmem:[%s5292_s1 + $0x628] sm:$0xff] }
  0xa0   : > { %2027 = vmatmul.mubr.f32.gmra.mrb[44].mxu0 %v537_v32  ;;  %1131 = vmatprep.mubr.f32.mxu1 %v546_v33  ;;  %v211_v32 = vld [vmem:[%s3853_s13 + $0x110] sm:$0xff] }
  0xa1   : > { %2031 = vmatprep.mubr.f32.mxu0 %v554_v34  ;;  %v219_v33 = vld [vmem:[%s3853_s13 + $0x150] sm:$0xff]  ;;  %v228_v34 = vld [vmem:[%s3853_s13 + $0x198] sm:$0xff] }
  0xa3   : > { %1132 = vmatmul.mubr.f32.gmra.mrb[46].mxu1 %v545_v35  ;;  %v2990_v35 = vpack.c.bf16 %v758_v29, %v757_v28  ;;  %v898_v28 = vld [vmem:[%s5292_s1 + $0x688] sm:$0xff]  ;;  %v307_v29 = vld [vmem:[%s3853_s13 + $0x410] sm:$0xff] }
  0xa4   : > { %2032 = vmatmul.mubr.f32.gmra.mrb[46].mxu0 %v553_v36  ;;  %1136 = vmatprep.mubr.f32.mxu1 %v562_v37  ;;  %v236_v36 = vld [vmem:[%s3853_s13 + $0x1d8] sm:$0xff]  ;;  %v3182_v37 = vpack.c.bf16 %v886_v31, %v885_v30  ;;  %v315_v30 = vld [vmem:[%s3853_s13 + $0x450] sm:$0xff] }
  0xa5   : > { %2036 = vmatprep.mubr.f32.mxu0 %v570_v38  ;;  %v759_v38 = vld [vmem:[%s5292_s1 + $0x230] sm:$0xff]  ;;  %v324_v31 = vld [vmem:[%s3853_s13 + $0x498] sm:$0xff] }
  0xa7   : > { %1137 = vmatmul.mubr.f32.gmra.mrb[48].mxu1 %v561_v39  ;;  %v760_v39 = vld [vmem:[%s5292_s1 + $0x238] sm:$0xff] }
  0xa8   : > { %2037 = vmatmul.mubr.f32.gmra.mrb[48].mxu0 %v569_v40  ;;  %1141 = vmatprep.mubr.f32.mxu1 %v578_v41  ;;  %v887_v40 = vld [vmem:[%s5292_s1 + $0x630] sm:$0xff]  ;;  %v888_v41 = vld [vmem:[%s5292_s1 + $0x638] sm:$0xff] }
  0xa9   : > { %2041 = vmatprep.mubr.f32.mxu0 %v586_v42  ;;  %v227_v42 = vld [vmem:[%s3853_s13 + $0x190] sm:$0xff] }
  0xab   : > { %1142 = vmatmul.mubr.f32.gmra.mrb[50].mxu1 %v577_v43  ;;  %v235_v43 = vld [vmem:[%s3853_s13 + $0x1d0] sm:$0xff] }
  0xac   : > { %2042 = vmatmul.mubr.f32.gmra.mrb[50].mxu0 %v585_v44  ;;  %1146 = vmatprep.mubr.f32.mxu1 %v594_v45  ;;  %v244_v44 = vld [vmem:[%s3853_s13 + $0x218] sm:$0xff]  ;;  %v2993_v45 = vpack.c.bf16 %v760_v39, %v759_v38  ;;  %v323_v39 = vld [vmem:[%s3853_s13 + $0x490] sm:$0xff] }
  0xad   : > { %2046 = vmatprep.mubr.f32.mxu0 %v602_v46  ;;  %v252_v46 = vld [vmem:[%s3853_s13 + $0x258] sm:$0xff] }
  0xae   : > { %v900_v38 = vld [vmem:[%s5292_s1 + $0x698] sm:$0xff] }
  0xaf   : > { %1147 = vmatmul.mubr.f32.gmra.mrb[52].mxu1 %v593_v47  ;;  %v3185_v47 = vpack.c.bf16 %v888_v41, %v887_v40  ;;  %v331_v40 = vld [vmem:[%s3853_s13 + $0x4d0] sm:$0xff]  ;;  %v340_v41 = vld [vmem:[%s3853_s13 + $0x518] sm:$0xff] }
  0xb0   : > { %2047 = vmatmul.mubr.f32.gmra.mrb[52].mxu0 %v601_v48  ;;  %1151 = vmatprep.mubr.f32.mxu1 %v610_v49  ;;  %v761_v48 = vld [vmem:[%s5292_s1 + $0x240] sm:$0xff]  ;;  %v762_v49 = vld [vmem:[%s5292_s1 + $0x248] sm:$0xff] }
  0xb1   : > { %2051 = vmatprep.mubr.f32.mxu0 %v618_v50  ;;  %v889_v50 = vld [vmem:[%s5292_s1 + $0x640] sm:$0xff] }
  0xb3   : > { %1152 = vmatmul.mubr.f32.gmra.mrb[54].mxu1 %v609_v51  ;;  %v890_v51 = vld [vmem:[%s5292_s1 + $0x648] sm:$0xff] }
  0xb4   : > { %2052 = vmatmul.mubr.f32.gmra.mrb[54].mxu0 %v617_v52  ;;  %1156 = vmatprep.mubr.f32.mxu1 %v626_v53  ;;  %v243_v52 = vld [vmem:[%s3853_s13 + $0x210] sm:$0xff] }
  0xb5   : > { %2056 = vmatprep.mubr.f32.mxu0 %v634_v54  ;;  %v251_v53 = vld [vmem:[%s3853_s13 + $0x250] sm:$0xff]  ;;  %v260_v54 = vld [vmem:[%s3853_s13 + $0x298] sm:$0xff] }
  0xb7   : > { %1157 = vmatmul.mubr.f32.gmra.mrb[56].mxu1 %v625_v55  ;;  %v2996_v55 = vpack.c.bf16 %v762_v49, %v761_v48  ;;  %v902_v48 = vld [vmem:[%s5292_s1 + $0x6a8] sm:$0xff]  ;;  %v339_v49 = vld [vmem:[%s3853_s13 + $0x510] sm:$0xff] }
  0xb8   : > { %2057 = vmatmul.mubr.f32.gmra.mrb[56].mxu0 %v633_v56  ;;  %1161 = vmatprep.mubr.f32.mxu1 %v642_v57  ;;  %v268_v56 = vld [vmem:[%s3853_s13 + $0x2d8] sm:$0xff]  ;;  %v3188_v57 = vpack.c.bf16 %v890_v51, %v889_v50  ;;  %v347_v50 = vld [vmem:[%s3853_s13 + $0x550] sm:$0xff] }
  0xb9   : > { %2061 = vmatprep.mubr.f32.mxu0 %v650_v58  ;;  %v763_v58 = vld [vmem:[%s5292_s1 + $0x250] sm:$0xff]  ;;  %v356_v51 = vld [vmem:[%s3853_s13 + $0x598] sm:$0xff] }
  0xbb   : > { %1162 = vmatmul.mubr.f32.gmra.mrb[58].mxu1 %v641_v59  ;;  %v764_v59 = vld [vmem:[%s5292_s1 + $0x258] sm:$0xff] }
  0xbc   : > { %2062 = vmatmul.mubr.f32.gmra.mrb[58].mxu0 %v649_v60  ;;  %1166 = vmatprep.mubr.f32.mxu1 %v658_v61  ;;  %v891_v60 = vld [vmem:[%s5292_s1 + $0x650] sm:$0xff]  ;;  %v892_v61 = vld [vmem:[%s5292_s1 + $0x658] sm:$0xff] }
  0xbd   : > { %2066 = vmatprep.mubr.f32.mxu0 %v666_v62  ;;  %v259_v62 = vld [vmem:[%s3853_s13 + $0x290] sm:$0xff] }
  0xbf   : > { %1167 = vmatmul.mubr.f32.gmra.mrb[60].mxu1 %v657_v63  ;;  %v267_v63 = vld [vmem:[%s3853_s13 + $0x2d0] sm:$0xff] }
  0xc0   : > { %2067 = vmatmul.mubr.f32.gmra.mrb[60].mxu0 %v665_v0  ;;  %1171 = vmatprep.mubr.f32.mxu1 %v674_v1  ;;  %v276_v0 = vld [vmem:[%s3853_s13 + $0x318] sm:$0xff]  ;;  %v2999_v1 = vpack.c.bf16 %v764_v59, %v763_v58  ;;  %v355_v59 = vld [vmem:[%s3853_s13 + $0x590] sm:$0xff] }
  0xc1   : > { %2071 = vmatprep.mubr.f32.mxu0 %v682_v2  ;;  %v284_v2 = vld [vmem:[%s3853_s13 + $0x358] sm:$0xff] }
  0xc2   : > { %v904_v58 = vld [vmem:[%s5292_s1 + $0x6b8] sm:$0xff] }
  0xc3   : > { %1172 = vmatmul.mubr.f32.gmra.mrb[62].mxu1 %v673_v4  ;;  %v3191_v4 = vpack.c.bf16 %v892_v61, %v891_v60  ;;  %v363_v60 = vld [vmem:[%s3853_s13 + $0x5d0] sm:$0xff]  ;;  %v372_v61 = vld [vmem:[%s3853_s13 + $0x618] sm:$0xff] }
  0xc4   : > { %2072 = vmatmul.mubr.f32.gmra.mrb[62].mxu0 %v681_v5  ;;  %1241 = vmatprep.mubr.f32.mxu1 %v180_v6  ;;  %v765_v5 = vld [vmem:[%s5292_s1 + $0x260] sm:$0xff]  ;;  %v766_v6 = vld [vmem:[%s5292_s1 + $0x268] sm:$0xff] }
  0xc5   : > { %2141 = vmatprep.mubr.f32.mxu0 %v188_v9  ;;  %v275_v9 = vld [vmem:[%s3853_s13 + $0x310] sm:$0xff] }
  0xc7   : > { %1242 = vmatmul.mubr.f32.vlgmr.msra.gmra.mrb[0].mxu1 %v179_v12  ;;  %v3002_v12 = vpack.c.bf16 %v766_v6, %v765_v5  ;;  %v906_v5 = vld [vmem:[%s5292_s1 + $0x6c8] sm:$0xff]  ;;  %v371_v6 = vld [vmem:[%s3853_s13 + $0x610] sm:$0xff] }
  0xc8   : > { %2142 = vmatmul.mubr.f32.vlgmr.msra.gmra.mrb[0].mxu0 %v187_v14  ;;  %2985 = vmatpush1.bf16.msra.mxu1 %v2984_v13  ;;  %v300_v13 = vld [vmem:[%s3853_s13 + $0x3d8] sm:$0xff]  ;;  %v3194_v14 = vpack.c.bf16 %v894_v8, %v893_v7  ;;  %v379_v7 = vld [vmem:[%s3853_s13 + $0x650] sm:$0xff] }
  0xc9   : > { %1246 = vmatprep.mubr.f32.mxu1 %v196_v15  ;;  %2146 = vmatprep.mubr.f32.mxu0 %v204_v16  ;;  %v767_v15 = vld [vmem:[%s5292_s1 + $0x270] sm:$0xff]  ;;  %v768_v16 = vld [vmem:[%s5292_s1 + $0x278] sm:$0xff] }
  0xca   : > { %3177 = vmatpush1.bf16.msra.mxu0 %v3176_v17  ;;  %2986 = vmatprep.subr.bf16.mxu1 %v3736_v3  ;;  %v895_v17 = vld [vmem:[%s5292_s1 + $0x670] sm:$0xff]  ;;  %v388_v8 = vld [vmem:[%s3853_s13 + $0x698] sm:$0xff] }
  0xcb   : > { %1247 = vmatmul.mubr.f32.gmra.mrb[2].mxu1 %v195_v22  ;;  %3178 = vmatprep.subr.bf16.mxu0 %v3736_v3  ;;  %v3005_v22 = vpack.c.bf16 %v768_v16, %v767_v15  ;;  %v908_v15 = vld [vmem:[%s5292_s1 + $0x6d8] sm:$0xff]  ;;  %v387_v16 = vld [vmem:[%s3853_s13 + $0x690] sm:$0xff] }
  0xcc   : > { %2147 = vmatmul.mubr.f32.gmra.mrb[2].mxu0 %v203_v23  ;;  %1251 = vmatprep.mubr.f32.mxu1 %v212_v24  ;;  %v316_v23 = vld [vmem:[%s3853_s13 + $0x458] sm:$0xff]  ;;  %v3197_v24 = vpack.c.bf16 %v896_v18, %v895_v17  ;;  %v395_v17 = vld [vmem:[%s3853_s13 + $0x6d0] sm:$0xff] }
  0xcd   : > { %2151 = vmatprep.mubr.f32.mxu0 %v220_v26  ;;  %2988 = vmatpush1.bf16.msra.mxu1 %v2987_v25  ;;  %v769_v25 = vld [vmem:[%s5292_s1 + $0x280] sm:$0xff]  ;;  %v770_v26 = vld [vmem:[%s5292_s1 + $0x288] sm:$0xff]  ;;  %v404_v18 = vld [vmem:[%s3853_s13 + $0x718] sm:$0xff] }
  0xce   : > { %3180 = vmatpush1.bf16.msra.mxu0 %v3179_v27  ;;  %2989 = vmatprep.subr.bf16.mxu1 %v3736_v3  ;;  %v897_v27 = vld [vmem:[%s5292_s1 + $0x680] sm:$0xff] }
  0xcf   : > { %1252 = vmatmul.mubr.f32.gmra.mrb[4].mxu1 %v211_v32  ;;  %3181 = vmatprep.subr.bf16.mxu0 %v3736_v3  ;;  %v3008_v32 = vpack.c.bf16 %v770_v26, %v769_v25  ;;  %v910_v25 = vld [vmem:[%s5292_s1 + $0x6e8] sm:$0xff]  ;;  %v403_v26 = vld [vmem:[%s3853_s13 + $0x710] sm:$0xff] }
  0xd0   : > { %2152 = vmatmul.mubr.f32.gmra.mrb[4].mxu0 %v219_v33  ;;  %1256 = vmatprep.mubr.f32.mxu1 %v228_v34  ;;  %v332_v33 = vld [vmem:[%s3853_s13 + $0x4d8] sm:$0xff]  ;;  %v3200_v34 = vpack.c.bf16 %v898_v28, %v897_v27  ;;  %v411_v27 = vld [vmem:[%s3853_s13 + $0x750] sm:$0xff] }
  0xd1   : > { %2156 = vmatprep.mubr.f32.mxu0 %v236_v36  ;;  %2991 = vmatpush1.bf16.msra.mxu1 %v2990_v35  ;;  %v771_v35 = vld [vmem:[%s5292_s1 + $0x290] sm:$0xff]  ;;  %v772_v36 = vld [vmem:[%s5292_s1 + $0x298] sm:$0xff] }
  0xd2   : > { %3183 = vmatpush1.bf16.msra.mxu0 %v3182_v37  ;;  %2992 = vmatprep.subr.bf16.mxu1 %v3736_v3  ;;  %v899_v37 = vld [vmem:[%s5292_s1 + $0x690] sm:$0xff]  ;;  %v420_v28 = vld [vmem:[%s3853_s13 + $0x798] sm:$0xff] }
  0xd3   : > { %1257 = vmatmul.mubr.f32.gmra.mrb[6].mxu1 %v227_v42  ;;  %3184 = vmatprep.subr.bf16.mxu0 %v3736_v3  ;;  %v3011_v42 = vpack.c.bf16 %v772_v36, %v771_v35  ;;  %v912_v35 = vld [vmem:[%s5292_s1 + $0x6f8] sm:$0xff]  ;;  %v419_v36 = vld [vmem:[%s3853_s13 + $0x790] sm:$0xff] }
  0xd4   : > { %2157 = vmatmul.mubr.f32.gmra.mrb[6].mxu0 %v235_v43  ;;  %1261 = vmatprep.mubr.f32.mxu1 %v244_v44  ;;  %v348_v43 = vld [vmem:[%s3853_s13 + $0x558] sm:$0xff]  ;;  %v3203_v44 = vpack.c.bf16 %v900_v38, %v899_v37  ;;  %v427_v37 = vld [vmem:[%s3853_s13 + $0x7d0] sm:$0xff] }
  0xd5   : > { %2161 = vmatprep.mubr.f32.mxu0 %v252_v46  ;;  %2994 = vmatpush1.bf16.msra.mxu1 %v2993_v45  ;;  %v773_v45 = vld [vmem:[%s5292_s1 + $0x2a0] sm:$0xff]  ;;  %v774_v46 = vld [vmem:[%s5292_s1 + $0x2a8] sm:$0xff]  ;;  %v436_v38 = vld [vmem:[%s3853_s13 + $0x818] sm:$0xff] }
  0xd6   : > { %3186 = vmatpush1.bf16.msra.mxu0 %v3185_v47  ;;  %2995 = vmatprep.subr.bf16.mxu1 %v3736_v3  ;;  %v901_v47 = vld [vmem:[%s5292_s1 + $0x6a0] sm:$0xff] }
  0xd7   : > { %1262 = vmatmul.mubr.f32.gmra.mrb[8].mxu1 %v243_v52  ;;  %3187 = vmatprep.subr.bf16.mxu0 %v3736_v3  ;;  %v3014_v52 = vpack.c.bf16 %v774_v46, %v773_v45  ;;  %v460_v45 = vld [vmem:[%s3853_s13 + $0x8d8] sm:$0xff]  ;;  %v451_v46 = vld [vmem:[%s3853_s13 + $0x890] sm:$0xff] }
  0xd8   : > { %2162 = vmatmul.mubr.f32.gmra.mrb[8].mxu0 %v251_v53  ;;  %1266 = vmatprep.mubr.f32.mxu1 %v260_v54  ;;  %v364_v53 = vld [vmem:[%s3853_s13 + $0x5d8] sm:$0xff]  ;;  %v3206_v54 = vpack.c.bf16 %v902_v48, %v901_v47  ;;  %v459_v47 = vld [vmem:[%s3853_s13 + $0x8d0] sm:$0xff] }
  0xd9   : > { %2166 = vmatprep.mubr.f32.mxu0 %v268_v56  ;;  %2997 = vmatpush1.bf16.msra.mxu1 %v2996_v55  ;;  %v775_v55 = vld [vmem:[%s5292_s1 + $0x2b0] sm:$0xff]  ;;  %v776_v56 = vld [vmem:[%s5292_s1 + $0x2b8] sm:$0xff] }
  0xda   : > { %3189 = vmatpush1.bf16.msra.mxu0 %v3188_v57  ;;  %2998 = vmatprep.subr.bf16.mxu1 %v3736_v3  ;;  %v903_v57 = vld [vmem:[%s5292_s1 + $0x6b0] sm:$0xff]  ;;  %v468_v48 = vld [vmem:[%s3853_s13 + $0x918] sm:$0xff] }
  0xdb   : > { %1267 = vmatmul.mubr.f32.gmra.mrb[10].mxu1 %v259_v62  ;;  %3190 = vmatprep.subr.bf16.mxu0 %v3736_v3  ;;  %v3017_v62 = vpack.c.bf16 %v776_v56, %v775_v55  ;;  %v491_v55 = vld [vmem:[%s3853_s13 + $0x9d0] sm:$0xff]  ;;  %v500_v56 = vld [vmem:[%s3853_s13 + $0xa18] sm:$0xff] }
  0xdc   : > { %2167 = vmatmul.mubr.f32.gmra.mrb[10].mxu0 %v267_v63  ;;  %1271 = vmatprep.mubr.f32.mxu1 %v276_v0  ;;  %v380_v63 = vld [vmem:[%s3853_s13 + $0x658] sm:$0xff]  ;;  %v3209_v0 = vpack.c.bf16 %v904_v58, %v903_v57  ;;  %v499_v58 = vld [vmem:[%s3853_s13 + $0xa10] sm:$0xff] }
  0xdd   : > { %2171 = vmatprep.mubr.f32.mxu0 %v284_v2  ;;  %3000 = vmatpush1.bf16.msra.mxu1 %v2999_v1  ;;  %v777_v1 = vld [vmem:[%s5292_s1 + $0x2c0] sm:$0xff]  ;;  %v778_v2 = vld [vmem:[%s5292_s1 + $0x2c8] sm:$0xff]  ;;  %v508_v57 = vld [vmem:[%s3853_s13 + $0xa58] sm:$0xff] }
  0xde   : > { %3192 = vmatpush1.bf16.msra.mxu0 %v3191_v4  ;;  %3001 = vmatprep.subr.bf16.mxu1 %v3736_v3  ;;  %v905_v4 = vld [vmem:[%s5292_s1 + $0x6c0] sm:$0xff] }
  0xdf   : > { %1272 = vmatmul.mubr.f32.gmra.mrb[12].mxu1 %v275_v9  ;;  %3193 = vmatprep.subr.bf16.mxu0 %v3736_v3  ;;  %v3020_v9 = vpack.c.bf16 %v778_v2, %v777_v1  ;;  %v540_v1 = vld [vmem:[%s3853_s13 + $0xb58] sm:$0xff]  ;;  %v531_v2 = vld [vmem:[%s3853_s13 + $0xb10] sm:$0xff] }
  0xe0   : > { %2172 = vmatmul.mubr.f32.gmra.mrb[12].mxu0 %v283_v10  ;;  %1276 = vmatprep.mubr.f32.mxu1 %v292_v11  ;;  %v396_v10 = vld [vmem:[%s3853_s13 + $0x6d8] sm:$0xff]  ;;  %v3212_v11 = vpack.c.bf16 %v906_v5, %v905_v4  ;;  %v539_v4 = vld [vmem:[%s3853_s13 + $0xb50] sm:$0xff] }
  0xe1   : > { %2176 = vmatprep.mubr.f32.mxu0 %v300_v13  ;;  %3003 = vmatpush1.bf16.msra.mxu1 %v3002_v12  ;;  %v779_v12 = vld [vmem:[%s5292_s1 + $0x2d0] sm:$0xff]  ;;  %v780_v13 = vld [vmem:[%s5292_s1 + $0x2d8] sm:$0xff] }
  0xe2   : > { %3195 = vmatpush1.bf16.msra.mxu0 %v3194_v14  ;;  %3004 = vmatprep.subr.bf16.mxu1 %v3736_v3  ;;  %v907_v14 = vld [vmem:[%s5292_s1 + $0x6d0] sm:$0xff]  ;;  %v548_v5 = vld [vmem:[%s3853_s13 + $0xb98] sm:$0xff] }
  0xe3   : > { %1277 = vmatmul.mubr.f32.gmra.mrb[14].mxu1 %v291_v19  ;;  %3196 = vmatprep.subr.bf16.mxu0 %v3736_v3  ;;  %v3023_v19 = vpack.c.bf16 %v780_v13, %v779_v12  ;;  %v571_v12 = vld [vmem:[%s3853_s13 + $0xc50] sm:$0xff]  ;;  %v580_v13 = vld [vmem:[%s3853_s13 + $0xc98] sm:$0xff] }
  0xe4   : > { %2177 = vmatmul.mubr.f32.gmra.mrb[14].mxu0 %v299_v20  ;;  %1281 = vmatprep.mubr.f32.mxu1 %v308_v21  ;;  %v412_v20 = vld [vmem:[%s3853_s13 + $0x758] sm:$0xff]  ;;  %v3215_v21 = vpack.c.bf16 %v908_v15, %v907_v14  ;;  %v579_v15 = vld [vmem:[%s3853_s13 + $0xc90] sm:$0xff] }
  0xe5   : > { %2181 = vmatprep.mubr.f32.mxu0 %v316_v23  ;;  %3006 = vmatpush1.bf16.msra.mxu1 %v3005_v22  ;;  %v781_v22 = vld [vmem:[%s5292_s1 + $0x2e0] sm:$0xff]  ;;  %v782_v23 = vld [vmem:[%s5292_s1 + $0x2e8] sm:$0xff]  ;;  %v588_v14 = vld [vmem:[%s3853_s13 + $0xcd8] sm:$0xff] }
  0xe6   : > { %3198 = vmatpush1.bf16.msra.mxu0 %v3197_v24  ;;  %3007 = vmatprep.subr.bf16.mxu1 %v3736_v3  ;;  %v909_v24 = vld [vmem:[%s5292_s1 + $0x6e0] sm:$0xff] }
  0xe7   : > { %1282 = vmatmul.mubr.f32.gmra.mrb[16].mxu1 %v307_v29  ;;  %3199 = vmatprep.subr.bf16.mxu0 %v3736_v3  ;;  %v3026_v29 = vpack.c.bf16 %v782_v23, %v781_v22  ;;  %v620_v22 = vld [vmem:[%s3853_s13 + $0xdd8] sm:$0xff]  ;;  %v611_v23 = vld [vmem:[%s3853_s13 + $0xd90] sm:$0xff] }
  0xe8   : > { %2182 = vmatmul.mubr.f32.gmra.mrb[16].mxu0 %v315_v30  ;;  %1286 = vmatprep.mubr.f32.mxu1 %v324_v31  ;;  %v428_v30 = vld [vmem:[%s3853_s13 + $0x7d8] sm:$0xff]  ;;  %v3218_v31 = vpack.c.bf16 %v910_v25, %v909_v24  ;;  %v619_v24 = vld [vmem:[%s3853_s13 + $0xdd0] sm:$0xff] }
  0xe9   : > { %2186 = vmatprep.mubr.f32.mxu0 %v332_v33  ;;  %3009 = vmatpush1.bf16.msra.mxu1 %v3008_v32  ;;  %v783_v32 = vld [vmem:[%s5292_s1 + $0x2f0] sm:$0xff]  ;;  %v784_v33 = vld [vmem:[%s5292_s1 + $0x2f8] sm:$0xff] }
  0xea   : > { %3201 = vmatpush1.bf16.msra.mxu0 %v3200_v34  ;;  %3010 = vmatprep.subr.bf16.mxu1 %v3736_v3  ;;  %v911_v34 = vld [vmem:[%s5292_s1 + $0x6f0] sm:$0xff]  ;;  %v628_v25 = vld [vmem:[%s3853_s13 + $0xe18] sm:$0xff] }
  0xeb   : > { %1287 = vmatmul.mubr.f32.gmra.mrb[18].mxu1 %v323_v39  ;;  %3202 = vmatprep.subr.bf16.mxu0 %v3736_v3  ;;  %v3029_v39 = vpack.c.bf16 %v784_v33, %v783_v32  ;;  %v651_v32 = vld [vmem:[%s3853_s13 + $0xed0] sm:$0xff]  ;;  %v660_v33 = vld [vmem:[%s3853_s13 + $0xf18] sm:$0xff] }
  0xec   : > { %2187 = vmatmul.mubr.f32.gmra.mrb[18].mxu0 %v331_v40  ;;  %1291 = vmatprep.mubr.f32.mxu1 %v340_v41  ;;  %v444_v40 = vld [vmem:[%s3853_s13 + $0x858] sm:$0xff]  ;;  %v3221_v41 = vpack.c.bf16 %v912_v35, %v911_v34  ;;  %v659_v35 = vld [vmem:[%s3853_s13 + $0xf10] sm:$0xff] }
  0xed   : > { %2191 = vmatprep.mubr.f32.mxu0 %v348_v43  ;;  %3012 = vmatpush1.bf16.msra.mxu1 %v3011_v42  ;;  %v435_v42 = vld [vmem:[%s3853_s13 + $0x810] sm:$0xff]  ;;  %v668_v34 = vld [vmem:[%s3853_s13 + $0xf58] sm:$0xff] }
  0xee   : > { %3204 = vmatpush1.bf16.msra.mxu0 %v3203_v44  ;;  %3013 = vmatprep.subr.bf16.mxu1 %v3736_v3  ;;  %v443_v43 = vld [vmem:[%s3853_s13 + $0x850] sm:$0xff]  ;;  %v452_v44 = vld [vmem:[%s3853_s13 + $0x898] sm:$0xff] }
  0xef   : > { %1292 = vmatmul.mubr.f32.gmra.mrb[20].mxu1 %v339_v49  ;;  %3205 = vmatprep.subr.bf16.mxu0 %v3736_v3  ;;  %v476_v49 = vld [vmem:[%s3853_s13 + $0x958] sm:$0xff] }
  0xf0   : > { %2192 = vmatmul.mubr.f32.gmra.mrb[20].mxu0 %v347_v50  ;;  %1296 = vmatprep.mubr.f32.mxu1 %v356_v51  ;;  %v467_v50 = vld [vmem:[%s3853_s13 + $0x910] sm:$0xff] }
  0xf1   : > { %2196 = vmatprep.mubr.f32.mxu0 %v364_v53  ;;  %3015 = vmatpush1.bf16.msra.mxu1 %v3014_v52  ;;  %v475_v51 = vld [vmem:[%s3853_s13 + $0x950] sm:$0xff]  ;;  %v484_v52 = vld [vmem:[%s3853_s13 + $0x998] sm:$0xff] }
  0xf2   : > { %3207 = vmatpush1.bf16.msra.mxu0 %v3206_v54  ;;  %3016 = vmatprep.subr.bf16.mxu1 %v3736_v3  ;;  %v492_v53 = vld [vmem:[%s3853_s13 + $0x9d8] sm:$0xff]  ;;  %v483_v54 = vld [vmem:[%s3853_s13 + $0x990] sm:$0xff] }
  0xf3   : > { %1297 = vmatmul.mubr.f32.gmra.mrb[22].mxu1 %v355_v59  ;;  %3208 = vmatprep.subr.bf16.mxu0 %v3736_v3  ;;  %v507_v59 = vld [vmem:[%s3853_s13 + $0xa50] sm:$0xff] }
  0xf4   : > { %2197 = vmatmul.mubr.f32.gmra.mrb[22].mxu0 %v363_v60  ;;  %1301 = vmatprep.mubr.f32.mxu1 %v372_v61  ;;  %v516_v60 = vld [vmem:[%s3853_s13 + $0xa98] sm:$0xff] }
  0xf5   : > { %2201 = vmatprep.mubr.f32.mxu0 %v380_v63  ;;  %3018 = vmatpush1.bf16.msra.mxu1 %v3017_v62  ;;  %v524_v61 = vld [vmem:[%s3853_s13 + $0xad8] sm:$0xff]  ;;  %v515_v62 = vld [vmem:[%s3853_s13 + $0xa90] sm:$0xff] }
  0xf6   : > { %3210 = vmatpush1.bf16.msra.mxu0 %v3209_v0  ;;  %3019 = vmatprep.subr.bf16.mxu1 %v3736_v3  ;;  %v523_v63 = vld [vmem:[%s3853_s13 + $0xad0] sm:$0xff]  ;;  %v532_v0 = vld [vmem:[%s3853_s13 + $0xb18] sm:$0xff] }
  0xf7   : > { %1302 = vmatmul.mubr.f32.gmra.mrb[24].mxu1 %v371_v6  ;;  %3211 = vmatprep.subr.bf16.mxu0 %v3736_v3  ;;  %v556_v6 = vld [vmem:[%s3853_s13 + $0xbd8] sm:$0xff] }
  0xf8   : > { %2202 = vmatmul.mubr.f32.gmra.mrb[24].mxu0 %v379_v7  ;;  %1306 = vmatprep.mubr.f32.mxu1 %v388_v8  ;;  %v547_v7 = vld [vmem:[%s3853_s13 + $0xb90] sm:$0xff] }
  0xf9   : > { %2206 = vmatprep.mubr.f32.mxu0 %v396_v10  ;;  %3021 = vmatpush1.bf16.msra.mxu1 %v3020_v9  ;;  %v555_v8 = vld [vmem:[%s3853_s13 + $0xbd0] sm:$0xff]  ;;  %v564_v9 = vld [vmem:[%s3853_s13 + $0xc18] sm:$0xff] }
  0xfa   : > { %3213 = vmatpush1.bf16.msra.mxu0 %v3212_v11  ;;  %3022 = vmatprep.subr.bf16.mxu1 %v3736_v3  ;;  %v572_v10 = vld [vmem:[%s3853_s13 + $0xc58] sm:$0xff]  ;;  %v563_v11 = vld [vmem:[%s3853_s13 + $0xc10] sm:$0xff] }
  0xfb   : > { %1307 = vmatmul.mubr.f32.gmra.mrb[26].mxu1 %v387_v16  ;;  %3214 = vmatprep.subr.bf16.mxu0 %v3736_v3  ;;  %v587_v16 = vld [vmem:[%s3853_s13 + $0xcd0] sm:$0xff] }
  0xfc   : > { %2207 = vmatmul.mubr.f32.gmra.mrb[26].mxu0 %v395_v17  ;;  %1311 = vmatprep.mubr.f32.mxu1 %v404_v18  ;;  %v596_v17 = vld [vmem:[%s3853_s13 + $0xd18] sm:$0xff] }
  0xfd   : > { %2211 = vmatprep.mubr.f32.mxu0 %v412_v20  ;;  %3024 = vmatpush1.bf16.msra.mxu1 %v3023_v19  ;;  %v604_v18 = vld [vmem:[%s3853_s13 + $0xd58] sm:$0xff]  ;;  %v595_v19 = vld [vmem:[%s3853_s13 + $0xd10] sm:$0xff] }
  0xfe   : > { %3216 = vmatpush1.bf16.msra.mxu0 %v3215_v21  ;;  %3025 = vmatprep.subr.bf16.mxu1 %v3736_v3  ;;  %v603_v20 = vld [vmem:[%s3853_s13 + $0xd50] sm:$0xff]  ;;  %v612_v21 = vld [vmem:[%s3853_s13 + $0xd98] sm:$0xff] }
  0xff   : > { %1312 = vmatmul.mubr.f32.gmra.mrb[28].mxu1 %v403_v26  ;;  %3217 = vmatprep.subr.bf16.mxu0 %v3736_v3  ;;  %v636_v26 = vld [vmem:[%s3853_s13 + $0xe58] sm:$0xff] }
 0x100   : > { %2212 = vmatmul.mubr.f32.gmra.mrb[28].mxu0 %v411_v27  ;;  %1316 = vmatprep.mubr.f32.mxu1 %v420_v28  ;;  %v627_v27 = vld [vmem:[%s3853_s13 + $0xe10] sm:$0xff] }
 0x101   : > { %2216 = vmatprep.mubr.f32.mxu0 %v428_v30  ;;  %3027 = vmatpush1.bf16.msra.mxu1 %v3026_v29  ;;  %v635_v28 = vld [vmem:[%s3853_s13 + $0xe50] sm:$0xff]  ;;  %v644_v29 = vld [vmem:[%s3853_s13 + $0xe98] sm:$0xff] }
 0x102   : > { %3219 = vmatpush1.bf16.msra.mxu0 %v3218_v31  ;;  %3028 = vmatprep.subr.bf16.mxu1 %v3736_v3  ;;  %v652_v30 = vld [vmem:[%s3853_s13 + $0xed8] sm:$0xff]  ;;  %v643_v31 = vld [vmem:[%s3853_s13 + $0xe90] sm:$0xff] }
 0x103   : > { %1317 = vmatmul.mubr.f32.gmra.mrb[30].mxu1 %v419_v36  ;;  %3220 = vmatprep.subr.bf16.mxu0 %v3736_v3  ;;  %v667_v36 = vld [vmem:[%s3853_s13 + $0xf50] sm:$0xff] }
 0x104   : > { %2217 = vmatmul.mubr.f32.gmra.mrb[30].mxu0 %v427_v37  ;;  %1321 = vmatprep.mubr.f32.mxu1 %v436_v38  ;;  %v676_v37 = vld [vmem:[%s3853_s13 + $0xf98] sm:$0xff] }
 0x105   : > { %2221 = vmatprep.mubr.f32.mxu0 %v444_v40  ;;  %3030 = vmatpush1.bf16.msra.mxu1 %v3029_v39  ;;  %v684_v38 = vld [vmem:[%s3853_s13 + $0xfd8] sm:$0xff]  ;;  %v675_v39 = vld [vmem:[%s3853_s13 + $0xf90] sm:$0xff] }
 0x106   : > { %3222 = vmatpush1.bf16.msra.mxu0 %v3221_v41  ;;  %3031 = vmatprep.subr.bf16.mxu1 %v3736_v3  ;;  %v683_v40 = vld [vmem:[%s3853_s13 + $0xfd0] sm:$0xff]  ;;  %v182_v41 = vld [vmem:[%s3853_s13 + $0x28] sm:$0xff] }
 0x107   : > { %1322 = vmatmul.mubr.f32.gmra.mrb[32].mxu1 %v435_v42  ;;  %3223 = vmatprep.subr.bf16.mxu0 %v3736_v3  ;;  %v785_v42 = vld [vmem:[%s5292_s1 + $0x300] sm:$0xff] }
 0x108   : > { %2222 = vmatmul.mubr.f32.gmra.mrb[32].mxu0 %v443_v43  ;;  %1326 = vmatprep.mubr.f32.mxu1 %v452_v44  ;;  %v786_v43 = vld [vmem:[%s5292_s1 + $0x308] sm:$0xff] }
 0x109   : > { %2226 = vmatprep.mubr.f32.mxu0 %v460_v45  ;;  %v190_v44 = vld [vmem:[%s3853_s13 + $0x68] sm:$0xff]  ;;  %v913_v45 = vld [vmem:[%s5292_s1 + $0x700] sm:$0xff] }
 0x10b   : > { %1327 = vmatmul.mubr.f32.gmra.mrb[34].mxu1 %v451_v46  ;;  %v914_v46 = vld [vmem:[%s5292_s1 + $0x708] sm:$0xff] }
 0x10c   : > { %2227 = vmatmul.mubr.f32.gmra.mrb[34].mxu0 %v459_v47  ;;  %1331 = vmatprep.mubr.f32.mxu1 %v468_v48  ;;  %v181_v47 = vld [vmem:[%s3853_s13 + $0x20] sm:$0xff]  ;;  %v3032_v48 = vpack.c.bf16 %v786_v43, %v785_v42  ;;  %v926_v43 = vld [vmem:[%s5292_s1 + $0x768] sm:$0xff] }
 0x10d   : > { %2231 = vmatprep.mubr.f32.mxu0 %v476_v49  ;;  %v189_v49 = vld [vmem:[%s3853_s13 + $0x60] sm:$0xff] }
 0x10e   : > { %v925_v42 = vld [vmem:[%s5292_s1 + $0x760] sm:$0xff] }
 0x10f   : > { %1332 = vmatmul.mubr.f32.gmra.mrb[36].mxu1 %v467_v50  ;;  %v198_v50 = vld [vmem:[%s3853_s13 + $0xa8] sm:$0xff] }
 0x110   : > { %2232 = vmatmul.mubr.f32.gmra.mrb[36].mxu0 %v475_v51  ;;  %1336 = vmatprep.mubr.f32.mxu1 %v484_v52  ;;  %v206_v51 = vld [vmem:[%s3853_s13 + $0xe8] sm:$0xff]  ;;  %v3224_v52 = vpack.c.bf16 %v914_v46, %v913_v45  ;;  %v285_v45 = vld [vmem:[%s3853_s13 + $0x360] sm:$0xff] }
 0x111   : > { %2236 = vmatprep.mubr.f32.mxu0 %v492_v53  ;;  %v787_v53 = vld [vmem:[%s5292_s1 + $0x310] sm:$0xff]  ;;  %v294_v46 = vld [vmem:[%s3853_s13 + $0x3a8] sm:$0xff] }
 0x113   : > { %1337 = vmatmul.mubr.f32.gmra.mrb[38].mxu1 %v483_v54  ;;  %v788_v54 = vld [vmem:[%s5292_s1 + $0x318] sm:$0xff] }
 0x114   : > { %2237 = vmatmul.mubr.f32.gmra.mrb[38].mxu0 %v491_v55  ;;  %1341 = vmatprep.mubr.f32.mxu1 %v500_v56  ;;  %v915_v55 = vld [vmem:[%s5292_s1 + $0x710] sm:$0xff]  ;;  %v916_v56 = vld [vmem:[%s5292_s1 + $0x718] sm:$0xff] }
 0x115   : > { %2241 = vmatprep.mubr.f32.mxu0 %v508_v57  ;;  %v197_v57 = vld [vmem:[%s3853_s13 + $0xa0] sm:$0xff] }
 0x117   : > { %1342 = vmatmul.mubr.f32.gmra.mrb[40].mxu1 %v499_v58  ;;  %v205_v58 = vld [vmem:[%s3853_s13 + $0xe0] sm:$0xff] }
 0x118   : > { %2242 = vmatmul.mubr.f32.gmra.mrb[40].mxu0 %v507_v59  ;;  %1346 = vmatprep.mubr.f32.mxu1 %v516_v60  ;;  %v214_v59 = vld [vmem:[%s3853_s13 + $0x128] sm:$0xff]  ;;  %v3035_v60 = vpack.c.bf16 %v788_v54, %v787_v53  ;;  %v928_v53 = vld [vmem:[%s5292_s1 + $0x778] sm:$0xff]  ;;  %v293_v54 = vld [vmem:[%s3853_s13 + $0x3a0] sm:$0xff] }
 0x119   : > { %2246 = vmatprep.mubr.f32.mxu0 %v524_v61  ;;  %v222_v61 = vld [vmem:[%s3853_s13 + $0x168] sm:$0xff] }
 0x11b   : > { %1347 = vmatmul.mubr.f32.gmra.mrb[42].mxu1 %v515_v62  ;;  %v3227_v62 = vpack.c.bf16 %v916_v56, %v915_v55  ;;  %v301_v55 = vld [vmem:[%s3853_s13 + $0x3e0] sm:$0xff]  ;;  %v310_v56 = vld [vmem:[%s3853_s13 + $0x428] sm:$0xff] }
 0x11c   : > { %2247 = vmatmul.mubr.f32.gmra.mrb[42].mxu0 %v523_v63  ;;  %1351 = vmatprep.mubr.f32.mxu1 %v532_v0  ;;  %v789_v63 = vld [vmem:[%s5292_s1 + $0x320] sm:$0xff]  ;;  %v790_v0 = vld [vmem:[%s5292_s1 + $0x328] sm:$0xff] }
 0x11d   : > { %2251 = vmatprep.mubr.f32.mxu0 %v540_v1  ;;  %v917_v1 = vld [vmem:[%s5292_s1 + $0x720] sm:$0xff] }
 0x11f   : > { %1352 = vmatmul.mubr.f32.gmra.mrb[44].mxu1 %v531_v2  ;;  %v918_v2 = vld [vmem:[%s5292_s1 + $0x728] sm:$0xff] }
 0x120   : > { %2252 = vmatmul.mubr.f32.gmra.mrb[44].mxu0 %v539_v4  ;;  %1356 = vmatprep.mubr.f32.mxu1 %v548_v5  ;;  %v213_v4 = vld [vmem:[%s3853_s13 + $0x120] sm:$0xff] }
 0x121   : > { %2256 = vmatprep.mubr.f32.mxu0 %v556_v6  ;;  %v221_v5 = vld [vmem:[%s3853_s13 + $0x160] sm:$0xff]  ;;  %v230_v6 = vld [vmem:[%s3853_s13 + $0x1a8] sm:$0xff] }
 0x123   : > { %1357 = vmatmul.mubr.f32.gmra.mrb[46].mxu1 %v547_v7  ;;  %v3038_v7 = vpack.c.bf16 %v790_v0, %v789_v63  ;;  %v930_v63 = vld [vmem:[%s5292_s1 + $0x788] sm:$0xff]  ;;  %v309_v0 = vld [vmem:[%s3853_s13 + $0x420] sm:$0xff] }
 0x124   : > { %2257 = vmatmul.mubr.f32.gmra.mrb[46].mxu0 %v555_v8  ;;  %1361 = vmatprep.mubr.f32.mxu1 %v564_v9  ;;  %v238_v8 = vld [vmem:[%s3853_s13 + $0x1e8] sm:$0xff]  ;;  %v3230_v9 = vpack.c.bf16 %v918_v2, %v917_v1  ;;  %v317_v1 = vld [vmem:[%s3853_s13 + $0x460] sm:$0xff] }
 0x125   : > { %2261 = vmatprep.mubr.f32.mxu0 %v572_v10  ;;  %v791_v10 = vld [vmem:[%s5292_s1 + $0x330] sm:$0xff]  ;;  %v326_v2 = vld [vmem:[%s3853_s13 + $0x4a8] sm:$0xff] }
 0x127   : > { %1362 = vmatmul.mubr.f32.gmra.mrb[48].mxu1 %v563_v11  ;;  %v792_v11 = vld [vmem:[%s5292_s1 + $0x338] sm:$0xff] }
 0x128   : > { %2262 = vmatmul.mubr.f32.gmra.mrb[48].mxu0 %v571_v12  ;;  %1366 = vmatprep.mubr.f32.mxu1 %v580_v13  ;;  %v919_v12 = vld [vmem:[%s5292_s1 + $0x730] sm:$0xff]  ;;  %v920_v13 = vld [vmem:[%s5292_s1 + $0x738] sm:$0xff] }
 0x129   : > { %2266 = vmatprep.mubr.f32.mxu0 %v588_v14  ;;  %v229_v14 = vld [vmem:[%s3853_s13 + $0x1a0] sm:$0xff] }
 0x12b   : > { %1367 = vmatmul.mubr.f32.gmra.mrb[50].mxu1 %v579_v15  ;;  %v237_v15 = vld [vmem:[%s3853_s13 + $0x1e0] sm:$0xff] }
 0x12c   : > { %2267 = vmatmul.mubr.f32.gmra.mrb[50].mxu0 %v587_v16  ;;  %1371 = vmatprep.mubr.f32.mxu1 %v596_v17  ;;  %v246_v16 = vld [vmem:[%s3853_s13 + $0x228] sm:$0xff]  ;;  %v3041_v17 = vpack.c.bf16 %v792_v11, %v791_v10  ;;  %v932_v10 = vld [vmem:[%s5292_s1 + $0x798] sm:$0xff]  ;;  %v325_v11 = vld [vmem:[%s3853_s13 + $0x4a0] sm:$0xff] }
 0x12d   : > { %2271 = vmatprep.mubr.f32.mxu0 %v604_v18  ;;  %v254_v18 = vld [vmem:[%s3853_s13 + $0x268] sm:$0xff] }
 0x12f   : > { %1372 = vmatmul.mubr.f32.gmra.mrb[52].mxu1 %v595_v19  ;;  %v3233_v19 = vpack.c.bf16 %v920_v13, %v919_v12  ;;  %v333_v12 = vld [vmem:[%s3853_s13 + $0x4e0] sm:$0xff]  ;;  %v342_v13 = vld [vmem:[%s3853_s13 + $0x528] sm:$0xff] }
 0x130   : > { %2272 = vmatmul.mubr.f32.gmra.mrb[52].mxu0 %v603_v20  ;;  %1376 = vmatprep.mubr.f32.mxu1 %v612_v21  ;;  %v793_v20 = vld [vmem:[%s5292_s1 + $0x340] sm:$0xff]  ;;  %v794_v21 = vld [vmem:[%s5292_s1 + $0x348] sm:$0xff] }
 0x131   : > { %2276 = vmatprep.mubr.f32.mxu0 %v620_v22  ;;  %v921_v22 = vld [vmem:[%s5292_s1 + $0x740] sm:$0xff] }
 0x133   : > { %1377 = vmatmul.mubr.f32.gmra.mrb[54].mxu1 %v611_v23  ;;  %v922_v23 = vld [vmem:[%s5292_s1 + $0x748] sm:$0xff] }
 0x134   : > { %2277 = vmatmul.mubr.f32.gmra.mrb[54].mxu0 %v619_v24  ;;  %1381 = vmatprep.mubr.f32.mxu1 %v628_v25  ;;  %v245_v24 = vld [vmem:[%s3853_s13 + $0x220] sm:$0xff] }
 0x135   : > { %2281 = vmatprep.mubr.f32.mxu0 %v636_v26  ;;  %v253_v25 = vld [vmem:[%s3853_s13 + $0x260] sm:$0xff]  ;;  %v262_v26 = vld [vmem:[%s3853_s13 + $0x2a8] sm:$0xff] }
 0x137   : > { %1382 = vmatmul.mubr.f32.gmra.mrb[56].mxu1 %v627_v27  ;;  %v3044_v27 = vpack.c.bf16 %v794_v21, %v793_v20  ;;  %v934_v20 = vld [vmem:[%s5292_s1 + $0x7a8] sm:$0xff]  ;;  %v341_v21 = vld [vmem:[%s3853_s13 + $0x520] sm:$0xff] }
 0x138   : > { %2282 = vmatmul.mubr.f32.gmra.mrb[56].mxu0 %v635_v28  ;;  %1386 = vmatprep.mubr.f32.mxu1 %v644_v29  ;;  %v270_v28 = vld [vmem:[%s3853_s13 + $0x2e8] sm:$0xff]  ;;  %v3236_v29 = vpack.c.bf16 %v922_v23, %v921_v22  ;;  %v349_v22 = vld [vmem:[%s3853_s13 + $0x560] sm:$0xff] }
 0x139   : > { %2286 = vmatprep.mubr.f32.mxu0 %v652_v30  ;;  %v795_v30 = vld [vmem:[%s5292_s1 + $0x350] sm:$0xff]  ;;  %v358_v23 = vld [vmem:[%s3853_s13 + $0x5a8] sm:$0xff] }
 0x13b   : > { %1387 = vmatmul.mubr.f32.gmra.mrb[58].mxu1 %v643_v31  ;;  %v796_v31 = vld [vmem:[%s5292_s1 + $0x358] sm:$0xff] }
 0x13c   : > { %2287 = vmatmul.mubr.f32.gmra.mrb[58].mxu0 %v651_v32  ;;  %1391 = vmatprep.mubr.f32.mxu1 %v660_v33  ;;  %v923_v32 = vld [vmem:[%s5292_s1 + $0x750] sm:$0xff]  ;;  %v924_v33 = vld [vmem:[%s5292_s1 + $0x758] sm:$0xff] }
 0x13d   : > { %2291 = vmatprep.mubr.f32.mxu0 %v668_v34  ;;  %v261_v34 = vld [vmem:[%s3853_s13 + $0x2a0] sm:$0xff] }
 0x13f   : > { %1392 = vmatmul.mubr.f32.gmra.mrb[60].mxu1 %v659_v35  ;;  %v269_v35 = vld [vmem:[%s3853_s13 + $0x2e0] sm:$0xff] }
 0x140   : > { %2292 = vmatmul.mubr.f32.gmra.mrb[60].mxu0 %v667_v36  ;;  %1396 = vmatprep.mubr.f32.mxu1 %v676_v37  ;;  %v278_v36 = vld [vmem:[%s3853_s13 + $0x328] sm:$0xff]  ;;  %v3047_v37 = vpack.c.bf16 %v796_v31, %v795_v30  ;;  %v936_v30 = vld [vmem:[%s5292_s1 + $0x7b8] sm:$0xff]  ;;  %v357_v31 = vld [vmem:[%s3853_s13 + $0x5a0] sm:$0xff] }
 0x141   : > { %2296 = vmatprep.mubr.f32.mxu0 %v684_v38  ;;  %v286_v38 = vld [vmem:[%s3853_s13 + $0x368] sm:$0xff] }
 0x143   : > { %1397 = vmatmul.mubr.f32.gmra.mrb[62].mxu1 %v675_v39  ;;  %v3239_v39 = vpack.c.bf16 %v924_v33, %v923_v32  ;;  %v365_v32 = vld [vmem:[%s3853_s13 + $0x5e0] sm:$0xff]  ;;  %v374_v33 = vld [vmem:[%s3853_s13 + $0x628] sm:$0xff] }
 0x144   : > { %2297 = vmatmul.mubr.f32.gmra.mrb[62].mxu0 %v683_v40  ;;  %1466 = vmatprep.mubr.f32.mxu1 %v182_v41  ;;  %v797_v40 = vld [vmem:[%s5292_s1 + $0x360] sm:$0xff]  ;;  %v798_v41 = vld [vmem:[%s5292_s1 + $0x368] sm:$0xff] }
 0x145   : > { %2366 = vmatprep.mubr.f32.mxu0 %v190_v44  ;;  %v277_v44 = vld [vmem:[%s3853_s13 + $0x320] sm:$0xff] }
 0x147   : > { %1467 = vmatmul.mubr.f32.vlgmr.msra.gmra.mrb[0].mxu1 %v181_v47  ;;  %v3050_v47 = vpack.c.bf16 %v798_v41, %v797_v40  ;;  %v938_v40 = vld [vmem:[%s5292_s1 + $0x7c8] sm:$0xff]  ;;  %v373_v41 = vld [vmem:[%s3853_s13 + $0x620] sm:$0xff] }
 0x148   : > { %2367 = vmatmul.mubr.f32.vlgmr.msra.gmra.mrb[0].mxu0 %v189_v49  ;;  %3033 = vmatpush1.bf16.msra.mxu1 %v3032_v48  ;;  %v302_v48 = vld [vmem:[%s3853_s13 + $0x3e8] sm:$0xff]  ;;  %v3242_v49 = vpack.c.bf16 %v926_v43, %v925_v42  ;;  %v381_v42 = vld [vmem:[%s3853_s13 + $0x660] sm:$0xff] }
 0x149   : > { %1471 = vmatprep.mubr.f32.mxu1 %v198_v50  ;;  %2371 = vmatprep.mubr.f32.mxu0 %v206_v51  ;;  %v799_v50 = vld [vmem:[%s5292_s1 + $0x370] sm:$0xff]  ;;  %v800_v51 = vld [vmem:[%s5292_s1 + $0x378] sm:$0xff]  ;;  %v390_v43 = vld [vmem:[%s3853_s13 + $0x6a8] sm:$0xff] }
 0x14a   : > { %3225 = vmatpush1.bf16.msra.mxu0 %v3224_v52  ;;  %3034 = vmatprep.subr.bf16.mxu1 %v3736_v3  ;;  %v927_v52 = vld [vmem:[%s5292_s1 + $0x770] sm:$0xff] }
 0x14b   : > { %1472 = vmatmul.mubr.f32.gmra.mrb[2].mxu1 %v197_v57  ;;  %3226 = vmatprep.subr.bf16.mxu0 %v3736_v3  ;;  %v3053_v57 = vpack.c.bf16 %v800_v51, %v799_v50  ;;  %v940_v50 = vld [vmem:[%s5292_s1 + $0x7d8] sm:$0xff]  ;;  %v389_v51 = vld [vmem:[%s3853_s13 + $0x6a0] sm:$0xff] }
 0x14c   : > { %2372 = vmatmul.mubr.f32.gmra.mrb[2].mxu0 %v205_v58  ;;  %1476 = vmatprep.mubr.f32.mxu1 %v214_v59  ;;  %v318_v58 = vld [vmem:[%s3853_s13 + $0x468] sm:$0xff]  ;;  %v3245_v59 = vpack.c.bf16 %v928_v53, %v927_v52  ;;  %v397_v52 = vld [vmem:[%s3853_s13 + $0x6e0] sm:$0xff] }
 0x14d   : > { %2376 = vmatprep.mubr.f32.mxu0 %v222_v61  ;;  %3036 = vmatpush1.bf16.msra.mxu1 %v3035_v60  ;;  %v801_v60 = vld [vmem:[%s5292_s1 + $0x380] sm:$0xff]  ;;  %v802_v61 = vld [vmem:[%s5292_s1 + $0x388] sm:$0xff] }
 0x14e   : > { %3228 = vmatpush1.bf16.msra.mxu0 %v3227_v62  ;;  %3037 = vmatprep.subr.bf16.mxu1 %v3736_v3  ;;  %v929_v62 = vld [vmem:[%s5292_s1 + $0x780] sm:$0xff]  ;;  %v406_v53 = vld [vmem:[%s3853_s13 + $0x728] sm:$0xff] }
 0x14f   : > { %1477 = vmatmul.mubr.f32.gmra.mrb[4].mxu1 %v213_v4  ;;  %3229 = vmatprep.subr.bf16.mxu0 %v3736_v3  ;;  %v3056_v4 = vpack.c.bf16 %v802_v61, %v801_v60  ;;  %v942_v60 = vld [vmem:[%s5292_s1 + $0x7e8] sm:$0xff]  ;;  %v405_v61 = vld [vmem:[%s3853_s13 + $0x720] sm:$0xff] }
 0x150   : > { %2377 = vmatmul.mubr.f32.gmra.mrb[4].mxu0 %v221_v5  ;;  %1481 = vmatprep.mubr.f32.mxu1 %v230_v6  ;;  %v334_v5 = vld [vmem:[%s3853_s13 + $0x4e8] sm:$0xff]  ;;  %v3248_v6 = vpack.c.bf16 %v930_v63, %v929_v62  ;;  %v413_v62 = vld [vmem:[%s3853_s13 + $0x760] sm:$0xff] }
 0x151   : > { %2381 = vmatprep.mubr.f32.mxu0 %v238_v8  ;;  %3039 = vmatpush1.bf16.msra.mxu1 %v3038_v7  ;;  %v803_v7 = vld [vmem:[%s5292_s1 + $0x390] sm:$0xff]  ;;  %v804_v8 = vld [vmem:[%s5292_s1 + $0x398] sm:$0xff]  ;;  %v422_v63 = vld [vmem:[%s3853_s13 + $0x7a8] sm:$0xff] }
 0x152   : > { %3231 = vmatpush1.bf16.msra.mxu0 %v3230_v9  ;;  %3040 = vmatprep.subr.bf16.mxu1 %v3736_v3  ;;  %v931_v9 = vld [vmem:[%s5292_s1 + $0x790] sm:$0xff] }
 0x153   : > { %1482 = vmatmul.mubr.f32.gmra.mrb[6].mxu1 %v229_v14  ;;  %3232 = vmatprep.subr.bf16.mxu0 %v3736_v3  ;;  %v3059_v14 = vpack.c.bf16 %v804_v8, %v803_v7  ;;  %v944_v7 = vld [vmem:[%s5292_s1 + $0x7f8] sm:$0xff]  ;;  %v421_v8 = vld [vmem:[%s3853_s13 + $0x7a0] sm:$0xff] }
 0x154   : > { %2382 = vmatmul.mubr.f32.gmra.mrb[6].mxu0 %v237_v15  ;;  %1486 = vmatprep.mubr.f32.mxu1 %v246_v16  ;;  %v350_v15 = vld [vmem:[%s3853_s13 + $0x568] sm:$0xff]  ;;  %v3251_v16 = vpack.c.bf16 %v932_v10, %v931_v9  ;;  %v429_v9 = vld [vmem:[%s3853_s13 + $0x7e0] sm:$0xff] }
 0x155   : > { %2386 = vmatprep.mubr.f32.mxu0 %v254_v18  ;;  %3042 = vmatpush1.bf16.msra.mxu1 %v3041_v17  ;;  %v805_v17 = vld [vmem:[%s5292_s1 + $0x3a0] sm:$0xff]  ;;  %v806_v18 = vld [vmem:[%s5292_s1 + $0x3a8] sm:$0xff] }
 0x156   : > { %3234 = vmatpush1.bf16.msra.mxu0 %v3233_v19  ;;  %3043 = vmatprep.subr.bf16.mxu1 %v3736_v3  ;;  %v933_v19 = vld [vmem:[%s5292_s1 + $0x7a0] sm:$0xff]  ;;  %v438_v10 = vld [vmem:[%s3853_s13 + $0x828] sm:$0xff] }
 0x157   : > { %1487 = vmatmul.mubr.f32.gmra.mrb[8].mxu1 %v245_v24  ;;  %3235 = vmatprep.subr.bf16.mxu0 %v3736_v3  ;;  %v3062_v24 = vpack.c.bf16 %v806_v18, %v805_v17  ;;  %v462_v17 = vld [vmem:[%s3853_s13 + $0x8e8] sm:$0xff]  ;;  %v453_v18 = vld [vmem:[%s3853_s13 + $0x8a0] sm:$0xff] }
 0x158   : > { %2387 = vmatmul.mubr.f32.gmra.mrb[8].mxu0 %v253_v25  ;;  %1491 = vmatprep.mubr.f32.mxu1 %v262_v26  ;;  %v366_v25 = vld [vmem:[%s3853_s13 + $0x5e8] sm:$0xff]  ;;  %v3254_v26 = vpack.c.bf16 %v934_v20, %v933_v19 }
 0x159   : > { %2391 = vmatprep.mubr.f32.mxu0 %v270_v28  ;;  %3045 = vmatpush1.bf16.msra.mxu1 %v3044_v27  ;;  %v807_v27 = vld [vmem:[%s5292_s1 + $0x3b0] sm:$0xff]  ;;  %v808_v28 = vld [vmem:[%s5292_s1 + $0x3b8] sm:$0xff]  ;;  %v470_v19 = vld [vmem:[%s3853_s13 + $0x928] sm:$0xff] }
 0x15a   : > { %3237 = vmatpush1.bf16.msra.mxu0 %v3236_v29  ;;  %3046 = vmatprep.subr.bf16.mxu1 %v3736_v3  ;;  %v935_v29 = vld [vmem:[%s5292_s1 + $0x7b0] sm:$0xff]  ;;  %v478_v20 = vld [vmem:[%s3853_s13 + $0x968] sm:$0xff] }
 0x15b   : > { %1492 = vmatmul.mubr.f32.gmra.mrb[10].mxu1 %v261_v34  ;;  %3238 = vmatprep.subr.bf16.mxu0 %v3736_v3  ;;  %v3065_v34 = vpack.c.bf16 %v808_v28, %v807_v27  ;;  %v502_v27 = vld [vmem:[%s3853_s13 + $0xa28] sm:$0xff] }
 0x15c   : > { %2392 = vmatmul.mubr.f32.gmra.mrb[10].mxu0 %v269_v35  ;;  %1496 = vmatprep.mubr.f32.mxu1 %v278_v36  ;;  %v382_v35 = vld [vmem:[%s3853_s13 + $0x668] sm:$0xff]  ;;  %v3257_v36 = vpack.c.bf16 %v936_v30, %v935_v29  ;;  %v501_v29 = vld [vmem:[%s3853_s13 + $0xa20] sm:$0xff] }
 0x15d   : > { %2396 = vmatprep.mubr.f32.mxu0 %v286_v38  ;;  %3048 = vmatpush1.bf16.msra.mxu1 %v3047_v37  ;;  %v809_v37 = vld [vmem:[%s5292_s1 + $0x3c0] sm:$0xff]  ;;  %v810_v38 = vld [vmem:[%s5292_s1 + $0x3c8] sm:$0xff] }
 0x15e   : > { %3240 = vmatpush1.bf16.msra.mxu0 %v3239_v39  ;;  %3049 = vmatprep.subr.bf16.mxu1 %v3736_v3  ;;  %v937_v39 = vld [vmem:[%s5292_s1 + $0x7c0] sm:$0xff]  ;;  %v510_v28 = vld [vmem:[%s3853_s13 + $0xa68] sm:$0xff] }
 0x15f   : > { %1497 = vmatmul.mubr.f32.gmra.mrb[12].mxu1 %v277_v44  ;;  %3241 = vmatprep.subr.bf16.mxu0 %v3736_v3  ;;  %v3068_v44 = vpack.c.bf16 %v810_v38, %v809_v37  ;;  %v509_v30 = vld [vmem:[%s3853_s13 + $0xa60] sm:$0xff] }
 0x160   : > { %2397 = vmatmul.mubr.f32.gmra.mrb[12].mxu0 %v285_v45  ;;  %1501 = vmatprep.mubr.f32.mxu1 %v294_v46  ;;  %v398_v45 = vld [vmem:[%s3853_s13 + $0x6e8] sm:$0xff]  ;;  %v3260_v46 = vpack.c.bf16 %v938_v40, %v937_v39  ;;  %v533_v37 = vld [vmem:[%s3853_s13 + $0xb20] sm:$0xff] }
 0x161   : > { %2401 = vmatprep.mubr.f32.mxu0 %v302_v48  ;;  %3051 = vmatpush1.bf16.msra.mxu1 %v3050_v47  ;;  %v811_v47 = vld [vmem:[%s5292_s1 + $0x3d0] sm:$0xff]  ;;  %v812_v48 = vld [vmem:[%s5292_s1 + $0x3d8] sm:$0xff]  ;;  %v541_v38 = vld [vmem:[%s3853_s13 + $0xb60] sm:$0xff] }
 0x162   : > { %3243 = vmatpush1.bf16.msra.mxu0 %v3242_v49  ;;  %3052 = vmatprep.subr.bf16.mxu1 %v3736_v3  ;;  %v939_v49 = vld [vmem:[%s5292_s1 + $0x7d0] sm:$0xff]  ;;  %v550_v39 = vld [vmem:[%s3853_s13 + $0xba8] sm:$0xff] }
 0x163   : > { %1502 = vmatmul.mubr.f32.gmra.mrb[14].mxu1 %v293_v54  ;;  %3244 = vmatprep.subr.bf16.mxu0 %v3736_v3  ;;  %v3071_v54 = vpack.c.bf16 %v812_v48, %v811_v47  ;;  %v558_v40 = vld [vmem:[%s3853_s13 + $0xbe8] sm:$0xff] }
 0x164   : > { %2402 = vmatmul.mubr.f32.gmra.mrb[14].mxu0 %v301_v55  ;;  %1506 = vmatprep.mubr.f32.mxu1 %v310_v56  ;;  %v414_v55 = vld [vmem:[%s3853_s13 + $0x768] sm:$0xff]  ;;  %v3263_v56 = vpack.c.bf16 %v940_v50, %v939_v49  ;;  %v581_v49 = vld [vmem:[%s3853_s13 + $0xca0] sm:$0xff] }
 0x165   : > { %2406 = vmatprep.mubr.f32.mxu0 %v318_v58  ;;  %3054 = vmatpush1.bf16.msra.mxu1 %v3053_v57  ;;  %v813_v57 = vld [vmem:[%s5292_s1 + $0x3e0] sm:$0xff]  ;;  %v814_v58 = vld [vmem:[%s5292_s1 + $0x3e8] sm:$0xff] }
 0x166   : > { %3246 = vmatpush1.bf16.msra.mxu0 %v3245_v59  ;;  %3055 = vmatprep.subr.bf16.mxu1 %v3736_v3  ;;  %v941_v59 = vld [vmem:[%s5292_s1 + $0x7e0] sm:$0xff]  ;;  %v582_v47 = vld [vmem:[%s3853_s13 + $0xca8] sm:$0xff] }
 0x167   : > { %1507 = vmatmul.mubr.f32.gmra.mrb[16].mxu1 %v309_v0  ;;  %3247 = vmatprep.subr.bf16.mxu0 %v3736_v3  ;;  %v3074_v0 = vpack.c.bf16 %v814_v58, %v813_v57  ;;  %v590_v48 = vld [vmem:[%s3853_s13 + $0xce8] sm:$0xff]  ;;  %v589_v50 = vld [vmem:[%s3853_s13 + $0xce0] sm:$0xff] }
 0x168   : > { %2407 = vmatmul.mubr.f32.gmra.mrb[16].mxu0 %v317_v1  ;;  %1511 = vmatprep.mubr.f32.mxu1 %v326_v2  ;;  %v430_v1 = vld [vmem:[%s3853_s13 + $0x7e8] sm:$0xff]  ;;  %v3266_v2 = vpack.c.bf16 %v942_v60, %v941_v59  ;;  %v613_v57 = vld [vmem:[%s3853_s13 + $0xda0] sm:$0xff] }
 0x169   : > { %2411 = vmatprep.mubr.f32.mxu0 %v334_v5  ;;  %3057 = vmatpush1.bf16.msra.mxu1 %v3056_v4  ;;  %v815_v4 = vld [vmem:[%s5292_s1 + $0x3f0] sm:$0xff]  ;;  %v816_v5 = vld [vmem:[%s5292_s1 + $0x3f8] sm:$0xff]  ;;  %v621_v58 = vld [vmem:[%s3853_s13 + $0xde0] sm:$0xff] }
 0x16a   : > { %3249 = vmatpush1.bf16.msra.mxu0 %v3248_v6  ;;  %3058 = vmatprep.subr.bf16.mxu1 %v3736_v3  ;;  %v943_v6 = vld [vmem:[%s5292_s1 + $0x7f0] sm:$0xff]  ;;  %v630_v59 = vld [vmem:[%s3853_s13 + $0xe28] sm:$0xff] }
 0x16b   : > { %1512 = vmatmul.mubr.f32.gmra.mrb[18].mxu1 %v325_v11  ;;  %3250 = vmatprep.subr.bf16.mxu0 %v3736_v3  ;;  %v3077_v11 = vpack.c.bf16 %v816_v5, %v815_v4  ;;  %v638_v60 = vld [vmem:[%s3853_s13 + $0xe68] sm:$0xff] }
 0x16c   : > { %2412 = vmatmul.mubr.f32.gmra.mrb[18].mxu0 %v333_v12  ;;  %1516 = vmatprep.mubr.f32.mxu1 %v342_v13  ;;  %v446_v12 = vld [vmem:[%s3853_s13 + $0x868] sm:$0xff]  ;;  %v3269_v13 = vpack.c.bf16 %v944_v7, %v943_v6  ;;  %v661_v6 = vld [vmem:[%s3853_s13 + $0xf20] sm:$0xff] }
 0x16d   : > { %2416 = vmatprep.mubr.f32.mxu0 %v350_v15  ;;  %3060 = vmatpush1.bf16.msra.mxu1 %v3059_v14  ;;  %v437_v14 = vld [vmem:[%s3853_s13 + $0x820] sm:$0xff]  ;;  %v662_v4 = vld [vmem:[%s3853_s13 + $0xf28] sm:$0xff] }
 0x16e   : > { %3252 = vmatpush1.bf16.msra.mxu0 %v3251_v16  ;;  %3061 = vmatprep.subr.bf16.mxu1 %v3736_v3  ;;  %v445_v15 = vld [vmem:[%s3853_s13 + $0x860] sm:$0xff]  ;;  %v454_v16 = vld [vmem:[%s3853_s13 + $0x8a8] sm:$0xff] }
 0x16f   : > { %1517 = vmatmul.mubr.f32.gmra.mrb[20].mxu1 %v341_v21  ;;  %3253 = vmatprep.subr.bf16.mxu0 %v3736_v3  ;;  %v469_v21 = vld [vmem:[%s3853_s13 + $0x920] sm:$0xff]  ;;  %v670_v5 = vld [vmem:[%s3853_s13 + $0xf68] sm:$0xff] }
 0x170   : > { %2417 = vmatmul.mubr.f32.gmra.mrb[20].mxu0 %v349_v22  ;;  %1521 = vmatprep.mubr.f32.mxu1 %v358_v23  ;;  %v477_v22 = vld [vmem:[%s3853_s13 + $0x960] sm:$0xff]  ;;  %v486_v23 = vld [vmem:[%s3853_s13 + $0x9a8] sm:$0xff] }
 0x171   : > { %2421 = vmatprep.mubr.f32.mxu0 %v366_v25  ;;  %3063 = vmatpush1.bf16.msra.mxu1 %v3062_v24  ;;  %v494_v24 = vld [vmem:[%s3853_s13 + $0x9e8] sm:$0xff]  ;;  %v485_v25 = vld [vmem:[%s3853_s13 + $0x9a0] sm:$0xff] }
 0x172   : > { %3255 = vmatpush1.bf16.msra.mxu0 %v3254_v26  ;;  %3064 = vmatprep.subr.bf16.mxu1 %v3736_v3  ;;  %v493_v26 = vld [vmem:[%s3853_s13 + $0x9e0] sm:$0xff] }
 0x173   : > { %1522 = vmatmul.mubr.f32.gmra.mrb[22].mxu1 %v357_v31  ;;  %3256 = vmatprep.subr.bf16.mxu0 %v3736_v3  ;;  %v518_v31 = vld [vmem:[%s3853_s13 + $0xaa8] sm:$0xff]  ;;  %v669_v7 = vld [vmem:[%s3853_s13 + $0xf60] sm:$0xff] }
 0x174   : > { %2422 = vmatmul.mubr.f32.gmra.mrb[22].mxu0 %v365_v32  ;;  %1526 = vmatprep.mubr.f32.mxu1 %v374_v33  ;;  %v526_v32 = vld [vmem:[%s3853_s13 + $0xae8] sm:$0xff]  ;;  %v517_v33 = vld [vmem:[%s3853_s13 + $0xaa0] sm:$0xff] }
 0x175   : > { %2426 = vmatprep.mubr.f32.mxu0 %v382_v35  ;;  %3066 = vmatpush1.bf16.msra.mxu1 %v3065_v34  ;;  %v525_v34 = vld [vmem:[%s3853_s13 + $0xae0] sm:$0xff]  ;;  %v534_v35 = vld [vmem:[%s3853_s13 + $0xb28] sm:$0xff] }
 0x176   : > { %3258 = vmatpush1.bf16.msra.mxu0 %v3257_v36  ;;  %3067 = vmatprep.subr.bf16.mxu1 %v3736_v3  ;;  %v542_v36 = vld [vmem:[%s3853_s13 + $0xb68] sm:$0xff] }
 0x177   : > { %1527 = vmatmul.mubr.f32.gmra.mrb[24].mxu1 %v373_v41  ;;  %3259 = vmatprep.subr.bf16.mxu0 %v3736_v3  ;;  %v549_v41 = vld [vmem:[%s3853_s13 + $0xba0] sm:$0xff] }
 0x178   : > { %2427 = vmatmul.mubr.f32.gmra.mrb[24].mxu0 %v381_v42  ;;  %1531 = vmatprep.mubr.f32.mxu1 %v390_v43  ;;  %v557_v42 = vld [vmem:[%s3853_s13 + $0xbe0] sm:$0xff]  ;;  %v566_v43 = vld [vmem:[%s3853_s13 + $0xc28] sm:$0xff] }
 0x179   : > { %2431 = vmatprep.mubr.f32.mxu0 %v398_v45  ;;  %3069 = vmatpush1.bf16.msra.mxu1 %v3068_v44  ;;  %v574_v44 = vld [vmem:[%s3853_s13 + $0xc68] sm:$0xff]  ;;  %v565_v45 = vld [vmem:[%s3853_s13 + $0xc20] sm:$0xff] }
 0x17a   : > { %3261 = vmatpush1.bf16.msra.mxu0 %v3260_v46  ;;  %3070 = vmatprep.subr.bf16.mxu1 %v3736_v3  ;;  %v573_v46 = vld [vmem:[%s3853_s13 + $0xc60] sm:$0xff] }
 0x17b   : > { %1532 = vmatmul.mubr.f32.gmra.mrb[26].mxu1 %v389_v51  ;;  %3262 = vmatprep.subr.bf16.mxu0 %v3736_v3  ;;  %v598_v51 = vld [vmem:[%s3853_s13 + $0xd28] sm:$0xff] }
 0x17c   : > { %2432 = vmatmul.mubr.f32.gmra.mrb[26].mxu0 %v397_v52  ;;  %1536 = vmatprep.mubr.f32.mxu1 %v406_v53  ;;  %v606_v52 = vld [vmem:[%s3853_s13 + $0xd68] sm:$0xff]  ;;  %v597_v53 = vld [vmem:[%s3853_s13 + $0xd20] sm:$0xff] }
 0x17d   : > { %2436 = vmatprep.mubr.f32.mxu0 %v414_v55  ;;  %3072 = vmatpush1.bf16.msra.mxu1 %v3071_v54  ;;  %v605_v54 = vld [vmem:[%s3853_s13 + $0xd60] sm:$0xff]  ;;  %v614_v55 = vld [vmem:[%s3853_s13 + $0xda8] sm:$0xff] }
 0x17e   : > { %3264 = vmatpush1.bf16.msra.mxu0 %v3263_v56  ;;  %3073 = vmatprep.subr.bf16.mxu1 %v3736_v3  ;;  %v622_v56 = vld [vmem:[%s3853_s13 + $0xde8] sm:$0xff] }
 0x17f   : > { %1537 = vmatmul.mubr.f32.gmra.mrb[28].mxu1 %v405_v61  ;;  %3265 = vmatprep.subr.bf16.mxu0 %v3736_v3  ;;  %v629_v61 = vld [vmem:[%s3853_s13 + $0xe20] sm:$0xff] }
 0x180   : > { %2437 = vmatmul.mubr.f32.gmra.mrb[28].mxu0 %v413_v62  ;;  %1541 = vmatprep.mubr.f32.mxu1 %v422_v63  ;;  %v637_v62 = vld [vmem:[%s3853_s13 + $0xe60] sm:$0xff]  ;;  %v646_v63 = vld [vmem:[%s3853_s13 + $0xea8] sm:$0xff] }
 0x181   : > { %2441 = vmatprep.mubr.f32.mxu0 %v430_v1  ;;  %3075 = vmatpush1.bf16.msra.mxu1 %v3074_v0  ;;  %v654_v0 = vld [vmem:[%s3853_s13 + $0xee8] sm:$0xff]  ;;  %v645_v1 = vld [vmem:[%s3853_s13 + $0xea0] sm:$0xff] }
 0x182   : > { %3267 = vmatpush1.bf16.msra.mxu0 %v3266_v2  ;;  %3076 = vmatprep.subr.bf16.mxu1 %v3736_v3  ;;  %v653_v2 = vld [vmem:[%s3853_s13 + $0xee0] sm:$0xff] }
 0x183   : > { %1542 = vmatmul.mubr.f32.gmra.mrb[30].mxu1 %v421_v8  ;;  %3268 = vmatprep.subr.bf16.mxu0 %v3736_v3  ;;  %v461_v3 = vld [vmem:[%s3853_s13 + $0x8e0] sm:$0xff]  ;;  %v678_v8 = vld [vmem:[%s3853_s13 + $0xfa8] sm:$0xff] }
 0x184   : > { %2442 = vmatmul.mubr.f32.gmra.mrb[30].mxu0 %v429_v9  ;;  %1546 = vmatprep.mubr.f32.mxu1 %v438_v10  ;;  %v686_v9 = vld [vmem:[%s3853_s13 + $0xfe8] sm:$0xff]  ;;  %v677_v10 = vld [vmem:[%s3853_s13 + $0xfa0] sm:$0xff] }
 0x185   : > { %2446 = vmatprep.mubr.f32.mxu0 %v446_v12  ;;  %3078 = vmatpush1.bf16.msra.mxu1 %v3077_v11  ;;  %v685_v11 = vld [vmem:[%s3853_s13 + $0xfe0] sm:$0xff]  ;;  %v184_v12 = vld [vmem:[%s3853_s13 + $0x38] sm:$0xff] }
 0x186   : > { %3270 = vmatpush1.bf16.msra.mxu0 %v3269_v13  ;;  %v192_v13 = vld [vmem:[%s3853_s13 + $0x78] sm:$0xff] }
 0x187   : > { %1547 = vmatmul.mubr.f32.gmra.mrb[32].mxu1 %v437_v14  ;;  %v183_v14 = vld [vmem:[%s3853_s13 + $0x30] sm:$0xff] }
 0x188   : > { %2447 = vmatmul.mubr.f32.gmra.mrb[32].mxu0 %v445_v15  ;;  %1551 = vmatprep.mubr.f32.mxu1 %v454_v16  ;;  %v191_v15 = vld [vmem:[%s3853_s13 + $0x70] sm:$0xff]  ;;  %v200_v16 = vld [vmem:[%s3853_s13 + $0xb8] sm:$0xff] }
 0x189   : > { %2451 = vmatprep.mubr.f32.mxu0 %v462_v17  ;;  %v208_v17 = vld [vmem:[%s3853_s13 + $0xf8] sm:$0xff] }
 0x18b   : > { %1552 = vmatmul.mubr.f32.gmra.mrb[34].mxu1 %v453_v18  ;;  %v199_v18 = vld [vmem:[%s3853_s13 + $0xb0] sm:$0xff] }
 0x18c   : > { %2452 = vmatmul.mubr.f32.gmra.mrb[34].mxu0 %v461_v3  ;;  %1556 = vmatprep.mubr.f32.mxu1 %v470_v19  ;;  %v207_v3 = vld [vmem:[%s3853_s13 + $0xf0] sm:$0xff]  ;;  %v216_v19 = vld [vmem:[%s3853_s13 + $0x138] sm:$0xff] }
 0x18d   : > { %2456 = vmatprep.mubr.f32.mxu0 %v478_v20  ;;  %v224_v20 = vld [vmem:[%s3853_s13 + $0x178] sm:$0xff] }
 0x18f   : > { %1557 = vmatmul.mubr.f32.gmra.mrb[36].mxu1 %v469_v21  ;;  %v215_v21 = vld [vmem:[%s3853_s13 + $0x130] sm:$0xff] }
 0x190   : > { %2457 = vmatmul.mubr.f32.gmra.mrb[36].mxu0 %v477_v22  ;;  %1561 = vmatprep.mubr.f32.mxu1 %v486_v23  ;;  %v223_v22 = vld [vmem:[%s3853_s13 + $0x170] sm:$0xff]  ;;  %v232_v23 = vld [vmem:[%s3853_s13 + $0x1b8] sm:$0xff] }
 0x191   : > { %2461 = vmatprep.mubr.f32.mxu0 %v494_v24  ;;  %v240_v24 = vld [vmem:[%s3853_s13 + $0x1f8] sm:$0xff] }
 0x193   : > { %1562 = vmatmul.mubr.f32.gmra.mrb[38].mxu1 %v485_v25  ;;  %v231_v25 = vld [vmem:[%s3853_s13 + $0x1b0] sm:$0xff] }
 0x194   : > { %2462 = vmatmul.mubr.f32.gmra.mrb[38].mxu0 %v493_v26  ;;  %1566 = vmatprep.mubr.f32.mxu1 %v502_v27  ;;  %v239_v26 = vld [vmem:[%s3853_s13 + $0x1f0] sm:$0xff]  ;;  %v248_v27 = vld [vmem:[%s3853_s13 + $0x238] sm:$0xff] }
 0x195   : > { %2466 = vmatprep.mubr.f32.mxu0 %v510_v28  ;;  %v256_v28 = vld [vmem:[%s3853_s13 + $0x278] sm:$0xff] }
 0x197   : > { %1567 = vmatmul.mubr.f32.gmra.mrb[40].mxu1 %v501_v29  ;;  %v247_v29 = vld [vmem:[%s3853_s13 + $0x230] sm:$0xff] }
 0x198   : > { %2467 = vmatmul.mubr.f32.gmra.mrb[40].mxu0 %v509_v30  ;;  %1571 = vmatprep.mubr.f32.mxu1 %v518_v31  ;;  %v255_v30 = vld [vmem:[%s3853_s13 + $0x270] sm:$0xff]  ;;  %v264_v31 = vld [vmem:[%s3853_s13 + $0x2b8] sm:$0xff] }
 0x199   : > { %2471 = vmatprep.mubr.f32.mxu0 %v526_v32  ;;  %v272_v32 = vld [vmem:[%s3853_s13 + $0x2f8] sm:$0xff] }
 0x19b   : > { %1572 = vmatmul.mubr.f32.gmra.mrb[42].mxu1 %v517_v33  ;;  %v263_v33 = vld [vmem:[%s3853_s13 + $0x2b0] sm:$0xff] }
 0x19c   : > { %2472 = vmatmul.mubr.f32.gmra.mrb[42].mxu0 %v525_v34  ;;  %1576 = vmatprep.mubr.f32.mxu1 %v534_v35  ;;  %v271_v34 = vld [vmem:[%s3853_s13 + $0x2f0] sm:$0xff]  ;;  %v280_v35 = vld [vmem:[%s3853_s13 + $0x338] sm:$0xff] }
 0x19d   : > { %2476 = vmatprep.mubr.f32.mxu0 %v542_v36  ;;  %v288_v36 = vld [vmem:[%s3853_s13 + $0x378] sm:$0xff] }
 0x19f   : > { %1577 = vmatmul.mubr.f32.gmra.mrb[44].mxu1 %v533_v37  ;;  %v279_v37 = vld [vmem:[%s3853_s13 + $0x330] sm:$0xff] }
 0x1a0   : > { %2477 = vmatmul.mubr.f32.gmra.mrb[44].mxu0 %v541_v38  ;;  %1581 = vmatprep.mubr.f32.mxu1 %v550_v39  ;;  %v287_v38 = vld [vmem:[%s3853_s13 + $0x370] sm:$0xff]  ;;  %v296_v39 = vld [vmem:[%s3853_s13 + $0x3b8] sm:$0xff] }
 0x1a1   : > { %2481 = vmatprep.mubr.f32.mxu0 %v558_v40  ;;  %v304_v40 = vld [vmem:[%s3853_s13 + $0x3f8] sm:$0xff] }
 0x1a3   : > { %1582 = vmatmul.mubr.f32.gmra.mrb[46].mxu1 %v549_v41  ;;  %v295_v41 = vld [vmem:[%s3853_s13 + $0x3b0] sm:$0xff] }
 0x1a4   : > { %2482 = vmatmul.mubr.f32.gmra.mrb[46].mxu0 %v557_v42  ;;  %1586 = vmatprep.mubr.f32.mxu1 %v566_v43  ;;  %v303_v42 = vld [vmem:[%s3853_s13 + $0x3f0] sm:$0xff]  ;;  %v312_v43 = vld [vmem:[%s3853_s13 + $0x438] sm:$0xff] }
 0x1a5   : > { %2486 = vmatprep.mubr.f32.mxu0 %v574_v44  ;;  %v320_v44 = vld [vmem:[%s3853_s13 + $0x478] sm:$0xff] }
 0x1a7   : > { %1587 = vmatmul.mubr.f32.gmra.mrb[48].mxu1 %v565_v45  ;;  %v311_v45 = vld [vmem:[%s3853_s13 + $0x430] sm:$0xff] }
 0x1a8   : > { %2487 = vmatmul.mubr.f32.gmra.mrb[48].mxu0 %v573_v46  ;;  %1591 = vmatprep.mubr.f32.mxu1 %v582_v47  ;;  %v319_v46 = vld [vmem:[%s3853_s13 + $0x470] sm:$0xff]  ;;  %v328_v47 = vld [vmem:[%s3853_s13 + $0x4b8] sm:$0xff] }
 0x1a9   : > { %2491 = vmatprep.mubr.f32.mxu0 %v590_v48  ;;  %v336_v48 = vld [vmem:[%s3853_s13 + $0x4f8] sm:$0xff] }
 0x1ab   : > { %1592 = vmatmul.mubr.f32.gmra.mrb[50].mxu1 %v581_v49  ;;  %v327_v49 = vld [vmem:[%s3853_s13 + $0x4b0] sm:$0xff] }
 0x1ac   : > { %2492 = vmatmul.mubr.f32.gmra.mrb[50].mxu0 %v589_v50  ;;  %1596 = vmatprep.mubr.f32.mxu1 %v598_v51  ;;  %v335_v50 = vld [vmem:[%s3853_s13 + $0x4f0] sm:$0xff]  ;;  %v344_v51 = vld [vmem:[%s3853_s13 + $0x538] sm:$0xff] }
 0x1ad   : > { %2496 = vmatprep.mubr.f32.mxu0 %v606_v52  ;;  %v352_v52 = vld [vmem:[%s3853_s13 + $0x578] sm:$0xff] }
 0x1af   : > { %1597 = vmatmul.mubr.f32.gmra.mrb[52].mxu1 %v597_v53  ;;  %v343_v53 = vld [vmem:[%s3853_s13 + $0x530] sm:$0xff] }
 0x1b0   : > { %2497 = vmatmul.mubr.f32.gmra.mrb[52].mxu0 %v605_v54  ;;  %1601 = vmatprep.mubr.f32.mxu1 %v614_v55  ;;  %v351_v54 = vld [vmem:[%s3853_s13 + $0x570] sm:$0xff]  ;;  %v360_v55 = vld [vmem:[%s3853_s13 + $0x5b8] sm:$0xff] }
 0x1b1   : > { %2501 = vmatprep.mubr.f32.mxu0 %v622_v56  ;;  %v368_v56 = vld [vmem:[%s3853_s13 + $0x5f8] sm:$0xff] }
 0x1b3   : > { %1602 = vmatmul.mubr.f32.gmra.mrb[54].mxu1 %v613_v57  ;;  %v359_v57 = vld [vmem:[%s3853_s13 + $0x5b0] sm:$0xff] }
 0x1b4   : > { %2502 = vmatmul.mubr.f32.gmra.mrb[54].mxu0 %v621_v58  ;;  %1606 = vmatprep.mubr.f32.mxu1 %v630_v59  ;;  %v367_v58 = vld [vmem:[%s3853_s13 + $0x5f0] sm:$0xff]  ;;  %v376_v59 = vld [vmem:[%s3853_s13 + $0x638] sm:$0xff] }
 0x1b5   : > { %2506 = vmatprep.mubr.f32.mxu0 %v638_v60  ;;  %v384_v60 = vld [vmem:[%s3853_s13 + $0x678] sm:$0xff] }
 0x1b7   : > { %1607 = vmatmul.mubr.f32.gmra.mrb[56].mxu1 %v629_v61  ;;  %v375_v61 = vld [vmem:[%s3853_s13 + $0x630] sm:$0xff] }
 0x1b8   : > { %2507 = vmatmul.mubr.f32.gmra.mrb[56].mxu0 %v637_v62  ;;  %1611 = vmatprep.mubr.f32.mxu1 %v646_v63  ;;  %v383_v62 = vld [vmem:[%s3853_s13 + $0x670] sm:$0xff]  ;;  %v392_v63 = vld [vmem:[%s3853_s13 + $0x6b8] sm:$0xff] }
 0x1b9   : > { %2511 = vmatprep.mubr.f32.mxu0 %v654_v0  ;;  %v400_v0 = vld [vmem:[%s3853_s13 + $0x6f8] sm:$0xff] }
 0x1bb   : > { %1612 = vmatmul.mubr.f32.gmra.mrb[58].mxu1 %v645_v1  ;;  %v391_v1 = vld [vmem:[%s3853_s13 + $0x6b0] sm:$0xff] }
 0x1bc   : > { %2512 = vmatmul.mubr.f32.gmra.mrb[58].mxu0 %v653_v2  ;;  %1616 = vmatprep.mubr.f32.mxu1 %v662_v4  ;;  %v399_v2 = vld [vmem:[%s3853_s13 + $0x6f0] sm:$0xff]  ;;  %v408_v4 = vld [vmem:[%s3853_s13 + $0x738] sm:$0xff] }
 0x1bd   : > { %2516 = vmatprep.mubr.f32.mxu0 %v670_v5  ;;  %v416_v5 = vld [vmem:[%s3853_s13 + $0x778] sm:$0xff] }
 0x1bf   : > { %1617 = vmatmul.mubr.f32.gmra.mrb[60].mxu1 %v661_v6  ;;  %v407_v6 = vld [vmem:[%s3853_s13 + $0x730] sm:$0xff] }
 0x1c0   : > { %2517 = vmatmul.mubr.f32.gmra.mrb[60].mxu0 %v669_v7  ;;  %1621 = vmatprep.mubr.f32.mxu1 %v678_v8  ;;  %v415_v7 = vld [vmem:[%s3853_s13 + $0x770] sm:$0xff]  ;;  %v424_v8 = vld [vmem:[%s3853_s13 + $0x7b8] sm:$0xff] }
 0x1c1   : > { %2521 = vmatprep.mubr.f32.mxu0 %v686_v9  ;;  %v432_v9 = vld [vmem:[%s3853_s13 + $0x7f8] sm:$0xff] }
 0x1c3   : > { %1622 = vmatmul.mubr.f32.gmra.mrb[62].mxu1 %v677_v10  ;;  %v423_v10 = vld [vmem:[%s3853_s13 + $0x7b0] sm:$0xff] }
 0x1c4   : > { %2522 = vmatmul.mubr.f32.gmra.mrb[62].mxu0 %v685_v11  ;;  %1691 = vmatprep.mubr.f32.mxu1 %v184_v12  ;;  %v431_v11 = vld [vmem:[%s3853_s13 + $0x7f0] sm:$0xff]  ;;  %v440_v12 = vld [vmem:[%s3853_s13 + $0x838] sm:$0xff] }
 0x1c5   : > { %2591 = vmatprep.mubr.f32.mxu0 %v192_v13  ;;  %v448_v13 = vld [vmem:[%s3853_s13 + $0x878] sm:$0xff] }
 0x1c7   : > { %1692 = vmatmul.mubr.f32.vlgmr.msra.gmra.mrb[0].mxu1 %v183_v14  ;;  %v439_v14 = vld [vmem:[%s3853_s13 + $0x830] sm:$0xff] }
 0x1c8   : > { %2592 = vmatmul.mubr.f32.vlgmr.msra.gmra.mrb[0].mxu0 %v191_v15  ;;  %1696 = vmatprep.mubr.f32.mxu1 %v200_v16  ;;  %v447_v15 = vld [vmem:[%s3853_s13 + $0x870] sm:$0xff]  ;;  %v456_v16 = vld [vmem:[%s3853_s13 + $0x8b8] sm:$0xff] }
 0x1c9   : > { %2596 = vmatprep.mubr.f32.mxu0 %v208_v17  ;;  %v464_v17 = vld [vmem:[%s3853_s13 + $0x8f8] sm:$0xff] }
 0x1cb   : > { %1697 = vmatmul.mubr.f32.gmra.mrb[2].mxu1 %v199_v18  ;;  %v455_v18 = vld [vmem:[%s3853_s13 + $0x8b0] sm:$0xff] }
 0x1cc   : > { %2597 = vmatmul.mubr.f32.gmra.mrb[2].mxu0 %v207_v3  ;;  %1701 = vmatprep.mubr.f32.mxu1 %v216_v19  ;;  %v463_v3 = vld [vmem:[%s3853_s13 + $0x8f0] sm:$0xff]  ;;  %v472_v19 = vld [vmem:[%s3853_s13 + $0x938] sm:$0xff] }
 0x1cd   : > { %2601 = vmatprep.mubr.f32.mxu0 %v224_v20  ;;  %v480_v20 = vld [vmem:[%s3853_s13 + $0x978] sm:$0xff] }
 0x1cf   : > { %1702 = vmatmul.mubr.f32.gmra.mrb[4].mxu1 %v215_v21  ;;  %v471_v21 = vld [vmem:[%s3853_s13 + $0x930] sm:$0xff] }
 0x1d0   : > { %2602 = vmatmul.mubr.f32.gmra.mrb[4].mxu0 %v223_v22  ;;  %1706 = vmatprep.mubr.f32.mxu1 %v232_v23  ;;  %v479_v22 = vld [vmem:[%s3853_s13 + $0x970] sm:$0xff]  ;;  %v488_v23 = vld [vmem:[%s3853_s13 + $0x9b8] sm:$0xff] }
 0x1d1   : > { %2606 = vmatprep.mubr.f32.mxu0 %v240_v24  ;;  %v496_v24 = vld [vmem:[%s3853_s13 + $0x9f8] sm:$0xff] }
 0x1d3   : > { %1707 = vmatmul.mubr.f32.gmra.mrb[6].mxu1 %v231_v25  ;;  %v487_v25 = vld [vmem:[%s3853_s13 + $0x9b0] sm:$0xff] }
 0x1d4   : > { %2607 = vmatmul.mubr.f32.gmra.mrb[6].mxu0 %v239_v26  ;;  %1711 = vmatprep.mubr.f32.mxu1 %v248_v27  ;;  %v495_v26 = vld [vmem:[%s3853_s13 + $0x9f0] sm:$0xff]  ;;  %v504_v27 = vld [vmem:[%s3853_s13 + $0xa38] sm:$0xff] }
 0x1d5   : > { %2611 = vmatprep.mubr.f32.mxu0 %v256_v28  ;;  %v512_v28 = vld [vmem:[%s3853_s13 + $0xa78] sm:$0xff] }
 0x1d7   : > { %1712 = vmatmul.mubr.f32.gmra.mrb[8].mxu1 %v247_v29  ;;  %v503_v29 = vld [vmem:[%s3853_s13 + $0xa30] sm:$0xff] }
 0x1d8   : > { %2612 = vmatmul.mubr.f32.gmra.mrb[8].mxu0 %v255_v30  ;;  %1716 = vmatprep.mubr.f32.mxu1 %v264_v31  ;;  %v511_v30 = vld [vmem:[%s3853_s13 + $0xa70] sm:$0xff]  ;;  %v520_v31 = vld [vmem:[%s3853_s13 + $0xab8] sm:$0xff] }
 0x1d9   : > { %2616 = vmatprep.mubr.f32.mxu0 %v272_v32  ;;  %v528_v32 = vld [vmem:[%s3853_s13 + $0xaf8] sm:$0xff] }
 0x1db   : > { %1717 = vmatmul.mubr.f32.gmra.mrb[10].mxu1 %v263_v33  ;;  %v519_v33 = vld [vmem:[%s3853_s13 + $0xab0] sm:$0xff] }
 0x1dc   : > { %2617 = vmatmul.mubr.f32.gmra.mrb[10].mxu0 %v271_v34  ;;  %1721 = vmatprep.mubr.f32.mxu1 %v280_v35  ;;  %v527_v34 = vld [vmem:[%s3853_s13 + $0xaf0] sm:$0xff]  ;;  %v536_v35 = vld [vmem:[%s3853_s13 + $0xb38] sm:$0xff] }
 0x1dd   : > { %2621 = vmatprep.mubr.f32.mxu0 %v288_v36  ;;  %v544_v36 = vld [vmem:[%s3853_s13 + $0xb78] sm:$0xff] }
 0x1df   : > { %1722 = vmatmul.mubr.f32.gmra.mrb[12].mxu1 %v279_v37  ;;  %v535_v37 = vld [vmem:[%s3853_s13 + $0xb30] sm:$0xff] }
 0x1e0   : > { %2622 = vmatmul.mubr.f32.gmra.mrb[12].mxu0 %v287_v38  ;;  %1726 = vmatprep.mubr.f32.mxu1 %v296_v39  ;;  %v543_v38 = vld [vmem:[%s3853_s13 + $0xb70] sm:$0xff]  ;;  %v552_v39 = vld [vmem:[%s3853_s13 + $0xbb8] sm:$0xff] }
 0x1e1   : > { %2626 = vmatprep.mubr.f32.mxu0 %v304_v40  ;;  %v560_v40 = vld [vmem:[%s3853_s13 + $0xbf8] sm:$0xff] }
 0x1e3   : > { %1727 = vmatmul.mubr.f32.gmra.mrb[14].mxu1 %v295_v41  ;;  %v551_v41 = vld [vmem:[%s3853_s13 + $0xbb0] sm:$0xff] }
 0x1e4   : > { %2627 = vmatmul.mubr.f32.gmra.mrb[14].mxu0 %v303_v42  ;;  %1731 = vmatprep.mubr.f32.mxu1 %v312_v43  ;;  %v559_v42 = vld [vmem:[%s3853_s13 + $0xbf0] sm:$0xff]  ;;  %v568_v43 = vld [vmem:[%s3853_s13 + $0xc38] sm:$0xff] }
 0x1e5   : > { %2631 = vmatprep.mubr.f32.mxu0 %v320_v44  ;;  %v576_v44 = vld [vmem:[%s3853_s13 + $0xc78] sm:$0xff] }
 0x1e7   : > { %1732 = vmatmul.mubr.f32.gmra.mrb[16].mxu1 %v311_v45  ;;  %v567_v45 = vld [vmem:[%s3853_s13 + $0xc30] sm:$0xff] }
 0x1e8   : > { %2632 = vmatmul.mubr.f32.gmra.mrb[16].mxu0 %v319_v46  ;;  %1736 = vmatprep.mubr.f32.mxu1 %v328_v47  ;;  %v575_v46 = vld [vmem:[%s3853_s13 + $0xc70] sm:$0xff]  ;;  %v584_v47 = vld [vmem:[%s3853_s13 + $0xcb8] sm:$0xff] }
 0x1e9   : > { %2636 = vmatprep.mubr.f32.mxu0 %v336_v48  ;;  %v592_v48 = vld [vmem:[%s3853_s13 + $0xcf8] sm:$0xff] }
 0x1eb   : > { %1737 = vmatmul.mubr.f32.gmra.mrb[18].mxu1 %v327_v49  ;;  %v583_v49 = vld [vmem:[%s3853_s13 + $0xcb0] sm:$0xff] }
 0x1ec   : > { %2637 = vmatmul.mubr.f32.gmra.mrb[18].mxu0 %v335_v50  ;;  %1741 = vmatprep.mubr.f32.mxu1 %v344_v51  ;;  %v591_v50 = vld [vmem:[%s3853_s13 + $0xcf0] sm:$0xff]  ;;  %v600_v51 = vld [vmem:[%s3853_s13 + $0xd38] sm:$0xff] }
 0x1ed   : > { %2641 = vmatprep.mubr.f32.mxu0 %v352_v52  ;;  %v608_v52 = vld [vmem:[%s3853_s13 + $0xd78] sm:$0xff] }
 0x1ef   : > { %1742 = vmatmul.mubr.f32.gmra.mrb[20].mxu1 %v343_v53  ;;  %v599_v53 = vld [vmem:[%s3853_s13 + $0xd30] sm:$0xff] }
 0x1f0   : > { %2642 = vmatmul.mubr.f32.gmra.mrb[20].mxu0 %v351_v54  ;;  %1746 = vmatprep.mubr.f32.mxu1 %v360_v55  ;;  %v607_v54 = vld [vmem:[%s3853_s13 + $0xd70] sm:$0xff]  ;;  %v616_v55 = vld [vmem:[%s3853_s13 + $0xdb8] sm:$0xff] }
 0x1f1   : > { %2646 = vmatprep.mubr.f32.mxu0 %v368_v56  ;;  %v624_v56 = vld [vmem:[%s3853_s13 + $0xdf8] sm:$0xff] }
 0x1f3   : > { %1747 = vmatmul.mubr.f32.gmra.mrb[22].mxu1 %v359_v57  ;;  %v615_v57 = vld [vmem:[%s3853_s13 + $0xdb0] sm:$0xff] }
 0x1f4   : > { %2647 = vmatmul.mubr.f32.gmra.mrb[22].mxu0 %v367_v58  ;;  %1751 = vmatprep.mubr.f32.mxu1 %v376_v59  ;;  %v623_v58 = vld [vmem:[%s3853_s13 + $0xdf0] sm:$0xff]  ;;  %v632_v59 = vld [vmem:[%s3853_s13 + $0xe38] sm:$0xff] }
 0x1f5   : > { %2651 = vmatprep.mubr.f32.mxu0 %v384_v60  ;;  %v640_v60 = vld [vmem:[%s3853_s13 + $0xe78] sm:$0xff] }
 0x1f7   : > { %1752 = vmatmul.mubr.f32.gmra.mrb[24].mxu1 %v375_v61  ;;  %v631_v61 = vld [vmem:[%s3853_s13 + $0xe30] sm:$0xff] }
 0x1f8   : > { %2652 = vmatmul.mubr.f32.gmra.mrb[24].mxu0 %v383_v62  ;;  %1756 = vmatprep.mubr.f32.mxu1 %v392_v63  ;;  %v639_v62 = vld [vmem:[%s3853_s13 + $0xe70] sm:$0xff]  ;;  %v648_v63 = vld [vmem:[%s3853_s13 + $0xeb8] sm:$0xff] }
 0x1f9   : > { %2656 = vmatprep.mubr.f32.mxu0 %v400_v0  ;;  %v656_v0 = vld [vmem:[%s3853_s13 + $0xef8] sm:$0xff] }
 0x1fb   : > { %1757 = vmatmul.mubr.f32.gmra.mrb[26].mxu1 %v391_v1  ;;  %v647_v1 = vld [vmem:[%s3853_s13 + $0xeb0] sm:$0xff] }
 0x1fc   : > { %2657 = vmatmul.mubr.f32.gmra.mrb[26].mxu0 %v399_v2  ;;  %1761 = vmatprep.mubr.f32.mxu1 %v408_v4  ;;  %v655_v2 = vld [vmem:[%s3853_s13 + $0xef0] sm:$0xff]  ;;  %v664_v4 = vld [vmem:[%s3853_s13 + $0xf38] sm:$0xff] }
 0x1fd   : > { %2661 = vmatprep.mubr.f32.mxu0 %v416_v5  ;;  %v672_v5 = vld [vmem:[%s3853_s13 + $0xf78] sm:$0xff] }
 0x1ff   : > { %1762 = vmatmul.mubr.f32.gmra.mrb[28].mxu1 %v407_v6  ;;  %v663_v6 = vld [vmem:[%s3853_s13 + $0xf30] sm:$0xff] }
 0x200   : > { %2662 = vmatmul.mubr.f32.gmra.mrb[28].mxu0 %v415_v7  ;;  %1766 = vmatprep.mubr.f32.mxu1 %v424_v8  ;;  %v671_v7 = vld [vmem:[%s3853_s13 + $0xf70] sm:$0xff]  ;;  %v680_v8 = vld [vmem:[%s3853_s13 + $0xfb8] sm:$0xff] }
 0x201   : > { %2666 = vmatprep.mubr.f32.mxu0 %v432_v9  ;;  %v688_v9 = vld [vmem:[%s3853_s13 + $0xff8] sm:$0xff] }
 0x203   : > { %1767 = vmatmul.mubr.f32.gmra.mrb[30].mxu1 %v423_v10  ;;  %v679_v10 = vld [vmem:[%s3853_s13 + $0xfb0] sm:$0xff] }
 0x204   : > { %2667 = vmatmul.mubr.f32.gmra.mrb[30].mxu0 %v431_v11  ;;  %1771 = vmatprep.mubr.f32.mxu1 %v440_v12  ;;  %v687_v11 = vld [vmem:[%s3853_s13 + $0xff0] sm:$0xff]  ;;  %v5184_v12 = vld [vmem:[%s5293_s2] ss:$0 sm:$0xff] }
 0x205   : > { %2671 = vmatprep.mubr.f32.mxu0 %v448_v13 }
 0x207   : > { %1772 = vmatmul.mubr.f32.gmra.mrb[32].mxu1 %v439_v14 }
 0x208   : > { %2672 = vmatmul.mubr.f32.gmra.mrb[32].mxu0 %v447_v15  ;;  %1776 = vmatprep.mubr.f32.mxu1 %v456_v16 }
 0x209   : > { %2676 = vmatprep.mubr.f32.mxu0 %v464_v17 }
 0x20b   : > { %1777 = vmatmul.mubr.f32.gmra.mrb[34].mxu1 %v455_v18 }
 0x20c   : > { %2677 = vmatmul.mubr.f32.gmra.mrb[34].mxu0 %v463_v3  ;;  %1781 = vmatprep.mubr.f32.mxu1 %v472_v19 }
 0x20d   : > { %2681 = vmatprep.mubr.f32.mxu0 %v480_v20 }
 0x20f   : > { %1782 = vmatmul.mubr.f32.gmra.mrb[36].mxu1 %v471_v21 }
 0x210   : > { %2682 = vmatmul.mubr.f32.gmra.mrb[36].mxu0 %v479_v22  ;;  %1786 = vmatprep.mubr.f32.mxu1 %v488_v23 }
 0x211   : > { %2686 = vmatprep.mubr.f32.mxu0 %v496_v24 }
 0x213   : > { %1787 = vmatmul.mubr.f32.gmra.mrb[38].mxu1 %v487_v25 }
 0x214   : > { %2687 = vmatmul.mubr.f32.gmra.mrb[38].mxu0 %v495_v26  ;;  %1791 = vmatprep.mubr.f32.mxu1 %v504_v27 }
 0x215   : > { %2691 = vmatprep.mubr.f32.mxu0 %v512_v28 }
 0x217   : > { %1792 = vmatmul.mubr.f32.gmra.mrb[40].mxu1 %v503_v29 }
 0x218   : > { %2692 = vmatmul.mubr.f32.gmra.mrb[40].mxu0 %v511_v30  ;;  %1796 = vmatprep.mubr.f32.mxu1 %v520_v31 }
 0x219   : > { %2696 = vmatprep.mubr.f32.mxu0 %v528_v32 }
 0x21b   : > { %1797 = vmatmul.mubr.f32.gmra.mrb[42].mxu1 %v519_v33 }
 0x21c   : > { %2697 = vmatmul.mubr.f32.gmra.mrb[42].mxu0 %v527_v34  ;;  %1801 = vmatprep.mubr.f32.mxu1 %v536_v35 }
 0x21d   : > { %2701 = vmatprep.mubr.f32.mxu0 %v544_v36 }
 0x21f   : > { %1802 = vmatmul.mubr.f32.gmra.mrb[44].mxu1 %v535_v37 }
 0x220   : > { %2702 = vmatmul.mubr.f32.gmra.mrb[44].mxu0 %v543_v38  ;;  %1806 = vmatprep.mubr.f32.mxu1 %v552_v39 }
 0x221   : > { %2706 = vmatprep.mubr.f32.mxu0 %v560_v40 }
 0x223   : > { %1807 = vmatmul.mubr.f32.gmra.mrb[46].mxu1 %v551_v41 }
 0x224   : > { %2707 = vmatmul.mubr.f32.gmra.mrb[46].mxu0 %v559_v42  ;;  %1811 = vmatprep.mubr.f32.mxu1 %v568_v43 }
 0x225   : > { %2711 = vmatprep.mubr.f32.mxu0 %v576_v44 }
 0x227   : > { %1812 = vmatmul.mubr.f32.gmra.mrb[48].mxu1 %v567_v45 }
 0x228   : > { %2712 = vmatmul.mubr.f32.gmra.mrb[48].mxu0 %v575_v46  ;;  %1816 = vmatprep.mubr.f32.mxu1 %v584_v47 }
 0x229   : > { %2716 = vmatprep.mubr.f32.mxu0 %v592_v48 }
 0x22b   : > { %1817 = vmatmul.mubr.f32.gmra.mrb[50].mxu1 %v583_v49 }
 0x22c   : > { %2717 = vmatmul.mubr.f32.gmra.mrb[50].mxu0 %v591_v50  ;;  %1821 = vmatprep.mubr.f32.mxu1 %v600_v51 }
 0x22d   : > { %2721 = vmatprep.mubr.f32.mxu0 %v608_v52 }
 0x22f   : > { %1822 = vmatmul.mubr.f32.gmra.mrb[52].mxu1 %v599_v53 }
 0x230   : > { %2722 = vmatmul.mubr.f32.gmra.mrb[52].mxu0 %v607_v54  ;;  %1826 = vmatprep.mubr.f32.mxu1 %v616_v55 }
 0x231   : > { %2726 = vmatprep.mubr.f32.mxu0 %v624_v56 }
 0x233   : > { %1827 = vmatmul.mubr.f32.gmra.mrb[54].mxu1 %v615_v57 }
 0x234   : > { %2727 = vmatmul.mubr.f32.gmra.mrb[54].mxu0 %v623_v58  ;;  %1831 = vmatprep.mubr.f32.mxu1 %v632_v59 }
 0x235   : > { %2731 = vmatprep.mubr.f32.mxu0 %v640_v60 }
 0x237   : > { %1832 = vmatmul.mubr.f32.gmra.mrb[56].mxu1 %v631_v61 }
 0x238   : > { %2732 = vmatmul.mubr.f32.gmra.mrb[56].mxu0 %v639_v62  ;;  %1836 = vmatprep.mubr.f32.mxu1 %v648_v63 }
 0x239   : > { %2736 = vmatprep.mubr.f32.mxu0 %v656_v0 }
 0x23b   : > { %1837 = vmatmul.mubr.f32.gmra.mrb[58].mxu1 %v647_v1 }
 0x23c   : > { %2737 = vmatmul.mubr.f32.gmra.mrb[58].mxu0 %v655_v2  ;;  %1841 = vmatprep.mubr.f32.mxu1 %v664_v4 }
 0x23d   : > { %2741 = vmatprep.mubr.f32.mxu0 %v672_v5 }
 0x23f   : > { %1842 = vmatmul.mubr.f32.gmra.mrb[60].mxu1 %v663_v6 }
 0x240   : > { %2742 = vmatmul.mubr.f32.gmra.mrb[60].mxu0 %v671_v7  ;;  %1846 = vmatprep.mubr.f32.mxu1 %v680_v8 }
 0x241   : > { %2746 = vmatprep.mubr.f32.mxu0 %v688_v9 }
 0x243   : > { %1847 = vmatmul.mubr.f32.gmra.mrb[62].mxu1 %v679_v10 }
 0x244   : > { %2747 = vmatmul.mubr.f32.gmra.mrb[62].mxu0 %v687_v11 }
 0x29a   : > { %v1693_v13 = vpop.f32.mrb[0].mxu1 }
 0x29b   : > { %v3271_v14 = vadd.f32 %v5184_v12, %v1693_v13  ;;  %v2593_v15 = vpop.f32.mrb[0].mxu0  ;;  %v1695_v16 = vpop.f32.mrb[1].mxu1 }
 0x29c   : > { %v2595_v17 = vpop.f32.mrb[1].mxu0 }
 0x29d   : > { %v3272_v18 = vadd.f32 %v3271_v14, %v2593_v15 }
 0x29e   : > { %v1698_v3 = vpop.f32.mrb[2].mxu1 }
 0x29f   : > { %v2752_v19 = vmax.f32 %v3272_v18, 0.0  ;;  %v3273_v20 = vadd.f32 %v5184_v12, %v1698_v3  ;;  %v2598_v21 = vpop.f32.mrb[2].mxu0  ;;  %v1700_v22 = vpop.f32.mrb[3].mxu1 }
 0x2a0   : > { %v2600_v23 = vpop.f32.mrb[3].mxu0 }
 0x2a1   : > { %2785 = vst.msk [vmem:[%s5191_s29] sm:$0xff] %vm2784_vm0, %v2752_v19  ;;  %v3274_v24 = vadd.f32 %v3273_v20, %v2598_v21 }
 0x2a2   : > { %v1703_v25 = vpop.f32.mrb[4].mxu1 }
 0x2a3   : > { %v2753_v26 = vmax.f32 %v3274_v24, 0.0  ;;  %v3275_v27 = vadd.f32 %v5184_v12, %v1703_v25  ;;  %v2603_v28 = vpop.f32.mrb[4].mxu0  ;;  %v1705_v29 = vpop.f32.mrb[5].mxu1 }
 0x2a4   : > { %v2605_v30 = vpop.f32.mrb[5].mxu0 }
 0x2a5   : > { %2786 = vst.msk [vmem:[%s5191_s29 + $0x8] sm:$0xff] %vm2784_vm0, %v2753_v26  ;;  %v3276_v31 = vadd.f32 %v3275_v27, %v2603_v28 }
 0x2a6   : > { %v1708_v32 = vpop.f32.mrb[6].mxu1 }
 0x2a7   : > { %v2754_v33 = vmax.f32 %v3276_v31, 0.0  ;;  %v3277_v34 = vadd.f32 %v5184_v12, %v1708_v32  ;;  %v2608_v35 = vpop.f32.mrb[6].mxu0  ;;  %v1710_v36 = vpop.f32.mrb[7].mxu1 }
 0x2a8   : > { %v2610_v37 = vpop.f32.mrb[7].mxu0 }
 0x2a9   : > { %2787 = vst.msk [vmem:[%s5191_s29 + $0x10] sm:$0xff] %vm2784_vm0, %v2754_v33  ;;  %v3278_v38 = vadd.f32 %v3277_v34, %v2608_v35 }
 0x2aa   : > { %v1713_v39 = vpop.f32.mrb[8].mxu1 }
 0x2ab   : > { %v2755_v40 = vmax.f32 %v3278_v38, 0.0  ;;  %v3279_v41 = vadd.f32 %v5184_v12, %v1713_v39  ;;  %v2613_v42 = vpop.f32.mrb[8].mxu0  ;;  %v1715_v43 = vpop.f32.mrb[9].mxu1 }
 0x2ac   : > { %v2615_v44 = vpop.f32.mrb[9].mxu0 }
 0x2ad   : > { %2788 = vst.msk [vmem:[%s5191_s29 + $0x18] sm:$0xff] %vm2784_vm0, %v2755_v40  ;;  %v3280_v45 = vadd.f32 %v3279_v41, %v2613_v42 }
 0x2ae   : > { %v1718_v46 = vpop.f32.mrb[10].mxu1 }
 0x2af   : > { %v2756_v47 = vmax.f32 %v3280_v45, 0.0  ;;  %v3281_v48 = vadd.f32 %v5184_v12, %v1718_v46  ;;  %v2618_v49 = vpop.f32.mrb[10].mxu0  ;;  %v1720_v50 = vpop.f32.mrb[11].mxu1 }
 0x2b0   : > { %v2620_v51 = vpop.f32.mrb[11].mxu0 }
 0x2b1   : > { %2789 = vst.msk [vmem:[%s5191_s29 + $0x20] sm:$0xff] %vm2784_vm0, %v2756_v47  ;;  %v3282_v52 = vadd.f32 %v3281_v48, %v2618_v49 }
 0x2b2   : > { %v1723_v53 = vpop.f32.mrb[12].mxu1 }
 0x2b3   : > { %v2757_v54 = vmax.f32 %v3282_v52, 0.0  ;;  %v3283_v55 = vadd.f32 %v5184_v12, %v1723_v53  ;;  %v2623_v56 = vpop.f32.mrb[12].mxu0  ;;  %v1725_v57 = vpop.f32.mrb[13].mxu1 }
 0x2b4   : > { %v2625_v58 = vpop.f32.mrb[13].mxu0 }
 0x2b5   : > { %2790 = vst.msk [vmem:[%s5191_s29 + $0x28] sm:$0xff] %vm2784_vm0, %v2757_v54  ;;  %v3284_v59 = vadd.f32 %v3283_v55, %v2623_v56 }
 0x2b6   : > { %v1728_v60 = vpop.f32.mrb[14].mxu1 }
 0x2b7   : > { %v2758_v61 = vmax.f32 %v3284_v59, 0.0  ;;  %v3285_v62 = vadd.f32 %v5184_v12, %v1728_v60  ;;  %v2628_v63 = vpop.f32.mrb[14].mxu0  ;;  %v1730_v0 = vpop.f32.mrb[15].mxu1 }
 0x2b8   : > { %v2630_v1 = vpop.f32.mrb[15].mxu0 }
 0x2b9   : > { %2791 = vst.msk [vmem:[%s5191_s29 + $0x30] sm:$0xff] %vm2784_vm0, %v2758_v61  ;;  %v3286_v2 = vadd.f32 %v3285_v62, %v2628_v63 }
 0x2ba   : > { %v1733_v4 = vpop.f32.mrb[16].mxu1 }
 0x2bb   : > { %v2759_v5 = vmax.f32 %v3286_v2, 0.0  ;;  %v3287_v6 = vadd.f32 %v5184_v12, %v1733_v4  ;;  %v2633_v7 = vpop.f32.mrb[16].mxu0  ;;  %v1735_v8 = vpop.f32.mrb[17].mxu1 }
 0x2bc   : > { %v2635_v9 = vpop.f32.mrb[17].mxu0 }
 0x2bd   : > { %2792 = vst.msk [vmem:[%s5191_s29 + $0x38] sm:$0xff] %vm2784_vm0, %v2759_v5  ;;  %v3288_v10 = vadd.f32 %v3287_v6, %v2633_v7 }
 0x2be   : > { %v1738_v11 = vpop.f32.mrb[18].mxu1 }
 0x2bf   : > { %v2760_v13 = vmax.f32 %v3288_v10, 0.0  ;;  %v3289_v14 = vadd.f32 %v5184_v12, %v1738_v11  ;;  %v2638_v15 = vpop.f32.mrb[18].mxu0  ;;  %v1740_v16 = vpop.f32.mrb[19].mxu1 }
 0x2c0   : > { %v2640_v17 = vpop.f32.mrb[19].mxu0 }
 0x2c1   : > { %2793 = vst.msk [vmem:[%s5191_s29 + $0x40] sm:$0xff] %vm2784_vm0, %v2760_v13  ;;  %v3290_v18 = vadd.f32 %v3289_v14, %v2638_v15 }
 0x2c2   : > { %v1743_v3 = vpop.f32.mrb[20].mxu1 }
 0x2c3   : > { %v2761_v19 = vmax.f32 %v3290_v18, 0.0  ;;  %v3291_v20 = vadd.f32 %v5184_v12, %v1743_v3  ;;  %v2643_v21 = vpop.f32.mrb[20].mxu0  ;;  %v1745_v22 = vpop.f32.mrb[21].mxu1 }
 0x2c4   : > { %v2645_v23 = vpop.f32.mrb[21].mxu0 }
 0x2c5   : > { %2794 = vst.msk [vmem:[%s5191_s29 + $0x48] sm:$0xff] %vm2784_vm0, %v2761_v19  ;;  %v3292_v24 = vadd.f32 %v3291_v20, %v2643_v21 }
 0x2c6   : > { %v1748_v25 = vpop.f32.mrb[22].mxu1 }
 0x2c7   : > { %v2762_v26 = vmax.f32 %v3292_v24, 0.0  ;;  %v3293_v27 = vadd.f32 %v5184_v12, %v1748_v25  ;;  %v2648_v28 = vpop.f32.mrb[22].mxu0  ;;  %v1750_v29 = vpop.f32.mrb[23].mxu1 }
 0x2c8   : > { %v2650_v30 = vpop.f32.mrb[23].mxu0 }
 0x2c9   : > { %2795 = vst.msk [vmem:[%s5191_s29 + $0x50] sm:$0xff] %vm2784_vm0, %v2762_v26  ;;  %v3294_v31 = vadd.f32 %v3293_v27, %v2648_v28 }
 0x2ca   : > { %v1753_v32 = vpop.f32.mrb[24].mxu1 }
 0x2cb   : > { %v2763_v33 = vmax.f32 %v3294_v31, 0.0  ;;  %v3295_v34 = vadd.f32 %v5184_v12, %v1753_v32  ;;  %v2653_v35 = vpop.f32.mrb[24].mxu0  ;;  %v1755_v36 = vpop.f32.mrb[25].mxu1 }
 0x2cc   : > { %v2655_v37 = vpop.f32.mrb[25].mxu0 }
 0x2cd   : > { %2796 = vst.msk [vmem:[%s5191_s29 + $0x58] sm:$0xff] %vm2784_vm0, %v2763_v33  ;;  %v3296_v38 = vadd.f32 %v3295_v34, %v2653_v35 }
 0x2ce   : > { %v1758_v39 = vpop.f32.mrb[26].mxu1 }
 0x2cf   : > { %v2764_v40 = vmax.f32 %v3296_v38, 0.0  ;;  %v3297_v41 = vadd.f32 %v5184_v12, %v1758_v39  ;;  %v2658_v42 = vpop.f32.mrb[26].mxu0  ;;  %v1760_v43 = vpop.f32.mrb[27].mxu1 }
 0x2d0   : > { %v2660_v44 = vpop.f32.mrb[27].mxu0 }
 0x2d1   : > { %2797 = vst.msk [vmem:[%s5191_s29 + $0x60] sm:$0xff] %vm2784_vm0, %v2764_v40  ;;  %v3298_v45 = vadd.f32 %v3297_v41, %v2658_v42 }
 0x2d2   : > { %v1763_v46 = vpop.f32.mrb[28].mxu1 }
 0x2d3   : > { %v2765_v47 = vmax.f32 %v3298_v45, 0.0  ;;  %v3299_v48 = vadd.f32 %v5184_v12, %v1763_v46  ;;  %v2663_v49 = vpop.f32.mrb[28].mxu0  ;;  %v1765_v50 = vpop.f32.mrb[29].mxu1 }
 0x2d4   : > { %v2665_v51 = vpop.f32.mrb[29].mxu0 }
 0x2d5   : > { %2798 = vst.msk [vmem:[%s5191_s29 + $0x68] sm:$0xff] %vm2784_vm0, %v2765_v47  ;;  %v3300_v52 = vadd.f32 %v3299_v48, %v2663_v49 }
 0x2d6   : > { %v1768_v53 = vpop.f32.mrb[30].mxu1 }
 0x2d7   : > { %v2766_v54 = vmax.f32 %v3300_v52, 0.0  ;;  %v3301_v55 = vadd.f32 %v5184_v12, %v1768_v53  ;;  %v2668_v56 = vpop.f32.mrb[30].mxu0  ;;  %v1770_v57 = vpop.f32.mrb[31].mxu1 }
 0x2d8   : > { %v2670_v58 = vpop.f32.mrb[31].mxu0 }
 0x2d9   : > { %2799 = vst.msk [vmem:[%s5191_s29 + $0x70] sm:$0xff] %vm2784_vm0, %v2766_v54  ;;  %v3302_v59 = vadd.f32 %v3301_v55, %v2668_v56 }
 0x2da   : > { %v1773_v60 = vpop.f32.mrb[32].mxu1 }
 0x2db   : > { %v2767_v61 = vmax.f32 %v3302_v59, 0.0  ;;  %v3303_v62 = vadd.f32 %v5184_v12, %v1773_v60  ;;  %v2673_v63 = vpop.f32.mrb[32].mxu0  ;;  %v1775_v0 = vpop.f32.mrb[33].mxu1 }
 0x2dc   : > { %v2675_v1 = vpop.f32.mrb[33].mxu0 }
 0x2dd   : > { %2800 = vst.msk [vmem:[%s5191_s29 + $0x78] sm:$0xff] %vm2784_vm0, %v2767_v61  ;;  %v3304_v2 = vadd.f32 %v3303_v62, %v2673_v63 }
 0x2de   : > { %v1778_v4 = vpop.f32.mrb[34].mxu1 }
 0x2df   : > { %v2768_v5 = vmax.f32 %v3304_v2, 0.0  ;;  %v3305_v6 = vadd.f32 %v5184_v12, %v1778_v4  ;;  %v2678_v7 = vpop.f32.mrb[34].mxu0  ;;  %v1780_v8 = vpop.f32.mrb[35].mxu1 }
 0x2e0   : > { %v2680_v9 = vpop.f32.mrb[35].mxu0 }
 0x2e1   : > { %2801 = vst.msk [vmem:[%s5191_s29 + $0x80] sm:$0xff] %vm2784_vm0, %v2768_v5  ;;  %v3306_v10 = vadd.f32 %v3305_v6, %v2678_v7 }
 0x2e2   : > { %v1783_v11 = vpop.f32.mrb[36].mxu1 }
 0x2e3   : > { %v2769_v13 = vmax.f32 %v3306_v10, 0.0  ;;  %v3307_v14 = vadd.f32 %v5184_v12, %v1783_v11  ;;  %v2683_v15 = vpop.f32.mrb[36].mxu0  ;;  %v1785_v16 = vpop.f32.mrb[37].mxu1 }
 0x2e4   : > { %v2685_v17 = vpop.f32.mrb[37].mxu0 }
 0x2e5   : > { %2802 = vst.msk [vmem:[%s5191_s29 + $0x88] sm:$0xff] %vm2784_vm0, %v2769_v13  ;;  %v3308_v18 = vadd.f32 %v3307_v14, %v2683_v15 }
 0x2e6   : > { %v1788_v3 = vpop.f32.mrb[38].mxu1 }
 0x2e7   : > { %v2770_v19 = vmax.f32 %v3308_v18, 0.0  ;;  %v3309_v20 = vadd.f32 %v5184_v12, %v1788_v3  ;;  %v2688_v21 = vpop.f32.mrb[38].mxu0  ;;  %v1790_v22 = vpop.f32.mrb[39].mxu1 }
 0x2e8   : > { %v2690_v23 = vpop.f32.mrb[39].mxu0 }
 0x2e9   : > { %2803 = vst.msk [vmem:[%s5191_s29 + $0x90] sm:$0xff] %vm2784_vm0, %v2770_v19  ;;  %v3310_v24 = vadd.f32 %v3309_v20, %v2688_v21 }
 0x2ea   : > { %v1793_v25 = vpop.f32.mrb[40].mxu1 }
 0x2eb   : > { %v2771_v26 = vmax.f32 %v3310_v24, 0.0  ;;  %v3311_v27 = vadd.f32 %v5184_v12, %v1793_v25  ;;  %v2693_v28 = vpop.f32.mrb[40].mxu0  ;;  %v1795_v29 = vpop.f32.mrb[41].mxu1 }
 0x2ec   : > { %v2695_v30 = vpop.f32.mrb[41].mxu0 }
 0x2ed   : > { %2804 = vst.msk [vmem:[%s5191_s29 + $0x98] sm:$0xff] %vm2784_vm0, %v2771_v26  ;;  %v3312_v31 = vadd.f32 %v3311_v27, %v2693_v28 }
 0x2ee   : > { %v1798_v32 = vpop.f32.mrb[42].mxu1 }
 0x2ef   : > { %v2772_v33 = vmax.f32 %v3312_v31, 0.0  ;;  %v3313_v34 = vadd.f32 %v5184_v12, %v1798_v32  ;;  %v2698_v35 = vpop.f32.mrb[42].mxu0  ;;  %v1800_v36 = vpop.f32.mrb[43].mxu1 }
 0x2f0   : > { %v2700_v37 = vpop.f32.mrb[43].mxu0 }
 0x2f1   : > { %2805 = vst.msk [vmem:[%s5191_s29 + $0xa0] sm:$0xff] %vm2784_vm0, %v2772_v33  ;;  %v3314_v38 = vadd.f32 %v3313_v34, %v2698_v35 }
 0x2f2   : > { %v1803_v39 = vpop.f32.mrb[44].mxu1 }
 0x2f3   : > { %v2773_v40 = vmax.f32 %v3314_v38, 0.0  ;;  %v3315_v41 = vadd.f32 %v5184_v12, %v1803_v39  ;;  %v2703_v42 = vpop.f32.mrb[44].mxu0  ;;  %v1805_v43 = vpop.f32.mrb[45].mxu1 }
 0x2f4   : > { %v2705_v44 = vpop.f32.mrb[45].mxu0 }
 0x2f5   : > { %2806 = vst.msk [vmem:[%s5191_s29 + $0xa8] sm:$0xff] %vm2784_vm0, %v2773_v40  ;;  %v3316_v45 = vadd.f32 %v3315_v41, %v2703_v42 }
 0x2f6   : > { %v1808_v46 = vpop.f32.mrb[46].mxu1 }
 0x2f7   : > { %v2774_v47 = vmax.f32 %v3316_v45, 0.0  ;;  %v3317_v48 = vadd.f32 %v5184_v12, %v1808_v46  ;;  %v2708_v49 = vpop.f32.mrb[46].mxu0  ;;  %v1810_v50 = vpop.f32.mrb[47].mxu1 }
 0x2f8   : > { %v2710_v51 = vpop.f32.mrb[47].mxu0 }
 0x2f9   : > { %2807 = vst.msk [vmem:[%s5191_s29 + $0xb0] sm:$0xff] %vm2784_vm0, %v2774_v47  ;;  %v3318_v52 = vadd.f32 %v3317_v48, %v2708_v49 }
 0x2fa   : > { %v1813_v53 = vpop.f32.mrb[48].mxu1 }
 0x2fb   : > { %v2775_v54 = vmax.f32 %v3318_v52, 0.0  ;;  %v3319_v55 = vadd.f32 %v5184_v12, %v1813_v53  ;;  %v2713_v56 = vpop.f32.mrb[48].mxu0  ;;  %v1815_v57 = vpop.f32.mrb[49].mxu1 }
 0x2fc   : > { %v2715_v58 = vpop.f32.mrb[49].mxu0 }
 0x2fd   : > { %2808 = vst.msk [vmem:[%s5191_s29 + $0xb8] sm:$0xff] %vm2784_vm0, %v2775_v54  ;;  %v3320_v59 = vadd.f32 %v3319_v55, %v2713_v56 }
 0x2fe   : > { %v1818_v60 = vpop.f32.mrb[50].mxu1 }
 0x2ff   : > { %v2776_v61 = vmax.f32 %v3320_v59, 0.0  ;;  %v3321_v62 = vadd.f32 %v5184_v12, %v1818_v60  ;;  %v2718_v63 = vpop.f32.mrb[50].mxu0  ;;  %v1820_v0 = vpop.f32.mrb[51].mxu1 }
 0x300   : > { %v2720_v1 = vpop.f32.mrb[51].mxu0 }
 0x301   : > { %2809 = vst.msk [vmem:[%s5191_s29 + $0xc0] sm:$0xff] %vm2784_vm0, %v2776_v61  ;;  %v3322_v2 = vadd.f32 %v3321_v62, %v2718_v63 }
 0x302   : > { %v1823_v4 = vpop.f32.mrb[52].mxu1 }
 0x303   : > { %v2777_v5 = vmax.f32 %v3322_v2, 0.0  ;;  %v3323_v6 = vadd.f32 %v5184_v12, %v1823_v4  ;;  %v2723_v7 = vpop.f32.mrb[52].mxu0  ;;  %v1825_v8 = vpop.f32.mrb[53].mxu1 }
 0x304   : > { %v2725_v9 = vpop.f32.mrb[53].mxu0 }
 0x305   : > { %2810 = vst.msk [vmem:[%s5191_s29 + $0xc8] sm:$0xff] %vm2784_vm0, %v2777_v5  ;;  %v3324_v10 = vadd.f32 %v3323_v6, %v2723_v7 }
 0x306   : > { %v1828_v11 = vpop.f32.mrb[54].mxu1 }
 0x307   : > { %v2778_v13 = vmax.f32 %v3324_v10, 0.0  ;;  %v3325_v14 = vadd.f32 %v5184_v12, %v1828_v11  ;;  %v2728_v15 = vpop.f32.mrb[54].mxu0  ;;  %v1830_v16 = vpop.f32.mrb[55].mxu1 }
 0x308   : > { %v2730_v17 = vpop.f32.mrb[55].mxu0 }
 0x309   : > { %2811 = vst.msk [vmem:[%s5191_s29 + $0xd0] sm:$0xff] %vm2784_vm0, %v2778_v13  ;;  %v3326_v18 = vadd.f32 %v3325_v14, %v2728_v15 }
 0x30a   : > { %v1833_v3 = vpop.f32.mrb[56].mxu1 }
 0x30b   : > { %v2779_v19 = vmax.f32 %v3326_v18, 0.0  ;;  %v3327_v20 = vadd.f32 %v5184_v12, %v1833_v3  ;;  %v2733_v21 = vpop.f32.mrb[56].mxu0  ;;  %v1835_v22 = vpop.f32.mrb[57].mxu1 }
 0x30c   : > { %v2735_v23 = vpop.f32.mrb[57].mxu0 }
 0x30d   : > { %2812 = vst.msk [vmem:[%s5191_s29 + $0xd8] sm:$0xff] %vm2784_vm0, %v2779_v19  ;;  %v3328_v24 = vadd.f32 %v3327_v20, %v2733_v21 }
 0x30e   : > { %v1838_v25 = vpop.f32.mrb[58].mxu1 }
 0x30f   : > { %v2780_v26 = vmax.f32 %v3328_v24, 0.0  ;;  %v3329_v27 = vadd.f32 %v5184_v12, %v1838_v25  ;;  %v2738_v28 = vpop.f32.mrb[58].mxu0  ;;  %v1840_v29 = vpop.f32.mrb[59].mxu1 }
 0x310   : > { %v2740_v30 = vpop.f32.mrb[59].mxu0 }
 0x311   : > { %2813 = vst.msk [vmem:[%s5191_s29 + $0xe0] sm:$0xff] %vm2784_vm0, %v2780_v26  ;;  %v3330_v31 = vadd.f32 %v3329_v27, %v2738_v28 }
 0x312   : > { %v1843_v32 = vpop.f32.mrb[60].mxu1 }
 0x313   : > { %v2781_v33 = vmax.f32 %v3330_v31, 0.0  ;;  %v3331_v34 = vadd.f32 %v5184_v12, %v1843_v32  ;;  %v2743_v35 = vpop.f32.mrb[60].mxu0  ;;  %v1845_v36 = vpop.f32.mrb[61].mxu1 }
 0x314   : > { %v2745_v37 = vpop.f32.mrb[61].mxu0 }
 0x315   : > { %2814 = vst.msk [vmem:[%s5191_s29 + $0xe8] sm:$0xff] %vm2784_vm0, %v2781_v33  ;;  %v3332_v38 = vadd.f32 %v3331_v34, %v2743_v35 }
 0x316   : > { %v1848_v39 = vpop.f32.mrb[62].mxu1 }
 0x317   : > { %v2782_v40 = vmax.f32 %v3332_v38, 0.0  ;;  %v3333_v41 = vadd.f32 %v5184_v12, %v1848_v39  ;;  %v2748_v42 = vpop.f32.mrb[62].mxu0  ;;  %v1850_v43 = vpop.f32.mrb[63].mxu1 }
 0x318   : > { %v2750_v44 = vpop.f32.mrb[63].mxu0 }
 0x319   : > { %2815 = vst.msk [vmem:[%s5191_s29 + $0xf0] sm:$0xff] %vm2784_vm0, %v2782_v40  ;;  %v3334_v45 = vadd.f32 %v3333_v41, %v2748_v42 }
 0x31b   : > { %v2783_v46 = vmax.f32 %v3334_v45, 0.0 }
 0x31d   : > { %2816 = vst.msk [vmem:[%s5191_s29 + $0xf8] sm:$0xff] %vm2784_vm0, %v2783_v46 }
 0x31e PF: > { %s13_s12 = sadd.s32 1, %s3734_s12  }
 0x31f   : > { %p10_p4 = scmp.ge.s32.totalorder %s13_s12, 4  }
 0x321   :  { %12 = sbr.rel (!%p10_p4) target bundleno = 1 (0x1), region = 62 }

// kernel: _lambda_.7
= control target key start
LH: loop header
LB: loop body
LE: loop exit
PB: predicated region body
PF: predicated region fallthrough
CT: control target
= control target key end

     0   :  { %s1554_s14 = smov 0   ;;  %s2208_s0 = inlined_call_operand.vmem [shape: f32[1792,1024], index: 0, kind: input, shape index: {}]   ;;  %s2209_s1 = inlined_call_operand.vmem [shape: f32[1,1024], index: 1, kind: input, shape index: {}]   ;;  %s2210_s2 = inlined_call_operand.<no memory space> [shape: f32[1,1], index: 2, kind: input, shape index: {}]   ;;  %s2211_s3 = inlined_call_operand.vmem [shape: f32[1792,1], index: 3, kind: output, shape index: {}]  }
   0x1   :  { %v8_v0 = vstv %s2210_s2 }
   0x2   :  { %9 = vst [vmem:[#allocation2] sm:$0x1] %v8_v0 }
   0x3 LB: > { %s1341_s15 = sadd.s32 4294967295, %s1529_s14   ;;  %p1345_p0 = scmp.ge.s32.totalorder %s1529_s14, 1  ;;  %s1529_s14 = sphi %s1554_s14, %s15_s14  }
   0x4   : > { %p141_p1 = scmp.lt.s32.totalorder %s1529_s14, 8 }
   0x6   : > { %p142_p2 = pnand %p1345_p0, %p141_p1 }
   0x7   : > { %s1346_s16 = sshll.u32 (!%p142_p2), %s1341_s15, 5  ;;  %v437_v1 = vlaneseq (!%p142_p2)  ;;  %v435_v3 = vld [vmem:[%s2209_s1] sm:$0xff] (!%p142_p2)  ;;  %vm1252_vm0 = vcmask (!%p142_p2), 7168  }
   0x8   : > { %145 = sbr.rel (%p142_p2) target bundleno = 319 (0x13f), region = 32  ;;  %p167_p3 = scmp.lt.s32.totalorder (!%p142_p2), %s1346_s16, 223 }
   0x9   : > { %v438_v2 = vshrl.u32 (!%p142_p2), %v437_v1, 7 }
   0xb   : > { %v439_v4 = vsub.s32 (!%p142_p2), 0, %v438_v2  ;;  %v443_v5 = vsub.s32 (!%p142_p2), 1, %v438_v2  ;;  %v447_v6 = vsub.s32 (!%p142_p2), 2, %v438_v2  ;;  %v451_v7 = vsub.s32 (!%p142_p2), 3, %v438_v2 }
   0xc   : > { %v455_v8 = vsub.s32 (!%p142_p2), 4, %v438_v2  ;;  %v459_v9 = vsub.s32 (!%p142_p2), 5, %v438_v2  ;;  %v463_v10 = vsub.s32 (!%p142_p2), 6, %v438_v2  ;;  %v467_v11 = vsub.s32 (!%p142_p2), 7, %v438_v2 }
   0xd   : > { %v1573_v12 = vrot.slane (!%p142_p2), %v435_v3, %v439_v4  ;;  %v1575_v13 = vrot.slane (!%p142_p2), %v435_v3, %v443_v5  ;;  %v1577_v14 = vrot.slane (!%p142_p2), %v435_v3, %v447_v6  ;;  %v1579_v15 = vrot.slane (!%p142_p2), %v435_v3, %v451_v7 }
   0xe   : > { %v1584_v19 = vrot.slane (!%p142_p2), %v435_v3, %v455_v8  ;;  %v1586_v20 = vrot.slane (!%p142_p2), %v435_v3, %v459_v9  ;;  %v1590_v23 = vrot.slane (!%p142_p2), %v435_v3, %v463_v10  ;;  %v1598_v30 = vrot.slane (!%p142_p2), %v435_v3, %v467_v11 }
   0xf   : > { %s2213_s16 = smov (!%p167_p3, %s1346_s16), 223 }
  0x10   : > { %s1386_s18 = sshll.u32 %s2213_s16, 6  ;;  %s1350_s22 = sshll.u32 %s2213_s16, 3 }
  0x11   : > { %s1571_s21 = scalar_lea.vmem %s2208_s0, %s1386_s18  ;;  %s2115_s25 = scalar_lea.vmem %s2211_s3, %s1350_s22 }
  0x12   : > { %v195_v16 = vld [vmem:[%s1571_s21 + $0x80] sm:$0xff]  ;;  %v196_v17 = vld [vmem:[%s1571_s21 + $0x88] sm:$0xff]  ;;  %v197_v18 = vld [vmem:[%s1571_s21 + $0x90] sm:$0xff] }
  0x13   : > { %v198_v21 = vld [vmem:[%s1571_s21 + $0x98] sm:$0xff]  ;;  %v199_v22 = vld [vmem:[%s1571_s21 + $0xa0] sm:$0xff]  ;;  %v493_v24 = vmul.f32 %v1573_v12, %v195_v16  ;;  %v494_v25 = vmul.f32 %v1575_v13, %v196_v17  ;;  %v495_v26 = vmul.f32 %v1577_v14, %v197_v18  ;;  %v200_v27 = vld [vmem:[%s1571_s21 + $0xa8] sm:$0xff] }
  0x14   : > { %v201_v28 = vld [vmem:[%s1571_s21 + $0xb0] sm:$0xff]  ;;  %v179_v29 = vld [vmem:[%s1571_s21] sm:$0xff]  ;;  %v496_v31 = vmul.f32 %v1579_v15, %v198_v21  ;;  %v180_v33 = vld [vmem:[%s1571_s21 + $0x8] sm:$0xff]  ;;  %v497_v42 = vmul.f32 %v1584_v19, %v199_v22  ;;  %v498_v43 = vmul.f32 %v1586_v20, %v200_v27 }
  0x15   : > { %v751_v32 = vadd.f32 %v494_v25, %v493_v24  ;;  %v181_v34 = vld [vmem:[%s1571_s21 + $0x10] sm:$0xff]  ;;  %v182_v35 = vld [vmem:[%s1571_s21 + $0x18] sm:$0xff]  ;;  %v477_v36 = vmul.f32 %v1573_v12, %v179_v29  ;;  %v183_v38 = vld [vmem:[%s1571_s21 + $0x20] sm:$0xff]  ;;  %v478_v40 = vmul.f32 %v1575_v13, %v180_v33  ;;  %v499_v44 = vmul.f32 %v1590_v23, %v201_v28 }
  0x16   : > { %v202_v37 = vld [vmem:[%s1571_s21 + $0xb8] sm:$0xff]  ;;  %v184_v39 = vld [vmem:[%s1571_s21 + $0x28] sm:$0xff]  ;;  %v479_v41 = vmul.f32 %v1577_v14, %v181_v34  ;;  %v185_v46 = vld [vmem:[%s1571_s21 + $0x30] sm:$0xff]  ;;  %v480_v50 = vmul.f32 %v1579_v15, %v182_v35  ;;  %v481_v58 = vmul.f32 %v1584_v19, %v183_v38 }
  0x17   : > { %v752_v45 = vadd.f32 %v751_v32, %v495_v26  ;;  %v203_v47 = vld [vmem:[%s1571_s21 + $0xc0] sm:$0xff]  ;;  %v204_v48 = vld [vmem:[%s1571_s21 + $0xc8] sm:$0xff]  ;;  %v186_v49 = vld [vmem:[%s1571_s21 + $0x38] sm:$0xff]  ;;  %v733_v51 = vadd.f32 %v478_v40, %v477_v36  ;;  %v500_v56 = vmul.f32 %v1598_v30, %v202_v37  ;;  %v482_v63 = vmul.f32 %v1586_v20, %v184_v39 }
  0x18   : > { %v205_v52 = vld [vmem:[%s1571_s21 + $0xd0] sm:$0xff]  ;;  %v206_v53 = vld [vmem:[%s1571_s21 + $0xd8] sm:$0xff]  ;;  %v501_v54 = vmul.f32 %v1573_v12, %v203_v47  ;;  %v502_v55 = vmul.f32 %v1575_v13, %v204_v48  ;;  %v207_v59 = vld [vmem:[%s1571_s21 + $0xe0] sm:$0xff]  ;;  %v483_v0 = vmul.f32 %v1590_v23, %v185_v46  ;;  %v484_v11 = vmul.f32 %v1598_v30, %v186_v49 }
  0x19   : > { %v753_v57 = vadd.f32 %v752_v45, %v496_v31  ;;  %v208_v60 = vld [vmem:[%s1571_s21 + $0xe8] sm:$0xff]  ;;  %v209_v61 = vld [vmem:[%s1571_s21 + $0xf0] sm:$0xff]  ;;  %v503_v62 = vmul.f32 %v1577_v14, %v205_v52  ;;  %v734_v1 = vadd.f32 %v733_v51, %v479_v41  ;;  %v504_v2 = vmul.f32 %v1579_v15, %v206_v53  ;;  %v187_v3 = vld [vmem:[%s1571_s21 + $0x40] sm:$0xff] }
  0x1a   : > { %v188_v4 = vld [vmem:[%s1571_s21 + $0x48] sm:$0xff]  ;;  %v189_v5 = vld [vmem:[%s1571_s21 + $0x50] sm:$0xff]  ;;  %v760_v7 = vadd.f32 %v502_v55, %v501_v54  ;;  %v190_v8 = vld [vmem:[%s1571_s21 + $0x58] sm:$0xff]  ;;  %v485_v9 = vmul.f32 %v1573_v12, %v187_v3  ;;  %v505_v18 = vmul.f32 %v1584_v19, %v207_v59  ;;  %v506_v25 = vmul.f32 %v1586_v20, %v208_v60 }
  0x1b   : > { %v754_v6 = vadd.f32 %v753_v57, %v497_v42  ;;  %v486_v10 = vmul.f32 %v1575_v13, %v188_v4  ;;  %v735_v16 = vadd.f32 %v734_v1, %v480_v50  ;;  %v210_v17 = vld [vmem:[%s1571_s21 + $0xf8] sm:$0xff]  ;;  %v487_v21 = vmul.f32 %v1577_v14, %v189_v5  ;;  %v219_v22 = vld [vmem:[%s1571_s21 + $0x140] sm:$0xff]  ;;  %v220_v29 = vld [vmem:[%s1571_s21 + $0x148] sm:$0xff] }
  0x1c   : > { %v507_v26 = vmul.f32 %v1590_v23, %v209_v61  ;;  %v761_v27 = vadd.f32 %v760_v7, %v503_v62  ;;  %v191_v28 = vld [vmem:[%s1571_s21 + $0x60] sm:$0xff]  ;;  %v221_v31 = vld [vmem:[%s1571_s21 + $0x150] sm:$0xff]  ;;  %v192_v33 = vld [vmem:[%s1571_s21 + $0x68] sm:$0xff]  ;;  %v488_v35 = vmul.f32 %v1579_v15, %v190_v8  ;;  %v517_v37 = vmul.f32 %v1573_v12, %v219_v22 }
  0x1d   : > { %v755_v24 = vadd.f32 %v754_v6, %v498_v43  ;;  %v736_v32 = vadd.f32 %v735_v16, %v481_v58  ;;  %v193_v34 = vld [vmem:[%s1571_s21 + $0x70] sm:$0xff]  ;;  %v742_v36 = vadd.f32 %v486_v10, %v485_v9  ;;  %v508_v39 = vmul.f32 %v1598_v30, %v210_v17  ;;  %v222_v41 = vld [vmem:[%s1571_s21 + $0x158] sm:$0xff]  ;;  %v223_v47 = vld [vmem:[%s1571_s21 + $0x160] sm:$0xff] }
  0x1e   : > { %v762_v40 = vadd.f32 %v761_v27, %v504_v2  ;;  %v518_v42 = vmul.f32 %v1575_v13, %v220_v29  ;;  %v489_v45 = vmul.f32 %v1584_v19, %v191_v28  ;;  %v519_v48 = vmul.f32 %v1577_v14, %v221_v31  ;;  %v211_v49 = vld [vmem:[%s1571_s21 + $0x100] sm:$0xff]  ;;  %v212_v50 = vld [vmem:[%s1571_s21 + $0x108] sm:$0xff]  ;;  %v213_v54 = vld [vmem:[%s1571_s21 + $0x110] sm:$0xff] }
  0x1f   : > { %v756_v38 = vadd.f32 %v755_v24, %v499_v44  ;;  %v737_v43 = vadd.f32 %v736_v32, %v482_v63  ;;  %v743_v46 = vadd.f32 %v742_v36, %v487_v21  ;;  %v490_v52 = vmul.f32 %v1586_v20, %v192_v33  ;;  %v194_v57 = vld [vmem:[%s1571_s21 + $0x78] sm:$0xff]  ;;  %v224_v59 = vld [vmem:[%s1571_s21 + $0x168] sm:$0xff]  ;;  %v225_v60 = vld [vmem:[%s1571_s21 + $0x170] sm:$0xff] }
  0x20   : > { %v763_v51 = vadd.f32 %v762_v40, %v505_v18  ;;  %v491_v53 = vmul.f32 %v1590_v23, %v193_v34  ;;  %v520_v61 = vmul.f32 %v1579_v15, %v222_v41  ;;  %v778_v62 = vadd.f32 %v518_v42, %v517_v37  ;;  %v214_v1 = vld [vmem:[%s1571_s21 + $0x118] sm:$0xff]  ;;  %v215_v6 = vld [vmem:[%s1571_s21 + $0x120] sm:$0xff]  ;;  %v236_v9 = vld [vmem:[%s1571_s21 + $0x1c8] sm:$0xff] }
  0x21   : > { %v757_v44 = vadd.f32 %v756_v38, %v500_v56  ;;  %v738_v55 = vadd.f32 %v737_v43, %v483_v0  ;;  %v744_v58 = vadd.f32 %v743_v46, %v488_v35  ;;  %v521_v63 = vmul.f32 %v1584_v19, %v223_v47  ;;  %v235_v8 = vld [vmem:[%s1571_s21 + $0x1c0] sm:$0xff]  ;;  %v226_v17 = vld [vmem:[%s1571_s21 + $0x178] sm:$0xff]  ;;  %v217_v27 = vld [vmem:[%s1571_s21 + $0x130] sm:$0xff] }
  0x22   : > { %v764_v56 = vadd.f32 %v763_v51, %v506_v25  ;;  %v509_v2 = vmul.f32 %v1573_v12, %v211_v49  ;;  %v510_v0 = vmul.f32 %v1575_v13, %v212_v50  ;;  %v779_v5 = vadd.f32 %v778_v62, %v519_v48  ;;  %v216_v25 = vld [vmem:[%s1571_s21 + $0x128] sm:$0xff]  ;;  %v218_v32 = vld [vmem:[%s1571_s21 + $0x138] sm:$0xff]  ;;  %v227_v41 = vld [vmem:[%s1571_s21 + $0x180] sm:$0xff] }
  0x23   : > { %758 = vadd.xlane.f32.xlu1 %v757_v44  ;;  %v739_v3 = vadd.f32 %v738_v55, %v484_v11  ;;  %v745_v4 = vadd.f32 %v744_v58, %v489_v45  ;;  %v511_v7 = vmul.f32 %v1577_v14, %v213_v54  ;;  %v492_v16 = vmul.f32 %v1598_v30, %v194_v57  ;;  %v237_v11 = vld [vmem:[%s1571_s21 + $0x1d0] sm:$0xff]  ;;  %v228_v42 = vld [vmem:[%s1571_s21 + $0x188] sm:$0xff]  ;;  %v239_v47 = vld [vmem:[%s1571_s21 + $0x1e0] sm:$0xff] }
  0x24   : > { %v765_v10 = vadd.f32 %v764_v56, %v507_v26  ;;  %v522_v18 = vmul.f32 %v1586_v20, %v224_v59  ;;  %v523_v21 = vmul.f32 %v1590_v23, %v225_v60  ;;  %v780_v24 = vadd.f32 %v779_v5, %v520_v61  ;;  %v238_v26 = vld [vmem:[%s1571_s21 + $0x1d8] sm:$0xff]  ;;  %v229_v43 = vld [vmem:[%s1571_s21 + $0x190] sm:$0xff]  ;;  %v240_v51 = vld [vmem:[%s1571_s21 + $0x1e8] sm:$0xff] }
  0x25   : > { %740 = vadd.xlane.f32.xlu0 %v739_v3  ;;  %v746_v22 = vadd.f32 %v745_v4, %v490_v52  ;;  %v512_v28 = vmul.f32 %v1579_v15, %v214_v1  ;;  %v769_v29 = vadd.f32 %v510_v0, %v509_v2  ;;  %v513_v33 = vmul.f32 %v1584_v19, %v215_v6  ;;  %v241_v52 = vld [vmem:[%s1571_s21 + $0x1f0] sm:$0xff]  ;;  %v230_v54 = vld [vmem:[%s1571_s21 + $0x198] sm:$0xff]  ;;  %v251_v60 = vld [vmem:[%s1571_s21 + $0x240] sm:$0xff] }
  0x26   : > { %v766_v31 = vadd.f32 %v765_v10, %v508_v39  ;;  %v533_v34 = vmul.f32 %v1573_v12, %v235_v8  ;;  %v534_v35 = vmul.f32 %v1575_v13, %v236_v9  ;;  %v781_v37 = vadd.f32 %v780_v24, %v521_v63  ;;  %v231_v1 = vld [vmem:[%s1571_s21 + $0x1a0] sm:$0xff]  ;;  %v252_v2 = vld [vmem:[%s1571_s21 + $0x248] sm:$0xff]  ;;  %v253_v0 = vld [vmem:[%s1571_s21 + $0x250] sm:$0xff] }
  0x27   : > { %v747_v36 = vadd.f32 %v746_v22, %v491_v53  ;;  %v770_v38 = vadd.f32 %v769_v29, %v511_v7  ;;  %v535_v40 = vmul.f32 %v1577_v14, %v237_v11  ;;  %v524_v39 = vmul.f32 %v1598_v30, %v226_v17  ;;  %v242_v3 = vld [vmem:[%s1571_s21 + $0x1f8] sm:$0xff]  ;;  %v232_v6 = vld [vmem:[%s1571_s21 + $0x1a8] sm:$0xff]  ;;  %v233_v17 = vld [vmem:[%s1571_s21 + $0x1b0] sm:$0xff] }
  0x28   : > { %767 = vadd.xlane.f32.xlu1 %v766_v31  ;;  %v514_v45 = vmul.f32 %v1586_v20, %v216_v25  ;;  %v515_v46 = vmul.f32 %v1590_v23, %v217_v27  ;;  %v536_v48 = vmul.f32 %v1579_v15, %v238_v26  ;;  %v782_v50 = vadd.f32 %v781_v37, %v522_v18  ;;  %v254_v18 = vld [vmem:[%s1571_s21 + $0x258] sm:$0xff]  ;;  %v243_v27 = vld [vmem:[%s1571_s21 + $0x200] sm:$0xff] }
  0x29   : > { %v748_v49 = vadd.f32 %v747_v36, %v492_v16  ;;  %v771_v44 = vadd.f32 %v770_v38, %v512_v28  ;;  %v796_v53 = vadd.f32 %v534_v35, %v533_v34  ;;  %v516_v55 = vmul.f32 %v1598_v30, %v218_v32  ;;  %v244_v28 = vld [vmem:[%s1571_s21 + $0x208] sm:$0xff]  ;;  %v245_v34 = vld [vmem:[%s1571_s21 + $0x210] sm:$0xff]  ;;  %v234_v35 = vld [vmem:[%s1571_s21 + $0x1b8] sm:$0xff] }
  0x2a   : > { %v525_v57 = vmul.f32 %v1573_v12, %v227_v41  ;;  %v526_v58 = vmul.f32 %v1575_v13, %v228_v42  ;;  %v527_v59 = vmul.f32 %v1577_v14, %v229_v43  ;;  %v783_v61 = vadd.f32 %v782_v50, %v523_v21  ;;  %v256_v38 = vld [vmem:[%s1571_s21 + $0x268] sm:$0xff] }
  0x2b   : > { %749 = vadd.xlane.f32.xlu0 %v748_v49  ;;  %v772_v62 = vadd.f32 %v771_v44, %v513_v33  ;;  %v537_v56 = vmul.f32 %v1584_v19, %v239_v47  ;;  %v797_v63 = vadd.f32 %v796_v53, %v535_v40  ;;  %v538_v4 = vmul.f32 %v1586_v20, %v240_v51  ;;  %v255_v33 = vld [vmem:[%s1571_s21 + $0x260] sm:$0xff]  ;;  %v257_v40 = vld [vmem:[%s1571_s21 + $0x270] sm:$0xff]  ;;  %v268_v53 = vld [vmem:[%s1571_s21 + $0x2c8] sm:$0xff] }
  0x2c   : > { %v539_v5 = vmul.f32 %v1590_v23, %v241_v52  ;;  %v528_v7 = vmul.f32 %v1579_v15, %v230_v54  ;;  %v787_v8 = vadd.f32 %v526_v58, %v525_v57  ;;  %v784_v9 = vadd.f32 %v783_v61, %v524_v39  ;;  %v247_v44 = vld [vmem:[%s1571_s21 + $0x220] sm:$0xff]  ;;  %v258_v57 = vld [vmem:[%s1571_s21 + $0x278] sm:$0xff] }
  0x2d   : > { %v773_v10 = vadd.f32 %v772_v62, %v514_v45  ;;  %v798_v16 = vadd.f32 %v797_v63, %v536_v48  ;;  %v549_v21 = vmul.f32 %v1573_v12, %v251_v60  ;;  %v529_v11 = vmul.f32 %v1584_v19, %v231_v1  ;;  %v246_v45 = vld [vmem:[%s1571_s21 + $0x218] sm:$0xff]  ;;  %v267_v52 = vld [vmem:[%s1571_s21 + $0x2c0] sm:$0xff]  ;;  %v269_v60 = vld [vmem:[%s1571_s21 + $0x2d0] sm:$0xff] }
  0x2e   : > { %v788_v22 = vadd.f32 %v787_v8, %v527_v59  ;;  %v550_v24 = vmul.f32 %v1575_v13, %v252_v2  ;;  %v551_v25 = vmul.f32 %v1577_v14, %v253_v0  ;;  %785 = vadd.xlane.f32.xlu1 %v784_v9  ;;  %v540_v26 = vmul.f32 %v1598_v30, %v242_v3  ;;  %v249_v63 = vld [vmem:[%s1571_s21 + $0x230] sm:$0xff]  ;;  %v270_v0 = vld [vmem:[%s1571_s21 + $0x2d8] sm:$0xff] }
  0x2f   : > { %v774_v29 = vadd.f32 %v773_v10, %v515_v46  ;;  %v799_v31 = vadd.f32 %v798_v16, %v537_v56  ;;  %v530_v32 = vmul.f32 %v1586_v20, %v232_v6  ;;  %v531_v36 = vmul.f32 %v1590_v23, %v233_v17  ;;  %v248_v56 = vld [vmem:[%s1571_s21 + $0x228] sm:$0xff]  ;;  %v259_v17 = vld [vmem:[%s1571_s21 + $0x280] sm:$0xff] }
  0x30   : > { %v789_v37 = vadd.f32 %v788_v22, %v528_v7  ;;  %v552_v41 = vmul.f32 %v1579_v15, %v254_v18  ;;  %v814_v42 = vadd.f32 %v550_v24, %v549_v21  ;;  %v541_v46 = vmul.f32 %v1573_v12, %v243_v27  ;;  %v260_v18 = vld [vmem:[%s1571_s21 + $0x288] sm:$0xff]  ;;  %v261_v21 = vld [vmem:[%s1571_s21 + $0x290] sm:$0xff] }
  0x31   : > { %v775_v43 = vadd.f32 %v774_v29, %v516_v55  ;;  %v800_v39 = vadd.f32 %v799_v31, %v538_v4  ;;  %v542_v47 = vmul.f32 %v1575_v13, %v244_v28  ;;  %v553_v49 = vmul.f32 %v1584_v19, %v255_v33  ;;  %v250_v4 = vld [vmem:[%s1571_s21 + $0x238] sm:$0xff]  ;;  %v272_v31 = vld [vmem:[%s1571_s21 + $0x2e8] sm:$0xff] }
  0x32   : > { %v790_v48 = vadd.f32 %v789_v37, %v529_v11  ;;  %v815_v50 = vadd.f32 %v814_v42, %v551_v25  ;;  %v543_v51 = vmul.f32 %v1577_v14, %v245_v34  ;;  %v532_v55 = vmul.f32 %v1598_v30, %v234_v35  ;;  %v271_v25 = vld [vmem:[%s1571_s21 + $0x2e0] sm:$0xff]  ;;  %v262_v34 = vld [vmem:[%s1571_s21 + $0x298] sm:$0xff] }
  0x33   : > { %776 = vadd.xlane.f32.xlu0 %v775_v43  ;;  %v801_v54 = vadd.f32 %v800_v39, %v539_v5  ;;  %v554_v58 = vmul.f32 %v1586_v20, %v256_v38  ;;  %v555_v59 = vmul.f32 %v1590_v23, %v257_v40  ;;  %v544_v1 = vmul.f32 %v1579_v15, %v246_v45  ;;  %v283_v40 = vld [vmem:[%s1571_s21 + $0x340] sm:$0xff] }
  0x34   : > { %v791_v61 = vadd.f32 %v790_v48, %v530_v32  ;;  %v816_v62 = vadd.f32 %v815_v50, %v552_v41  ;;  %v805_v2 = vadd.f32 %v542_v47, %v541_v46  ;;  %v545_v5 = vmul.f32 %v1584_v19, %v247_v44  ;;  %v273_v32 = vld [vmem:[%s1571_s21 + $0x2f0] sm:$0xff]  ;;  %v263_v45 = vld [vmem:[%s1571_s21 + $0x2a0] sm:$0xff]  ;;  %v284_v46 = vld [vmem:[%s1571_s21 + $0x348] sm:$0xff] }
  0x35   : > { %v802_v3 = vadd.f32 %v801_v54, %v540_v26  ;;  %v565_v6 = vmul.f32 %v1573_v12, %v267_v52  ;;  %v566_v7 = vmul.f32 %v1575_v13, %v268_v53  ;;  %v567_v16 = vmul.f32 %v1577_v14, %v269_v60  ;;  %v285_v47 = vld [vmem:[%s1571_s21 + $0x350] sm:$0xff]  ;;  %v274_v48 = vld [vmem:[%s1571_s21 + $0x2f8] sm:$0xff]  ;;  %v264_v44 = vld [vmem:[%s1571_s21 + $0x2a8] sm:$0xff] }
  0x36   : > { %v792_v8 = vadd.f32 %v791_v61, %v531_v36  ;;  %v817_v9 = vadd.f32 %v816_v62, %v553_v49  ;;  %v806_v10 = vadd.f32 %v805_v2, %v543_v51  ;;  %v556_v11 = vmul.f32 %v1598_v30, %v258_v57  ;;  %v265_v57 = vld [vmem:[%s1571_s21 + $0x2b0] sm:$0xff] }
  0x37   : > { %803 = vadd.xlane.f32.xlu1 %v802_v3  ;;  %v546_v22 = vmul.f32 %v1586_v20, %v248_v56  ;;  %v547_v24 = vmul.f32 %v1590_v23, %v249_v63  ;;  %v568_v27 = vmul.f32 %v1579_v15, %v270_v0  ;;  %v832_v33 = vadd.f32 %v566_v7, %v565_v6  ;;  %v275_v63 = vld [vmem:[%s1571_s21 + $0x300] sm:$0xff]  ;;  %v277_v6 = vld [vmem:[%s1571_s21 + $0x310] sm:$0xff]  ;;  %v266_v7 = vld [vmem:[%s1571_s21 + $0x2b8] sm:$0xff] }
  0x38   : > { %v793_v28 = vadd.f32 %v792_v8, %v532_v55  ;;  %v818_v29 = vadd.f32 %v817_v9, %v554_v58  ;;  %v807_v26 = vadd.f32 %v806_v10, %v544_v1  ;;  %v548_v35 = vmul.f32 %v1598_v30, %v250_v4  ;;  %v286_v58 = vld [vmem:[%s1571_s21 + $0x358] sm:$0xff]  ;;  %v276_v1 = vld [vmem:[%s1571_s21 + $0x308] sm:$0xff] }
  0x39   : > { %v557_v36 = vmul.f32 %v1573_v12, %v259_v17  ;;  %v558_v37 = vmul.f32 %v1575_v13, %v260_v18  ;;  %v559_v38 = vmul.f32 %v1577_v14, %v261_v21  ;;  %v569_v43 = vmul.f32 %v1584_v19, %v271_v25  ;;  %v288_v10 = vld [vmem:[%s1571_s21 + $0x368] sm:$0xff] }
  0x3a   : > { %794 = vadd.xlane.f32.xlu0 %v793_v28  ;;  %v819_v41 = vadd.f32 %v818_v29, %v555_v59  ;;  %v808_v42 = vadd.f32 %v807_v26, %v545_v5  ;;  %v833_v39 = vadd.f32 %v832_v33, %v567_v16  ;;  %v570_v49 = vmul.f32 %v1586_v20, %v272_v31  ;;  %v287_v5 = vld [vmem:[%s1571_s21 + $0x360] sm:$0xff]  ;;  %v289_v16 = vld [vmem:[%s1571_s21 + $0x370] sm:$0xff]  ;;  %v300_v33 = vld [vmem:[%s1571_s21 + $0x3c8] sm:$0xff] }
  0x3b   : > { %v571_v50 = vmul.f32 %v1590_v23, %v273_v32  ;;  %v560_v51 = vmul.f32 %v1579_v15, %v262_v34  ;;  %v823_v52 = vadd.f32 %v558_v37, %v557_v36  ;;  %v581_v59 = vmul.f32 %v1573_v12, %v283_v40  ;;  %v279_v26 = vld [vmem:[%s1571_s21 + $0x320] sm:$0xff]  ;;  %v290_v36 = vld [vmem:[%s1571_s21 + $0x378] sm:$0xff]  ;;  %v301_v40 = vld [vmem:[%s1571_s21 + $0x3d0] sm:$0xff] }
  0x3c   : > { %v820_v53 = vadd.f32 %v819_v41, %v556_v11  ;;  %v809_v54 = vadd.f32 %v808_v42, %v546_v22  ;;  %v834_v55 = vadd.f32 %v833_v39, %v568_v27  ;;  %v561_v60 = vmul.f32 %v1584_v19, %v263_v45  ;;  %v278_v22 = vld [vmem:[%s1571_s21 + $0x318] sm:$0xff]  ;;  %v299_v32 = vld [vmem:[%s1571_s21 + $0x3c0] sm:$0xff]  ;;  %v281_v39 = vld [vmem:[%s1571_s21 + $0x330] sm:$0xff] }
  0x3d   : > { %v824_v61 = vadd.f32 %v823_v52, %v559_v38  ;;  %v582_v62 = vmul.f32 %v1575_v13, %v284_v46  ;;  %v583_v56 = vmul.f32 %v1577_v14, %v285_v47  ;;  %v572_v0 = vmul.f32 %v1598_v30, %v274_v48  ;;  %v302_v47 = vld [vmem:[%s1571_s21 + $0x3d8] sm:$0xff] }
  0x3e   : > { %821 = vadd.xlane.f32.xlu1 %v820_v53  ;;  %v810_v2 = vadd.f32 %v809_v54, %v547_v24  ;;  %v835_v3 = vadd.f32 %v834_v55, %v569_v43  ;;  %v562_v4 = vmul.f32 %v1586_v20, %v264_v44  ;;  %v563_v8 = vmul.f32 %v1590_v23, %v265_v57  ;;  %v280_v43 = vld [vmem:[%s1571_s21 + $0x328] sm:$0xff]  ;;  %v291_v57 = vld [vmem:[%s1571_s21 + $0x380] sm:$0xff] }
  0x3f   : > { %v825_v9 = vadd.f32 %v824_v61, %v560_v51  ;;  %v584_v17 = vmul.f32 %v1579_v15, %v286_v58  ;;  %v850_v18 = vadd.f32 %v582_v62, %v581_v59  ;;  %v573_v24 = vmul.f32 %v1573_v12, %v275_v63  ;;  %v292_v58 = vld [vmem:[%s1571_s21 + $0x388] sm:$0xff]  ;;  %v293_v59 = vld [vmem:[%s1571_s21 + $0x390] sm:$0xff] }
  0x40   : > { %v811_v21 = vadd.f32 %v810_v2, %v548_v35  ;;  %v836_v11 = vadd.f32 %v835_v3, %v570_v49  ;;  %v574_v25 = vmul.f32 %v1575_v13, %v276_v1  ;;  %v585_v28 = vmul.f32 %v1584_v19, %v287_v5  ;;  %v282_v49 = vld [vmem:[%s1571_s21 + $0x338] sm:$0xff]  ;;  %v304_v3 = vld [vmem:[%s1571_s21 + $0x3e8] sm:$0xff] }
  0x41   : > { %v826_v27 = vadd.f32 %v825_v9, %v561_v60  ;;  %v851_v29 = vadd.f32 %v850_v18, %v583_v56  ;;  %v575_v31 = vmul.f32 %v1577_v14, %v277_v6  ;;  %v564_v35 = vmul.f32 %v1598_v30, %v266_v7  ;;  %v303_v56 = vld [vmem:[%s1571_s21 + $0x3e0] sm:$0xff]  ;;  %v294_v6 = vld [vmem:[%s1571_s21 + $0x398] sm:$0xff] }
  0x42   : > { %812 = vadd.xlane.f32.xlu0 %v811_v21  ;;  %v837_v34 = vadd.f32 %v836_v11, %v571_v50  ;;  %v586_v37 = vmul.f32 %v1586_v20, %v288_v10  ;;  %v587_v38 = vmul.f32 %v1590_v23, %v289_v16  ;;  %v576_v45 = vmul.f32 %v1579_v15, %v278_v22  ;;  %v315_v16 = vld [vmem:[%s1571_s21 + $0x440] sm:$0xff] }
  0x43   : > { %v827_v41 = vadd.f32 %v826_v27, %v562_v4  ;;  %v852_v42 = vadd.f32 %v851_v29, %v584_v17  ;;  %v841_v46 = vadd.f32 %v574_v25, %v573_v24  ;;  %v577_v50 = vmul.f32 %v1584_v19, %v279_v26  ;;  %v305_v4 = vld [vmem:[%s1571_s21 + $0x3f0] sm:$0xff]  ;;  %v295_v22 = vld [vmem:[%s1571_s21 + $0x3a0] sm:$0xff]  ;;  %v316_v24 = vld [vmem:[%s1571_s21 + $0x448] sm:$0xff] }
  0x44   : > { %v838_v48 = vadd.f32 %v837_v34, %v572_v0  ;;  %v597_v44 = vmul.f32 %v1573_v12, %v299_v32  ;;  %v598_v51 = vmul.f32 %v1575_v13, %v300_v33  ;;  %v599_v55 = vmul.f32 %v1577_v14, %v301_v40  ;;  %v317_v25 = vld [vmem:[%s1571_s21 + $0x450] sm:$0xff]  ;;  %v306_v27 = vld [vmem:[%s1571_s21 + $0x3f8] sm:$0xff]  ;;  %v296_v26 = vld [vmem:[%s1571_s21 + $0x3a8] sm:$0xff] }
  0x45   : > { %v828_v52 = vadd.f32 %v827_v41, %v563_v8  ;;  %v853_v53 = vadd.f32 %v852_v42, %v585_v28  ;;  %v842_v54 = vadd.f32 %v841_v46, %v575_v31  ;;  %v588_v60 = vmul.f32 %v1598_v30, %v290_v36  ;;  %v297_v36 = vld [vmem:[%s1571_s21 + $0x3b0] sm:$0xff] }
  0x46   : > { %839 = vadd.xlane.f32.xlu1 %v838_v48  ;;  %v578_v61 = vmul.f32 %v1586_v20, %v280_v43  ;;  %v579_v62 = vmul.f32 %v1590_v23, %v281_v39  ;;  %v600_v63 = vmul.f32 %v1579_v15, %v302_v47  ;;  %v868_v5 = vadd.f32 %v598_v51, %v597_v44  ;;  %v307_v39 = vld [vmem:[%s1571_s21 + $0x400] sm:$0xff]  ;;  %v309_v44 = vld [vmem:[%s1571_s21 + $0x410] sm:$0xff]  ;;  %v298_v51 = vld [vmem:[%s1571_s21 + $0x3b8] sm:$0xff] }
  0x47   : > { %v829_v1 = vadd.f32 %v828_v52, %v564_v35  ;;  %v854_v2 = vadd.f32 %v853_v53, %v586_v37  ;;  %v843_v0 = vadd.f32 %v842_v54, %v576_v45  ;;  %v580_v7 = vmul.f32 %v1598_v30, %v282_v49  ;;  %v318_v37 = vld [vmem:[%s1571_s21 + $0x458] sm:$0xff]  ;;  %v308_v45 = vld [vmem:[%s1571_s21 + $0x408] sm:$0xff] }
  0x48   : > { %v589_v8 = vmul.f32 %v1573_v12, %v291_v57  ;;  %v590_v9 = vmul.f32 %v1575_v13, %v292_v58  ;;  %v591_v10 = vmul.f32 %v1577_v14, %v293_v59  ;;  %v601_v21 = vmul.f32 %v1584_v19, %v303_v56  ;;  %v320_v54 = vld [vmem:[%s1571_s21 + $0x468] sm:$0xff] }
  0x49   : > { %830 = vadd.xlane.f32.xlu0 %v829_v1  ;;  %v855_v17 = vadd.f32 %v854_v2, %v587_v38  ;;  %v844_v18 = vadd.f32 %v843_v0, %v577_v50  ;;  %v869_v11 = vadd.f32 %v868_v5, %v599_v55  ;;  %v602_v28 = vmul.f32 %v1586_v20, %v304_v3  ;;  %v319_v50 = vld [vmem:[%s1571_s21 + $0x460] sm:$0xff]  ;;  %v321_v55 = vld [vmem:[%s1571_s21 + $0x470] sm:$0xff]  ;;  %v332_v5 = vld [vmem:[%s1571_s21 + $0x4c8] sm:$0xff] }
  0x4a   : > { %v603_v29 = vmul.f32 %v1590_v23, %v305_v4  ;;  %v592_v31 = vmul.f32 %v1579_v15, %v294_v6  ;;  %v859_v32 = vadd.f32 %v590_v9, %v589_v8  ;;  %v613_v38 = vmul.f32 %v1573_v12, %v315_v16  ;;  %v311_v0 = vld [vmem:[%s1571_s21 + $0x420] sm:$0xff]  ;;  %v322_v8 = vld [vmem:[%s1571_s21 + $0x478] sm:$0xff]  ;;  %v333_v16 = vld [vmem:[%s1571_s21 + $0x4d0] sm:$0xff] }
  0x4b   : > { %v856_v33 = vadd.f32 %v855_v17, %v588_v60  ;;  %v845_v34 = vadd.f32 %v844_v18, %v578_v61  ;;  %v870_v35 = vadd.f32 %v869_v11, %v600_v63  ;;  %v593_v40 = vmul.f32 %v1584_v19, %v295_v22  ;;  %v310_v61 = vld [vmem:[%s1571_s21 + $0x418] sm:$0xff]  ;;  %v331_v4 = vld [vmem:[%s1571_s21 + $0x4c0] sm:$0xff]  ;;  %v313_v11 = vld [vmem:[%s1571_s21 + $0x430] sm:$0xff] }
  0x4c   : > { %v860_v41 = vadd.f32 %v859_v32, %v591_v10  ;;  %v614_v42 = vmul.f32 %v1575_v13, %v316_v24  ;;  %v615_v43 = vmul.f32 %v1577_v14, %v317_v25  ;;  %v604_v47 = vmul.f32 %v1598_v30, %v306_v27  ;;  %v334_v25 = vld [vmem:[%s1571_s21 + $0x4d8] sm:$0xff] }
  0x4d   : > { %857 = vadd.xlane.f32.xlu1 %v856_v33  ;;  %v846_v46 = vadd.f32 %v845_v34, %v579_v62  ;;  %v871_v48 = vadd.f32 %v870_v35, %v601_v21  ;;  %v594_v49 = vmul.f32 %v1586_v20, %v296_v26  ;;  %v595_v52 = vmul.f32 %v1590_v23, %v297_v36  ;;  %v312_v21 = vld [vmem:[%s1571_s21 + $0x428] sm:$0xff]  ;;  %v323_v36 = vld [vmem:[%s1571_s21 + $0x480] sm:$0xff] }
  0x4e   : > { %v861_v53 = vadd.f32 %v860_v41, %v592_v31  ;;  %v616_v57 = vmul.f32 %v1579_v15, %v318_v37  ;;  %v886_v58 = vadd.f32 %v614_v42, %v613_v38  ;;  %v605_v62 = vmul.f32 %v1573_v12, %v307_v39  ;;  %v324_v37 = vld [vmem:[%s1571_s21 + $0x488] sm:$0xff]  ;;  %v325_v38 = vld [vmem:[%s1571_s21 + $0x490] sm:$0xff] }
  0x4f   : > { %v847_v59 = vadd.f32 %v846_v46, %v580_v7  ;;  %v872_v60 = vadd.f32 %v871_v48, %v602_v28  ;;  %v606_v56 = vmul.f32 %v1575_v13, %v308_v45  ;;  %v617_v1 = vmul.f32 %v1584_v19, %v319_v50  ;;  %v314_v28 = vld [vmem:[%s1571_s21 + $0x438] sm:$0xff]  ;;  %v336_v48 = vld [vmem:[%s1571_s21 + $0x4e8] sm:$0xff] }
  0x50   : > { %v862_v63 = vadd.f32 %v861_v53, %v593_v40  ;;  %v887_v2 = vadd.f32 %v886_v58, %v615_v43  ;;  %v607_v3 = vmul.f32 %v1577_v14, %v309_v44  ;;  %v596_v7 = vmul.f32 %v1598_v30, %v298_v51  ;;  %v335_v43 = vld [vmem:[%s1571_s21 + $0x4e0] sm:$0xff]  ;;  %v326_v44 = vld [vmem:[%s1571_s21 + $0x498] sm:$0xff] }
  0x51   : > { %848 = vadd.xlane.f32.xlu0 %v847_v59  ;;  %v873_v6 = vadd.f32 %v872_v60, %v603_v29  ;;  %v618_v9 = vmul.f32 %v1586_v20, %v320_v54  ;;  %v619_v10 = vmul.f32 %v1590_v23, %v321_v55  ;;  %v608_v22 = vmul.f32 %v1579_v15, %v310_v61  ;;  %v347_v55 = vld [vmem:[%s1571_s21 + $0x540] sm:$0xff] }
  0x52   : > { %v863_v17 = vadd.f32 %v862_v63, %v594_v49  ;;  %v888_v18 = vadd.f32 %v887_v2, %v616_v57  ;;  %v877_v24 = vadd.f32 %v606_v56, %v605_v62  ;;  %v609_v29 = vmul.f32 %v1584_v19, %v311_v0  ;;  %v337_v49 = vld [vmem:[%s1571_s21 + $0x4f0] sm:$0xff]  ;;  %v327_v61 = vld [vmem:[%s1571_s21 + $0x4a0] sm:$0xff]  ;;  %v348_v62 = vld [vmem:[%s1571_s21 + $0x548] sm:$0xff] }
  0x53   : > { %v874_v27 = vadd.f32 %v873_v6, %v604_v47  ;;  %v629_v26 = vmul.f32 %v1573_v12, %v331_v4  ;;  %v630_v31 = vmul.f32 %v1575_v13, %v332_v5  ;;  %v631_v35 = vmul.f32 %v1577_v14, %v333_v16  ;;  %v349_v56 = vld [vmem:[%s1571_s21 + $0x550] sm:$0xff]  ;;  %v338_v63 = vld [vmem:[%s1571_s21 + $0x4f8] sm:$0xff]  ;;  %v328_v0 = vld [vmem:[%s1571_s21 + $0x4a8] sm:$0xff] }
  0x54   : > { %v864_v32 = vadd.f32 %v863_v17, %v595_v52  ;;  %v889_v33 = vadd.f32 %v888_v18, %v617_v1  ;;  %v878_v34 = vadd.f32 %v877_v24, %v607_v3  ;;  %v620_v40 = vmul.f32 %v1598_v30, %v322_v8  ;;  %v329_v8 = vld [vmem:[%s1571_s21 + $0x4b0] sm:$0xff] }
  0x55   : > { %875 = vadd.xlane.f32.xlu1 %v874_v27  ;;  %v610_v41 = vmul.f32 %v1586_v20, %v312_v21  ;;  %v611_v42 = vmul.f32 %v1590_v23, %v313_v11  ;;  %v632_v39 = vmul.f32 %v1579_v15, %v334_v25  ;;  %v904_v50 = vadd.f32 %v630_v31, %v629_v26  ;;  %v339_v11 = vld [vmem:[%s1571_s21 + $0x500] sm:$0xff]  ;;  %v341_v26 = vld [vmem:[%s1571_s21 + $0x510] sm:$0xff]  ;;  %v330_v31 = vld [vmem:[%s1571_s21 + $0x4b8] sm:$0xff] }
  0x56   : > { %v865_v45 = vadd.f32 %v864_v32, %v596_v7  ;;  %v890_v46 = vadd.f32 %v889_v33, %v618_v9  ;;  %v879_v47 = vadd.f32 %v878_v34, %v608_v22  ;;  %v612_v51 = vmul.f32 %v1598_v30, %v314_v28  ;;  %v350_v9 = vld [vmem:[%s1571_s21 + $0x558] sm:$0xff]  ;;  %v340_v22 = vld [vmem:[%s1571_s21 + $0x508] sm:$0xff] }
  0x57   : > { %v621_v52 = vmul.f32 %v1573_v12, %v323_v36  ;;  %v622_v53 = vmul.f32 %v1575_v13, %v324_v37  ;;  %v623_v54 = vmul.f32 %v1577_v14, %v325_v38  ;;  %v633_v59 = vmul.f32 %v1584_v19, %v335_v43  ;;  %v352_v34 = vld [vmem:[%s1571_s21 + $0x568] sm:$0xff] }
  0x58   : > { %866 = vadd.xlane.f32.xlu0 %v865_v45  ;;  %v891_v57 = vadd.f32 %v890_v46, %v619_v10  ;;  %v880_v58 = vadd.f32 %v879_v47, %v609_v29  ;;  %v905_v60 = vadd.f32 %v904_v50, %v631_v35  ;;  %v634_v1 = vmul.f32 %v1586_v20, %v336_v48  ;;  %v351_v29 = vld [vmem:[%s1571_s21 + $0x560] sm:$0xff]  ;;  %v353_v35 = vld [vmem:[%s1571_s21 + $0x570] sm:$0xff]  ;;  %v364_v50 = vld [vmem:[%s1571_s21 + $0x5c8] sm:$0xff] }
  0x59   : > { %v635_v2 = vmul.f32 %v1590_v23, %v337_v49  ;;  %v624_v3 = vmul.f32 %v1579_v15, %v326_v44  ;;  %v895_v4 = vadd.f32 %v622_v53, %v621_v52  ;;  %v645_v10 = vmul.f32 %v1573_v12, %v347_v55  ;;  %v343_v47 = vld [vmem:[%s1571_s21 + $0x520] sm:$0xff]  ;;  %v354_v52 = vld [vmem:[%s1571_s21 + $0x578] sm:$0xff]  ;;  %v365_v55 = vld [vmem:[%s1571_s21 + $0x5d0] sm:$0xff] }
  0x5a   : > { %v892_v5 = vadd.f32 %v891_v57, %v620_v40  ;;  %v881_v6 = vadd.f32 %v880_v58, %v610_v41  ;;  %v906_v7 = vadd.f32 %v905_v60, %v632_v39  ;;  %v625_v16 = vmul.f32 %v1584_v19, %v327_v61  ;;  %v342_v41 = vld [vmem:[%s1571_s21 + $0x518] sm:$0xff]  ;;  %v363_v49 = vld [vmem:[%s1571_s21 + $0x5c0] sm:$0xff]  ;;  %v345_v60 = vld [vmem:[%s1571_s21 + $0x530] sm:$0xff] }
  0x5b   : > { %v896_v17 = vadd.f32 %v895_v4, %v623_v54  ;;  %v646_v18 = vmul.f32 %v1575_v13, %v348_v62  ;;  %v647_v21 = vmul.f32 %v1577_v14, %v349_v56  ;;  %v636_v25 = vmul.f32 %v1598_v30, %v338_v63  ;;  %v366_v56 = vld [vmem:[%s1571_s21 + $0x5d8] sm:$0xff] }
  0x5c   : > { %893 = vadd.xlane.f32.xlu1 %v892_v5  ;;  %v882_v24 = vadd.f32 %v881_v6, %v611_v42  ;;  %v907_v27 = vadd.f32 %v906_v7, %v633_v59  ;;  %v626_v28 = vmul.f32 %v1586_v20, %v328_v0  ;;  %v627_v32 = vmul.f32 %v1590_v23, %v329_v8  ;;  %v344_v59 = vld [vmem:[%s1571_s21 + $0x528] sm:$0xff]  ;;  %v355_v8 = vld [vmem:[%s1571_s21 + $0x580] sm:$0xff] }
  0x5d   : > { %v897_v33 = vadd.f32 %v896_v17, %v624_v3  ;;  %v648_v36 = vmul.f32 %v1579_v15, %v350_v9  ;;  %v922_v37 = vadd.f32 %v646_v18, %v645_v10  ;;  %v637_v42 = vmul.f32 %v1573_v12, %v339_v11  ;;  %v356_v9 = vld [vmem:[%s1571_s21 + $0x588] sm:$0xff]  ;;  %v357_v10 = vld [vmem:[%s1571_s21 + $0x590] sm:$0xff] }
  0x5e   : > { %v883_v38 = vadd.f32 %v882_v24, %v612_v51  ;;  %v908_v40 = vadd.f32 %v907_v27, %v634_v1  ;;  %v638_v43 = vmul.f32 %v1575_v13, %v340_v22  ;;  %v649_v45 = vmul.f32 %v1584_v19, %v351_v29  ;;  %v346_v1 = vld [vmem:[%s1571_s21 + $0x538] sm:$0xff]  ;;  %v368_v27 = vld [vmem:[%s1571_s21 + $0x5e8] sm:$0xff] }
  0x5f   : > { %v898_v39 = vadd.f32 %v897_v33, %v625_v16  ;;  %v923_v46 = vadd.f32 %v922_v37, %v647_v21  ;;  %v639_v48 = vmul.f32 %v1577_v14, %v341_v26  ;;  %v628_v51 = vmul.f32 %v1598_v30, %v330_v31  ;;  %v367_v21 = vld [vmem:[%s1571_s21 + $0x5e0] sm:$0xff]  ;;  %v358_v26 = vld [vmem:[%s1571_s21 + $0x598] sm:$0xff] }
  0x60   : > { %884 = vadd.xlane.f32.xlu0 %v883_v38  ;;  %v909_v44 = vadd.f32 %v908_v40, %v635_v2  ;;  %v650_v53 = vmul.f32 %v1586_v20, %v352_v34  ;;  %v651_v54 = vmul.f32 %v1590_v23, %v353_v35  ;;  %v640_v61 = vmul.f32 %v1579_v15, %v342_v41  ;;  %v379_v35 = vld [vmem:[%s1571_s21 + $0x640] sm:$0xff] }
  0x61   : > { %v899_v57 = vadd.f32 %v898_v39, %v626_v28  ;;  %v924_v58 = vadd.f32 %v923_v46, %v648_v36  ;;  %v913_v62 = vadd.f32 %v638_v43, %v637_v42  ;;  %v641_v2 = vmul.f32 %v1584_v19, %v343_v47  ;;  %v369_v28 = vld [vmem:[%s1571_s21 + $0x5f0] sm:$0xff]  ;;  %v359_v41 = vld [vmem:[%s1571_s21 + $0x5a0] sm:$0xff]  ;;  %v380_v42 = vld [vmem:[%s1571_s21 + $0x648] sm:$0xff] }
  0x62   : > { %v910_v63 = vadd.f32 %v909_v44, %v636_v25  ;;  %v661_v0 = vmul.f32 %v1573_v12, %v363_v49  ;;  %v662_v3 = vmul.f32 %v1575_v13, %v364_v50  ;;  %v663_v7 = vmul.f32 %v1577_v14, %v365_v55  ;;  %v381_v43 = vld [vmem:[%s1571_s21 + $0x650] sm:$0xff]  ;;  %v370_v39 = vld [vmem:[%s1571_s21 + $0x5f8] sm:$0xff]  ;;  %v360_v47 = vld [vmem:[%s1571_s21 + $0x5a8] sm:$0xff] }
  0x63   : > { %v900_v4 = vadd.f32 %v899_v57, %v627_v32  ;;  %v925_v5 = vadd.f32 %v924_v58, %v649_v45  ;;  %v914_v6 = vadd.f32 %v913_v62, %v639_v48  ;;  %v652_v16 = vmul.f32 %v1598_v30, %v354_v52  ;;  %v361_v52 = vld [vmem:[%s1571_s21 + $0x5b0] sm:$0xff] }
  0x64   : > { %911 = vadd.xlane.f32.xlu1 %v910_v63  ;;  %v642_v17 = vmul.f32 %v1586_v20, %v344_v59  ;;  %v643_v18 = vmul.f32 %v1590_v23, %v345_v60  ;;  %v664_v11 = vmul.f32 %v1579_v15, %v366_v56  ;;  %v940_v29 = vadd.f32 %v662_v3, %v661_v0  ;;  %v371_v60 = vld [vmem:[%s1571_s21 + $0x600] sm:$0xff]  ;;  %v373_v0 = vld [vmem:[%s1571_s21 + $0x610] sm:$0xff]  ;;  %v362_v3 = vld [vmem:[%s1571_s21 + $0x5b8] sm:$0xff] }
  0x65   : > { %v901_v22 = vadd.f32 %v900_v4, %v628_v51  ;;  %v926_v24 = vadd.f32 %v925_v5, %v650_v53  ;;  %v915_v25 = vadd.f32 %v914_v6, %v640_v61  ;;  %v644_v31 = vmul.f32 %v1598_v30, %v346_v1  ;;  %v382_v53 = vld [vmem:[%s1571_s21 + $0x658] sm:$0xff]  ;;  %v372_v61 = vld [vmem:[%s1571_s21 + $0x608] sm:$0xff] }
  0x66   : > { %v653_v32 = vmul.f32 %v1573_v12, %v355_v8  ;;  %v654_v33 = vmul.f32 %v1575_v13, %v356_v9  ;;  %v655_v34 = vmul.f32 %v1577_v14, %v357_v10  ;;  %v665_v38 = vmul.f32 %v1584_v19, %v367_v21  ;;  %v384_v6 = vld [vmem:[%s1571_s21 + $0x668] sm:$0xff] }
  0x67   : > { %902 = vadd.xlane.f32.xlu0 %v901_v22  ;;  %v927_v36 = vadd.f32 %v926_v24, %v651_v54  ;;  %v916_v37 = vadd.f32 %v915_v25, %v641_v2  ;;  %v941_v40 = vadd.f32 %v940_v29, %v663_v7  ;;  %v666_v45 = vmul.f32 %v1586_v20, %v368_v27  ;;  %v383_v2 = vld [vmem:[%s1571_s21 + $0x660] sm:$0xff]  ;;  %v385_v7 = vld [vmem:[%s1571_s21 + $0x670] sm:$0xff]  ;;  %v396_v29 = vld [vmem:[%s1571_s21 + $0x6c8] sm:$0xff] }
  0x68   : > { %v667_v46 = vmul.f32 %v1590_v23, %v369_v28  ;;  %v656_v48 = vmul.f32 %v1579_v15, %v358_v26  ;;  %v931_v49 = vadd.f32 %v654_v33, %v653_v32  ;;  %v677_v54 = vmul.f32 %v1573_v12, %v379_v35  ;;  %v375_v25 = vld [vmem:[%s1571_s21 + $0x620] sm:$0xff]  ;;  %v386_v32 = vld [vmem:[%s1571_s21 + $0x678] sm:$0xff]  ;;  %v397_v35 = vld [vmem:[%s1571_s21 + $0x6d0] sm:$0xff] }
  0x69   : > { %v928_v50 = vadd.f32 %v927_v36, %v652_v16  ;;  %v917_v44 = vadd.f32 %v916_v37, %v642_v17  ;;  %v942_v51 = vadd.f32 %v941_v40, %v664_v11  ;;  %v657_v55 = vmul.f32 %v1584_v19, %v359_v41  ;;  %v374_v17 = vld [vmem:[%s1571_s21 + $0x618] sm:$0xff]  ;;  %v395_v28 = vld [vmem:[%s1571_s21 + $0x6c0] sm:$0xff]  ;;  %v377_v40 = vld [vmem:[%s1571_s21 + $0x630] sm:$0xff] }
  0x6a   : > { %v932_v57 = vadd.f32 %v931_v49, %v655_v34  ;;  %v678_v58 = vmul.f32 %v1575_v13, %v380_v42  ;;  %v679_v59 = vmul.f32 %v1577_v14, %v381_v43  ;;  %v668_v56 = vmul.f32 %v1598_v30, %v370_v39  ;;  %v398_v43 = vld [vmem:[%s1571_s21 + $0x6d8] sm:$0xff] }
  0x6b   : > { %929 = vadd.xlane.f32.xlu1 %v928_v50  ;;  %v918_v62 = vadd.f32 %v917_v44, %v643_v18  ;;  %v943_v63 = vadd.f32 %v942_v51, %v665_v38  ;;  %v658_v1 = vmul.f32 %v1586_v20, %v360_v47  ;;  %v659_v4 = vmul.f32 %v1590_v23, %v361_v52  ;;  %v376_v38 = vld [vmem:[%s1571_s21 + $0x628] sm:$0xff]  ;;  %v387_v52 = vld [vmem:[%s1571_s21 + $0x680] sm:$0xff] }
  0x6c   : > { %v933_v5 = vadd.f32 %v932_v57, %v656_v48  ;;  %v680_v8 = vmul.f32 %v1579_v15, %v382_v53  ;;  %v958_v9 = vadd.f32 %v678_v58, %v677_v54  ;;  %v669_v18 = vmul.f32 %v1573_v12, %v371_v60  ;;  %v388_v53 = vld [vmem:[%s1571_s21 + $0x688] sm:$0xff]  ;;  %v389_v54 = vld [vmem:[%s1571_s21 + $0x690] sm:$0xff] }
  0x6d   : > { %v919_v10 = vadd.f32 %v918_v62, %v644_v31  ;;  %v944_v16 = vadd.f32 %v943_v63, %v666_v45  ;;  %v670_v21 = vmul.f32 %v1575_v13, %v372_v61  ;;  %v681_v22 = vmul.f32 %v1584_v19, %v383_v2  ;;  %v378_v45 = vld [vmem:[%s1571_s21 + $0x638] sm:$0xff]  ;;  %v400_v63 = vld [vmem:[%s1571_s21 + $0x6e8] sm:$0xff] }
  0x6e   : > { %v934_v11 = vadd.f32 %v933_v5, %v657_v55  ;;  %v959_v24 = vadd.f32 %v958_v9, %v679_v59  ;;  %v671_v27 = vmul.f32 %v1577_v14, %v373_v0  ;;  %v660_v31 = vmul.f32 %v1598_v30, %v362_v3  ;;  %v399_v59 = vld [vmem:[%s1571_s21 + $0x6e0] sm:$0xff]  ;;  %v390_v0 = vld [vmem:[%s1571_s21 + $0x698] sm:$0xff] }
  0x6f   : > { %920 = vadd.xlane.f32.xlu0 %v919_v10  ;;  %v945_v26 = vadd.f32 %v944_v16, %v667_v46  ;;  %v682_v33 = vmul.f32 %v1586_v20, %v384_v6  ;;  %v683_v34 = vmul.f32 %v1590_v23, %v385_v7  ;;  %v672_v41 = vmul.f32 %v1579_v15, %v374_v17  ;;  %v411_v7 = vld [vmem:[%s1571_s21 + $0x740] sm:$0xff] }
  0x70   : > { %v935_v36 = vadd.f32 %v934_v11, %v658_v1  ;;  %v960_v37 = vadd.f32 %v959_v24, %v680_v8  ;;  %v949_v42 = vadd.f32 %v670_v21, %v669_v18  ;;  %v673_v46 = vmul.f32 %v1584_v19, %v375_v25  ;;  %v401_v1 = vld [vmem:[%s1571_s21 + $0x6f0] sm:$0xff]  ;;  %v391_v17 = vld [vmem:[%s1571_s21 + $0x6a0] sm:$0xff]  ;;  %v412_v18 = vld [vmem:[%s1571_s21 + $0x748] sm:$0xff] }
  0x71   : > { %v946_v39 = vadd.f32 %v945_v26, %v668_v56  ;;  %v693_v47 = vmul.f32 %v1573_v12, %v395_v28  ;;  %v694_v48 = vmul.f32 %v1575_v13, %v396_v29  ;;  %v695_v51 = vmul.f32 %v1577_v14, %v397_v35  ;;  %v413_v21 = vld [vmem:[%s1571_s21 + $0x750] sm:$0xff]  ;;  %v402_v11 = vld [vmem:[%s1571_s21 + $0x6f8] sm:$0xff]  ;;  %v392_v25 = vld [vmem:[%s1571_s21 + $0x6a8] sm:$0xff] }
  0x72   : > { %v936_v49 = vadd.f32 %v935_v36, %v659_v4  ;;  %v961_v50 = vadd.f32 %v960_v37, %v681_v22  ;;  %v950_v44 = vadd.f32 %v949_v42, %v671_v27  ;;  %v684_v55 = vmul.f32 %v1598_v30, %v386_v32  ;;  %v393_v32 = vld [vmem:[%s1571_s21 + $0x6b0] sm:$0xff] }
  0x73   : > { %947 = vadd.xlane.f32.xlu1 %v946_v39  ;;  %v674_v57 = vmul.f32 %v1586_v20, %v376_v38  ;;  %v675_v58 = vmul.f32 %v1590_v23, %v377_v40  ;;  %v696_v60 = vmul.f32 %v1579_v15, %v398_v43  ;;  %v976_v2 = vadd.f32 %v694_v48, %v693_v47  ;;  %v403_v40 = vld [vmem:[%s1571_s21 + $0x700] sm:$0xff]  ;;  %v405_v47 = vld [vmem:[%s1571_s21 + $0x710] sm:$0xff]  ;;  %v394_v48 = vld [vmem:[%s1571_s21 + $0x6b8] sm:$0xff] }
  0x74   : > { %v937_v61 = vadd.f32 %v936_v49, %v660_v31  ;;  %v962_v62 = vadd.f32 %v961_v50, %v682_v33  ;;  %v951_v56 = vadd.f32 %v950_v44, %v672_v41  ;;  %v676_v3 = vmul.f32 %v1598_v30, %v378_v45  ;;  %v414_v33 = vld [vmem:[%s1571_s21 + $0x758] sm:$0xff]  ;;  %v404_v41 = vld [vmem:[%s1571_s21 + $0x708] sm:$0xff] }
  0x75   : > { %v685_v4 = vmul.f32 %v1573_v12, %v387_v52  ;;  %v686_v5 = vmul.f32 %v1575_v13, %v388_v53  ;;  %v687_v6 = vmul.f32 %v1577_v14, %v389_v54  ;;  %v697_v10 = vmul.f32 %v1584_v19, %v399_v59  ;;  %v416_v44 = vld [vmem:[%s1571_s21 + $0x768] sm:$0xff] }
  0x76   : > { %938 = vadd.xlane.f32.xlu0 %v937_v61  ;;  %v963_v8 = vadd.f32 %v962_v62, %v683_v34  ;;  %v952_v9 = vadd.f32 %v951_v56, %v673_v46  ;;  %v977_v16 = vadd.f32 %v976_v2, %v695_v51  ;;  %v698_v22 = vmul.f32 %v1586_v20, %v400_v63  ;;  %v415_v46 = vld [vmem:[%s1571_s21 + $0x760] sm:$0xff]  ;;  %v417_v51 = vld [vmem:[%s1571_s21 + $0x770] sm:$0xff]  ;;  %v428_v2 = vld [vmem:[%s1571_s21 + $0x7c8] sm:$0xff] }
  0x77   : > { %v699_v24 = vmul.f32 %v1590_v23, %v401_v1  ;;  %v688_v27 = vmul.f32 %v1579_v15, %v390_v0  ;;  %v967_v28 = vadd.f32 %v686_v5, %v685_v4  ;;  %v709_v34 = vmul.f32 %v1573_v12, %v411_v7  ;;  %v407_v56 = vld [vmem:[%s1571_s21 + $0x720] sm:$0xff] }
  0x78   : > { %v964_v29 = vadd.f32 %v963_v8, %v684_v55  ;;  %v953_v26 = vadd.f32 %v952_v9, %v674_v57  ;;  %v978_v31 = vadd.f32 %v977_v16, %v696_v60  ;;  %v689_v35 = vmul.f32 %v1584_v19, %v391_v17  ;;  %v406_v57 = vld [vmem:[%s1571_s21 + $0x718] sm:$0xff]  ;;  %v427_v1 = vld [vmem:[%s1571_s21 + $0x7c0] sm:$0xff] }
  0x79   : > { %v968_v36 = vadd.f32 %v967_v28, %v687_v6  ;;  %v710_v37 = vmul.f32 %v1575_v13, %v412_v18  ;;  %v711_v38 = vmul.f32 %v1577_v14, %v413_v21  ;;  %v700_v43 = vmul.f32 %v1598_v30, %v402_v11  ;;  %v429_v6 = vld [vmem:[%s1571_s21 + $0x7d0] sm:$0xff]  ;;  %v418_v8 = vld [vmem:[%s1571_s21 + $0x778] sm:$0xff] }
  0x7a   : > { %965 = vadd.xlane.f32.xlu1 %v964_v29  ;;  %v954_v42 = vadd.f32 %v953_v26, %v675_v58  ;;  %v979_v39 = vadd.f32 %v978_v31, %v697_v10  ;;  %v690_v45 = vmul.f32 %v1586_v20, %v392_v25  ;;  %v691_v49 = vmul.f32 %v1590_v23, %v393_v32  ;;  %v408_v10 = vld [vmem:[%s1571_s21 + $0x728] sm:$0xff]  ;;  %v430_v18 = vld [vmem:[%s1571_s21 + $0x7d8] sm:$0xff]  ;;  %v409_v11 = vld [vmem:[%s1571_s21 + $0x730] sm:$0xff] }
  0x7b   : > { %v969_v50 = vadd.f32 %v968_v36, %v688_v27  ;;  %v712_v52 = vmul.f32 %v1579_v15, %v414_v33  ;;  %v994_v53 = vadd.f32 %v710_v37, %v709_v34  ;;  %v701_v58 = vmul.f32 %v1573_v12, %v403_v40  ;;  %v419_v31 = vld [vmem:[%s1571_s21 + $0x780] sm:$0xff]  ;;  %v420_v32 = vld [vmem:[%s1571_s21 + $0x788] sm:$0xff]  ;;  %v421_v33 = vld [vmem:[%s1571_s21 + $0x790] sm:$0xff] }
  0x7c   : > { %v955_v54 = vadd.f32 %v954_v42, %v676_v3  ;;  %v980_v55 = vadd.f32 %v979_v39, %v698_v22  ;;  %v702_v59 = vmul.f32 %v1575_v13, %v404_v41  ;;  %v713_v61 = vmul.f32 %v1584_v19, %v415_v46  ;;  %v431_v36 = vld [vmem:[%s1571_s21 + $0x7e0] sm:$0xff]  ;;  %v410_v41 = vld [vmem:[%s1571_s21 + $0x738] sm:$0xff]  ;;  %v432_v46 = vld [vmem:[%s1571_s21 + $0x7e8] sm:$0xff] }
  0x7d   : > { %v970_v60 = vadd.f32 %v969_v50, %v689_v35  ;;  %v995_v62 = vadd.f32 %v994_v53, %v711_v38  ;;  %v703_v63 = vmul.f32 %v1577_v14, %v405_v47  ;;  %v692_v3 = vmul.f32 %v1598_v30, %v394_v48  ;;  %v422_v39 = vld [vmem:[%s1571_s21 + $0x798] sm:$0xff]  ;;  %v423_v53 = vld [vmem:[%s1571_s21 + $0x7a0] sm:$0xff] }
  0x7e   : > { %956 = vadd.xlane.f32.xlu0 %v955_v54  ;;  %v981_v0 = vadd.f32 %v980_v55, %v699_v24  ;;  %v714_v4 = vmul.f32 %v1586_v20, %v416_v44  ;;  %v715_v5 = vmul.f32 %v1590_v23, %v417_v51  ;;  %v704_v16 = vmul.f32 %v1579_v15, %v406_v57  ;;  %v433_v55 = vld [vmem:[%s1571_s21 + $0x7f0] sm:$0xff] }
  0x7f   : > { %v971_v7 = vadd.f32 %v970_v60, %v690_v45  ;;  %v996_v9 = vadd.f32 %v995_v62, %v712_v52  ;;  %v985_v17 = vadd.f32 %v702_v59, %v701_v58  ;;  %v705_v22 = vmul.f32 %v1584_v19, %v407_v56  ;;  %v424_v60 = vld [vmem:[%s1571_s21 + $0x7a8] sm:$0xff] }
  0x80   : > { %v982_v21 = vadd.f32 %v981_v0, %v700_v43  ;;  %v725_v24 = vmul.f32 %v1573_v12, %v427_v1  ;;  %v726_v25 = vmul.f32 %v1575_v13, %v428_v2  ;;  %v727_v26 = vmul.f32 %v1577_v14, %v429_v6  ;;  %v425_v0 = vld [vmem:[%s1571_s21 + $0x7b0] sm:$0xff] }
  0x81   : > { %v972_v27 = vadd.f32 %v971_v7, %v691_v49  ;;  %v997_v28 = vadd.f32 %v996_v9, %v713_v61  ;;  %v986_v29 = vadd.f32 %v985_v17, %v703_v63  ;;  %v716_v34 = vmul.f32 %v1598_v30, %v418_v8  ;;  %v434_v61 = vld [vmem:[%s1571_s21 + $0x7f8] sm:$0xff] }
  0x82   : > { %983 = vadd.xlane.f32.xlu1 %v982_v21  ;;  %v706_v35 = vmul.f32 %v1586_v20, %v408_v10  ;;  %v728_v37 = vmul.f32 %v1579_v15, %v430_v18  ;;  %v1012_v43 = vadd.f32 %v726_v25, %v725_v24  ;;  %v707_v45 = vmul.f32 %v1590_v23, %v409_v11  ;;  %v426_v7 = vld [vmem:[%s1571_s21 + $0x7b8] sm:$0xff] }
  0x83   : > { %v973_v38 = vadd.f32 %v972_v27, %v692_v3  ;;  %v998_v40 = vadd.f32 %v997_v28, %v714_v4  ;;  %v987_v42 = vadd.f32 %v986_v29, %v704_v16  ;;  %v717_v47 = vmul.f32 %v1573_v12, %v419_v31 }
  0x84   : > { %v718_v48 = vmul.f32 %v1575_v13, %v420_v32  ;;  %v719_v49 = vmul.f32 %v1577_v14, %v421_v33  ;;  %v729_v51 = vmul.f32 %v1584_v19, %v431_v36  ;;  %v1013_v52 = vadd.f32 %v1012_v43, %v727_v26 }
  0x85   : > { %974 = vadd.xlane.f32.xlu0 %v973_v38  ;;  %v999_v50 = vadd.f32 %v998_v40, %v715_v5  ;;  %v988_v44 = vadd.f32 %v987_v42, %v705_v22  ;;  %v708_v54 = vmul.f32 %v1598_v30, %v410_v41  ;;  %v720_v57 = vmul.f32 %v1579_v15, %v422_v39 }
  0x86   : > { %v1003_v12 = vadd.f32 %v718_v48, %v717_v47  ;;  %v730_v59 = vmul.f32 %v1586_v20, %v432_v46  ;;  %v1014_v14 = vadd.f32 %v1013_v52, %v728_v37  ;;  %v721_v62 = vmul.f32 %v1584_v19, %v423_v53 }
  0x87   : > { %v1000_v58 = vadd.f32 %v999_v50, %v716_v34  ;;  %v989_v13 = vadd.f32 %v988_v44, %v706_v35  ;;  %v731_v1 = vmul.f32 %v1590_v23, %v433_v55  ;;  %v722_v15 = vmul.f32 %v1586_v20, %v424_v60  ;;  %v2101_v20 = vld [vmem:[#allocation2] ss:$0 sm:$0xff] }
  0x88   : > { %v1004_v56 = vadd.f32 %v1003_v12, %v719_v49  ;;  %v1015_v2 = vadd.f32 %v1014_v14, %v729_v51  ;;  %v732_v5 = vmul.f32 %v1598_v30, %v434_v61  ;;  %v723_v8 = vmul.f32 %v1590_v23, %v425_v0 }
  0x89   : > { %1001 = vadd.xlane.f32.xlu1 %v1000_v58  ;;  %v990_v63 = vadd.f32 %v989_v13, %v707_v45  ;;  %v724_v10 = vmul.f32 %v1598_v30, %v426_v7 }
  0x8a   : > { %v1005_v3 = vadd.f32 %v1004_v56, %v720_v57  ;;  %v1016_v6 = vadd.f32 %v1015_v2, %v730_v59 }
  0x8b   : > { %v991_v4 = vadd.f32 %v990_v63, %v708_v54 }
  0x8c   : > { %v1006_v9 = vadd.f32 %v1005_v3, %v721_v62  ;;  %v1017_v19 = vadd.f32 %v1016_v6, %v731_v1 }
  0x8d   : > { %992 = vadd.xlane.f32.xlu0 %v991_v4 }
  0x8e   : > { %v1007_v16 = vadd.f32 %v1006_v9, %v722_v15  ;;  %v1018_v17 = vadd.f32 %v1017_v19, %v732_v5 }
  0x90   : > { %v1008_v18 = vadd.f32 %v1007_v16, %v723_v8  ;;  %1019 = vadd.xlane.f32.xlu1 %v1018_v17 }
  0x92   : > { %v1009_v21 = vadd.f32 %v1008_v18, %v724_v10 }
  0x94   : > { %1010 = vadd.xlane.f32.xlu0 %v1009_v21 }
  0xb0   : > { %v759_v11 = vpop.xlane.xlu1 %758 }
  0xb1   : > { %v1030_v22 = vadd.f32 %v2101_v20, %v759_v11 }
  0xb2   : > { %v741_v25 = vpop.xlane.xlu0 %740 }
  0xb3   : > { %v1354_v24 = vmul.f32 -1.442695, %v1030_v22  ;;  %v1028_v23 = vadd.f32 %v2101_v20, %v741_v25 }
  0xb5   : > { %1395 = vpow2.f32 %v1354_v24  ;;  %v1352_v27 = vmul.f32 -1.442695, %v1028_v23  ;;  %v768_v28 = vpop.xlane.xlu1 %767 }
  0xb6   : > { %v1031_v30 = vadd.f32 %v2101_v20, %v768_v28 }
  0xb7   : > { %1397 = vpow2.f32 %v1352_v27 }
  0xb8   : > { %v1355_v29 = vmul.f32 -1.442695, %v1031_v30  ;;  %v750_v26 = vpop.xlane.xlu0 %749 }
  0xb9   : > { %v1029_v31 = vadd.f32 %v2101_v20, %v750_v26 }
  0xba   : > { %1399 = vpow2.f32 %v1355_v29 }
  0xbb   : > { %v1353_v32 = vmul.f32 -1.442695, %v1029_v31  ;;  %v786_v33 = vpop.xlane.xlu1 %785 }
  0xbc   : > { %v1033_v34 = vadd.f32 %v2101_v20, %v786_v33 }
  0xbd   : > { %1401 = vpow2.f32 %v1353_v32 }
  0xbe   : > { %v1357_v37 = vmul.f32 -1.442695, %v1033_v34 }
  0xbf   : > { %v1396_v35 = vpop.eup %1395 }
  0xc0   : > { %v1158_v36 = vadd.f32 1.0, %v1396_v35  ;;  %v777_v38 = vpop.xlane.xlu0 %776 }
  0xc1   : > { %v1398_v40 = vpop.eup %1397  ;;  %v1032_v41 = vadd.f32 %v2101_v20, %v777_v38 }
  0xc2   : > { %1403 = vrcp.f32 %v1158_v36  ;;  %v1156_v42 = vadd.f32 1.0, %v1398_v40 }
  0xc3   : > { %1405 = vpow2.f32 %v1357_v37  ;;  %v1356_v43 = vmul.f32 -1.442695, %v1032_v41 }
  0xc4   : > { %v1400_v39 = vpop.eup %1399  ;;  %1407 = vrcp.f32 %v1156_v42  ;;  %v804_v45 = vpop.xlane.xlu1 %803 }
  0xc5   : > { %v1159_v46 = vadd.f32 1.0, %v1400_v39  ;;  %1409 = vpow2.f32 %v1356_v43  ;;  %v1035_v47 = vadd.f32 %v2101_v20, %v804_v45 }
  0xc7   : > { %v1402_v48 = vpop.eup %1401  ;;  %1411 = vrcp.f32 %v1159_v46  ;;  %v1359_v49 = vmul.f32 -1.442695, %v1035_v47  ;;  %v795_v50 = vpop.xlane.xlu0 %794 }
  0xc8   : > { %v1157_v44 = vadd.f32 1.0, %v1402_v48  ;;  %v1034_v51 = vadd.f32 %v2101_v20, %v795_v50 }
  0xc9   : > { %1413 = vpow2.f32 %v1359_v49 }
  0xca   : > { %1415 = vrcp.f32 %v1157_v44  ;;  %v1358_v52 = vmul.f32 -1.442695, %v1034_v51 }
  0xcb   : > { %v822_v54 = vpop.xlane.xlu1 %821 }
  0xcc   : > { %v1404_v53 = vpop.eup %1403  ;;  %1417 = vpow2.f32 %v1358_v52  ;;  %v1037_v57 = vadd.f32 %v2101_v20, %v822_v54 }
  0xcd   : > { %v1406_v55 = vpop.eup %1405  ;;  %1255 = vst.msk [vmem:[%s2115_s25 + $0x10] sm:$0xff] %vm1252_vm0, %v1404_v53 }
  0xce   : > { %v1161_v12 = vadd.f32 1.0, %v1406_v55  ;;  %v1408_v58 = vpop.eup %1407  ;;  %v1361_v13 = vmul.f32 -1.442695, %v1037_v57 }
  0xcf   : > { %v1410_v59 = vpop.eup %1409  ;;  %1253 = vst.msk [vmem:[%s2115_s25] sm:$0xff] %vm1252_vm0, %v1408_v58  ;;  %v813_v14 = vpop.xlane.xlu0 %812 }
  0xd0   : > { %1419 = vrcp.f32 %v1161_v12  ;;  %v1160_v60 = vadd.f32 1.0, %v1410_v59  ;;  %v1036_v61 = vadd.f32 %v2101_v20, %v813_v14 }
  0xd1   : > { %1421 = vpow2.f32 %v1361_v13  ;;  %v1412_v62 = vpop.eup %1411 }
  0xd2   : > { %1256 = vst.msk [vmem:[%s2115_s25 + $0x18] sm:$0xff] %vm1252_vm0, %v1412_v62  ;;  %1423 = vrcp.f32 %v1160_v60  ;;  %v1360_v56 = vmul.f32 -1.442695, %v1036_v61 }
  0xd3   : > { %v1414_v63 = vpop.eup %1413  ;;  %v840_v1 = vpop.xlane.xlu1 %839 }
  0xd4   : > { %v1416_v2 = vpop.eup %1415  ;;  %v1163_v0 = vadd.f32 1.0, %v1414_v63  ;;  %1425 = vpow2.f32 %v1360_v56  ;;  %v1039_v15 = vadd.f32 %v2101_v20, %v840_v1 }
  0xd5   : > { %1254 = vst.msk [vmem:[%s2115_s25 + $0x8] sm:$0xff] %vm1252_vm0, %v1416_v2 }
  0xd6   : > { %v1418_v3 = vpop.eup %1417  ;;  %1427 = vrcp.f32 %v1163_v0  ;;  %v1363_v4 = vmul.f32 -1.442695, %v1039_v15  ;;  %v831_v5 = vpop.xlane.xlu0 %830 }
  0xd7   : > { %v1162_v6 = vadd.f32 1.0, %v1418_v3  ;;  %v1038_v7 = vadd.f32 %v2101_v20, %v831_v5 }
  0xd8   : > { %1429 = vpow2.f32 %v1363_v4 }
  0xd9   : > { %1431 = vrcp.f32 %v1162_v6  ;;  %v1362_v9 = vmul.f32 -1.442695, %v1038_v7 }
  0xda   : > { %v1420_v8 = vpop.eup %1419  ;;  %v858_v10 = vpop.xlane.xlu1 %857 }
  0xdb   : > { %v1422_v19 = vpop.eup %1421  ;;  %1258 = vst.msk [vmem:[%s2115_s25 + $0x28] sm:$0xff] %vm1252_vm0, %v1420_v8  ;;  %1433 = vpow2.f32 %v1362_v9  ;;  %v1041_v17 = vadd.f32 %v2101_v20, %v858_v10 }
  0xdc   : > { %v1165_v16 = vadd.f32 1.0, %v1422_v19  ;;  %v1424_v18 = vpop.eup %1423 }
  0xdd   : > { %1257 = vst.msk [vmem:[%s2115_s25 + $0x20] sm:$0xff] %vm1252_vm0, %v1424_v18  ;;  %v1365_v21 = vmul.f32 -1.442695, %v1041_v17 }
  0xde   : > { %1435 = vrcp.f32 %v1165_v16  ;;  %v1426_v11 = vpop.eup %1425  ;;  %v849_v22 = vpop.xlane.xlu0 %848 }
  0xdf   : > { %v1164_v24 = vadd.f32 1.0, %v1426_v11  ;;  %1437 = vpow2.f32 %v1365_v21  ;;  %v1040_v25 = vadd.f32 %v2101_v20, %v849_v22 }
  0xe0   : > { %v1428_v23 = vpop.eup %1427 }
  0xe1   : > { %1260 = vst.msk [vmem:[%s2115_s25 + $0x38] sm:$0xff] %vm1252_vm0, %v1428_v23  ;;  %1439 = vrcp.f32 %v1164_v24  ;;  %v1364_v27 = vmul.f32 -1.442695, %v1040_v25 }
  0xe2   : > { %v1430_v28 = vpop.eup %1429  ;;  %v876_v30 = vpop.xlane.xlu1 %875 }
  0xe3   : > { %v1432_v29 = vpop.eup %1431  ;;  %v1167_v26 = vadd.f32 1.0, %v1430_v28  ;;  %1441 = vpow2.f32 %v1364_v27  ;;  %v1043_v31 = vadd.f32 %v2101_v20, %v876_v30 }
  0xe4   : > { %1259 = vst.msk [vmem:[%s2115_s25 + $0x30] sm:$0xff] %vm1252_vm0, %v1432_v29 }
  0xe5   : > { %v1434_v32 = vpop.eup %1433  ;;  %1443 = vrcp.f32 %v1167_v26  ;;  %v1367_v33 = vmul.f32 -1.442695, %v1043_v31  ;;  %v867_v34 = vpop.xlane.xlu0 %866 }
  0xe6   : > { %v1166_v35 = vadd.f32 1.0, %v1434_v32  ;;  %v1042_v36 = vadd.f32 %v2101_v20, %v867_v34 }
  0xe7   : > { %1445 = vpow2.f32 %v1367_v33 }
  0xe8   : > { %v1436_v37 = vpop.eup %1435  ;;  %1447 = vrcp.f32 %v1166_v35  ;;  %v1366_v38 = vmul.f32 -1.442695, %v1042_v36 }
  0xe9   : > { %1262 = vst.msk [vmem:[%s2115_s25 + $0x48] sm:$0xff] %vm1252_vm0, %v1436_v37  ;;  %v1438_v40 = vpop.eup %1437  ;;  %v894_v41 = vpop.xlane.xlu1 %893 }
  0xea   : > { %v1169_v42 = vadd.f32 1.0, %v1438_v40  ;;  %1449 = vpow2.f32 %v1366_v38  ;;  %v1045_v43 = vadd.f32 %v2101_v20, %v894_v41 }
  0xeb   : > { %v1440_v39 = vpop.eup %1439 }
  0xec   : > { %1261 = vst.msk [vmem:[%s2115_s25 + $0x40] sm:$0xff] %vm1252_vm0, %v1440_v39  ;;  %1451 = vrcp.f32 %v1169_v42  ;;  %v1369_v45 = vmul.f32 -1.442695, %v1045_v43 }
  0xed   : > { %v1442_v46 = vpop.eup %1441  ;;  %v885_v47 = vpop.xlane.xlu0 %884 }
  0xee   : > { %v1168_v48 = vadd.f32 1.0, %v1442_v46  ;;  %1453 = vpow2.f32 %v1369_v45  ;;  %v1044_v49 = vadd.f32 %v2101_v20, %v885_v47 }
  0xef   : > { %v1444_v50 = vpop.eup %1443 }
  0xf0   : > { %1264 = vst.msk [vmem:[%s2115_s25 + $0x58] sm:$0xff] %vm1252_vm0, %v1444_v50  ;;  %1455 = vrcp.f32 %v1168_v48  ;;  %v1368_v44 = vmul.f32 -1.442695, %v1044_v49 }
  0xf1   : > { %v1446_v51 = vpop.eup %1445  ;;  %v912_v52 = vpop.xlane.xlu1 %911 }
  0xf2   : > { %v1448_v53 = vpop.eup %1447  ;;  %v1171_v54 = vadd.f32 1.0, %v1446_v51  ;;  %1457 = vpow2.f32 %v1368_v44  ;;  %v1047_v55 = vadd.f32 %v2101_v20, %v912_v52 }
  0xf3   : > { %1263 = vst.msk [vmem:[%s2115_s25 + $0x50] sm:$0xff] %vm1252_vm0, %v1448_v53 }
  0xf4   : > { %v1450_v57 = vpop.eup %1449  ;;  %1459 = vrcp.f32 %v1171_v54  ;;  %v1371_v12 = vmul.f32 -1.442695, %v1047_v55  ;;  %v903_v58 = vpop.xlane.xlu0 %902 }
  0xf5   : > { %v1170_v13 = vadd.f32 1.0, %v1450_v57  ;;  %v1046_v59 = vadd.f32 %v2101_v20, %v903_v58 }
  0xf6   : > { %v1452_v14 = vpop.eup %1451  ;;  %1461 = vpow2.f32 %v1371_v12 }
  0xf7   : > { %1266 = vst.msk [vmem:[%s2115_s25 + $0x68] sm:$0xff] %vm1252_vm0, %v1452_v14  ;;  %1463 = vrcp.f32 %v1170_v13  ;;  %v1370_v60 = vmul.f32 -1.442695, %v1046_v59 }
  0xf8   : > { %v1454_v61 = vpop.eup %1453  ;;  %v930_v62 = vpop.xlane.xlu1 %929 }
  0xf9   : > { %v1173_v56 = vadd.f32 1.0, %v1454_v61  ;;  %1465 = vpow2.f32 %v1370_v60  ;;  %v1049_v63 = vadd.f32 %v2101_v20, %v930_v62 }
  0xfa   : > { %v1456_v1 = vpop.eup %1455 }
  0xfb   : > { %1265 = vst.msk [vmem:[%s2115_s25 + $0x60] sm:$0xff] %vm1252_vm0, %v1456_v1  ;;  %1467 = vrcp.f32 %v1173_v56  ;;  %v1373_v2 = vmul.f32 -1.442695, %v1049_v63 }
  0xfc   : > { %v1458_v0 = vpop.eup %1457  ;;  %v921_v15 = vpop.xlane.xlu0 %920 }
  0xfd   : > { %v1172_v3 = vadd.f32 1.0, %v1458_v0  ;;  %1469 = vpow2.f32 %v1373_v2  ;;  %v1048_v4 = vadd.f32 %v2101_v20, %v921_v15 }
  0xfe   : > { %v1460_v5 = vpop.eup %1459 }
  0xff   : > { %1268 = vst.msk [vmem:[%s2115_s25 + $0x78] sm:$0xff] %vm1252_vm0, %v1460_v5  ;;  %1471 = vrcp.f32 %v1172_v3  ;;  %v1372_v6 = vmul.f32 -1.442695, %v1048_v4 }
 0x100   : > { %v1462_v7 = vpop.eup %1461  ;;  %v948_v8 = vpop.xlane.xlu1 %947 }
 0x101   : > { %v1464_v9 = vpop.eup %1463  ;;  %v1175_v19 = vadd.f32 1.0, %v1462_v7  ;;  %1473 = vpow2.f32 %v1372_v6  ;;  %v1051_v10 = vadd.f32 %v2101_v20, %v948_v8 }
 0x102   : > { %1267 = vst.msk [vmem:[%s2115_s25 + $0x70] sm:$0xff] %vm1252_vm0, %v1464_v9 }
 0x103   : > { %v1466_v16 = vpop.eup %1465  ;;  %1475 = vrcp.f32 %v1175_v19  ;;  %v1375_v17 = vmul.f32 -1.442695, %v1051_v10  ;;  %v939_v18 = vpop.xlane.xlu0 %938 }
 0x104   : > { %v1174_v21 = vadd.f32 1.0, %v1466_v16  ;;  %v1050_v11 = vadd.f32 %v2101_v20, %v939_v18 }
 0x105   : > { %v1468_v22 = vpop.eup %1467  ;;  %1477 = vpow2.f32 %v1375_v17 }
 0x106   : > { %1270 = vst.msk [vmem:[%s2115_s25 + $0x88] sm:$0xff] %vm1252_vm0, %v1468_v22  ;;  %1479 = vrcp.f32 %v1174_v21  ;;  %v1374_v24 = vmul.f32 -1.442695, %v1050_v11 }
 0x107   : > { %v1470_v25 = vpop.eup %1469  ;;  %v966_v23 = vpop.xlane.xlu1 %965 }
 0x108   : > { %v1177_v27 = vadd.f32 1.0, %v1470_v25  ;;  %1481 = vpow2.f32 %v1374_v24  ;;  %v1053_v28 = vadd.f32 %v2101_v20, %v966_v23 }
 0x109   : > { %v1472_v30 = vpop.eup %1471 }
 0x10a   : > { %1269 = vst.msk [vmem:[%s2115_s25 + $0x80] sm:$0xff] %vm1252_vm0, %v1472_v30  ;;  %1483 = vrcp.f32 %v1177_v27  ;;  %v1377_v29 = vmul.f32 -1.442695, %v1053_v28 }
 0x10b   : > { %v1474_v26 = vpop.eup %1473  ;;  %v957_v31 = vpop.xlane.xlu0 %956 }
 0x10c   : > { %v1176_v32 = vadd.f32 1.0, %v1474_v26  ;;  %1485 = vpow2.f32 %v1377_v29  ;;  %v1052_v33 = vadd.f32 %v2101_v20, %v957_v31 }
 0x10d   : > { %v1476_v34 = vpop.eup %1475 }
 0x10e   : > { %1272 = vst.msk [vmem:[%s2115_s25 + $0x98] sm:$0xff] %vm1252_vm0, %v1476_v34  ;;  %1487 = vrcp.f32 %v1176_v32  ;;  %v1376_v35 = vmul.f32 -1.442695, %v1052_v33 }
 0x10f   : > { %v1478_v36 = vpop.eup %1477  ;;  %v984_v37 = vpop.xlane.xlu1 %983 }
 0x110   : > { %v1480_v38 = vpop.eup %1479  ;;  %v1179_v40 = vadd.f32 1.0, %v1478_v36  ;;  %1489 = vpow2.f32 %v1376_v35  ;;  %v1055_v41 = vadd.f32 %v2101_v20, %v984_v37 }
 0x111   : > { %1271 = vst.msk [vmem:[%s2115_s25 + $0x90] sm:$0xff] %vm1252_vm0, %v1480_v38 }
 0x112   : > { %v1482_v42 = vpop.eup %1481  ;;  %1491 = vrcp.f32 %v1179_v40  ;;  %v1379_v43 = vmul.f32 -1.442695, %v1055_v41  ;;  %v975_v39 = vpop.xlane.xlu0 %974 }
 0x113   : > { %v1178_v45 = vadd.f32 1.0, %v1482_v42  ;;  %v1054_v46 = vadd.f32 %v2101_v20, %v975_v39 }
 0x114   : > { %v1484_v47 = vpop.eup %1483  ;;  %1493 = vpow2.f32 %v1379_v43 }
 0x115   : > { %1274 = vst.msk [vmem:[%s2115_s25 + $0xa8] sm:$0xff] %vm1252_vm0, %v1484_v47  ;;  %1495 = vrcp.f32 %v1178_v45  ;;  %v1378_v48 = vmul.f32 -1.442695, %v1054_v46 }
 0x116   : > { %v1486_v49 = vpop.eup %1485  ;;  %v1002_v50 = vpop.xlane.xlu1 %1001 }
 0x117   : > { %v1181_v44 = vadd.f32 1.0, %v1486_v49  ;;  %1497 = vpow2.f32 %v1378_v48  ;;  %v1057_v51 = vadd.f32 %v2101_v20, %v1002_v50 }
 0x118   : > { %v1488_v52 = vpop.eup %1487 }
 0x119   : > { %1273 = vst.msk [vmem:[%s2115_s25 + $0xa0] sm:$0xff] %vm1252_vm0, %v1488_v52  ;;  %1499 = vrcp.f32 %v1181_v44  ;;  %v1381_v53 = vmul.f32 -1.442695, %v1057_v51 }
 0x11a   : > { %v1490_v54 = vpop.eup %1489  ;;  %v993_v55 = vpop.xlane.xlu0 %992 }
 0x11b   : > { %v1180_v57 = vadd.f32 1.0, %v1490_v54  ;;  %1501 = vpow2.f32 %v1381_v53  ;;  %v1056_v12 = vadd.f32 %v2101_v20, %v993_v55 }
 0x11c   : > { %v1492_v58 = vpop.eup %1491 }
 0x11d   : > { %1276 = vst.msk [vmem:[%s2115_s25 + $0xb8] sm:$0xff] %vm1252_vm0, %v1492_v58  ;;  %1503 = vrcp.f32 %v1180_v57  ;;  %v1380_v13 = vmul.f32 -1.442695, %v1056_v12  ;;  %v1020_v14 = vpop.xlane.xlu1 %1019 }
 0x11e   : > { %v1494_v59 = vpop.eup %1493  ;;  %v1059_v62 = vadd.f32 %v2101_v20, %v1020_v14 }
 0x11f   : > { %v1496_v60 = vpop.eup %1495  ;;  %v1183_v61 = vadd.f32 1.0, %v1494_v59  ;;  %1505 = vpow2.f32 %v1380_v13 }
 0x120   : > { %1275 = vst.msk [vmem:[%s2115_s25 + $0xb0] sm:$0xff] %vm1252_vm0, %v1496_v60  ;;  %v1383_v63 = vmul.f32 -1.442695, %v1059_v62 }
 0x121   : > { %v1498_v56 = vpop.eup %1497  ;;  %1507 = vrcp.f32 %v1183_v61  ;;  %v1011_v1 = vpop.xlane.xlu0 %1010 }
 0x122   : > { %v1182_v2 = vadd.f32 1.0, %v1498_v56  ;;  %v1058_v0 = vadd.f32 %v2101_v20, %v1011_v1  ;;  %1509 = vpow2.f32 %v1383_v63 }
 0x123   : > { %v1500_v15 = vpop.eup %1499 }
 0x124   : > { %1278 = vst.msk [vmem:[%s2115_s25 + $0xc8] sm:$0xff] %vm1252_vm0, %v1500_v15  ;;  %1511 = vrcp.f32 %v1182_v2  ;;  %v1382_v3 = vmul.f32 -1.442695, %v1058_v0 }
 0x125   : > { %v1502_v4 = vpop.eup %1501 }
 0x126   : > { %v1185_v5 = vadd.f32 1.0, %v1502_v4  ;;  %1513 = vpow2.f32 %v1382_v3 }
 0x127   : > { %v1504_v6 = vpop.eup %1503 }
 0x128   : > { %1277 = vst.msk [vmem:[%s2115_s25 + $0xc0] sm:$0xff] %vm1252_vm0, %v1504_v6  ;;  %1515 = vrcp.f32 %v1185_v5 }
 0x129   : > { %v1506_v7 = vpop.eup %1505 }
 0x12a   : > { %v1184_v8 = vadd.f32 1.0, %v1506_v7 }
 0x12b   : > { %v1508_v9 = vpop.eup %1507 }
 0x12c   : > { %1280 = vst.msk [vmem:[%s2115_s25 + $0xd8] sm:$0xff] %vm1252_vm0, %v1508_v9  ;;  %1517 = vrcp.f32 %v1184_v8  ;;  %v1510_v20 = vpop.eup %1509 }
 0x12d   : > { %v1187_v10 = vadd.f32 1.0, %v1510_v20 }
 0x12e   : > { %v1512_v19 = vpop.eup %1511 }
 0x12f   : > { %1279 = vst.msk [vmem:[%s2115_s25 + $0xd0] sm:$0xff] %vm1252_vm0, %v1512_v19  ;;  %1519 = vrcp.f32 %v1187_v10 }
 0x130   : > { %v1514_v16 = vpop.eup %1513 }
 0x131   : > { %v1186_v17 = vadd.f32 1.0, %v1514_v16 }
 0x132   : > { %v1516_v18 = vpop.eup %1515 }
 0x133   : > { %1282 = vst.msk [vmem:[%s2115_s25 + $0xe8] sm:$0xff] %vm1252_vm0, %v1516_v18  ;;  %1521 = vrcp.f32 %v1186_v17 }
 0x136   : > { %v1518_v21 = vpop.eup %1517 }
 0x137   : > { %1281 = vst.msk [vmem:[%s2115_s25 + $0xe0] sm:$0xff] %vm1252_vm0, %v1518_v21 }
 0x139   : > { %v1520_v11 = vpop.eup %1519 }
 0x13a   : > { %1284 = vst.msk [vmem:[%s2115_s25 + $0xf8] sm:$0xff] %vm1252_vm0, %v1520_v11 }
 0x13d   : > { %v1522_v22 = vpop.eup %1521 }
 0x13e   : > { %1283 = vst.msk [vmem:[%s2115_s25 + $0xf0] sm:$0xff] %vm1252_vm0, %v1522_v22 }
 0x13f PF: > { %s15_s14 = sadd.s32 1, %s1529_s14  }
 0x140   : > { %p12_p4 = scmp.ge.s32.totalorder %s15_s14, 9  }
 0x142   :  { %14 = sbr.rel (!%p12_p4) target bundleno = 3 (0x3), region = 62 }

</bundles_post_ra>
